<compile_context>
chip_gen: v6e
topology: v6e:2x2x1
jax: 0.10.0
libtpu: 0.0.40
codegen_flags: <defaults>
</compile_context>

<pallas_src>
import functools
import math

import jax
import jax.numpy as jnp
from jax import lax
from jax.experimental import pallas as pl
from jax.experimental.pallas import tpu as pltpu

F32 = jnp.float32
LN_EPS = 1e-5
BN_EPS = 1e-5


# ---------------------------------------------------------------------------
# Small in-kernel helpers (all plain VPU/EUP/MXU friendly ops).
# ---------------------------------------------------------------------------
def _gelu(x):
    c = math.sqrt(2.0 / math.pi)
    return 0.5 * x * (1.0 + jnp.tanh(c * (x + 0.044715 * x * x * x)))


def _layer_norm(x, g, b):
    mu = jnp.mean(x, axis=-1, keepdims=True)
    xc = x - mu
    var = jnp.mean(xc * xc, axis=-1, keepdims=True)
    return xc * lax.rsqrt(var + LN_EPS) * g + b


def _softmax_last(s):
    m = jnp.max(s, axis=-1, keepdims=True)
    e = jnp.exp(s - m)
    return e / jnp.sum(e, axis=-1, keepdims=True)


def _mha_heads(q, k, v, n_heads, causal):
    """Per-head scaled-dot-product attention on 2-D (L, d_model) operands.
    Returns the list of per-head outputs, each (L_q, d_head)."""
    l_q, d_model = q.shape
    l_k = k.shape[0]
    d_head = d_model // n_heads
    scale = 1.0 / math.sqrt(d_head)
    if causal:
        row = lax.broadcasted_iota(jnp.int32, (l_q, l_k), 0)
        col = lax.broadcasted_iota(jnp.int32, (l_q, l_k), 1)
        neg = jnp.full((l_q, l_k), -jnp.inf, F32)
    outs = []
    for h in range(n_heads):
        sl = slice(h * d_head, (h + 1) * d_head)
        qh, kh, vh = q[:, sl], k[:, sl], v[:, sl]
        s = lax.dot_general(qh, kh, (((1,), (1,)), ((), ())),
                            preferred_element_type=F32) * scale
        if causal:
            s = jnp.where(col > row, neg, s)
        a = _softmax_last(s)
        outs.append(jnp.dot(a, vh, preferred_element_type=F32))
    return outs


# ---------------------------------------------------------------------------
# Kernels.  Every kernel processes one batch element per grid step: the batched
# refs have block shape (1, ...) and weights are passed whole (lane-dense, D=128).
# ---------------------------------------------------------------------------
def _embedding_kernel(x_ref, pt_ref, w0_ref, w1_ref, w2_ref, cb_ref, o_ref):
    # TokenEmbedding: Conv1d(c_in -> d_model, k=3, circular padding) over time,
    # expressed as 3 MXU matmuls on circularly shifted inputs, + (pos + temporal).
    x = x_ref[0]                                             # (L, c_in)
    x_prev = jnp.concatenate([x[-1:], x[:-1]], axis=0)       # x[(t-1) mod L]
    x_next = jnp.concatenate([x[1:], x[:1]], axis=0)         # x[(t+1) mod L]
    tok = (jnp.dot(x_prev, w0_ref[...], preferred_element_type=F32)
           + jnp.dot(x, w1_ref[...], preferred_element_type=F32)
           + jnp.dot(x_next, w2_ref[...], preferred_element_type=F32)
           + cb_ref[...])
    o_ref[0] = tok + pt_ref[0]


def _make_encoder_layer_kernel(n_heads):
    def kernel(x_ref, wq_ref, bq_ref, wk_ref, bk_ref, wv_ref, bv_ref,
               wo_ref, bo_ref, ln1g_ref, ln1b_ref,
               w1_ref, b1_ref, w2_ref, b2_ref, ln2g_ref, ln2b_ref, o_ref):
        x = x_ref[0]                                          # (L, D)
        q = jnp.dot(x, wq_ref[...], preferred_element_type=F32) + bq_ref[...]
        k = jnp.dot(x, wk_ref[...], preferred_element_type=F32) + bk_ref[...]
        v = jnp.dot(x, wv_ref[...], preferred_element_type=F32) + bv_ref[...]
        heads = _mha_heads(q, k, v, n_heads, causal=False)
        attn = jnp.concatenate(heads, axis=-1)                # mix=False concat
        attn = jnp.dot(attn, wo_ref[...], preferred_element_type=F32) + bo_ref[...]
        x1 = _layer_norm(x + attn, ln1g_ref[...], ln1b_ref[...])
        y = _gelu(jnp.dot(x1, w1_ref[...], preferred_element_type=F32) + b1_ref[...])
        y = jnp.dot(y, w2_ref[...], preferred_element_type=F32) + b2_ref[...]
        o_ref[0] = _layer_norm(x1 + y, ln2g_ref[...], ln2b_ref[...])
    return kernel


def _make_conv_distil_kernel(l_out):
    def kernel(x_ref, w0_ref, w1_ref, w2_ref, cb_ref,
               bng_ref, bnb_ref, bnm_ref, bnv_ref, o_ref):
        x = x_ref[0]                                          # (L, D)
        x_prev = jnp.concatenate([x[-1:], x[:-1]], axis=0)
        x_next = jnp.concatenate([x[1:], x[:1]], axis=0)
        z = (jnp.dot(x_prev, w0_ref[...], preferred_element_type=F32)
             + jnp.dot(x, w1_ref[...], preferred_element_type=F32)
             + jnp.dot(x_next, w2_ref[...], preferred_element_type=F32)
             + cb_ref[...])
        # BatchNorm1d (inference, running statistics)
        z = (z - bnm_ref[...]) * lax.rsqrt(bnv_ref[...] + BN_EPS) * bng_ref[...] \
            + bnb_ref[...]
        # ELU
        z = jnp.where(z > 0, z, jnp.exp(z) - 1.0)
        # MaxPool1d(kernel=3, stride=2, padding=1) along time (implicit -inf pad).
        L = z.shape[0]
        rows = []
        for t in range(l_out):
            lo = max(2 * t - 1, 0)
            hi = min(2 * t + 2, L)
            r = z[lo:lo + 1]
            for j in range(lo + 1, hi):
                r = jnp.maximum(r, z[j:j + 1])
            rows.append(r)
        o_ref[0] = jnp.concatenate(rows, axis=0)
    return kernel


def _layernorm_kernel(x_ref, g_ref, b_ref, o_ref):
    o_ref[0] = _layer_norm(x_ref[0], g_ref[...], b_ref[...])


def _make_dec_self_heads_kernel(n_heads):
    # Causal self-attention; emits the head-major (H*L, d_head) context so the
    # wrapper can reproduce AttentionLayer(mix=True)'s transpose(2,1).view(B,L,-1)
    # with a free XLA reshape (avoids an in-kernel sublane->lane repack).
    def kernel(x_ref, wq_ref, bq_ref, wk_ref, bk_ref, wv_ref, bv_ref, o_ref):
        x = x_ref[0]
        l_q = x.shape[0]
        q = jnp.dot(x, wq_ref[...], preferred_element_type=F32) + bq_ref[...]
        k = jnp.dot(x, wk_ref[...], preferred_element_type=F32) + bk_ref[...]
        v = jnp.dot(x, wv_ref[...], preferred_element_type=F32) + bv_ref[...]
        heads = _mha_heads(q, k, v, n_heads, causal=True)
        for h in range(n_heads):
            o_ref[0, h * l_q:(h + 1) * l_q, :] = heads[h]
    return kernel


def _make_decoder_rest_kernel(n_heads):
    def kernel(x_ref, mix_ref, mem_ref,
               wos_ref, bos_ref, ln1g_ref, ln1b_ref,
               wqc_ref, bqc_ref, wkc_ref, bkc_ref, wvc_ref, bvc_ref,
               woc_ref, boc_ref, ln2g_ref, ln2b_ref,
               w1_ref, b1_ref, w2_ref, b2_ref, ln3g_ref, ln3b_ref, o_ref):
        x = x_ref[0]                                          # (Ld, D)
        mem = mem_ref[0]                                      # (Lc, D)
        self_out = jnp.dot(mix_ref[0], wos_ref[...],
                           preferred_element_type=F32) + bos_ref[...]
        x1 = _layer_norm(x + self_out, ln1g_ref[...], ln1b_ref[...])
        # Cross attention (mix=False).
        q = jnp.dot(x1, wqc_ref[...], preferred_element_type=F32) + bqc_ref[...]
        k = jnp.dot(mem, wkc_ref[...], preferred_element_type=F32) + bkc_ref[...]
        v = jnp.dot(mem, wvc_ref[...], preferred_element_type=F32) + bvc_ref[...]
        heads = _mha_heads(q, k, v, n_heads, causal=False)
        cross = jnp.concatenate(heads, axis=-1)
        cross = jnp.dot(cross, woc_ref[...], preferred_element_type=F32) + boc_ref[...]
        x2 = _layer_norm(x1 + cross, ln2g_ref[...], ln2b_ref[...])
        y = _gelu(jnp.dot(x2, w1_ref[...], preferred_element_type=F32) + b1_ref[...])
        y = jnp.dot(y, w2_ref[...], preferred_element_type=F32) + b2_ref[...]
        o_ref[0] = _layer_norm(x2 + y, ln3g_ref[...], ln3b_ref[...])
    return kernel


def _make_final_kernel(pred_len):
    def kernel(x_ref, g_ref, b_ref, wp_ref, bp_ref, o_ref):
        xn = _layer_norm(x_ref[0], g_ref[...], b_ref[...])
        y = jnp.dot(xn, wp_ref[...], preferred_element_type=F32) + bp_ref[...]
        o_ref[0] = y[-pred_len:, :]
    return kernel


# ---------------------------------------------------------------------------
# pallas_call helper: grid over batch ("parallel" => v7x dual-TC split),
# batched arrays delivered as (1, ...) blocks, weights passed whole (resident).
# ---------------------------------------------------------------------------
def _cparams():
    return pltpu.CompilerParams(dimension_semantics=("parallel",),
                                vmem_limit_bytes=32 * 1024 * 1024)


def _batched_call(kernel, batched, shared, out_shape):
    B = batched[0].shape[0]
    in_specs = []
    for a in batched:
        rest = a.ndim - 1
        in_specs.append(pl.BlockSpec((1,) + a.shape[1:],
                                     lambda b, _r=rest: (b,) + (0,) * _r))
    for a in shared:
        in_specs.append(pl.BlockSpec(a.shape,
                                     lambda b, _r=a.ndim: (0,) * _r))
    out_rest = len(out_shape.shape) - 1
    out_spec = pl.BlockSpec((1,) + out_shape.shape[1:],
                            lambda b, _r=out_rest: (b,) + (0,) * _r)
    return pl.pallas_call(
        kernel,
        grid=(B,),
        in_specs=in_specs,
        out_specs=out_spec,
        out_shape=out_shape,
        compiler_params=_cparams(),
    )(*batched, *shared)


# ---------------------------------------------------------------------------
# Constant sinusoid tables (PositionalEmbedding / FixedEmbedding), wrapper side.
# ---------------------------------------------------------------------------
def _sinusoid_table(n_pos, d_model):
    pos = jnp.arange(n_pos, dtype=F32)[:, None]
    div = jnp.exp(jnp.arange(0, d_model, 2, dtype=F32)
                  * (-math.log(10000.0) / d_model))
    ang = pos * div[None, :]
    tab = jnp.zeros((n_pos, d_model), F32)
    tab = tab.at[:, 0::2].set(jnp.sin(ang))
    tab = tab.at[:, 1::2].set(jnp.cos(ang))
    return tab


def _pos_temporal(x_mark, d_model):
    # TemporalEmbedding(embed='fixed', freq='h'): marks = [month, day, weekday, hour].
    B, L, _ = x_mark.shape
    out = jnp.broadcast_to(_sinusoid_table(L, d_model)[None], (B, L, d_model))
    for f, size in enumerate((13, 32, 7, 24)):
        tab = _sinusoid_table(size, d_model)
        out = out + jnp.take(tab, x_mark[..., f], axis=0)
    return out


# ---------------------------------------------------------------------------
# Parameter init (torch Linear/Conv1d conventions; weights pre-transposed (in, out)).
# ---------------------------------------------------------------------------
def init_informer_params(key, *, enc_in, dec_in, c_out, d_model, n_heads,
                         e_layers, d_layers, d_ff):
    assert d_model % n_heads == 0
    state = {"key": key}

    def nxt():
        state["key"], sub = jax.random.split(state["key"])
        return sub

    def dense(fan_in, fan_out):
        bound = 1.0 / math.sqrt(fan_in)
        w = jax.random.uniform(nxt(), (fan_in, fan_out), F32, -bound, bound)
        b = jax.random.uniform(nxt(), (1, fan_out), F32, -bound, bound)
        return w, b

    def conv3(fan_in, fan_out):
        bound = 1.0 / math.sqrt(3 * fan_in)
        w = jax.random.uniform(nxt(), (3, fan_in, fan_out), F32, -bound, bound)
        b = jnp.zeros((1, fan_out), F32)
        return w, b

    def ln():
        return jnp.ones((1, d_model), F32), jnp.zeros((1, d_model), F32)

    p = {}
    p["enc_emb_w"], p["enc_emb_b"] = conv3(enc_in, d_model)
    p["dec_emb_w"], p["dec_emb_b"] = conv3(dec_in, d_model)

    p["enc_layers"] = []
    for _ in range(e_layers):
        lyr = {}
        lyr["wq"], lyr["bq"] = dense(d_model, d_model)
        lyr["wk"], lyr["bk"] = dense(d_model, d_model)
        lyr["wv"], lyr["bv"] = dense(d_model, d_model)
        lyr["wo"], lyr["bo"] = dense(d_model, d_model)
        lyr["ln1g"], lyr["ln1b"] = ln()
        lyr["w1"], lyr["b1"] = dense(d_model, d_ff)
        lyr["w2"], lyr["b2"] = dense(d_ff, d_model)
        lyr["ln2g"], lyr["ln2b"] = ln()
        p["enc_layers"].append(lyr)

    p["enc_convs"] = []
    for _ in range(e_layers - 1):
        c = {}
        c["w"], c["b"] = conv3(d_model, d_model)
        c["bn_g"] = jnp.ones((1, d_model), F32)
        c["bn_b"] = jnp.zeros((1, d_model), F32)
        c["bn_m"] = jnp.zeros((1, d_model), F32)
        c["bn_v"] = jnp.ones((1, d_model), F32)
        p["enc_convs"].append(c)
    p["enc_norm_g"], p["enc_norm_b"] = ln()

    p["dec_layers"] = []
    for _ in range(d_layers):
        lyr = {}
        for pre in ("s", "c"):
            lyr[pre + "_wq"], lyr[pre + "_bq"] = dense(d_model, d_model)
            lyr[pre + "_wk"], lyr[pre + "_bk"] = dense(d_model, d_model)
            lyr[pre + "_wv"], lyr[pre + "_bv"] = dense(d_model, d_model)
            lyr[pre + "_wo"], lyr[pre + "_bo"] = dense(d_model, d_model)
        lyr["ln1g"], lyr["ln1b"] = ln()
        lyr["ln2g"], lyr["ln2b"] = ln()
        lyr["w1"], lyr["b1"] = dense(d_model, d_ff)
        lyr["w2"], lyr["b2"] = dense(d_ff, d_model)
        lyr["ln3g"], lyr["ln3b"] = ln()
        p["dec_layers"].append(lyr)
    p["dec_norm_g"], p["dec_norm_b"] = ln()
    p["proj_w"], p["proj_b"] = dense(d_model, c_out)
    return p


# ---------------------------------------------------------------------------
# Full Eq_Fore forward (inference).
# ---------------------------------------------------------------------------
def informer_forward(params, x_enc, x_mark_enc, x_dec, x_mark_dec, *,
                     d_model, n_heads, pred_len):
    B = x_enc.shape[0]
    c_out = params["proj_w"].shape[1]
    d_head = d_model // n_heads

    def embed(x, x_mark, w, b):
        pt = _pos_temporal(x_mark, d_model)
        L = x.shape[1]
        return _batched_call(
            _embedding_kernel,
            batched=[x.astype(F32), pt],
            shared=[w[0], w[1], w[2], b],
            out_shape=jax.ShapeDtypeStruct((B, L, d_model), F32))

    enc = embed(x_enc, x_mark_enc, params["enc_emb_w"], params["enc_emb_b"])
    dec = embed(x_dec, x_mark_dec, params["dec_emb_w"], params["dec_emb_b"])

    # ----- Encoder: attn layer -> distil conv -> ... -> last attn layer -> norm
    enc_kernel = _make_encoder_layer_kernel(n_heads)
    n_enc = len(params["enc_layers"])
    for i, lyr in enumerate(params["enc_layers"]):
        L = enc.shape[1]
        enc = _batched_call(
            enc_kernel, batched=[enc],
            shared=[lyr["wq"], lyr["bq"], lyr["wk"], lyr["bk"],
                    lyr["wv"], lyr["bv"], lyr["wo"], lyr["bo"],
                    lyr["ln1g"], lyr["ln1b"],
                    lyr["w1"], lyr["b1"], lyr["w2"], lyr["b2"],
                    lyr["ln2g"], lyr["ln2b"]],
            out_shape=jax.ShapeDtypeStruct((B, L, d_model), F32))
        if i < n_enc - 1:  # distil ConvLayer between attention layers
            c = params["enc_convs"][i]
            L_out = (L - 1) // 2 + 1
            enc = _batched_call(
                _make_conv_distil_kernel(L_out), batched=[enc],
                shared=[c["w"][0], c["w"][1], c["w"][2], c["b"],
                        c["bn_g"], c["bn_b"], c["bn_m"], c["bn_v"]],
                out_shape=jax.ShapeDtypeStruct((B, L_out, d_model), F32))
    enc = _batched_call(
        _layernorm_kernel, batched=[enc],
        shared=[params["enc_norm_g"], params["enc_norm_b"]],
        out_shape=jax.ShapeDtypeStruct((B, enc.shape[1], d_model), F32))

    # ----- Decoder
    Ld = dec.shape[1]
    heads_kernel = _make_dec_self_heads_kernel(n_heads)
    rest_kernel = _make_decoder_rest_kernel(n_heads)
    for lyr in params["dec_layers"]:
        ctx = _batched_call(
            heads_kernel, batched=[dec],
            shared=[lyr["s_wq"], lyr["s_bq"], lyr["s_wk"], lyr["s_bk"],
                    lyr["s_wv"], lyr["s_bv"]],
            out_shape=jax.ShapeDtypeStruct((B, n_heads * Ld, d_head), F32))
        # AttentionLayer(mix=True): out.transpose(2,1).contiguous().view(B, L, -1)
        # == C-order reshape of the head-major context (free, XLA side).
        mixed = jnp.reshape(ctx, (B, Ld, d_model))
        dec = _batched_call(
            rest_kernel, batched=[dec, mixed, enc],
            shared=[lyr["s_wo"], lyr["s_bo"], lyr["ln1g"], lyr["ln1b"],
                    lyr["c_wq"], lyr["c_bq"], lyr["c_wk"], lyr["c_bk"],
                    lyr["c_wv"], lyr["c_bv"], lyr["c_wo"], lyr["c_bo"],
                    lyr["ln2g"], lyr["ln2b"],
                    lyr["w1"], lyr["b1"], lyr["w2"], lyr["b2"],
                    lyr["ln3g"], lyr["ln3b"]],
            out_shape=jax.ShapeDtypeStruct((B, Ld, d_model), F32))

    # ----- Final decoder LayerNorm + projection + last pred_len timesteps
    return _batched_call(
        _make_final_kernel(pred_len), batched=[dec],
        shared=[params["dec_norm_g"], params["dec_norm_b"],
                params["proj_w"], params["proj_b"]],
        out_shape=jax.ShapeDtypeStruct((B, pred_len, c_out), F32))


if __name__ == "__main__":
    B = 2
    enc_in = dec_in = 4
    c_out = 4
    seq_len, label_len, out_len = 16, 8, 4
    d_model, n_heads, e_layers, d_layers, d_ff = 128, 4, 2, 1, 128

    key = jax.random.PRNGKey(0)
    kp, k1, k2, k3, k4 = jax.random.split(key, 5)
    params = init_informer_params(
        kp, enc_in=enc_in, dec_in=dec_in, c_out=c_out, d_model=d_model,
        n_heads=n_heads, e_layers=e_layers, d_layers=d_layers, d_ff=d_ff)

    x_enc = jax.random.normal(k1, (B, seq_len, enc_in), F32)
    x_dec = jax.random.normal(k2, (B, label_len + out_len, dec_in), F32)

    def marks(k, L):
        ks = jax.random.split(k, 4)
        cols = [jax.random.randint(ks[i], (B, L, 1), 0, hi)
                for i, hi in enumerate((13, 32, 7, 24))]
        return jnp.concatenate(cols, axis=-1).astype(jnp.int32)

    x_mark_enc = marks(k3, seq_len)
    x_mark_dec = marks(k4, label_len + out_len)

    fwd = jax.jit(functools.partial(informer_forward, d_model=d_model,
                                    n_heads=n_heads, pred_len=out_len))
    out = fwd(params, x_enc, x_mark_enc, x_dec, x_mark_dec)
    jax.block_until_ready(out)

    assert out.shape == (B, out_len, c_out), out.shape
    assert out.dtype == F32
    assert bool(jnp.all(jnp.isfinite(out)))
    print("KERNEL_OK")
</pallas_src>

<mosaic_0001>
module attributes {stable_mosaic.version = 11 : i64} {
  func.func @_embedding_kernel(%arg0: i32, %arg1: memref<1x12x4xf32, #tpu.memory_space<vmem>>, %arg2: memref<1x12x128xf32, #tpu.memory_space<vmem>>, %arg3: memref<4x128xf32, #tpu.memory_space<vmem>>, %arg4: memref<4x128xf32, #tpu.memory_space<vmem>>, %arg5: memref<4x128xf32, #tpu.memory_space<vmem>>, %arg6: memref<1x128xf32, #tpu.memory_space<vmem>>, %arg7: memref<1x12x128xf32, #tpu.memory_space<vmem>>) attributes {dimension_semantics = [#tpu.dimension_semantics<parallel>], iteration_bounds = array<i64: 2>, scalar_prefetch = 0 : i64, scratch_operands = 0 : i64, tpu.core_type = #tpu.core_type<tc>, window_params = [{transform_indices = @transform_0, window_bounds = array<i64: 1, 12, 4>}, {transform_indices = @transform_1, window_bounds = array<i64: 1, 12, 128>}, {pipeline_mode = #tpu.pipeline_mode<synchronous>, transform_indices = @transform_2, window_bounds = array<i64: 4, 128>}, {pipeline_mode = #tpu.pipeline_mode<synchronous>, transform_indices = @transform_3, window_bounds = array<i64: 4, 128>}, {pipeline_mode = #tpu.pipeline_mode<synchronous>, transform_indices = @transform_4, window_bounds = array<i64: 4, 128>}, {pipeline_mode = #tpu.pipeline_mode<synchronous>, transform_indices = @transform_5, window_bounds = array<i64: 1, 128>}, {transform_indices = @transform_6, window_bounds = array<i64: 1, 12, 128>}]} {
    %c0 = arith.constant 0 : index
    %c0_0 = arith.constant 0 : index
    %c0_1 = arith.constant 0 : index
    %0 = vector.load %arg1[%c0, %c0_0, %c0_1] : memref<1x12x4xf32, #tpu.memory_space<vmem>>, vector<1x12x4xf32>
    %1 = vector.shape_cast %0 : vector<1x12x4xf32> to vector<12x4xf32>
    %2 = vector.extract_strided_slice %1 {offsets = [11, 0], sizes = [1, 4], strides = [1, 1]} : vector<12x4xf32> to vector<1x4xf32>
    %3 = vector.extract_strided_slice %1 {offsets = [0, 0], sizes = [11, 4], strides = [1, 1]} : vector<12x4xf32> to vector<11x4xf32>
    %4 = tpu.concatenate %2, %3 in 0 : vector<1x4xf32>, vector<11x4xf32> -> vector<12x4xf32>
    %5 = vector.extract_strided_slice %1 {offsets = [1, 0], sizes = [11, 4], strides = [1, 1]} : vector<12x4xf32> to vector<11x4xf32>
    %6 = vector.extract_strided_slice %1 {offsets = [0, 0], sizes = [1, 4], strides = [1, 1]} : vector<12x4xf32> to vector<1x4xf32>
    %7 = tpu.concatenate %5, %6 in 0 : vector<11x4xf32>, vector<1x4xf32> -> vector<12x4xf32>
    %c0_2 = arith.constant 0 : index
    %c0_3 = arith.constant 0 : index
    %8 = vector.load %arg3[%c0_2, %c0_3] : memref<4x128xf32, #tpu.memory_space<vmem>>, vector<4x128xf32>
    %cst = arith.constant dense<0.000000e+00> : vector<12x128xf32>
    %9 = tpu.matmul %4, %8, %cst {dimension_numbers = #tpu.dot_dimension_numbers<[1], [0], [0], [1], [0, 0, 1, 1], [], []>} : vector<12x4xf32>, vector<4x128xf32>, vector<12x128xf32> -> vector<12x128xf32>
    %c0_4 = arith.constant 0 : index
    %c0_5 = arith.constant 0 : index
    %10 = vector.load %arg4[%c0_4, %c0_5] : memref<4x128xf32, #tpu.memory_space<vmem>>, vector<4x128xf32>
    %cst_6 = arith.constant dense<0.000000e+00> : vector<12x128xf32>
    %11 = tpu.matmul %1, %10, %cst_6 {dimension_numbers = #tpu.dot_dimension_numbers<[1], [0], [0], [1], [0, 0, 1, 1], [], []>} : vector<12x4xf32>, vector<4x128xf32>, vector<12x128xf32> -> vector<12x128xf32>
    %12 = arith.addf %9, %11 : vector<12x128xf32>
    %c0_7 = arith.constant 0 : index
    %c0_8 = arith.constant 0 : index
    %13 = vector.load %arg5[%c0_7, %c0_8] : memref<4x128xf32, #tpu.memory_space<vmem>>, vector<4x128xf32>
    %cst_9 = arith.constant dense<0.000000e+00> : vector<12x128xf32>
    %14 = tpu.matmul %7, %13, %cst_9 {dimension_numbers = #tpu.dot_dimension_numbers<[1], [0], [0], [1], [0, 0, 1, 1], [], []>} : vector<12x4xf32>, vector<4x128xf32>, vector<12x128xf32> -> vector<12x128xf32>
    %15 = arith.addf %12, %14 : vector<12x128xf32>
    %c0_10 = arith.constant 0 : index
    %c0_11 = arith.constant 0 : index
    %16 = vector.load %arg6[%c0_10, %c0_11] : memref<1x128xf32, #tpu.memory_space<vmem>>, vector<1x128xf32>
    %17 = vector.broadcast %16 : vector<1x128xf32> to vector<12x128xf32>
    %18 = arith.addf %15, %17 : vector<12x128xf32>
    %c0_12 = arith.constant 0 : index
    %c0_13 = arith.constant 0 : index
    %c0_14 = arith.constant 0 : index
    %19 = vector.load %arg2[%c0_12, %c0_13, %c0_14] : memref<1x12x128xf32, #tpu.memory_space<vmem>>, vector<1x12x128xf32>
    %20 = vector.shape_cast %19 : vector<1x12x128xf32> to vector<12x128xf32>
    %21 = arith.addf %18, %20 : vector<12x128xf32>
    %c0_15 = arith.constant 0 : index
    %c0_16 = arith.constant 0 : index
    %c0_17 = arith.constant 0 : index
    %22 = vector.load %arg7[%c0_15, %c0_16, %c0_17] : memref<1x12x128xf32, #tpu.memory_space<vmem>>, vector<1x12x128xf32>
    %23 = vector.shape_cast %22 : vector<1x12x128xf32> to vector<12x128xf32>
    %24 = vector.shape_cast %21 : vector<12x128xf32> to vector<1x12x128xf32>
    tpu.vector_store %arg7[%c0_15, %c0_16, %c0_17], %24 {strides = array<i32>} : memref<1x12x128xf32, #tpu.memory_space<vmem>>, vector<1x12x128xf32>,
    return
  }
  func.func @transform_0(%arg0: i32) -> (i32, i32, i32) {
    %c0_i32 = arith.constant 0 : i32
    %c0_i32_0 = arith.constant 0 : i32
    %c0_i32_1 = arith.constant 0 : i32
    return %arg0, %c0_i32, %c0_i32_0 : i32, i32, i32
  }
  func.func @transform_1(%arg0: i32) -> (i32, i32, i32) {
    %c0_i32 = arith.constant 0 : i32
    %c0_i32_0 = arith.constant 0 : i32
    %c0_i32_1 = arith.constant 0 : i32
    return %arg0, %c0_i32, %c0_i32_0 : i32, i32, i32
  }
  func.func @transform_2(%arg0: i32) -> (i32, i32) {
    %c0_i32 = arith.constant 0 : i32
    %c0_i32_0 = arith.constant 0 : i32
    %c0_i32_1 = arith.constant 0 : i32
    return %c0_i32, %c0_i32_0 : i32, i32
  }
  func.func @transform_3(%arg0: i32) -> (i32, i32) {
    %c0_i32 = arith.constant 0 : i32
    %c0_i32_0 = arith.constant 0 : i32
    %c0_i32_1 = arith.constant 0 : i32
    return %c0_i32, %c0_i32_0 : i32, i32
  }
  func.func @transform_4(%arg0: i32) -> (i32, i32) {
    %c0_i32 = arith.constant 0 : i32
    %c0_i32_0 = arith.constant 0 : i32
    %c0_i32_1 = arith.constant 0 : i32
    return %c0_i32, %c0_i32_0 : i32, i32
  }
  func.func @transform_5(%arg0: i32) -> (i32, i32) {
    %c0_i32 = arith.constant 0 : i32
    %c0_i32_0 = arith.constant 0 : i32
    %c0_i32_1 = arith.constant 0 : i32
    return %c0_i32, %c0_i32_0 : i32, i32
  }
  func.func @transform_6(%arg0: i32) -> (i32, i32, i32) {
    %c0_i32 = arith.constant 0 : i32
    %c0_i32_0 = arith.constant 0 : i32
    %c0_i32_1 = arith.constant 0 : i32
    return %arg0, %c0_i32, %c0_i32_0 : i32, i32, i32
  }
}

module attributes {stable_mosaic.version = 11 : i64} {
  func.func @kernel(%arg0: i32, %arg1: memref<1x12x128xf32, #tpu.memory_space<vmem>>, %arg2: memref<128x128xf32, #tpu.memory_space<vmem>>, %arg3: memref<1x128xf32, #tpu.memory_space<vmem>>, %arg4: memref<128x128xf32, #tpu.memory_space<vmem>>, %arg5: memref<1x128xf32, #tpu.memory_space<vmem>>, %arg6: memref<128x128xf32, #tpu.memory_space<vmem>>, %arg7: memref<1x128xf32, #tpu.memory_space<vmem>>, %arg8: memref<1x48x32xf32, #tpu.memory_space<vmem>>) attributes {dimension_semantics = [#tpu.dimension_semantics<parallel>], iteration_bounds = array<i64: 2>, scalar_prefetch = 0 : i64, scratch_operands = 0 : i64, tpu.core_type = #tpu.core_type<tc>, window_params = [{transform_indices = @transform_0, window_bounds = array<i64: 1, 12, 128>}, {pipeline_mode = #tpu.pipeline_mode<synchronous>, transform_indices = @transform_1, window_bounds = array<i64: 128, 128>}, {pipeline_mode = #tpu.pipeline_mode<synchronous>, transform_indices = @transform_2, window_bounds = array<i64: 1, 128>}, {pipeline_mode = #tpu.pipeline_mode<synchronous>, transform_indices = @transform_3, window_bounds = array<i64: 128, 128>}, {pipeline_mode = #tpu.pipeline_mode<synchronous>, transform_indices = @transform_4, window_bounds = array<i64: 1, 128>}, {pipeline_mode = #tpu.pipeline_mode<synchronous>, transform_indices = @transform_5, window_bounds = array<i64: 128, 128>}, {pipeline_mode = #tpu.pipeline_mode<synchronous>, transform_indices = @transform_6, window_bounds = array<i64: 1, 128>}, {transform_indices = @transform_7, window_bounds = array<i64: 1, 48, 32>}]} {
    %c0 = arith.constant 0 : index
    %c0_0 = arith.constant 0 : index
    %c0_1 = arith.constant 0 : index
    %0 = vector.load %arg1[%c0, %c0_0, %c0_1] : memref<1x12x128xf32, #tpu.memory_space<vmem>>, vector<1x12x128xf32>
    %1 = vector.shape_cast %0 : vector<1x12x128xf32> to vector<12x128xf32>
    %c0_2 = arith.constant 0 : index
    %c0_3 = arith.constant 0 : index
    %2 = vector.load %arg2[%c0_2, %c0_3] : memref<128x128xf32, #tpu.memory_space<vmem>>, vector<128x128xf32>
    %cst = arith.constant dense<0.000000e+00> : vector<12x128xf32>
    %3 = tpu.matmul %1, %2, %cst {dimension_numbers = #tpu.dot_dimension_numbers<[1], [0], [0], [1], [0, 0, 1, 1], [], []>} : vector<12x128xf32>, vector<128x128xf32>, vector<12x128xf32> -> vector<12x128xf32>
    %c0_4 = arith.constant 0 : index
    %c0_5 = arith.constant 0 : index
    %4 = vector.load %arg3[%c0_4, %c0_5] : memref<1x128xf32, #tpu.memory_space<vmem>>, vector<1x128xf32>
    %5 = vector.broadcast %4 : vector<1x128xf32> to vector<12x128xf32>
    %6 = arith.addf %3, %5 : vector<12x128xf32>
    %c0_6 = arith.constant 0 : index
    %c0_7 = arith.constant 0 : index
    %7 = vector.load %arg4[%c0_6, %c0_7] : memref<128x128xf32, #tpu.memory_space<vmem>>, vector<128x128xf32>
    %cst_8 = arith.constant dense<0.000000e+00> : vector<12x128xf32>
    %8 = tpu.matmul %1, %7, %cst_8 {dimension_numbers = #tpu.dot_dimension_numbers<[1], [0], [0], [1], [0, 0, 1, 1], [], []>} : vector<12x128xf32>, vector<128x128xf32>, vector<12x128xf32> -> vector<12x128xf32>
    %c0_9 = arith.constant 0 : index
    %c0_10 = arith.constant 0 : index
    %9 = vector.load %arg5[%c0_9, %c0_10] : memref<1x128xf32, #tpu.memory_space<vmem>>, vector<1x128xf32>
    %10 = vector.broadcast %9 : vector<1x128xf32> to vector<12x128xf32>
    %11 = arith.addf %8, %10 : vector<12x128xf32>
    %c0_11 = arith.constant 0 : index
    %c0_12 = arith.constant 0 : index
    %12 = vector.load %arg6[%c0_11, %c0_12] : memref<128x128xf32, #tpu.memory_space<vmem>>, vector<128x128xf32>
    %cst_13 = arith.constant dense<0.000000e+00> : vector<12x128xf32>
    %13 = tpu.matmul %1, %12, %cst_13 {dimension_numbers = #tpu.dot_dimension_numbers<[1], [0], [0], [1], [0, 0, 1, 1], [], []>} : vector<12x128xf32>, vector<128x128xf32>, vector<12x128xf32> -> vector<12x128xf32>
    %c0_14 = arith.constant 0 : index
    %c0_15 = arith.constant 0 : index
    %14 = vector.load %arg7[%c0_14, %c0_15] : memref<1x128xf32, #tpu.memory_space<vmem>>, vector<1x128xf32>
    %15 = vector.broadcast %14 : vector<1x128xf32> to vector<12x128xf32>
    %16 = arith.addf %13, %15 : vector<12x128xf32>
    %17 = tpu.iota {dimensions = array<i32: 0>} : vector<12x12xi32>
    %18 = tpu.iota {dimensions = array<i32: 1>} : vector<12x12xi32>
    %cst_16 = arith.constant 0xFF800000 : f32
    %19 = vector.broadcast %cst_16 : f32 to vector<12x12xf32>
    %20 = vector.extract_strided_slice %6 {offsets = [0, 0], sizes = [12, 32], strides = [1, 1]} : vector<12x128xf32> to vector<12x32xf32>
    %21 = vector.extract_strided_slice %11 {offsets = [0, 0], sizes = [12, 32], strides = [1, 1]} : vector<12x128xf32> to vector<12x32xf32>
    %22 = vector.extract_strided_slice %16 {offsets = [0, 0], sizes = [12, 32], strides = [1, 1]} : vector<12x128xf32> to vector<12x32xf32>
    %cst_17 = arith.constant dense<0.000000e+00> : vector<12x12xf32>
    %23 = tpu.matmul %20, %21, %cst_17 {dimension_numbers = #tpu.dot_dimension_numbers<[1], [1], [0], [0], [0, 0, 1, 0], [], []>} : vector<12x32xf32>, vector<12x32xf32>, vector<12x12xf32> -> vector<12x12xf32>
    %cst_18 = arith.constant 0.176776692 : f32
    %24 = vector.broadcast %cst_18 : f32 to vector<12x12xf32>
    %25 = arith.mulf %23, %24 : vector<12x12xf32>
    %26 = arith.cmpi sgt, %18, %17 : vector<12x12xi32>
    %27 = arith.select %26, %19, %25 : vector<12x12xi1>, vector<12x12xf32>
    %cst_19 = arith.constant dense<0xFF800000> : vector<12xf32>
    %28 = vector.multi_reduction <maximumf>, %27, %cst_19 [1] : vector<12x12xf32> to vector<12xf32>
    %29 = vector.shape_cast %28 : vector<12xf32> to vector<12x1xf32>
    %30 = vector.broadcast %29 : vector<12x1xf32> to vector<12x12xf32>
    %31 = arith.subf %27, %30 : vector<12x12xf32>
    %32 = math.exp %31 : vector<12x12xf32>
    %cst_20 = arith.constant dense<0.000000e+00> : vector<12xf32>
    %33 = vector.multi_reduction <add>, %32, %cst_20 [1] : vector<12x12xf32> to vector<12xf32>
    %34 = vector.shape_cast %33 : vector<12xf32> to vector<12x1xf32>
    %35 = vector.broadcast %34 : vector<12x1xf32> to vector<12x12xf32>
    %36 = arith.divf %32, %35 : vector<12x12xf32>
    %cst_21 = arith.constant dense<0.000000e+00> : vector<12x32xf32>
    %37 = tpu.matmul %36, %22, %cst_21 {dimension_numbers = #tpu.dot_dimension_numbers<[1], [0], [0], [1], [0, 0, 1, 1], [], []>} : vector<12x12xf32>, vector<12x32xf32>, vector<12x32xf32> -> vector<12x32xf32>
    %38 = vector.extract_strided_slice %6 {offsets = [0, 32], sizes = [12, 32], strides = [1, 1]} : vector<12x128xf32> to vector<12x32xf32>
    %39 = vector.extract_strided_slice %11 {offsets = [0, 32], sizes = [12, 32], strides = [1, 1]} : vector<12x128xf32> to vector<12x32xf32>
    %40 = vector.extract_strided_slice %16 {offsets = [0, 32], sizes = [12, 32], strides = [1, 1]} : vector<12x128xf32> to vector<12x32xf32>
    %cst_22 = arith.constant dense<0.000000e+00> : vector<12x12xf32>
    %41 = tpu.matmul %38, %39, %cst_22 {dimension_numbers = #tpu.dot_dimension_numbers<[1], [1], [0], [0], [0, 0, 1, 0], [], []>} : vector<12x32xf32>, vector<12x32xf32>, vector<12x12xf32> -> vector<12x12xf32>
    %cst_23 = arith.constant 0.176776692 : f32
    %42 = vector.broadcast %cst_23 : f32 to vector<12x12xf32>
    %43 = arith.mulf %41, %42 : vector<12x12xf32>
    %44 = arith.cmpi sgt, %18, %17 : vector<12x12xi32>
    %45 = arith.select %44, %19, %43 : vector<12x12xi1>, vector<12x12xf32>
    %cst_24 = arith.constant dense<0xFF800000> : vector<12xf32>
    %46 = vector.multi_reduction <maximumf>, %45, %cst_24 [1] : vector<12x12xf32> to vector<12xf32>
    %47 = vector.shape_cast %46 : vector<12xf32> to vector<12x1xf32>
    %48 = vector.broadcast %47 : vector<12x1xf32> to vector<12x12xf32>
    %49 = arith.subf %45, %48 : vector<12x12xf32>
    %50 = math.exp %49 : vector<12x12xf32>
    %cst_25 = arith.constant dense<0.000000e+00> : vector<12xf32>
    %51 = vector.multi_reduction <add>, %50, %cst_25 [1] : vector<12x12xf32> to vector<12xf32>
    %52 = vector.shape_cast %51 : vector<12xf32> to vector<12x1xf32>
    %53 = vector.broadcast %52 : vector<12x1xf32> to vector<12x12xf32>
    %54 = arith.divf %50, %53 : vector<12x12xf32>
    %cst_26 = arith.constant dense<0.000000e+00> : vector<12x32xf32>
    %55 = tpu.matmul %54, %40, %cst_26 {dimension_numbers = #tpu.dot_dimension_numbers<[1], [0], [0], [1], [0, 0, 1, 1], [], []>} : vector<12x12xf32>, vector<12x32xf32>, vector<12x32xf32> -> vector<12x32xf32>
    %56 = vector.extract_strided_slice %6 {offsets = [0, 64], sizes = [12, 32], strides = [1, 1]} : vector<12x128xf32> to vector<12x32xf32>
    %57 = vector.extract_strided_slice %11 {offsets = [0, 64], sizes = [12, 32], strides = [1, 1]} : vector<12x128xf32> to vector<12x32xf32>
    %58 = vector.extract_strided_slice %16 {offsets = [0, 64], sizes = [12, 32], strides = [1, 1]} : vector<12x128xf32> to vector<12x32xf32>
    %cst_27 = arith.constant dense<0.000000e+00> : vector<12x12xf32>
    %59 = tpu.matmul %56, %57, %cst_27 {dimension_numbers = #tpu.dot_dimension_numbers<[1], [1], [0], [0], [0, 0, 1, 0], [], []>} : vector<12x32xf32>, vector<12x32xf32>, vector<12x12xf32> -> vector<12x12xf32>
    %cst_28 = arith.constant 0.176776692 : f32
    %60 = vector.broadcast %cst_28 : f32 to vector<12x12xf32>
    %61 = arith.mulf %59, %60 : vector<12x12xf32>
    %62 = arith.cmpi sgt, %18, %17 : vector<12x12xi32>
    %63 = arith.select %62, %19, %61 : vector<12x12xi1>, vector<12x12xf32>
    %cst_29 = arith.constant dense<0xFF800000> : vector<12xf32>
    %64 = vector.multi_reduction <maximumf>, %63, %cst_29 [1] : vector<12x12xf32> to vector<12xf32>
    %65 = vector.shape_cast %64 : vector<12xf32> to vector<12x1xf32>
    %66 = vector.broadcast %65 : vector<12x1xf32> to vector<12x12xf32>
    %67 = arith.subf %63, %66 : vector<12x12xf32>
    %68 = math.exp %67 : vector<12x12xf32>
    %cst_30 = arith.constant dense<0.000000e+00> : vector<12xf32>
    %69 = vector.multi_reduction <add>, %68, %cst_30 [1] : vector<12x12xf32> to vector<12xf32>
    %70 = vector.shape_cast %69 : vector<12xf32> to vector<12x1xf32>
    %71 = vector.broadcast %70 : vector<12x1xf32> to vector<12x12xf32>
    %72 = arith.divf %68, %71 : vector<12x12xf32>
    %cst_31 = arith.constant dense<0.000000e+00> : vector<12x32xf32>
    %73 = tpu.matmul %72, %58, %cst_31 {dimension_numbers = #tpu.dot_dimension_numbers<[1], [0], [0], [1], [0, 0, 1, 1], [], []>} : vector<12x12xf32>, vector<12x32xf32>, vector<12x32xf32> -> vector<12x32xf32>
    %74 = vector.extract_strided_slice %6 {offsets = [0, 96], sizes = [12, 32], strides = [1, 1]} : vector<12x128xf32> to vector<12x32xf32>
    %75 = vector.extract_strided_slice %11 {offsets = [0, 96], sizes = [12, 32], strides = [1, 1]} : vector<12x128xf32> to vector<12x32xf32>
    %76 = vector.extract_strided_slice %16 {offsets = [0, 96], sizes = [12, 32], strides = [1, 1]} : vector<12x128xf32> to vector<12x32xf32>
    %cst_32 = arith.constant dense<0.000000e+00> : vector<12x12xf32>
    %77 = tpu.matmul %74, %75, %cst_32 {dimension_numbers = #tpu.dot_dimension_numbers<[1], [1], [0], [0], [0, 0, 1, 0], [], []>} : vector<12x32xf32>, vector<12x32xf32>, vector<12x12xf32> -> vector<12x12xf32>
    %cst_33 = arith.constant 0.176776692 : f32
    %78 = vector.broadcast %cst_33 : f32 to vector<12x12xf32>
    %79 = arith.mulf %77, %78 : vector<12x12xf32>
    %80 = arith.cmpi sgt, %18, %17 : vector<12x12xi32>
    %81 = arith.select %80, %19, %79 : vector<12x12xi1>, vector<12x12xf32>
    %cst_34 = arith.constant dense<0xFF800000> : vector<12xf32>
    %82 = vector.multi_reduction <maximumf>, %81, %cst_34 [1] : vector<12x12xf32> to vector<12xf32>
    %83 = vector.shape_cast %82 : vector<12xf32> to vector<12x1xf32>
    %84 = vector.broadcast %83 : vector<12x1xf32> to vector<12x12xf32>
    %85 = arith.subf %81, %84 : vector<12x12xf32>
    %86 = math.exp %85 : vector<12x12xf32>
    %cst_35 = arith.constant dense<0.000000e+00> : vector<12xf32>
    %87 = vector.multi_reduction <add>, %86, %cst_35 [1] : vector<12x12xf32> to vector<12xf32>
    %88 = vector.shape_cast %87 : vector<12xf32> to vector<12x1xf32>
    %89 = vector.broadcast %88 : vector<12x1xf32> to vector<12x12xf32>
    %90 = arith.divf %86, %89 : vector<12x12xf32>
    %cst_36 = arith.constant dense<0.000000e+00> : vector<12x32xf32>
    %91 = tpu.matmul %90, %76, %cst_36 {dimension_numbers = #tpu.dot_dimension_numbers<[1], [0], [0], [1], [0, 0, 1, 1], [], []>} : vector<12x12xf32>, vector<12x32xf32>, vector<12x32xf32> -> vector<12x32xf32>
    %c0_37 = arith.constant 0 : index
    %c0_38 = arith.constant 0 : index
    %c0_39 = arith.constant 0 : index
    %92 = vector.load %arg8[%c0_37, %c0_38, %c0_39] : memref<1x48x32xf32, #tpu.memory_space<vmem>>, vector<1x12x32xf32>
    %93 = vector.shape_cast %92 : vector<1x12x32xf32> to vector<12x32xf32>
    %94 = vector.shape_cast %37 : vector<12x32xf32> to vector<1x12x32xf32>
    tpu.vector_store %arg8[%c0_37, %c0_38, %c0_39], %94 {strides = array<i32>} : memref<1x48x32xf32, #tpu.memory_space<vmem>>, vector<1x12x32xf32>,
    %c0_40 = arith.constant 0 : index
    %c12 = arith.constant 12 : index
    %c0_41 = arith.constant 0 : index
    %95 = vector.load %arg8[%c0_40, %c12, %c0_41] : memref<1x48x32xf32, #tpu.memory_space<vmem>>, vector<1x12x32xf32>
    %96 = vector.shape_cast %95 : vector<1x12x32xf32> to vector<12x32xf32>
    %97 = vector.shape_cast %55 : vector<12x32xf32> to vector<1x12x32xf32>
    tpu.vector_store %arg8[%c0_40, %c12, %c0_41], %97 {strides = array<i32>} : memref<1x48x32xf32, #tpu.memory_space<vmem>>, vector<1x12x32xf32>,
    %c0_42 = arith.constant 0 : index
    %c24 = arith.constant 24 : index
    %c0_43 = arith.constant 0 : index
    %98 = vector.load %arg8[%c0_42, %c24, %c0_43] : memref<1x48x32xf32, #tpu.memory_space<vmem>>, vector<1x12x32xf32>
    %99 = vector.shape_cast %98 : vector<1x12x32xf32> to vector<12x32xf32>
    %100 = vector.shape_cast %73 : vector<12x32xf32> to vector<1x12x32xf32>
    tpu.vector_store %arg8[%c0_42, %c24, %c0_43], %100 {strides = array<i32>} : memref<1x48x32xf32, #tpu.memory_space<vmem>>, vector<1x12x32xf32>,
    %c0_44 = arith.constant 0 : index
    %c36 = arith.constant 36 : index
    %c0_45 = arith.constant 0 : index
    %101 = vector.load %arg8[%c0_44, %c36, %c0_45] : memref<1x48x32xf32, #tpu.memory_space<vmem>>, vector<1x12x32xf32>
    %102 = vector.shape_cast %101 : vector<1x12x32xf32> to vector<12x32xf32>
    %103 = vector.shape_cast %91 : vector<12x32xf32> to vector<1x12x32xf32>
    tpu.vector_store %arg8[%c0_44, %c36, %c0_45], %103 {strides = array<i32>} : memref<1x48x32xf32, #tpu.memory_space<vmem>>, vector<1x12x32xf32>,
    return
  }
  func.func @transform_0(%arg0: i32) -> (i32, i32, i32) {
    %c0_i32 = arith.constant 0 : i32
    %c0_i32_0 = arith.constant 0 : i32
    %c0_i32_1 = arith.constant 0 : i32
    return %arg0, %c0_i32, %c0_i32_0 : i32, i32, i32
  }
  func.func @transform_1(%arg0: i32) -> (i32, i32) {
    %c0_i32 = arith.constant 0 : i32
    %c0_i32_0 = arith.constant 0 : i32
    %c0_i32_1 = arith.constant 0 : i32
    return %c0_i32, %c0_i32_0 : i32, i32
  }
  func.func @transform_2(%arg0: i32) -> (i32, i32) {
    %c0_i32 = arith.constant 0 : i32
    %c0_i32_0 = arith.constant 0 : i32
    %c0_i32_1 = arith.constant 0 : i32
    return %c0_i32, %c0_i32_0 : i32, i32
  }
  func.func @transform_3(%arg0: i32) -> (i32, i32) {
    %c0_i32 = arith.constant 0 : i32
    %c0_i32_0 = arith.constant 0 : i32
    %c0_i32_1 = arith.constant 0 : i32
    return %c0_i32, %c0_i32_0 : i32, i32
  }
  func.func @transform_4(%arg0: i32) -> (i32, i32) {
    %c0_i32 = arith.constant 0 : i32
    %c0_i32_0 = arith.constant 0 : i32
    %c0_i32_1 = arith.constant 0 : i32
    return %c0_i32, %c0_i32_0 : i32, i32
  }
  func.func @transform_5(%arg0: i32) -> (i32, i32) {
    %c0_i32 = arith.constant 0 : i32
    %c0_i32_0 = arith.constant 0 : i32
    %c0_i32_1 = arith.constant 0 : i32
    return %c0_i32, %c0_i32_0 : i32, i32
  }
  func.func @transform_6(%arg0: i32) -> (i32, i32) {
    %c0_i32 = arith.constant 0 : i32
    %c0_i32_0 = arith.constant 0 : i32
    %c0_i32_1 = arith.constant 0 : i32
    return %c0_i32, %c0_i32_0 : i32, i32
  }
  func.func @transform_7(%arg0: i32) -> (i32, i32, i32) {
    %c0_i32 = arith.constant 0 : i32
    %c0_i32_0 = arith.constant 0 : i32
    %c0_i32_1 = arith.constant 0 : i32
    return %arg0, %c0_i32, %c0_i32_0 : i32, i32, i32
  }
}

module attributes {stable_mosaic.version = 11 : i64} {
  func.func @kernel(%arg0: i32, %arg1: memref<1x16x128xf32, #tpu.memory_space<vmem>>, %arg2: memref<128x128xf32, #tpu.memory_space<vmem>>, %arg3: memref<1x128xf32, #tpu.memory_space<vmem>>, %arg4: memref<128x128xf32, #tpu.memory_space<vmem>>, %arg5: memref<1x128xf32, #tpu.memory_space<vmem>>, %arg6: memref<128x128xf32, #tpu.memory_space<vmem>>, %arg7: memref<1x128xf32, #tpu.memory_space<vmem>>, %arg8: memref<128x128xf32, #tpu.memory_space<vmem>>, %arg9: memref<1x128xf32, #tpu.memory_space<vmem>>, %arg10: memref<1x128xf32, #tpu.memory_space<vmem>>, %arg11: memref<1x128xf32, #tpu.memory_space<vmem>>, %arg12: memref<128x128xf32, #tpu.memory_space<vmem>>, %arg13: memref<1x128xf32, #tpu.memory_space<vmem>>, %arg14: memref<128x128xf32, #tpu.memory_space<vmem>>, %arg15: memref<1x128xf32, #tpu.memory_space<vmem>>, %arg16: memref<1x128xf32, #tpu.memory_space<vmem>>, %arg17: memref<1x128xf32, #tpu.memory_space<vmem>>, %arg18: memref<1x16x128xf32, #tpu.memory_space<vmem>>) attributes {dimension_semantics = [#tpu.dimension_semantics<parallel>], iteration_bounds = array<i64: 2>, scalar_prefetch = 0 : i64, scratch_operands = 0 : i64, tpu.core_type = #tpu.core_type<tc>, window_params = [{transform_indices = @transform_0, window_bounds = array<i64: 1, 16, 128>}, {pipeline_mode = #tpu.pipeline_mode<synchronous>, transform_indices = @transform_1, window_bounds = array<i64: 128, 128>}, {pipeline_mode = #tpu.pipeline_mode<synchronous>, transform_indices = @transform_2, window_bounds = array<i64: 1, 128>}, {pipeline_mode = #tpu.pipeline_mode<synchronous>, transform_indices = @transform_3, window_bounds = array<i64: 128, 128>}, {pipeline_mode = #tpu.pipeline_mode<synchronous>, transform_indices = @transform_4, window_bounds = array<i64: 1, 128>}, {pipeline_mode = #tpu.pipeline_mode<synchronous>, transform_indices = @transform_5, window_bounds = array<i64: 128, 128>}, {pipeline_mode = #tpu.pipeline_mode<synchronous>, transform_indices = @transform_6, window_bounds = array<i64: 1, 128>}, {pipeline_mode = #tpu.pipeline_mode<synchronous>, transform_indices = @transform_7, window_bounds = array<i64: 128, 128>}, {pipeline_mode = #tpu.pipeline_mode<synchronous>, transform_indices = @transform_8, window_bounds = array<i64: 1, 128>}, {pipeline_mode = #tpu.pipeline_mode<synchronous>, transform_indices = @transform_9, window_bounds = array<i64: 1, 128>}, {pipeline_mode = #tpu.pipeline_mode<synchronous>, transform_indices = @transform_10, window_bounds = array<i64: 1, 128>}, {pipeline_mode = #tpu.pipeline_mode<synchronous>, transform_indices = @transform_11, window_bounds = array<i64: 128, 128>}, {pipeline_mode = #tpu.pipeline_mode<synchronous>, transform_indices = @transform_12, window_bounds = array<i64: 1, 128>}, {pipeline_mode = #tpu.pipeline_mode<synchronous>, transform_indices = @transform_13, window_bounds = array<i64: 128, 128>}, {pipeline_mode = #tpu.pipeline_mode<synchronous>, transform_indices = @transform_14, window_bounds = array<i64: 1, 128>}, {pipeline_mode = #tpu.pipeline_mode<synchronous>, transform_indices = @transform_15, window_bounds = array<i64: 1, 128>}, {pipeline_mode = #tpu.pipeline_mode<synchronous>, transform_indices = @transform_16, window_bounds = array<i64: 1, 128>}, {transform_indices = @transform_17, window_bounds = array<i64: 1, 16, 128>}]} {
    %c0 = arith.constant 0 : index
    %c0_0 = arith.constant 0 : index
    %c0_1 = arith.constant 0 : index
    %0 = vector.load %arg1[%c0, %c0_0, %c0_1] : memref<1x16x128xf32, #tpu.memory_space<vmem>>, vector<1x16x128xf32>
    %1 = vector.shape_cast %0 : vector<1x16x128xf32> to vector<16x128xf32>
    %c0_2 = arith.constant 0 : index
    %c0_3 = arith.constant 0 : index
    %2 = vector.load %arg2[%c0_2, %c0_3] : memref<128x128xf32, #tpu.memory_space<vmem>>, vector<128x128xf32>
    %cst = arith.constant dense<0.000000e+00> : vector<16x128xf32>
    %3 = tpu.matmul %1, %2, %cst {dimension_numbers = #tpu.dot_dimension_numbers<[1], [0], [0], [1], [0, 0, 1, 1], [], []>} : vector<16x128xf32>, vector<128x128xf32>, vector<16x128xf32> -> vector<16x128xf32>
    %c0_4 = arith.constant 0 : index
    %c0_5 = arith.constant 0 : index
    %4 = vector.load %arg3[%c0_4, %c0_5] : memref<1x128xf32, #tpu.memory_space<vmem>>, vector<1x128xf32>
    %5 = vector.broadcast %4 : vector<1x128xf32> to vector<16x128xf32>
    %6 = arith.addf %3, %5 : vector<16x128xf32>
    %c0_6 = arith.constant 0 : index
    %c0_7 = arith.constant 0 : index
    %7 = vector.load %arg4[%c0_6, %c0_7] : memref<128x128xf32, #tpu.memory_space<vmem>>, vector<128x128xf32>
    %cst_8 = arith.constant dense<0.000000e+00> : vector<16x128xf32>
    %8 = tpu.matmul %1, %7, %cst_8 {dimension_numbers = #tpu.dot_dimension_numbers<[1], [0], [0], [1], [0, 0, 1, 1], [], []>} : vector<16x128xf32>, vector<128x128xf32>, vector<16x128xf32> -> vector<16x128xf32>
    %c0_9 = arith.constant 0 : index
    %c0_10 = arith.constant 0 : index
    %9 = vector.load %arg5[%c0_9, %c0_10] : memref<1x128xf32, #tpu.memory_space<vmem>>, vector<1x128xf32>
    %10 = vector.broadcast %9 : vector<1x128xf32> to vector<16x128xf32>
    %11 = arith.addf %8, %10 : vector<16x128xf32>
    %c0_11 = arith.constant 0 : index
    %c0_12 = arith.constant 0 : index
    %12 = vector.load %arg6[%c0_11, %c0_12] : memref<128x128xf32, #tpu.memory_space<vmem>>, vector<128x128xf32>
    %cst_13 = arith.constant dense<0.000000e+00> : vector<16x128xf32>
    %13 = tpu.matmul %1, %12, %cst_13 {dimension_numbers = #tpu.dot_dimension_numbers<[1], [0], [0], [1], [0, 0, 1, 1], [], []>} : vector<16x128xf32>, vector<128x128xf32>, vector<16x128xf32> -> vector<16x128xf32>
    %c0_14 = arith.constant 0 : index
    %c0_15 = arith.constant 0 : index
    %14 = vector.load %arg7[%c0_14, %c0_15] : memref<1x128xf32, #tpu.memory_space<vmem>>, vector<1x128xf32>
    %15 = vector.broadcast %14 : vector<1x128xf32> to vector<16x128xf32>
    %16 = arith.addf %13, %15 : vector<16x128xf32>
    %17 = vector.extract_strided_slice %6 {offsets = [0, 0], sizes = [16, 32], strides = [1, 1]} : vector<16x128xf32> to vector<16x32xf32>
    %18 = vector.extract_strided_slice %11 {offsets = [0, 0], sizes = [16, 32], strides = [1, 1]} : vector<16x128xf32> to vector<16x32xf32>
    %19 = vector.extract_strided_slice %16 {offsets = [0, 0], sizes = [16, 32], strides = [1, 1]} : vector<16x128xf32> to vector<16x32xf32>
    %cst_16 = arith.constant dense<0.000000e+00> : vector<16x16xf32>
    %20 = tpu.matmul %17, %18, %cst_16 {dimension_numbers = #tpu.dot_dimension_numbers<[1], [1], [0], [0], [0, 0, 1, 0], [], []>} : vector<16x32xf32>, vector<16x32xf32>, vector<16x16xf32> -> vector<16x16xf32>
    %cst_17 = arith.constant 0.176776692 : f32
    %21 = vector.broadcast %cst_17 : f32 to vector<16x16xf32>
    %22 = arith.mulf %20, %21 : vector<16x16xf32>
    %cst_18 = arith.constant dense<0xFF800000> : vector<16xf32>
    %23 = vector.multi_reduction <maximumf>, %22, %cst_18 [1] : vector<16x16xf32> to vector<16xf32>
    %24 = vector.shape_cast %23 : vector<16xf32> to vector<16x1xf32>
    %25 = vector.broadcast %24 : vector<16x1xf32> to vector<16x16xf32>
    %26 = arith.subf %22, %25 : vector<16x16xf32>
    %27 = math.exp %26 : vector<16x16xf32>
    %cst_19 = arith.constant dense<0.000000e+00> : vector<16xf32>
    %28 = vector.multi_reduction <add>, %27, %cst_19 [1] : vector<16x16xf32> to vector<16xf32>
    %29 = vector.shape_cast %28 : vector<16xf32> to vector<16x1xf32>
    %30 = vector.broadcast %29 : vector<16x1xf32> to vector<16x16xf32>
    %31 = arith.divf %27, %30 : vector<16x16xf32>
    %cst_20 = arith.constant dense<0.000000e+00> : vector<16x32xf32>
    %32 = tpu.matmul %31, %19, %cst_20 {dimension_numbers = #tpu.dot_dimension_numbers<[1], [0], [0], [1], [0, 0, 1, 1], [], []>} : vector<16x16xf32>, vector<16x32xf32>, vector<16x32xf32> -> vector<16x32xf32>
    %33 = vector.extract_strided_slice %6 {offsets = [0, 32], sizes = [16, 32], strides = [1, 1]} : vector<16x128xf32> to vector<16x32xf32>
    %34 = vector.extract_strided_slice %11 {offsets = [0, 32], sizes = [16, 32], strides = [1, 1]} : vector<16x128xf32> to vector<16x32xf32>
    %35 = vector.extract_strided_slice %16 {offsets = [0, 32], sizes = [16, 32], strides = [1, 1]} : vector<16x128xf32> to vector<16x32xf32>
    %cst_21 = arith.constant dense<0.000000e+00> : vector<16x16xf32>
    %36 = tpu.matmul %33, %34, %cst_21 {dimension_numbers = #tpu.dot_dimension_numbers<[1], [1], [0], [0], [0, 0, 1, 0], [], []>} : vector<16x32xf32>, vector<16x32xf32>, vector<16x16xf32> -> vector<16x16xf32>
    %cst_22 = arith.constant 0.176776692 : f32
    %37 = vector.broadcast %cst_22 : f32 to vector<16x16xf32>
    %38 = arith.mulf %36, %37 : vector<16x16xf32>
    %cst_23 = arith.constant dense<0xFF800000> : vector<16xf32>
    %39 = vector.multi_reduction <maximumf>, %38, %cst_23 [1] : vector<16x16xf32> to vector<16xf32>
    %40 = vector.shape_cast %39 : vector<16xf32> to vector<16x1xf32>
    %41 = vector.broadcast %40 : vector<16x1xf32> to vector<16x16xf32>
    %42 = arith.subf %38, %41 : vector<16x16xf32>
    %43 = math.exp %42 : vector<16x16xf32>
    %cst_24 = arith.constant dense<0.000000e+00> : vector<16xf32>
    %44 = vector.multi_reduction <add>, %43, %cst_24 [1] : vector<16x16xf32> to vector<16xf32>
    %45 = vector.shape_cast %44 : vector<16xf32> to vector<16x1xf32>
    %46 = vector.broadcast %45 : vector<16x1xf32> to vector<16x16xf32>
    %47 = arith.divf %43, %46 : vector<16x16xf32>
    %cst_25 = arith.constant dense<0.000000e+00> : vector<16x32xf32>
    %48 = tpu.matmul %47, %35, %cst_25 {dimension_numbers = #tpu.dot_dimension_numbers<[1], [0], [0], [1], [0, 0, 1, 1], [], []>} : vector<16x16xf32>, vector<16x32xf32>, vector<16x32xf32> -> vector<16x32xf32>
    %49 = vector.extract_strided_slice %6 {offsets = [0, 64], sizes = [16, 32], strides = [1, 1]} : vector<16x128xf32> to vector<16x32xf32>
    %50 = vector.extract_strided_slice %11 {offsets = [0, 64], sizes = [16, 32], strides = [1, 1]} : vector<16x128xf32> to vector<16x32xf32>
    %51 = vector.extract_strided_slice %16 {offsets = [0, 64], sizes = [16, 32], strides = [1, 1]} : vector<16x128xf32> to vector<16x32xf32>
    %cst_26 = arith.constant dense<0.000000e+00> : vector<16x16xf32>
    %52 = tpu.matmul %49, %50, %cst_26 {dimension_numbers = #tpu.dot_dimension_numbers<[1], [1], [0], [0], [0, 0, 1, 0], [], []>} : vector<16x32xf32>, vector<16x32xf32>, vector<16x16xf32> -> vector<16x16xf32>
    %cst_27 = arith.constant 0.176776692 : f32
    %53 = vector.broadcast %cst_27 : f32 to vector<16x16xf32>
    %54 = arith.mulf %52, %53 : vector<16x16xf32>
    %cst_28 = arith.constant dense<0xFF800000> : vector<16xf32>
    %55 = vector.multi_reduction <maximumf>, %54, %cst_28 [1] : vector<16x16xf32> to vector<16xf32>
    %56 = vector.shape_cast %55 : vector<16xf32> to vector<16x1xf32>
    %57 = vector.broadcast %56 : vector<16x1xf32> to vector<16x16xf32>
    %58 = arith.subf %54, %57 : vector<16x16xf32>
    %59 = math.exp %58 : vector<16x16xf32>
    %cst_29 = arith.constant dense<0.000000e+00> : vector<16xf32>
    %60 = vector.multi_reduction <add>, %59, %cst_29 [1] : vector<16x16xf32> to vector<16xf32>
    %61 = vector.shape_cast %60 : vector<16xf32> to vector<16x1xf32>
    %62 = vector.broadcast %61 : vector<16x1xf32> to vector<16x16xf32>
    %63 = arith.divf %59, %62 : vector<16x16xf32>
    %cst_30 = arith.constant dense<0.000000e+00> : vector<16x32xf32>
    %64 = tpu.matmul %63, %51, %cst_30 {dimension_numbers = #tpu.dot_dimension_numbers<[1], [0], [0], [1], [0, 0, 1, 1], [], []>} : vector<16x16xf32>, vector<16x32xf32>, vector<16x32xf32> -> vector<16x32xf32>
    %65 = vector.extract_strided_slice %6 {offsets = [0, 96], sizes = [16, 32], strides = [1, 1]} : vector<16x128xf32> to vector<16x32xf32>
    %66 = vector.extract_strided_slice %11 {offsets = [0, 96], sizes = [16, 32], strides = [1, 1]} : vector<16x128xf32> to vector<16x32xf32>
    %67 = vector.extract_strided_slice %16 {offsets = [0, 96], sizes = [16, 32], strides = [1, 1]} : vector<16x128xf32> to vector<16x32xf32>
    %cst_31 = arith.constant dense<0.000000e+00> : vector<16x16xf32>
    %68 = tpu.matmul %65, %66, %cst_31 {dimension_numbers = #tpu.dot_dimension_numbers<[1], [1], [0], [0], [0, 0, 1, 0], [], []>} : vector<16x32xf32>, vector<16x32xf32>, vector<16x16xf32> -> vector<16x16xf32>
    %cst_32 = arith.constant 0.176776692 : f32
    %69 = vector.broadcast %cst_32 : f32 to vector<16x16xf32>
    %70 = arith.mulf %68, %69 : vector<16x16xf32>
    %cst_33 = arith.constant dense<0xFF800000> : vector<16xf32>
    %71 = vector.multi_reduction <maximumf>, %70, %cst_33 [1] : vector<16x16xf32> to vector<16xf32>
    %72 = vector.shape_cast %71 : vector<16xf32> to vector<16x1xf32>
    %73 = vector.broadcast %72 : vector<16x1xf32> to vector<16x16xf32>
    %74 = arith.subf %70, %73 : vector<16x16xf32>
    %75 = math.exp %74 : vector<16x16xf32>
    %cst_34 = arith.constant dense<0.000000e+00> : vector<16xf32>
    %76 = vector.multi_reduction <add>, %75, %cst_34 [1] : vector<16x16xf32> to vector<16xf32>
    %77 = vector.shape_cast %76 : vector<16xf32> to vector<16x1xf32>
    %78 = vector.broadcast %77 : vector<16x1xf32> to vector<16x16xf32>
    %79 = arith.divf %75, %78 : vector<16x16xf32>
    %cst_35 = arith.constant dense<0.000000e+00> : vector<16x32xf32>
    %80 = tpu.matmul %79, %67, %cst_35 {dimension_numbers = #tpu.dot_dimension_numbers<[1], [0], [0], [1], [0, 0, 1, 1], [], []>} : vector<16x16xf32>, vector<16x32xf32>, vector<16x32xf32> -> vector<16x32xf32>
    %81 = tpu.concatenate %32, %48, %64, %80 in 1 : vector<16x32xf32>, vector<16x32xf32>, vector<16x32xf32>, vector<16x32xf32> -> vector<16x128xf32>
    %c0_36 = arith.constant 0 : index
    %c0_37 = arith.constant 0 : index
    %82 = vector.load %arg8[%c0_36, %c0_37] : memref<128x128xf32, #tpu.memory_space<vmem>>, vector<128x128xf32>
    %cst_38 = arith.constant dense<0.000000e+00> : vector<16x128xf32>
    %83 = tpu.matmul %81, %82, %cst_38 {dimension_numbers = #tpu.dot_dimension_numbers<[1], [0], [0], [1], [0, 0, 1, 1], [], []>} : vector<16x128xf32>, vector<128x128xf32>, vector<16x128xf32> -> vector<16x128xf32>
    %c0_39 = arith.constant 0 : index
    %c0_40 = arith.constant 0 : index
    %84 = vector.load %arg9[%c0_39, %c0_40] : memref<1x128xf32, #tpu.memory_space<vmem>>, vector<1x128xf32>
    %85 = vector.broadcast %84 : vector<1x128xf32> to vector<16x128xf32>
    %86 = arith.addf %83, %85 : vector<16x128xf32>
    %87 = arith.addf %1, %86 : vector<16x128xf32>
    %c0_41 = arith.constant 0 : index
    %c0_42 = arith.constant 0 : index
    %88 = vector.load %arg10[%c0_41, %c0_42] : memref<1x128xf32, #tpu.memory_space<vmem>>, vector<1x128xf32>
    %c0_43 = arith.constant 0 : index
    %c0_44 = arith.constant 0 : index
    %89 = vector.load %arg11[%c0_43, %c0_44] : memref<1x128xf32, #tpu.memory_space<vmem>>, vector<1x128xf32>
    %cst_45 = arith.constant dense<0.000000e+00> : vector<16xf32>
    %90 = vector.multi_reduction <add>, %87, %cst_45 [1] : vector<16x128xf32> to vector<16xf32>
    %91 = vector.shape_cast %90 : vector<16xf32> to vector<16x1xf32>
    %cst_46 = arith.constant 1.280000e+02 : f32
    %92 = vector.broadcast %cst_46 : f32 to vector<16x1xf32>
    %93 = arith.divf %91, %92 : vector<16x1xf32>
    %94 = vector.broadcast %93 : vector<16x1xf32> to vector<16x128xf32>
    %95 = arith.subf %87, %94 : vector<16x128xf32>
    %96 = arith.mulf %95, %95 : vector<16x128xf32>
    %cst_47 = arith.constant dense<0.000000e+00> : vector<16xf32>
    %97 = vector.multi_reduction <add>, %96, %cst_47 [1] : vector<16x128xf32> to vector<16xf32>
    %98 = vector.shape_cast %97 : vector<16xf32> to vector<16x1xf32>
    %cst_48 = arith.constant 1.280000e+02 : f32
    %99 = vector.broadcast %cst_48 : f32 to vector<16x1xf32>
    %100 = arith.divf %98, %99 : vector<16x1xf32>
    %cst_49 = arith.constant 9.99999974E-6 : f32
    %101 = vector.broadcast %cst_49 : f32 to vector<16x1xf32>
    %102 = arith.addf %100, %101 : vector<16x1xf32>
    %103 = math.rsqrt %102 : vector<16x1xf32>
    %104 = vector.broadcast %103 : vector<16x1xf32> to vector<16x128xf32>
    %105 = arith.mulf %95, %104 : vector<16x128xf32>
    %106 = vector.broadcast %88 : vector<1x128xf32> to vector<16x128xf32>
    %107 = arith.mulf %105, %106 : vector<16x128xf32>
    %108 = vector.broadcast %89 : vector<1x128xf32> to vector<16x128xf32>
    %109 = arith.addf %107, %108 : vector<16x128xf32>
    %c0_50 = arith.constant 0 : index
    %c0_51 = arith.constant 0 : index
    %110 = vector.load %arg12[%c0_50, %c0_51] : memref<128x128xf32, #tpu.memory_space<vmem>>, vector<128x128xf32>
    %cst_52 = arith.constant dense<0.000000e+00> : vector<16x128xf32>
    %111 = tpu.matmul %109, %110, %cst_52 {dimension_numbers = #tpu.dot_dimension_numbers<[1], [0], [0], [1], [0, 0, 1, 1], [], []>} : vector<16x128xf32>, vector<128x128xf32>, vector<16x128xf32> -> vector<16x128xf32>
    %c0_53 = arith.constant 0 : index
    %c0_54 = arith.constant 0 : index
    %112 = vector.load %arg13[%c0_53, %c0_54] : memref<1x128xf32, #tpu.memory_space<vmem>>, vector<1x128xf32>
    %113 = vector.broadcast %112 : vector<1x128xf32> to vector<16x128xf32>
    %114 = arith.addf %111, %113 : vector<16x128xf32>
    %cst_55 = arith.constant 5.000000e-01 : f32
    %115 = vector.broadcast %cst_55 : f32 to vector<16x128xf32>
    %116 = arith.mulf %115, %114 : vector<16x128xf32>
    %cst_56 = arith.constant 4.471500e-02 : f32
    %117 = vector.broadcast %cst_56 : f32 to vector<16x128xf32>
    %118 = arith.mulf %117, %114 : vector<16x128xf32>
    %119 = arith.mulf %118, %114 : vector<16x128xf32>
    %120 = arith.mulf %119, %114 : vector<16x128xf32>
    %121 = arith.addf %114, %120 : vector<16x128xf32>
    %cst_57 = arith.constant 0.797884583 : f32
    %122 = vector.broadcast %cst_57 : f32 to vector<16x128xf32>
    %123 = arith.mulf %122, %121 : vector<16x128xf32>
    %124 = math.tanh %123 : vector<16x128xf32>
    %cst_58 = arith.constant 1.000000e+00 : f32
    %125 = vector.broadcast %cst_58 : f32 to vector<16x128xf32>
    %126 = arith.addf %125, %124 : vector<16x128xf32>
    %127 = arith.mulf %116, %126 : vector<16x128xf32>
    %c0_59 = arith.constant 0 : index
    %c0_60 = arith.constant 0 : index
    %128 = vector.load %arg14[%c0_59, %c0_60] : memref<128x128xf32, #tpu.memory_space<vmem>>, vector<128x128xf32>
    %cst_61 = arith.constant dense<0.000000e+00> : vector<16x128xf32>
    %129 = tpu.matmul %127, %128, %cst_61 {dimension_numbers = #tpu.dot_dimension_numbers<[1], [0], [0], [1], [0, 0, 1, 1], [], []>} : vector<16x128xf32>, vector<128x128xf32>, vector<16x128xf32> -> vector<16x128xf32>
    %c0_62 = arith.constant 0 : index
    %c0_63 = arith.constant 0 : index
    %130 = vector.load %arg15[%c0_62, %c0_63] : memref<1x128xf32, #tpu.memory_space<vmem>>, vector<1x128xf32>
    %131 = vector.broadcast %130 : vector<1x128xf32> to vector<16x128xf32>
    %132 = arith.addf %129, %131 : vector<16x128xf32>
    %133 = arith.addf %109, %132 : vector<16x128xf32>
    %c0_64 = arith.constant 0 : index
    %c0_65 = arith.constant 0 : index
    %134 = vector.load %arg16[%c0_64, %c0_65] : memref<1x128xf32, #tpu.memory_space<vmem>>, vector<1x128xf32>
    %c0_66 = arith.constant 0 : index
    %c0_67 = arith.constant 0 : index
    %135 = vector.load %arg17[%c0_66, %c0_67] : memref<1x128xf32, #tpu.memory_space<vmem>>, vector<1x128xf32>
    %cst_68 = arith.constant dense<0.000000e+00> : vector<16xf32>
    %136 = vector.multi_reduction <add>, %133, %cst_68 [1] : vector<16x128xf32> to vector<16xf32>
    %137 = vector.shape_cast %136 : vector<16xf32> to vector<16x1xf32>
    %cst_69 = arith.constant 1.280000e+02 : f32
    %138 = vector.broadcast %cst_69 : f32 to vector<16x1xf32>
    %139 = arith.divf %137, %138 : vector<16x1xf32>
    %140 = vector.broadcast %139 : vector<16x1xf32> to vector<16x128xf32>
    %141 = arith.subf %133, %140 : vector<16x128xf32>
    %142 = arith.mulf %141, %141 : vector<16x128xf32>
    %cst_70 = arith.constant dense<0.000000e+00> : vector<16xf32>
    %143 = vector.multi_reduction <add>, %142, %cst_70 [1] : vector<16x128xf32> to vector<16xf32>
    %144 = vector.shape_cast %143 : vector<16xf32> to vector<16x1xf32>
    %cst_71 = arith.constant 1.280000e+02 : f32
    %145 = vector.broadcast %cst_71 : f32 to vector<16x1xf32>
    %146 = arith.divf %144, %145 : vector<16x1xf32>
    %cst_72 = arith.constant 9.99999974E-6 : f32
    %147 = vector.broadcast %cst_72 : f32 to vector<16x1xf32>
    %148 = arith.addf %146, %147 : vector<16x1xf32>
    %149 = math.rsqrt %148 : vector<16x1xf32>
    %150 = vector.broadcast %149 : vector<16x1xf32> to vector<16x128xf32>
    %151 = arith.mulf %141, %150 : vector<16x128xf32>
    %152 = vector.broadcast %134 : vector<1x128xf32> to vector<16x128xf32>
    %153 = arith.mulf %151, %152 : vector<16x128xf32>
    %154 = vector.broadcast %135 : vector<1x128xf32> to vector<16x128xf32>
    %155 = arith.addf %153, %154 : vector<16x128xf32>
    %c0_73 = arith.constant 0 : index
    %c0_74 = arith.constant 0 : index
    %c0_75 = arith.constant 0 : index
    %156 = vector.load %arg18[%c0_73, %c0_74, %c0_75] : memref<1x16x128xf32, #tpu.memory_space<vmem>>, vector<1x16x128xf32>
    %157 = vector.shape_cast %156 : vector<1x16x128xf32> to vector<16x128xf32>
    %158 = vector.shape_cast %155 : vector<16x128xf32> to vector<1x16x128xf32>
    tpu.vector_store %arg18[%c0_73, %c0_74, %c0_75], %158 {strides = array<i32>} : memref<1x16x128xf32, #tpu.memory_space<vmem>>, vector<1x16x128xf32>,
    return
  }
  func.func @transform_0(%arg0: i32) -> (i32, i32, i32) {
    %c0_i32 = arith.constant 0 : i32
    %c0_i32_0 = arith.constant 0 : i32
    %c0_i32_1 = arith.constant 0 : i32
    return %arg0, %c0_i32, %c0_i32_0 : i32, i32, i32
  }
  func.func @transform_1(%arg0: i32) -> (i32, i32) {
    %c0_i32 = arith.constant 0 : i32
    %c0_i32_0 = arith.constant 0 : i32
    %c0_i32_1 = arith.constant 0 : i32
    return %c0_i32, %c0_i32_0 : i32, i32
  }
  func.func @transform_2(%arg0: i32) -> (i32, i32) {
    %c0_i32 = arith.constant 0 : i32
    %c0_i32_0 = arith.constant 0 : i32
    %c0_i32_1 = arith.constant 0 : i32
    return %c0_i32, %c0_i32_0 : i32, i32
  }
  func.func @transform_3(%arg0: i32) -> (i32, i32) {
    %c0_i32 = arith.constant 0 : i32
    %c0_i32_0 = arith.constant 0 : i32
    %c0_i32_1 = arith.constant 0 : i32
    return %c0_i32, %c0_i32_0 : i32, i32
  }
  func.func @transform_4(%arg0: i32) -> (i32, i32) {
    %c0_i32 = arith.constant 0 : i32
    %c0_i32_0 = arith.constant 0 : i32
    %c0_i32_1 = arith.constant 0 : i32
    return %c0_i32, %c0_i32_0 : i32, i32
  }
  func.func @transform_5(%arg0: i32) -> (i32, i32) {
    %c0_i32 = arith.constant 0 : i32
    %c0_i32_0 = arith.constant 0 : i32
    %c0_i32_1 = arith.constant 0 : i32
    return %c0_i32, %c0_i32_0 : i32, i32
  }
  func.func @transform_6(%arg0: i32) -> (i32, i32) {
    %c0_i32 = arith.constant 0 : i32
    %c0_i32_0 = arith.constant 0 : i32
    %c0_i32_1 = arith.constant 0 : i32
    return %c0_i32, %c0_i32_0 : i32, i32
  }
  func.func @transform_7(%arg0: i32) -> (i32, i32) {
    %c0_i32 = arith.constant 0 : i32
    %c0_i32_0 = arith.constant 0 : i32
    %c0_i32_1 = arith.constant 0 : i32
    return %c0_i32, %c0_i32_0 : i32, i32
  }
  func.func @transform_8(%arg0: i32) -> (i32, i32) {
    %c0_i32 = arith.constant 0 : i32
    %c0_i32_0 = arith.constant 0 : i32
    %c0_i32_1 = arith.constant 0 : i32
    return %c0_i32, %c0_i32_0 : i32, i32
  }
  func.func @transform_9(%arg0: i32) -> (i32, i32) {
    %c0_i32 = arith.constant 0 : i32
    %c0_i32_0 = arith.constant 0 : i32
    %c0_i32_1 = arith.constant 0 : i32
    return %c0_i32, %c0_i32_0 : i32, i32
  }
  func.func @transform_10(%arg0: i32) -> (i32, i32) {
    %c0_i32 = arith.constant 0 : i32
    %c0_i32_0 = arith.constant 0 : i32
    %c0_i32_1 = arith.constant 0 : i32
    return %c0_i32, %c0_i32_0 : i32, i32
  }
  func.func @transform_11(%arg0: i32) -> (i32, i32) {
    %c0_i32 = arith.constant 0 : i32
    %c0_i32_0 = arith.constant 0 : i32
    %c0_i32_1 = arith.constant 0 : i32
    return %c0_i32, %c0_i32_0 : i32, i32
  }
  func.func @transform_12(%arg0: i32) -> (i32, i32) {
    %c0_i32 = arith.constant 0 : i32
    %c0_i32_0 = arith.constant 0 : i32
    %c0_i32_1 = arith.constant 0 : i32
    return %c0_i32, %c0_i32_0 : i32, i32
  }
  func.func @transform_13(%arg0: i32) -> (i32, i32) {
    %c0_i32 = arith.constant 0 : i32
    %c0_i32_0 = arith.constant 0 : i32
    %c0_i32_1 = arith.constant 0 : i32
    return %c0_i32, %c0_i32_0 : i32, i32
  }
  func.func @transform_14(%arg0: i32) -> (i32, i32) {
    %c0_i32 = arith.constant 0 : i32
    %c0_i32_0 = arith.constant 0 : i32
    %c0_i32_1 = arith.constant 0 : i32
    return %c0_i32, %c0_i32_0 : i32, i32
  }
  func.func @transform_15(%arg0: i32) -> (i32, i32) {
    %c0_i32 = arith.constant 0 : i32
    %c0_i32_0 = arith.constant 0 : i32
    %c0_i32_1 = arith.constant 0 : i32
    return %c0_i32, %c0_i32_0 : i32, i32
  }
  func.func @transform_16(%arg0: i32) -> (i32, i32) {
    %c0_i32 = arith.constant 0 : i32
    %c0_i32_0 = arith.constant 0 : i32
    %c0_i32_1 = arith.constant 0 : i32
    return %c0_i32, %c0_i32_0 : i32, i32
  }
  func.func @transform_17(%arg0: i32) -> (i32, i32, i32) {
    %c0_i32 = arith.constant 0 : i32
    %c0_i32_0 = arith.constant 0 : i32
    %c0_i32_1 = arith.constant 0 : i32
    return %arg0, %c0_i32, %c0_i32_0 : i32, i32, i32
  }
}

module attributes {stable_mosaic.version = 11 : i64} {
  func.func @_embedding_kernel(%arg0: i32, %arg1: memref<1x16x4xf32, #tpu.memory_space<vmem>>, %arg2: memref<1x16x128xf32, #tpu.memory_space<vmem>>, %arg3: memref<4x128xf32, #tpu.memory_space<vmem>>, %arg4: memref<4x128xf32, #tpu.memory_space<vmem>>, %arg5: memref<4x128xf32, #tpu.memory_space<vmem>>, %arg6: memref<1x128xf32, #tpu.memory_space<vmem>>, %arg7: memref<1x16x128xf32, #tpu.memory_space<vmem>>) attributes {dimension_semantics = [#tpu.dimension_semantics<parallel>], iteration_bounds = array<i64: 2>, scalar_prefetch = 0 : i64, scratch_operands = 0 : i64, tpu.core_type = #tpu.core_type<tc>, window_params = [{transform_indices = @transform_0, window_bounds = array<i64: 1, 16, 4>}, {transform_indices = @transform_1, window_bounds = array<i64: 1, 16, 128>}, {pipeline_mode = #tpu.pipeline_mode<synchronous>, transform_indices = @transform_2, window_bounds = array<i64: 4, 128>}, {pipeline_mode = #tpu.pipeline_mode<synchronous>, transform_indices = @transform_3, window_bounds = array<i64: 4, 128>}, {pipeline_mode = #tpu.pipeline_mode<synchronous>, transform_indices = @transform_4, window_bounds = array<i64: 4, 128>}, {pipeline_mode = #tpu.pipeline_mode<synchronous>, transform_indices = @transform_5, window_bounds = array<i64: 1, 128>}, {transform_indices = @transform_6, window_bounds = array<i64: 1, 16, 128>}]} {
    %c0 = arith.constant 0 : index
    %c0_0 = arith.constant 0 : index
    %c0_1 = arith.constant 0 : index
    %0 = vector.load %arg1[%c0, %c0_0, %c0_1] : memref<1x16x4xf32, #tpu.memory_space<vmem>>, vector<1x16x4xf32>
    %1 = vector.shape_cast %0 : vector<1x16x4xf32> to vector<16x4xf32>
    %2 = vector.extract_strided_slice %1 {offsets = [15, 0], sizes = [1, 4], strides = [1, 1]} : vector<16x4xf32> to vector<1x4xf32>
    %3 = vector.extract_strided_slice %1 {offsets = [0, 0], sizes = [15, 4], strides = [1, 1]} : vector<16x4xf32> to vector<15x4xf32>
    %4 = tpu.concatenate %2, %3 in 0 : vector<1x4xf32>, vector<15x4xf32> -> vector<16x4xf32>
    %5 = vector.extract_strided_slice %1 {offsets = [1, 0], sizes = [15, 4], strides = [1, 1]} : vector<16x4xf32> to vector<15x4xf32>
    %6 = vector.extract_strided_slice %1 {offsets = [0, 0], sizes = [1, 4], strides = [1, 1]} : vector<16x4xf32> to vector<1x4xf32>
    %7 = tpu.concatenate %5, %6 in 0 : vector<15x4xf32>, vector<1x4xf32> -> vector<16x4xf32>
    %c0_2 = arith.constant 0 : index
    %c0_3 = arith.constant 0 : index
    %8 = vector.load %arg3[%c0_2, %c0_3] : memref<4x128xf32, #tpu.memory_space<vmem>>, vector<4x128xf32>
    %cst = arith.constant dense<0.000000e+00> : vector<16x128xf32>
    %9 = tpu.matmul %4, %8, %cst {dimension_numbers = #tpu.dot_dimension_numbers<[1], [0], [0], [1], [0, 0, 1, 1], [], []>} : vector<16x4xf32>, vector<4x128xf32>, vector<16x128xf32> -> vector<16x128xf32>
    %c0_4 = arith.constant 0 : index
    %c0_5 = arith.constant 0 : index
    %10 = vector.load %arg4[%c0_4, %c0_5] : memref<4x128xf32, #tpu.memory_space<vmem>>, vector<4x128xf32>
    %cst_6 = arith.constant dense<0.000000e+00> : vector<16x128xf32>
    %11 = tpu.matmul %1, %10, %cst_6 {dimension_numbers = #tpu.dot_dimension_numbers<[1], [0], [0], [1], [0, 0, 1, 1], [], []>} : vector<16x4xf32>, vector<4x128xf32>, vector<16x128xf32> -> vector<16x128xf32>
    %12 = arith.addf %9, %11 : vector<16x128xf32>
    %c0_7 = arith.constant 0 : index
    %c0_8 = arith.constant 0 : index
    %13 = vector.load %arg5[%c0_7, %c0_8] : memref<4x128xf32, #tpu.memory_space<vmem>>, vector<4x128xf32>
    %cst_9 = arith.constant dense<0.000000e+00> : vector<16x128xf32>
    %14 = tpu.matmul %7, %13, %cst_9 {dimension_numbers = #tpu.dot_dimension_numbers<[1], [0], [0], [1], [0, 0, 1, 1], [], []>} : vector<16x4xf32>, vector<4x128xf32>, vector<16x128xf32> -> vector<16x128xf32>
    %15 = arith.addf %12, %14 : vector<16x128xf32>
    %c0_10 = arith.constant 0 : index
    %c0_11 = arith.constant 0 : index
    %16 = vector.load %arg6[%c0_10, %c0_11] : memref<1x128xf32, #tpu.memory_space<vmem>>, vector<1x128xf32>
    %17 = vector.broadcast %16 : vector<1x128xf32> to vector<16x128xf32>
    %18 = arith.addf %15, %17 : vector<16x128xf32>
    %c0_12 = arith.constant 0 : index
    %c0_13 = arith.constant 0 : index
    %c0_14 = arith.constant 0 : index
    %19 = vector.load %arg2[%c0_12, %c0_13, %c0_14] : memref<1x16x128xf32, #tpu.memory_space<vmem>>, vector<1x16x128xf32>
    %20 = vector.shape_cast %19 : vector<1x16x128xf32> to vector<16x128xf32>
    %21 = arith.addf %18, %20 : vector<16x128xf32>
    %c0_15 = arith.constant 0 : index
    %c0_16 = arith.constant 0 : index
    %c0_17 = arith.constant 0 : index
    %22 = vector.load %arg7[%c0_15, %c0_16, %c0_17] : memref<1x16x128xf32, #tpu.memory_space<vmem>>, vector<1x16x128xf32>
    %23 = vector.shape_cast %22 : vector<1x16x128xf32> to vector<16x128xf32>
    %24 = vector.shape_cast %21 : vector<16x128xf32> to vector<1x16x128xf32>
    tpu.vector_store %arg7[%c0_15, %c0_16, %c0_17], %24 {strides = array<i32>} : memref<1x16x128xf32, #tpu.memory_space<vmem>>, vector<1x16x128xf32>,
    return
  }
  func.func @transform_0(%arg0: i32) -> (i32, i32, i32) {
    %c0_i32 = arith.constant 0 : i32
    %c0_i32_0 = arith.constant 0 : i32
    %c0_i32_1 = arith.constant 0 : i32
    return %arg0, %c0_i32, %c0_i32_0 : i32, i32, i32
  }
  func.func @transform_1(%arg0: i32) -> (i32, i32, i32) {
    %c0_i32 = arith.constant 0 : i32
    %c0_i32_0 = arith.constant 0 : i32
    %c0_i32_1 = arith.constant 0 : i32
    return %arg0, %c0_i32, %c0_i32_0 : i32, i32, i32
  }
  func.func @transform_2(%arg0: i32) -> (i32, i32) {
    %c0_i32 = arith.constant 0 : i32
    %c0_i32_0 = arith.constant 0 : i32
    %c0_i32_1 = arith.constant 0 : i32
    return %c0_i32, %c0_i32_0 : i32, i32
  }
  func.func @transform_3(%arg0: i32) -> (i32, i32) {
    %c0_i32 = arith.constant 0 : i32
    %c0_i32_0 = arith.constant 0 : i32
    %c0_i32_1 = arith.constant 0 : i32
    return %c0_i32, %c0_i32_0 : i32, i32
  }
  func.func @transform_4(%arg0: i32) -> (i32, i32) {
    %c0_i32 = arith.constant 0 : i32
    %c0_i32_0 = arith.constant 0 : i32
    %c0_i32_1 = arith.constant 0 : i32
    return %c0_i32, %c0_i32_0 : i32, i32
  }
  func.func @transform_5(%arg0: i32) -> (i32, i32) {
    %c0_i32 = arith.constant 0 : i32
    %c0_i32_0 = arith.constant 0 : i32
    %c0_i32_1 = arith.constant 0 : i32
    return %c0_i32, %c0_i32_0 : i32, i32
  }
  func.func @transform_6(%arg0: i32) -> (i32, i32, i32) {
    %c0_i32 = arith.constant 0 : i32
    %c0_i32_0 = arith.constant 0 : i32
    %c0_i32_1 = arith.constant 0 : i32
    return %arg0, %c0_i32, %c0_i32_0 : i32, i32, i32
  }
}

module attributes {stable_mosaic.version = 11 : i64} {
  func.func @kernel(%arg0: i32, %arg1: memref<1x16x128xf32, #tpu.memory_space<vmem>>, %arg2: memref<128x128xf32, #tpu.memory_space<vmem>>, %arg3: memref<128x128xf32, #tpu.memory_space<vmem>>, %arg4: memref<128x128xf32, #tpu.memory_space<vmem>>, %arg5: memref<1x128xf32, #tpu.memory_space<vmem>>, %arg6: memref<1x128xf32, #tpu.memory_space<vmem>>, %arg7: memref<1x128xf32, #tpu.memory_space<vmem>>, %arg8: memref<1x128xf32, #tpu.memory_space<vmem>>, %arg9: memref<1x128xf32, #tpu.memory_space<vmem>>, %arg10: memref<1x8x128xf32, #tpu.memory_space<vmem>>) attributes {dimension_semantics = [#tpu.dimension_semantics<parallel>], iteration_bounds = array<i64: 2>, scalar_prefetch = 0 : i64, scratch_operands = 0 : i64, tpu.core_type = #tpu.core_type<tc>, window_params = [{transform_indices = @transform_0, window_bounds = array<i64: 1, 16, 128>}, {pipeline_mode = #tpu.pipeline_mode<synchronous>, transform_indices = @transform_1, window_bounds = array<i64: 128, 128>}, {pipeline_mode = #tpu.pipeline_mode<synchronous>, transform_indices = @transform_2, window_bounds = array<i64: 128, 128>}, {pipeline_mode = #tpu.pipeline_mode<synchronous>, transform_indices = @transform_3, window_bounds = array<i64: 128, 128>}, {pipeline_mode = #tpu.pipeline_mode<synchronous>, transform_indices = @transform_4, window_bounds = array<i64: 1, 128>}, {pipeline_mode = #tpu.pipeline_mode<synchronous>, transform_indices = @transform_5, window_bounds = array<i64: 1, 128>}, {pipeline_mode = #tpu.pipeline_mode<synchronous>, transform_indices = @transform_6, window_bounds = array<i64: 1, 128>}, {pipeline_mode = #tpu.pipeline_mode<synchronous>, transform_indices = @transform_7, window_bounds = array<i64: 1, 128>}, {pipeline_mode = #tpu.pipeline_mode<synchronous>, transform_indices = @transform_8, window_bounds = array<i64: 1, 128>}, {transform_indices = @transform_9, window_bounds = array<i64: 1, 8, 128>}]} {
    %c0 = arith.constant 0 : index
    %c0_0 = arith.constant 0 : index
    %c0_1 = arith.constant 0 : index
    %0 = vector.load %arg1[%c0, %c0_0, %c0_1] : memref<1x16x128xf32, #tpu.memory_space<vmem>>, vector<1x16x128xf32>
    %1 = vector.shape_cast %0 : vector<1x16x128xf32> to vector<16x128xf32>
    %2 = vector.extract_strided_slice %1 {offsets = [15, 0], sizes = [1, 128], strides = [1, 1]} : vector<16x128xf32> to vector<1x128xf32>
    %3 = vector.extract_strided_slice %1 {offsets = [0, 0], sizes = [15, 128], strides = [1, 1]} : vector<16x128xf32> to vector<15x128xf32>
    %4 = tpu.concatenate %2, %3 in 0 : vector<1x128xf32>, vector<15x128xf32> -> vector<16x128xf32>
    %5 = vector.extract_strided_slice %1 {offsets = [1, 0], sizes = [15, 128], strides = [1, 1]} : vector<16x128xf32> to vector<15x128xf32>
    %6 = vector.extract_strided_slice %1 {offsets = [0, 0], sizes = [1, 128], strides = [1, 1]} : vector<16x128xf32> to vector<1x128xf32>
    %7 = tpu.concatenate %5, %6 in 0 : vector<15x128xf32>, vector<1x128xf32> -> vector<16x128xf32>
    %c0_2 = arith.constant 0 : index
    %c0_3 = arith.constant 0 : index
    %8 = vector.load %arg2[%c0_2, %c0_3] : memref<128x128xf32, #tpu.memory_space<vmem>>, vector<128x128xf32>
    %cst = arith.constant dense<0.000000e+00> : vector<16x128xf32>
    %9 = tpu.matmul %4, %8, %cst {dimension_numbers = #tpu.dot_dimension_numbers<[1], [0], [0], [1], [0, 0, 1, 1], [], []>} : vector<16x128xf32>, vector<128x128xf32>, vector<16x128xf32> -> vector<16x128xf32>
    %c0_4 = arith.constant 0 : index
    %c0_5 = arith.constant 0 : index
    %10 = vector.load %arg3[%c0_4, %c0_5] : memref<128x128xf32, #tpu.memory_space<vmem>>, vector<128x128xf32>
    %cst_6 = arith.constant dense<0.000000e+00> : vector<16x128xf32>
    %11 = tpu.matmul %1, %10, %cst_6 {dimension_numbers = #tpu.dot_dimension_numbers<[1], [0], [0], [1], [0, 0, 1, 1], [], []>} : vector<16x128xf32>, vector<128x128xf32>, vector<16x128xf32> -> vector<16x128xf32>
    %12 = arith.addf %9, %11 : vector<16x128xf32>
    %c0_7 = arith.constant 0 : index
    %c0_8 = arith.constant 0 : index
    %13 = vector.load %arg4[%c0_7, %c0_8] : memref<128x128xf32, #tpu.memory_space<vmem>>, vector<128x128xf32>
    %cst_9 = arith.constant dense<0.000000e+00> : vector<16x128xf32>
    %14 = tpu.matmul %7, %13, %cst_9 {dimension_numbers = #tpu.dot_dimension_numbers<[1], [0], [0], [1], [0, 0, 1, 1], [], []>} : vector<16x128xf32>, vector<128x128xf32>, vector<16x128xf32> -> vector<16x128xf32>
    %15 = arith.addf %12, %14 : vector<16x128xf32>
    %c0_10 = arith.constant 0 : index
    %c0_11 = arith.constant 0 : index
    %16 = vector.load %arg5[%c0_10, %c0_11] : memref<1x128xf32, #tpu.memory_space<vmem>>, vector<1x128xf32>
    %17 = vector.broadcast %16 : vector<1x128xf32> to vector<16x128xf32>
    %18 = arith.addf %15, %17 : vector<16x128xf32>
    %c0_12 = arith.constant 0 : index
    %c0_13 = arith.constant 0 : index
    %19 = vector.load %arg8[%c0_12, %c0_13] : memref<1x128xf32, #tpu.memory_space<vmem>>, vector<1x128xf32>
    %20 = vector.broadcast %19 : vector<1x128xf32> to vector<16x128xf32>
    %21 = arith.subf %18, %20 : vector<16x128xf32>
    %c0_14 = arith.constant 0 : index
    %c0_15 = arith.constant 0 : index
    %22 = vector.load %arg9[%c0_14, %c0_15] : memref<1x128xf32, #tpu.memory_space<vmem>>, vector<1x128xf32>
    %cst_16 = arith.constant 9.99999974E-6 : f32
    %23 = vector.broadcast %cst_16 : f32 to vector<1x128xf32>
    %24 = arith.addf %22, %23 : vector<1x128xf32>
    %25 = math.rsqrt %24 : vector<1x128xf32>
    %26 = vector.broadcast %25 : vector<1x128xf32> to vector<16x128xf32>
    %27 = arith.mulf %21, %26 : vector<16x128xf32>
    %c0_17 = arith.constant 0 : index
    %c0_18 = arith.constant 0 : index
    %28 = vector.load %arg6[%c0_17, %c0_18] : memref<1x128xf32, #tpu.memory_space<vmem>>, vector<1x128xf32>
    %29 = vector.broadcast %28 : vector<1x128xf32> to vector<16x128xf32>
    %30 = arith.mulf %27, %29 : vector<16x128xf32>
    %c0_19 = arith.constant 0 : index
    %c0_20 = arith.constant 0 : index
    %31 = vector.load %arg7[%c0_19, %c0_20] : memref<1x128xf32, #tpu.memory_space<vmem>>, vector<1x128xf32>
    %32 = vector.broadcast %31 : vector<1x128xf32> to vector<16x128xf32>
    %33 = arith.addf %30, %32 : vector<16x128xf32>
    %cst_21 = arith.constant 0.000000e+00 : f32
    %34 = vector.broadcast %cst_21 : f32 to vector<16x128xf32>
    %35 = arith.cmpf ogt, %33, %34 : vector<16x128xf32>
    %36 = math.exp %33 : vector<16x128xf32>
    %cst_22 = arith.constant 1.000000e+00 : f32
    %37 = vector.broadcast %cst_22 : f32 to vector<16x128xf32>
    %38 = arith.subf %36, %37 : vector<16x128xf32>
    %39 = arith.select %35, %33, %38 : vector<16x128xi1>, vector<16x128xf32>
    %40 = vector.extract_strided_slice %39 {offsets = [0, 0], sizes = [1, 128], strides = [1, 1]} : vector<16x128xf32> to vector<1x128xf32>
    %41 = vector.extract_strided_slice %39 {offsets = [1, 0], sizes = [1, 128], strides = [1, 1]} : vector<16x128xf32> to vector<1x128xf32>
    %42 = arith.maximumf %40, %41 : vector<1x128xf32>
    %43 = vector.extract_strided_slice %39 {offsets = [1, 0], sizes = [1, 128], strides = [1, 1]} : vector<16x128xf32> to vector<1x128xf32>
    %44 = vector.extract_strided_slice %39 {offsets = [2, 0], sizes = [1, 128], strides = [1, 1]} : vector<16x128xf32> to vector<1x128xf32>
    %45 = arith.maximumf %43, %44 : vector<1x128xf32>
    %46 = vector.extract_strided_slice %39 {offsets = [3, 0], sizes = [1, 128], strides = [1, 1]} : vector<16x128xf32> to vector<1x128xf32>
    %47 = arith.maximumf %45, %46 : vector<1x128xf32>
    %48 = vector.extract_strided_slice %39 {offsets = [3, 0], sizes = [1, 128], strides = [1, 1]} : vector<16x128xf32> to vector<1x128xf32>
    %49 = vector.extract_strided_slice %39 {offsets = [4, 0], sizes = [1, 128], strides = [1, 1]} : vector<16x128xf32> to vector<1x128xf32>
    %50 = arith.maximumf %48, %49 : vector<1x128xf32>
    %51 = vector.extract_strided_slice %39 {offsets = [5, 0], sizes = [1, 128], strides = [1, 1]} : vector<16x128xf32> to vector<1x128xf32>
    %52 = arith.maximumf %50, %51 : vector<1x128xf32>
    %53 = vector.extract_strided_slice %39 {offsets = [5, 0], sizes = [1, 128], strides = [1, 1]} : vector<16x128xf32> to vector<1x128xf32>
    %54 = vector.extract_strided_slice %39 {offsets = [6, 0], sizes = [1, 128], strides = [1, 1]} : vector<16x128xf32> to vector<1x128xf32>
    %55 = arith.maximumf %53, %54 : vector<1x128xf32>
    %56 = vector.extract_strided_slice %39 {offsets = [7, 0], sizes = [1, 128], strides = [1, 1]} : vector<16x128xf32> to vector<1x128xf32>
    %57 = arith.maximumf %55, %56 : vector<1x128xf32>
    %58 = vector.extract_strided_slice %39 {offsets = [7, 0], sizes = [1, 128], strides = [1, 1]} : vector<16x128xf32> to vector<1x128xf32>
    %59 = vector.extract_strided_slice %39 {offsets = [8, 0], sizes = [1, 128], strides = [1, 1]} : vector<16x128xf32> to vector<1x128xf32>
    %60 = arith.maximumf %58, %59 : vector<1x128xf32>
    %61 = vector.extract_strided_slice %39 {offsets = [9, 0], sizes = [1, 128], strides = [1, 1]} : vector<16x128xf32> to vector<1x128xf32>
    %62 = arith.maximumf %60, %61 : vector<1x128xf32>
    %63 = vector.extract_strided_slice %39 {offsets = [9, 0], sizes = [1, 128], strides = [1, 1]} : vector<16x128xf32> to vector<1x128xf32>
    %64 = vector.extract_strided_slice %39 {offsets = [10, 0], sizes = [1, 128], strides = [1, 1]} : vector<16x128xf32> to vector<1x128xf32>
    %65 = arith.maximumf %63, %64 : vector<1x128xf32>
    %66 = vector.extract_strided_slice %39 {offsets = [11, 0], sizes = [1, 128], strides = [1, 1]} : vector<16x128xf32> to vector<1x128xf32>
    %67 = arith.maximumf %65, %66 : vector<1x128xf32>
    %68 = vector.extract_strided_slice %39 {offsets = [11, 0], sizes = [1, 128], strides = [1, 1]} : vector<16x128xf32> to vector<1x128xf32>
    %69 = vector.extract_strided_slice %39 {offsets = [12, 0], sizes = [1, 128], strides = [1, 1]} : vector<16x128xf32> to vector<1x128xf32>
    %70 = arith.maximumf %68, %69 : vector<1x128xf32>
    %71 = vector.extract_strided_slice %39 {offsets = [13, 0], sizes = [1, 128], strides = [1, 1]} : vector<16x128xf32> to vector<1x128xf32>
    %72 = arith.maximumf %70, %71 : vector<1x128xf32>
    %73 = vector.extract_strided_slice %39 {offsets = [13, 0], sizes = [1, 128], strides = [1, 1]} : vector<16x128xf32> to vector<1x128xf32>
    %74 = vector.extract_strided_slice %39 {offsets = [14, 0], sizes = [1, 128], strides = [1, 1]} : vector<16x128xf32> to vector<1x128xf32>
    %75 = arith.maximumf %73, %74 : vector<1x128xf32>
    %76 = vector.extract_strided_slice %39 {offsets = [15, 0], sizes = [1, 128], strides = [1, 1]} : vector<16x128xf32> to vector<1x128xf32>
    %77 = arith.maximumf %75, %76 : vector<1x128xf32>
    %78 = tpu.concatenate %42, %47, %52, %57, %62, %67, %72, %77 in 0 : vector<1x128xf32>, vector<1x128xf32>, vector<1x128xf32>, vector<1x128xf32>, vector<1x128xf32>, vector<1x128xf32>, vector<1x128xf32>, vector<1x128xf32> -> vector<8x128xf32>
    %c0_23 = arith.constant 0 : index
    %c0_24 = arith.constant 0 : index
    %c0_25 = arith.constant 0 : index
    %79 = vector.load %arg10[%c0_23, %c0_24, %c0_25] : memref<1x8x128xf32, #tpu.memory_space<vmem>>, vector<1x8x128xf32>
    %80 = vector.shape_cast %79 : vector<1x8x128xf32> to vector<8x128xf32>
    %81 = vector.shape_cast %78 : vector<8x128xf32> to vector<1x8x128xf32>
    tpu.vector_store %arg10[%c0_23, %c0_24, %c0_25], %81 {strides = array<i32>} : memref<1x8x128xf32, #tpu.memory_space<vmem>>, vector<1x8x128xf32>,
    return
  }
  func.func @transform_0(%arg0: i32) -> (i32, i32, i32) {
    %c0_i32 = arith.constant 0 : i32
    %c0_i32_0 = arith.constant 0 : i32
    %c0_i32_1 = arith.constant 0 : i32
    return %arg0, %c0_i32, %c0_i32_0 : i32, i32, i32
  }
  func.func @transform_1(%arg0: i32) -> (i32, i32) {
    %c0_i32 = arith.constant 0 : i32
    %c0_i32_0 = arith.constant 0 : i32
    %c0_i32_1 = arith.constant 0 : i32
    return %c0_i32, %c0_i32_0 : i32, i32
  }
  func.func @transform_2(%arg0: i32) -> (i32, i32) {
    %c0_i32 = arith.constant 0 : i32
    %c0_i32_0 = arith.constant 0 : i32
    %c0_i32_1 = arith.constant 0 : i32
    return %c0_i32, %c0_i32_0 : i32, i32
  }
  func.func @transform_3(%arg0: i32) -> (i32, i32) {
    %c0_i32 = arith.constant 0 : i32
    %c0_i32_0 = arith.constant 0 : i32
    %c0_i32_1 = arith.constant 0 : i32
    return %c0_i32, %c0_i32_0 : i32, i32
  }
  func.func @transform_4(%arg0: i32) -> (i32, i32) {
    %c0_i32 = arith.constant 0 : i32
    %c0_i32_0 = arith.constant 0 : i32
    %c0_i32_1 = arith.constant 0 : i32
    return %c0_i32, %c0_i32_0 : i32, i32
  }
  func.func @transform_5(%arg0: i32) -> (i32, i32) {
    %c0_i32 = arith.constant 0 : i32
    %c0_i32_0 = arith.constant 0 : i32
    %c0_i32_1 = arith.constant 0 : i32
    return %c0_i32, %c0_i32_0 : i32, i32
  }
  func.func @transform_6(%arg0: i32) -> (i32, i32) {
    %c0_i32 = arith.constant 0 : i32
    %c0_i32_0 = arith.constant 0 : i32
    %c0_i32_1 = arith.constant 0 : i32
    return %c0_i32, %c0_i32_0 : i32, i32
  }
  func.func @transform_7(%arg0: i32) -> (i32, i32) {
    %c0_i32 = arith.constant 0 : i32
    %c0_i32_0 = arith.constant 0 : i32
    %c0_i32_1 = arith.constant 0 : i32
    return %c0_i32, %c0_i32_0 : i32, i32
  }
  func.func @transform_8(%arg0: i32) -> (i32, i32) {
    %c0_i32 = arith.constant 0 : i32
    %c0_i32_0 = arith.constant 0 : i32
    %c0_i32_1 = arith.constant 0 : i32
    return %c0_i32, %c0_i32_0 : i32, i32
  }
  func.func @transform_9(%arg0: i32) -> (i32, i32, i32) {
    %c0_i32 = arith.constant 0 : i32
    %c0_i32_0 = arith.constant 0 : i32
    %c0_i32_1 = arith.constant 0 : i32
    return %arg0, %c0_i32, %c0_i32_0 : i32, i32, i32
  }
}

module attributes {stable_mosaic.version = 11 : i64} {
  func.func @kernel(%arg0: i32, %arg1: memref<1x8x128xf32, #tpu.memory_space<vmem>>, %arg2: memref<128x128xf32, #tpu.memory_space<vmem>>, %arg3: memref<1x128xf32, #tpu.memory_space<vmem>>, %arg4: memref<128x128xf32, #tpu.memory_space<vmem>>, %arg5: memref<1x128xf32, #tpu.memory_space<vmem>>, %arg6: memref<128x128xf32, #tpu.memory_space<vmem>>, %arg7: memref<1x128xf32, #tpu.memory_space<vmem>>, %arg8: memref<128x128xf32, #tpu.memory_space<vmem>>, %arg9: memref<1x128xf32, #tpu.memory_space<vmem>>, %arg10: memref<1x128xf32, #tpu.memory_space<vmem>>, %arg11: memref<1x128xf32, #tpu.memory_space<vmem>>, %arg12: memref<128x128xf32, #tpu.memory_space<vmem>>, %arg13: memref<1x128xf32, #tpu.memory_space<vmem>>, %arg14: memref<128x128xf32, #tpu.memory_space<vmem>>, %arg15: memref<1x128xf32, #tpu.memory_space<vmem>>, %arg16: memref<1x128xf32, #tpu.memory_space<vmem>>, %arg17: memref<1x128xf32, #tpu.memory_space<vmem>>, %arg18: memref<1x8x128xf32, #tpu.memory_space<vmem>>) attributes {dimension_semantics = [#tpu.dimension_semantics<parallel>], iteration_bounds = array<i64: 2>, scalar_prefetch = 0 : i64, scratch_operands = 0 : i64, tpu.core_type = #tpu.core_type<tc>, window_params = [{transform_indices = @transform_0, window_bounds = array<i64: 1, 8, 128>}, {pipeline_mode = #tpu.pipeline_mode<synchronous>, transform_indices = @transform_1, window_bounds = array<i64: 128, 128>}, {pipeline_mode = #tpu.pipeline_mode<synchronous>, transform_indices = @transform_2, window_bounds = array<i64: 1, 128>}, {pipeline_mode = #tpu.pipeline_mode<synchronous>, transform_indices = @transform_3, window_bounds = array<i64: 128, 128>}, {pipeline_mode = #tpu.pipeline_mode<synchronous>, transform_indices = @transform_4, window_bounds = array<i64: 1, 128>}, {pipeline_mode = #tpu.pipeline_mode<synchronous>, transform_indices = @transform_5, window_bounds = array<i64: 128, 128>}, {pipeline_mode = #tpu.pipeline_mode<synchronous>, transform_indices = @transform_6, window_bounds = array<i64: 1, 128>}, {pipeline_mode = #tpu.pipeline_mode<synchronous>, transform_indices = @transform_7, window_bounds = array<i64: 128, 128>}, {pipeline_mode = #tpu.pipeline_mode<synchronous>, transform_indices = @transform_8, window_bounds = array<i64: 1, 128>}, {pipeline_mode = #tpu.pipeline_mode<synchronous>, transform_indices = @transform_9, window_bounds = array<i64: 1, 128>}, {pipeline_mode = #tpu.pipeline_mode<synchronous>, transform_indices = @transform_10, window_bounds = array<i64: 1, 128>}, {pipeline_mode = #tpu.pipeline_mode<synchronous>, transform_indices = @transform_11, window_bounds = array<i64: 128, 128>}, {pipeline_mode = #tpu.pipeline_mode<synchronous>, transform_indices = @transform_12, window_bounds = array<i64: 1, 128>}, {pipeline_mode = #tpu.pipeline_mode<synchronous>, transform_indices = @transform_13, window_bounds = array<i64: 128, 128>}, {pipeline_mode = #tpu.pipeline_mode<synchronous>, transform_indices = @transform_14, window_bounds = array<i64: 1, 128>}, {pipeline_mode = #tpu.pipeline_mode<synchronous>, transform_indices = @transform_15, window_bounds = array<i64: 1, 128>}, {pipeline_mode = #tpu.pipeline_mode<synchronous>, transform_indices = @transform_16, window_bounds = array<i64: 1, 128>}, {transform_indices = @transform_17, window_bounds = array<i64: 1, 8, 128>}]} {
    %c0 = arith.constant 0 : index
    %c0_0 = arith.constant 0 : index
    %c0_1 = arith.constant 0 : index
    %0 = vector.load %arg1[%c0, %c0_0, %c0_1] : memref<1x8x128xf32, #tpu.memory_space<vmem>>, vector<1x8x128xf32>
    %1 = vector.shape_cast %0 : vector<1x8x128xf32> to vector<8x128xf32>
    %c0_2 = arith.constant 0 : index
    %c0_3 = arith.constant 0 : index
    %2 = vector.load %arg2[%c0_2, %c0_3] : memref<128x128xf32, #tpu.memory_space<vmem>>, vector<128x128xf32>
    %cst = arith.constant dense<0.000000e+00> : vector<8x128xf32>
    %3 = tpu.matmul %1, %2, %cst {dimension_numbers = #tpu.dot_dimension_numbers<[1], [0], [0], [1], [0, 0, 1, 1], [], []>} : vector<8x128xf32>, vector<128x128xf32>, vector<8x128xf32> -> vector<8x128xf32>
    %c0_4 = arith.constant 0 : index
    %c0_5 = arith.constant 0 : index
    %4 = vector.load %arg3[%c0_4, %c0_5] : memref<1x128xf32, #tpu.memory_space<vmem>>, vector<1x128xf32>
    %5 = vector.broadcast %4 : vector<1x128xf32> to vector<8x128xf32>
    %6 = arith.addf %3, %5 : vector<8x128xf32>
    %c0_6 = arith.constant 0 : index
    %c0_7 = arith.constant 0 : index
    %7 = vector.load %arg4[%c0_6, %c0_7] : memref<128x128xf32, #tpu.memory_space<vmem>>, vector<128x128xf32>
    %cst_8 = arith.constant dense<0.000000e+00> : vector<8x128xf32>
    %8 = tpu.matmul %1, %7, %cst_8 {dimension_numbers = #tpu.dot_dimension_numbers<[1], [0], [0], [1], [0, 0, 1, 1], [], []>} : vector<8x128xf32>, vector<128x128xf32>, vector<8x128xf32> -> vector<8x128xf32>
    %c0_9 = arith.constant 0 : index
    %c0_10 = arith.constant 0 : index
    %9 = vector.load %arg5[%c0_9, %c0_10] : memref<1x128xf32, #tpu.memory_space<vmem>>, vector<1x128xf32>
    %10 = vector.broadcast %9 : vector<1x128xf32> to vector<8x128xf32>
    %11 = arith.addf %8, %10 : vector<8x128xf32>
    %c0_11 = arith.constant 0 : index
    %c0_12 = arith.constant 0 : index
    %12 = vector.load %arg6[%c0_11, %c0_12] : memref<128x128xf32, #tpu.memory_space<vmem>>, vector<128x128xf32>
    %cst_13 = arith.constant dense<0.000000e+00> : vector<8x128xf32>
    %13 = tpu.matmul %1, %12, %cst_13 {dimension_numbers = #tpu.dot_dimension_numbers<[1], [0], [0], [1], [0, 0, 1, 1], [], []>} : vector<8x128xf32>, vector<128x128xf32>, vector<8x128xf32> -> vector<8x128xf32>
    %c0_14 = arith.constant 0 : index
    %c0_15 = arith.constant 0 : index
    %14 = vector.load %arg7[%c0_14, %c0_15] : memref<1x128xf32, #tpu.memory_space<vmem>>, vector<1x128xf32>
    %15 = vector.broadcast %14 : vector<1x128xf32> to vector<8x128xf32>
    %16 = arith.addf %13, %15 : vector<8x128xf32>
    %17 = vector.extract_strided_slice %6 {offsets = [0, 0], sizes = [8, 32], strides = [1, 1]} : vector<8x128xf32> to vector<8x32xf32>
    %18 = vector.extract_strided_slice %11 {offsets = [0, 0], sizes = [8, 32], strides = [1, 1]} : vector<8x128xf32> to vector<8x32xf32>
    %19 = vector.extract_strided_slice %16 {offsets = [0, 0], sizes = [8, 32], strides = [1, 1]} : vector<8x128xf32> to vector<8x32xf32>
    %cst_16 = arith.constant dense<0.000000e+00> : vector<8x8xf32>
    %20 = tpu.matmul %17, %18, %cst_16 {dimension_numbers = #tpu.dot_dimension_numbers<[1], [1], [0], [0], [0, 0, 1, 0], [], []>} : vector<8x32xf32>, vector<8x32xf32>, vector<8x8xf32> -> vector<8x8xf32>
    %cst_17 = arith.constant 0.176776692 : f32
    %21 = vector.broadcast %cst_17 : f32 to vector<8x8xf32>
    %22 = arith.mulf %20, %21 : vector<8x8xf32>
    %cst_18 = arith.constant dense<0xFF800000> : vector<8xf32>
    %23 = vector.multi_reduction <maximumf>, %22, %cst_18 [1] : vector<8x8xf32> to vector<8xf32>
    %24 = vector.shape_cast %23 : vector<8xf32> to vector<8x1xf32>
    %25 = vector.broadcast %24 : vector<8x1xf32> to vector<8x8xf32>
    %26 = arith.subf %22, %25 : vector<8x8xf32>
    %27 = math.exp %26 : vector<8x8xf32>
    %cst_19 = arith.constant dense<0.000000e+00> : vector<8xf32>
    %28 = vector.multi_reduction <add>, %27, %cst_19 [1] : vector<8x8xf32> to vector<8xf32>
    %29 = vector.shape_cast %28 : vector<8xf32> to vector<8x1xf32>
    %30 = vector.broadcast %29 : vector<8x1xf32> to vector<8x8xf32>
    %31 = arith.divf %27, %30 : vector<8x8xf32>
    %cst_20 = arith.constant dense<0.000000e+00> : vector<8x32xf32>
    %32 = tpu.matmul %31, %19, %cst_20 {dimension_numbers = #tpu.dot_dimension_numbers<[1], [0], [0], [1], [0, 0, 1, 1], [], []>} : vector<8x8xf32>, vector<8x32xf32>, vector<8x32xf32> -> vector<8x32xf32>
    %33 = vector.extract_strided_slice %6 {offsets = [0, 32], sizes = [8, 32], strides = [1, 1]} : vector<8x128xf32> to vector<8x32xf32>
    %34 = vector.extract_strided_slice %11 {offsets = [0, 32], sizes = [8, 32], strides = [1, 1]} : vector<8x128xf32> to vector<8x32xf32>
    %35 = vector.extract_strided_slice %16 {offsets = [0, 32], sizes = [8, 32], strides = [1, 1]} : vector<8x128xf32> to vector<8x32xf32>
    %cst_21 = arith.constant dense<0.000000e+00> : vector<8x8xf32>
    %36 = tpu.matmul %33, %34, %cst_21 {dimension_numbers = #tpu.dot_dimension_numbers<[1], [1], [0], [0], [0, 0, 1, 0], [], []>} : vector<8x32xf32>, vector<8x32xf32>, vector<8x8xf32> -> vector<8x8xf32>
    %cst_22 = arith.constant 0.176776692 : f32
    %37 = vector.broadcast %cst_22 : f32 to vector<8x8xf32>
    %38 = arith.mulf %36, %37 : vector<8x8xf32>
    %cst_23 = arith.constant dense<0xFF800000> : vector<8xf32>
    %39 = vector.multi_reduction <maximumf>, %38, %cst_23 [1] : vector<8x8xf32> to vector<8xf32>
    %40 = vector.shape_cast %39 : vector<8xf32> to vector<8x1xf32>
    %41 = vector.broadcast %40 : vector<8x1xf32> to vector<8x8xf32>
    %42 = arith.subf %38, %41 : vector<8x8xf32>
    %43 = math.exp %42 : vector<8x8xf32>
    %cst_24 = arith.constant dense<0.000000e+00> : vector<8xf32>
    %44 = vector.multi_reduction <add>, %43, %cst_24 [1] : vector<8x8xf32> to vector<8xf32>
    %45 = vector.shape_cast %44 : vector<8xf32> to vector<8x1xf32>
    %46 = vector.broadcast %45 : vector<8x1xf32> to vector<8x8xf32>
    %47 = arith.divf %43, %46 : vector<8x8xf32>
    %cst_25 = arith.constant dense<0.000000e+00> : vector<8x32xf32>
    %48 = tpu.matmul %47, %35, %cst_25 {dimension_numbers = #tpu.dot_dimension_numbers<[1], [0], [0], [1], [0, 0, 1, 1], [], []>} : vector<8x8xf32>, vector<8x32xf32>, vector<8x32xf32> -> vector<8x32xf32>
    %49 = vector.extract_strided_slice %6 {offsets = [0, 64], sizes = [8, 32], strides = [1, 1]} : vector<8x128xf32> to vector<8x32xf32>
    %50 = vector.extract_strided_slice %11 {offsets = [0, 64], sizes = [8, 32], strides = [1, 1]} : vector<8x128xf32> to vector<8x32xf32>
    %51 = vector.extract_strided_slice %16 {offsets = [0, 64], sizes = [8, 32], strides = [1, 1]} : vector<8x128xf32> to vector<8x32xf32>
    %cst_26 = arith.constant dense<0.000000e+00> : vector<8x8xf32>
    %52 = tpu.matmul %49, %50, %cst_26 {dimension_numbers = #tpu.dot_dimension_numbers<[1], [1], [0], [0], [0, 0, 1, 0], [], []>} : vector<8x32xf32>, vector<8x32xf32>, vector<8x8xf32> -> vector<8x8xf32>
    %cst_27 = arith.constant 0.176776692 : f32
    %53 = vector.broadcast %cst_27 : f32 to vector<8x8xf32>
    %54 = arith.mulf %52, %53 : vector<8x8xf32>
    %cst_28 = arith.constant dense<0xFF800000> : vector<8xf32>
    %55 = vector.multi_reduction <maximumf>, %54, %cst_28 [1] : vector<8x8xf32> to vector<8xf32>
    %56 = vector.shape_cast %55 : vector<8xf32> to vector<8x1xf32>
    %57 = vector.broadcast %56 : vector<8x1xf32> to vector<8x8xf32>
    %58 = arith.subf %54, %57 : vector<8x8xf32>
    %59 = math.exp %58 : vector<8x8xf32>
    %cst_29 = arith.constant dense<0.000000e+00> : vector<8xf32>
    %60 = vector.multi_reduction <add>, %59, %cst_29 [1] : vector<8x8xf32> to vector<8xf32>
    %61 = vector.shape_cast %60 : vector<8xf32> to vector<8x1xf32>
    %62 = vector.broadcast %61 : vector<8x1xf32> to vector<8x8xf32>
    %63 = arith.divf %59, %62 : vector<8x8xf32>
    %cst_30 = arith.constant dense<0.000000e+00> : vector<8x32xf32>
    %64 = tpu.matmul %63, %51, %cst_30 {dimension_numbers = #tpu.dot_dimension_numbers<[1], [0], [0], [1], [0, 0, 1, 1], [], []>} : vector<8x8xf32>, vector<8x32xf32>, vector<8x32xf32> -> vector<8x32xf32>
    %65 = vector.extract_strided_slice %6 {offsets = [0, 96], sizes = [8, 32], strides = [1, 1]} : vector<8x128xf32> to vector<8x32xf32>
    %66 = vector.extract_strided_slice %11 {offsets = [0, 96], sizes = [8, 32], strides = [1, 1]} : vector<8x128xf32> to vector<8x32xf32>
    %67 = vector.extract_strided_slice %16 {offsets = [0, 96], sizes = [8, 32], strides = [1, 1]} : vector<8x128xf32> to vector<8x32xf32>
    %cst_31 = arith.constant dense<0.000000e+00> : vector<8x8xf32>
    %68 = tpu.matmul %65, %66, %cst_31 {dimension_numbers = #tpu.dot_dimension_numbers<[1], [1], [0], [0], [0, 0, 1, 0], [], []>} : vector<8x32xf32>, vector<8x32xf32>, vector<8x8xf32> -> vector<8x8xf32>
    %cst_32 = arith.constant 0.176776692 : f32
    %69 = vector.broadcast %cst_32 : f32 to vector<8x8xf32>
    %70 = arith.mulf %68, %69 : vector<8x8xf32>
    %cst_33 = arith.constant dense<0xFF800000> : vector<8xf32>
    %71 = vector.multi_reduction <maximumf>, %70, %cst_33 [1] : vector<8x8xf32> to vector<8xf32>
    %72 = vector.shape_cast %71 : vector<8xf32> to vector<8x1xf32>
    %73 = vector.broadcast %72 : vector<8x1xf32> to vector<8x8xf32>
    %74 = arith.subf %70, %73 : vector<8x8xf32>
    %75 = math.exp %74 : vector<8x8xf32>
    %cst_34 = arith.constant dense<0.000000e+00> : vector<8xf32>
    %76 = vector.multi_reduction <add>, %75, %cst_34 [1] : vector<8x8xf32> to vector<8xf32>
    %77 = vector.shape_cast %76 : vector<8xf32> to vector<8x1xf32>
    %78 = vector.broadcast %77 : vector<8x1xf32> to vector<8x8xf32>
    %79 = arith.divf %75, %78 : vector<8x8xf32>
    %cst_35 = arith.constant dense<0.000000e+00> : vector<8x32xf32>
    %80 = tpu.matmul %79, %67, %cst_35 {dimension_numbers = #tpu.dot_dimension_numbers<[1], [0], [0], [1], [0, 0, 1, 1], [], []>} : vector<8x8xf32>, vector<8x32xf32>, vector<8x32xf32> -> vector<8x32xf32>
    %81 = tpu.concatenate %32, %48, %64, %80 in 1 : vector<8x32xf32>, vector<8x32xf32>, vector<8x32xf32>, vector<8x32xf32> -> vector<8x128xf32>
    %c0_36 = arith.constant 0 : index
    %c0_37 = arith.constant 0 : index
    %82 = vector.load %arg8[%c0_36, %c0_37] : memref<128x128xf32, #tpu.memory_space<vmem>>, vector<128x128xf32>
    %cst_38 = arith.constant dense<0.000000e+00> : vector<8x128xf32>
    %83 = tpu.matmul %81, %82, %cst_38 {dimension_numbers = #tpu.dot_dimension_numbers<[1], [0], [0], [1], [0, 0, 1, 1], [], []>} : vector<8x128xf32>, vector<128x128xf32>, vector<8x128xf32> -> vector<8x128xf32>
    %c0_39 = arith.constant 0 : index
    %c0_40 = arith.constant 0 : index
    %84 = vector.load %arg9[%c0_39, %c0_40] : memref<1x128xf32, #tpu.memory_space<vmem>>, vector<1x128xf32>
    %85 = vector.broadcast %84 : vector<1x128xf32> to vector<8x128xf32>
    %86 = arith.addf %83, %85 : vector<8x128xf32>
    %87 = arith.addf %1, %86 : vector<8x128xf32>
    %c0_41 = arith.constant 0 : index
    %c0_42 = arith.constant 0 : index
    %88 = vector.load %arg10[%c0_41, %c0_42] : memref<1x128xf32, #tpu.memory_space<vmem>>, vector<1x128xf32>
    %c0_43 = arith.constant 0 : index
    %c0_44 = arith.constant 0 : index
    %89 = vector.load %arg11[%c0_43, %c0_44] : memref<1x128xf32, #tpu.memory_space<vmem>>, vector<1x128xf32>
    %cst_45 = arith.constant dense<0.000000e+00> : vector<8xf32>
    %90 = vector.multi_reduction <add>, %87, %cst_45 [1] : vector<8x128xf32> to vector<8xf32>
    %91 = vector.shape_cast %90 : vector<8xf32> to vector<8x1xf32>
    %cst_46 = arith.constant 1.280000e+02 : f32
    %92 = vector.broadcast %cst_46 : f32 to vector<8x1xf32>
    %93 = arith.divf %91, %92 : vector<8x1xf32>
    %94 = vector.broadcast %93 : vector<8x1xf32> to vector<8x128xf32>
    %95 = arith.subf %87, %94 : vector<8x128xf32>
    %96 = arith.mulf %95, %95 : vector<8x128xf32>
    %cst_47 = arith.constant dense<0.000000e+00> : vector<8xf32>
    %97 = vector.multi_reduction <add>, %96, %cst_47 [1] : vector<8x128xf32> to vector<8xf32>
    %98 = vector.shape_cast %97 : vector<8xf32> to vector<8x1xf32>
    %cst_48 = arith.constant 1.280000e+02 : f32
    %99 = vector.broadcast %cst_48 : f32 to vector<8x1xf32>
    %100 = arith.divf %98, %99 : vector<8x1xf32>
    %cst_49 = arith.constant 9.99999974E-6 : f32
    %101 = vector.broadcast %cst_49 : f32 to vector<8x1xf32>
    %102 = arith.addf %100, %101 : vector<8x1xf32>
    %103 = math.rsqrt %102 : vector<8x1xf32>
    %104 = vector.broadcast %103 : vector<8x1xf32> to vector<8x128xf32>
    %105 = arith.mulf %95, %104 : vector<8x128xf32>
    %106 = vector.broadcast %88 : vector<1x128xf32> to vector<8x128xf32>
    %107 = arith.mulf %105, %106 : vector<8x128xf32>
    %108 = vector.broadcast %89 : vector<1x128xf32> to vector<8x128xf32>
    %109 = arith.addf %107, %108 : vector<8x128xf32>
    %c0_50 = arith.constant 0 : index
    %c0_51 = arith.constant 0 : index
    %110 = vector.load %arg12[%c0_50, %c0_51] : memref<128x128xf32, #tpu.memory_space<vmem>>, vector<128x128xf32>
    %cst_52 = arith.constant dense<0.000000e+00> : vector<8x128xf32>
    %111 = tpu.matmul %109, %110, %cst_52 {dimension_numbers = #tpu.dot_dimension_numbers<[1], [0], [0], [1], [0, 0, 1, 1], [], []>} : vector<8x128xf32>, vector<128x128xf32>, vector<8x128xf32> -> vector<8x128xf32>
    %c0_53 = arith.constant 0 : index
    %c0_54 = arith.constant 0 : index
    %112 = vector.load %arg13[%c0_53, %c0_54] : memref<1x128xf32, #tpu.memory_space<vmem>>, vector<1x128xf32>
    %113 = vector.broadcast %112 : vector<1x128xf32> to vector<8x128xf32>
    %114 = arith.addf %111, %113 : vector<8x128xf32>
    %cst_55 = arith.constant 5.000000e-01 : f32
    %115 = vector.broadcast %cst_55 : f32 to vector<8x128xf32>
    %116 = arith.mulf %115, %114 : vector<8x128xf32>
    %cst_56 = arith.constant 4.471500e-02 : f32
    %117 = vector.broadcast %cst_56 : f32 to vector<8x128xf32>
    %118 = arith.mulf %117, %114 : vector<8x128xf32>
    %119 = arith.mulf %118, %114 : vector<8x128xf32>
    %120 = arith.mulf %119, %114 : vector<8x128xf32>
    %121 = arith.addf %114, %120 : vector<8x128xf32>
    %cst_57 = arith.constant 0.797884583 : f32
    %122 = vector.broadcast %cst_57 : f32 to vector<8x128xf32>
    %123 = arith.mulf %122, %121 : vector<8x128xf32>
    %124 = math.tanh %123 : vector<8x128xf32>
    %cst_58 = arith.constant 1.000000e+00 : f32
    %125 = vector.broadcast %cst_58 : f32 to vector<8x128xf32>
    %126 = arith.addf %125, %124 : vector<8x128xf32>
    %127 = arith.mulf %116, %126 : vector<8x128xf32>
    %c0_59 = arith.constant 0 : index
    %c0_60 = arith.constant 0 : index
    %128 = vector.load %arg14[%c0_59, %c0_60] : memref<128x128xf32, #tpu.memory_space<vmem>>, vector<128x128xf32>
    %cst_61 = arith.constant dense<0.000000e+00> : vector<8x128xf32>
    %129 = tpu.matmul %127, %128, %cst_61 {dimension_numbers = #tpu.dot_dimension_numbers<[1], [0], [0], [1], [0, 0, 1, 1], [], []>} : vector<8x128xf32>, vector<128x128xf32>, vector<8x128xf32> -> vector<8x128xf32>
    %c0_62 = arith.constant 0 : index
    %c0_63 = arith.constant 0 : index
    %130 = vector.load %arg15[%c0_62, %c0_63] : memref<1x128xf32, #tpu.memory_space<vmem>>, vector<1x128xf32>
    %131 = vector.broadcast %130 : vector<1x128xf32> to vector<8x128xf32>
    %132 = arith.addf %129, %131 : vector<8x128xf32>
    %133 = arith.addf %109, %132 : vector<8x128xf32>
    %c0_64 = arith.constant 0 : index
    %c0_65 = arith.constant 0 : index
    %134 = vector.load %arg16[%c0_64, %c0_65] : memref<1x128xf32, #tpu.memory_space<vmem>>, vector<1x128xf32>
    %c0_66 = arith.constant 0 : index
    %c0_67 = arith.constant 0 : index
    %135 = vector.load %arg17[%c0_66, %c0_67] : memref<1x128xf32, #tpu.memory_space<vmem>>, vector<1x128xf32>
    %cst_68 = arith.constant dense<0.000000e+00> : vector<8xf32>
    %136 = vector.multi_reduction <add>, %133, %cst_68 [1] : vector<8x128xf32> to vector<8xf32>
    %137 = vector.shape_cast %136 : vector<8xf32> to vector<8x1xf32>
    %cst_69 = arith.constant 1.280000e+02 : f32
    %138 = vector.broadcast %cst_69 : f32 to vector<8x1xf32>
    %139 = arith.divf %137, %138 : vector<8x1xf32>
    %140 = vector.broadcast %139 : vector<8x1xf32> to vector<8x128xf32>
    %141 = arith.subf %133, %140 : vector<8x128xf32>
    %142 = arith.mulf %141, %141 : vector<8x128xf32>
    %cst_70 = arith.constant dense<0.000000e+00> : vector<8xf32>
    %143 = vector.multi_reduction <add>, %142, %cst_70 [1] : vector<8x128xf32> to vector<8xf32>
    %144 = vector.shape_cast %143 : vector<8xf32> to vector<8x1xf32>
    %cst_71 = arith.constant 1.280000e+02 : f32
    %145 = vector.broadcast %cst_71 : f32 to vector<8x1xf32>
    %146 = arith.divf %144, %145 : vector<8x1xf32>
    %cst_72 = arith.constant 9.99999974E-6 : f32
    %147 = vector.broadcast %cst_72 : f32 to vector<8x1xf32>
    %148 = arith.addf %146, %147 : vector<8x1xf32>
    %149 = math.rsqrt %148 : vector<8x1xf32>
    %150 = vector.broadcast %149 : vector<8x1xf32> to vector<8x128xf32>
    %151 = arith.mulf %141, %150 : vector<8x128xf32>
    %152 = vector.broadcast %134 : vector<1x128xf32> to vector<8x128xf32>
    %153 = arith.mulf %151, %152 : vector<8x128xf32>
    %154 = vector.broadcast %135 : vector<1x128xf32> to vector<8x128xf32>
    %155 = arith.addf %153, %154 : vector<8x128xf32>
    %c0_73 = arith.constant 0 : index
    %c0_74 = arith.constant 0 : index
    %c0_75 = arith.constant 0 : index
    %156 = vector.load %arg18[%c0_73, %c0_74, %c0_75] : memref<1x8x128xf32, #tpu.memory_space<vmem>>, vector<1x8x128xf32>
    %157 = vector.shape_cast %156 : vector<1x8x128xf32> to vector<8x128xf32>
    %158 = vector.shape_cast %155 : vector<8x128xf32> to vector<1x8x128xf32>
    tpu.vector_store %arg18[%c0_73, %c0_74, %c0_75], %158 {strides = array<i32>} : memref<1x8x128xf32, #tpu.memory_space<vmem>>, vector<1x8x128xf32>,
    return
  }
  func.func @transform_0(%arg0: i32) -> (i32, i32, i32) {
    %c0_i32 = arith.constant 0 : i32
    %c0_i32_0 = arith.constant 0 : i32
    %c0_i32_1 = arith.constant 0 : i32
    return %arg0, %c0_i32, %c0_i32_0 : i32, i32, i32
  }
  func.func @transform_1(%arg0: i32) -> (i32, i32) {
    %c0_i32 = arith.constant 0 : i32
    %c0_i32_0 = arith.constant 0 : i32
    %c0_i32_1 = arith.constant 0 : i32
    return %c0_i32, %c0_i32_0 : i32, i32
  }
  func.func @transform_2(%arg0: i32) -> (i32, i32) {
    %c0_i32 = arith.constant 0 : i32
    %c0_i32_0 = arith.constant 0 : i32
    %c0_i32_1 = arith.constant 0 : i32
    return %c0_i32, %c0_i32_0 : i32, i32
  }
  func.func @transform_3(%arg0: i32) -> (i32, i32) {
    %c0_i32 = arith.constant 0 : i32
    %c0_i32_0 = arith.constant 0 : i32
    %c0_i32_1 = arith.constant 0 : i32
    return %c0_i32, %c0_i32_0 : i32, i32
  }
  func.func @transform_4(%arg0: i32) -> (i32, i32) {
    %c0_i32 = arith.constant 0 : i32
    %c0_i32_0 = arith.constant 0 : i32
    %c0_i32_1 = arith.constant 0 : i32
    return %c0_i32, %c0_i32_0 : i32, i32
  }
  func.func @transform_5(%arg0: i32) -> (i32, i32) {
    %c0_i32 = arith.constant 0 : i32
    %c0_i32_0 = arith.constant 0 : i32
    %c0_i32_1 = arith.constant 0 : i32
    return %c0_i32, %c0_i32_0 : i32, i32
  }
  func.func @transform_6(%arg0: i32) -> (i32, i32) {
    %c0_i32 = arith.constant 0 : i32
    %c0_i32_0 = arith.constant 0 : i32
    %c0_i32_1 = arith.constant 0 : i32
    return %c0_i32, %c0_i32_0 : i32, i32
  }
  func.func @transform_7(%arg0: i32) -> (i32, i32) {
    %c0_i32 = arith.constant 0 : i32
    %c0_i32_0 = arith.constant 0 : i32
    %c0_i32_1 = arith.constant 0 : i32
    return %c0_i32, %c0_i32_0 : i32, i32
  }
  func.func @transform_8(%arg0: i32) -> (i32, i32) {
    %c0_i32 = arith.constant 0 : i32
    %c0_i32_0 = arith.constant 0 : i32
    %c0_i32_1 = arith.constant 0 : i32
    return %c0_i32, %c0_i32_0 : i32, i32
  }
  func.func @transform_9(%arg0: i32) -> (i32, i32) {
    %c0_i32 = arith.constant 0 : i32
    %c0_i32_0 = arith.constant 0 : i32
    %c0_i32_1 = arith.constant 0 : i32
    return %c0_i32, %c0_i32_0 : i32, i32
  }
  func.func @transform_10(%arg0: i32) -> (i32, i32) {
    %c0_i32 = arith.constant 0 : i32
    %c0_i32_0 = arith.constant 0 : i32
    %c0_i32_1 = arith.constant 0 : i32
    return %c0_i32, %c0_i32_0 : i32, i32
  }
  func.func @transform_11(%arg0: i32) -> (i32, i32) {
    %c0_i32 = arith.constant 0 : i32
    %c0_i32_0 = arith.constant 0 : i32
    %c0_i32_1 = arith.constant 0 : i32
    return %c0_i32, %c0_i32_0 : i32, i32
  }
  func.func @transform_12(%arg0: i32) -> (i32, i32) {
    %c0_i32 = arith.constant 0 : i32
    %c0_i32_0 = arith.constant 0 : i32
    %c0_i32_1 = arith.constant 0 : i32
    return %c0_i32, %c0_i32_0 : i32, i32
  }
  func.func @transform_13(%arg0: i32) -> (i32, i32) {
    %c0_i32 = arith.constant 0 : i32
    %c0_i32_0 = arith.constant 0 : i32
    %c0_i32_1 = arith.constant 0 : i32
    return %c0_i32, %c0_i32_0 : i32, i32
  }
  func.func @transform_14(%arg0: i32) -> (i32, i32) {
    %c0_i32 = arith.constant 0 : i32
    %c0_i32_0 = arith.constant 0 : i32
    %c0_i32_1 = arith.constant 0 : i32
    return %c0_i32, %c0_i32_0 : i32, i32
  }
  func.func @transform_15(%arg0: i32) -> (i32, i32) {
    %c0_i32 = arith.constant 0 : i32
    %c0_i32_0 = arith.constant 0 : i32
    %c0_i32_1 = arith.constant 0 : i32
    return %c0_i32, %c0_i32_0 : i32, i32
  }
  func.func @transform_16(%arg0: i32) -> (i32, i32) {
    %c0_i32 = arith.constant 0 : i32
    %c0_i32_0 = arith.constant 0 : i32
    %c0_i32_1 = arith.constant 0 : i32
    return %c0_i32, %c0_i32_0 : i32, i32
  }
  func.func @transform_17(%arg0: i32) -> (i32, i32, i32) {
    %c0_i32 = arith.constant 0 : i32
    %c0_i32_0 = arith.constant 0 : i32
    %c0_i32_1 = arith.constant 0 : i32
    return %arg0, %c0_i32, %c0_i32_0 : i32, i32, i32
  }
}

module attributes {stable_mosaic.version = 11 : i64} {
  func.func @_layernorm_kernel(%arg0: i32, %arg1: memref<1x8x128xf32, #tpu.memory_space<vmem>>, %arg2: memref<1x128xf32, #tpu.memory_space<vmem>>, %arg3: memref<1x128xf32, #tpu.memory_space<vmem>>, %arg4: memref<1x8x128xf32, #tpu.memory_space<vmem>>) attributes {dimension_semantics = [#tpu.dimension_semantics<parallel>], iteration_bounds = array<i64: 2>, scalar_prefetch = 0 : i64, scratch_operands = 0 : i64, tpu.core_type = #tpu.core_type<tc>, window_params = [{transform_indices = @transform_0, window_bounds = array<i64: 1, 8, 128>}, {pipeline_mode = #tpu.pipeline_mode<synchronous>, transform_indices = @transform_1, window_bounds = array<i64: 1, 128>}, {pipeline_mode = #tpu.pipeline_mode<synchronous>, transform_indices = @transform_2, window_bounds = array<i64: 1, 128>}, {transform_indices = @transform_3, window_bounds = array<i64: 1, 8, 128>}]} {
    %c0 = arith.constant 0 : index
    %c0_0 = arith.constant 0 : index
    %c0_1 = arith.constant 0 : index
    %0 = vector.load %arg1[%c0, %c0_0, %c0_1] : memref<1x8x128xf32, #tpu.memory_space<vmem>>, vector<1x8x128xf32>
    %1 = vector.shape_cast %0 : vector<1x8x128xf32> to vector<8x128xf32>
    %c0_2 = arith.constant 0 : index
    %c0_3 = arith.constant 0 : index
    %2 = vector.load %arg2[%c0_2, %c0_3] : memref<1x128xf32, #tpu.memory_space<vmem>>, vector<1x128xf32>
    %c0_4 = arith.constant 0 : index
    %c0_5 = arith.constant 0 : index
    %3 = vector.load %arg3[%c0_4, %c0_5] : memref<1x128xf32, #tpu.memory_space<vmem>>, vector<1x128xf32>
    %cst = arith.constant dense<0.000000e+00> : vector<8xf32>
    %4 = vector.multi_reduction <add>, %1, %cst [1] : vector<8x128xf32> to vector<8xf32>
    %5 = vector.shape_cast %4 : vector<8xf32> to vector<8x1xf32>
    %cst_6 = arith.constant 1.280000e+02 : f32
    %6 = vector.broadcast %cst_6 : f32 to vector<8x1xf32>
    %7 = arith.divf %5, %6 : vector<8x1xf32>
    %8 = vector.broadcast %7 : vector<8x1xf32> to vector<8x128xf32>
    %9 = arith.subf %1, %8 : vector<8x128xf32>
    %10 = arith.mulf %9, %9 : vector<8x128xf32>
    %cst_7 = arith.constant dense<0.000000e+00> : vector<8xf32>
    %11 = vector.multi_reduction <add>, %10, %cst_7 [1] : vector<8x128xf32> to vector<8xf32>
    %12 = vector.shape_cast %11 : vector<8xf32> to vector<8x1xf32>
    %cst_8 = arith.constant 1.280000e+02 : f32
    %13 = vector.broadcast %cst_8 : f32 to vector<8x1xf32>
    %14 = arith.divf %12, %13 : vector<8x1xf32>
    %cst_9 = arith.constant 9.99999974E-6 : f32
    %15 = vector.broadcast %cst_9 : f32 to vector<8x1xf32>
    %16 = arith.addf %14, %15 : vector<8x1xf32>
    %17 = math.rsqrt %16 : vector<8x1xf32>
    %18 = vector.broadcast %17 : vector<8x1xf32> to vector<8x128xf32>
    %19 = arith.mulf %9, %18 : vector<8x128xf32>
    %20 = vector.broadcast %2 : vector<1x128xf32> to vector<8x128xf32>
    %21 = arith.mulf %19, %20 : vector<8x128xf32>
    %22 = vector.broadcast %3 : vector<1x128xf32> to vector<8x128xf32>
    %23 = arith.addf %21, %22 : vector<8x128xf32>
    %c0_10 = arith.constant 0 : index
    %c0_11 = arith.constant 0 : index
    %c0_12 = arith.constant 0 : index
    %24 = vector.load %arg4[%c0_10, %c0_11, %c0_12] : memref<1x8x128xf32, #tpu.memory_space<vmem>>, vector<1x8x128xf32>
    %25 = vector.shape_cast %24 : vector<1x8x128xf32> to vector<8x128xf32>
    %26 = vector.shape_cast %23 : vector<8x128xf32> to vector<1x8x128xf32>
    tpu.vector_store %arg4[%c0_10, %c0_11, %c0_12], %26 {strides = array<i32>} : memref<1x8x128xf32, #tpu.memory_space<vmem>>, vector<1x8x128xf32>,
    return
  }
  func.func @transform_0(%arg0: i32) -> (i32, i32, i32) {
    %c0_i32 = arith.constant 0 : i32
    %c0_i32_0 = arith.constant 0 : i32
    %c0_i32_1 = arith.constant 0 : i32
    return %arg0, %c0_i32, %c0_i32_0 : i32, i32, i32
  }
  func.func @transform_1(%arg0: i32) -> (i32, i32) {
    %c0_i32 = arith.constant 0 : i32
    %c0_i32_0 = arith.constant 0 : i32
    %c0_i32_1 = arith.constant 0 : i32
    return %c0_i32, %c0_i32_0 : i32, i32
  }
  func.func @transform_2(%arg0: i32) -> (i32, i32) {
    %c0_i32 = arith.constant 0 : i32
    %c0_i32_0 = arith.constant 0 : i32
    %c0_i32_1 = arith.constant 0 : i32
    return %c0_i32, %c0_i32_0 : i32, i32
  }
  func.func @transform_3(%arg0: i32) -> (i32, i32, i32) {
    %c0_i32 = arith.constant 0 : i32
    %c0_i32_0 = arith.constant 0 : i32
    %c0_i32_1 = arith.constant 0 : i32
    return %arg0, %c0_i32, %c0_i32_0 : i32, i32, i32
  }
}

module attributes {stable_mosaic.version = 11 : i64} {
  func.func @kernel(%arg0: i32, %arg1: memref<1x12x128xf32, #tpu.memory_space<vmem>>, %arg2: memref<1x128xf32, #tpu.memory_space<vmem>>, %arg3: memref<1x128xf32, #tpu.memory_space<vmem>>, %arg4: memref<128x4xf32, #tpu.memory_space<vmem>>, %arg5: memref<1x4xf32, #tpu.memory_space<vmem>>, %arg6: memref<1x4x4xf32, #tpu.memory_space<vmem>>) attributes {dimension_semantics = [#tpu.dimension_semantics<parallel>], iteration_bounds = array<i64: 2>, scalar_prefetch = 0 : i64, scratch_operands = 0 : i64, tpu.core_type = #tpu.core_type<tc>, window_params = [{transform_indices = @transform_0, window_bounds = array<i64: 1, 12, 128>}, {pipeline_mode = #tpu.pipeline_mode<synchronous>, transform_indices = @transform_1, window_bounds = array<i64: 1, 128>}, {pipeline_mode = #tpu.pipeline_mode<synchronous>, transform_indices = @transform_2, window_bounds = array<i64: 1, 128>}, {pipeline_mode = #tpu.pipeline_mode<synchronous>, transform_indices = @transform_3, window_bounds = array<i64: 128, 4>}, {pipeline_mode = #tpu.pipeline_mode<synchronous>, transform_indices = @transform_4, window_bounds = array<i64: 1, 4>}, {transform_indices = @transform_5, window_bounds = array<i64: 1, 4, 4>}]} {
    %c0 = arith.constant 0 : index
    %c0_0 = arith.constant 0 : index
    %c0_1 = arith.constant 0 : index
    %0 = vector.load %arg1[%c0, %c0_0, %c0_1] : memref<1x12x128xf32, #tpu.memory_space<vmem>>, vector<1x12x128xf32>
    %1 = vector.shape_cast %0 : vector<1x12x128xf32> to vector<12x128xf32>
    %c0_2 = arith.constant 0 : index
    %c0_3 = arith.constant 0 : index
    %2 = vector.load %arg2[%c0_2, %c0_3] : memref<1x128xf32, #tpu.memory_space<vmem>>, vector<1x128xf32>
    %c0_4 = arith.constant 0 : index
    %c0_5 = arith.constant 0 : index
    %3 = vector.load %arg3[%c0_4, %c0_5] : memref<1x128xf32, #tpu.memory_space<vmem>>, vector<1x128xf32>
    %cst = arith.constant dense<0.000000e+00> : vector<12xf32>
    %4 = vector.multi_reduction <add>, %1, %cst [1] : vector<12x128xf32> to vector<12xf32>
    %5 = vector.shape_cast %4 : vector<12xf32> to vector<12x1xf32>
    %cst_6 = arith.constant 1.280000e+02 : f32
    %6 = vector.broadcast %cst_6 : f32 to vector<12x1xf32>
    %7 = arith.divf %5, %6 : vector<12x1xf32>
    %8 = vector.broadcast %7 : vector<12x1xf32> to vector<12x128xf32>
    %9 = arith.subf %1, %8 : vector<12x128xf32>
    %10 = arith.mulf %9, %9 : vector<12x128xf32>
    %cst_7 = arith.constant dense<0.000000e+00> : vector<12xf32>
    %11 = vector.multi_reduction <add>, %10, %cst_7 [1] : vector<12x128xf32> to vector<12xf32>
    %12 = vector.shape_cast %11 : vector<12xf32> to vector<12x1xf32>
    %cst_8 = arith.constant 1.280000e+02 : f32
    %13 = vector.broadcast %cst_8 : f32 to vector<12x1xf32>
    %14 = arith.divf %12, %13 : vector<12x1xf32>
    %cst_9 = arith.constant 9.99999974E-6 : f32
    %15 = vector.broadcast %cst_9 : f32 to vector<12x1xf32>
    %16 = arith.addf %14, %15 : vector<12x1xf32>
    %17 = math.rsqrt %16 : vector<12x1xf32>
    %18 = vector.broadcast %17 : vector<12x1xf32> to vector<12x128xf32>
    %19 = arith.mulf %9, %18 : vector<12x128xf32>
    %20 = vector.broadcast %2 : vector<1x128xf32> to vector<12x128xf32>
    %21 = arith.mulf %19, %20 : vector<12x128xf32>
    %22 = vector.broadcast %3 : vector<1x128xf32> to vector<12x128xf32>
    %23 = arith.addf %21, %22 : vector<12x128xf32>
    %c0_10 = arith.constant 0 : index
    %c0_11 = arith.constant 0 : index
    %24 = vector.load %arg4[%c0_10, %c0_11] : memref<128x4xf32, #tpu.memory_space<vmem>>, vector<128x4xf32>
    %cst_12 = arith.constant dense<0.000000e+00> : vector<12x4xf32>
    %25 = tpu.matmul %23, %24, %cst_12 {dimension_numbers = #tpu.dot_dimension_numbers<[1], [0], [0], [1], [0, 0, 1, 1], [], []>} : vector<12x128xf32>, vector<128x4xf32>, vector<12x4xf32> -> vector<12x4xf32>
    %c0_13 = arith.constant 0 : index
    %c0_14 = arith.constant 0 : index
    %26 = vector.load %arg5[%c0_13, %c0_14] : memref<1x4xf32, #tpu.memory_space<vmem>>, vector<1x4xf32>
    %27 = vector.broadcast %26 : vector<1x4xf32> to vector<12x4xf32>
    %28 = arith.addf %25, %27 : vector<12x4xf32>
    %29 = vector.extract_strided_slice %28 {offsets = [8, 0], sizes = [4, 4], strides = [1, 1]} : vector<12x4xf32> to vector<4x4xf32>
    %c0_15 = arith.constant 0 : index
    %c0_16 = arith.constant 0 : index
    %c0_17 = arith.constant 0 : index
    %30 = vector.load %arg6[%c0_15, %c0_16, %c0_17] : memref<1x4x4xf32, #tpu.memory_space<vmem>>, vector<1x4x4xf32>
    %31 = vector.shape_cast %30 : vector<1x4x4xf32> to vector<4x4xf32>
    %32 = vector.shape_cast %29 : vector<4x4xf32> to vector<1x4x4xf32>
    tpu.vector_store %arg6[%c0_15, %c0_16, %c0_17], %32 {strides = array<i32>} : memref<1x4x4xf32, #tpu.memory_space<vmem>>, vector<1x4x4xf32>,
    return
  }
  func.func @transform_0(%arg0: i32) -> (i32, i32, i32) {
    %c0_i32 = arith.constant 0 : i32
    %c0_i32_0 = arith.constant 0 : i32
    %c0_i32_1 = arith.constant 0 : i32
    return %arg0, %c0_i32, %c0_i32_0 : i32, i32, i32
  }
  func.func @transform_1(%arg0: i32) -> (i32, i32) {
    %c0_i32 = arith.constant 0 : i32
    %c0_i32_0 = arith.constant 0 : i32
    %c0_i32_1 = arith.constant 0 : i32
    return %c0_i32, %c0_i32_0 : i32, i32
  }
  func.func @transform_2(%arg0: i32) -> (i32, i32) {
    %c0_i32 = arith.constant 0 : i32
    %c0_i32_0 = arith.constant 0 : i32
    %c0_i32_1 = arith.constant 0 : i32
    return %c0_i32, %c0_i32_0 : i32, i32
  }
  func.func @transform_3(%arg0: i32) -> (i32, i32) {
    %c0_i32 = arith.constant 0 : i32
    %c0_i32_0 = arith.constant 0 : i32
    %c0_i32_1 = arith.constant 0 : i32
    return %c0_i32, %c0_i32_0 : i32, i32
  }
  func.func @transform_4(%arg0: i32) -> (i32, i32) {
    %c0_i32 = arith.constant 0 : i32
    %c0_i32_0 = arith.constant 0 : i32
    %c0_i32_1 = arith.constant 0 : i32
    return %c0_i32, %c0_i32_0 : i32, i32
  }
  func.func @transform_5(%arg0: i32) -> (i32, i32, i32) {
    %c0_i32 = arith.constant 0 : i32
    %c0_i32_0 = arith.constant 0 : i32
    %c0_i32_1 = arith.constant 0 : i32
    return %arg0, %c0_i32, %c0_i32_0 : i32, i32, i32
  }
}

module attributes {stable_mosaic.version = 11 : i64} {
  func.func @kernel(%arg0: i32, %arg1: memref<1x12x128xf32, #tpu.memory_space<vmem>>, %arg2: memref<1x12x128xf32, #tpu.memory_space<vmem>>, %arg3: memref<1x8x128xf32, #tpu.memory_space<vmem>>, %arg4: memref<128x128xf32, #tpu.memory_space<vmem>>, %arg5: memref<1x128xf32, #tpu.memory_space<vmem>>, %arg6: memref<1x128xf32, #tpu.memory_space<vmem>>, %arg7: memref<1x128xf32, #tpu.memory_space<vmem>>, %arg8: memref<128x128xf32, #tpu.memory_space<vmem>>, %arg9: memref<1x128xf32, #tpu.memory_space<vmem>>, %arg10: memref<128x128xf32, #tpu.memory_space<vmem>>, %arg11: memref<1x128xf32, #tpu.memory_space<vmem>>, %arg12: memref<128x128xf32, #tpu.memory_space<vmem>>, %arg13: memref<1x128xf32, #tpu.memory_space<vmem>>, %arg14: memref<128x128xf32, #tpu.memory_space<vmem>>, %arg15: memref<1x128xf32, #tpu.memory_space<vmem>>, %arg16: memref<1x128xf32, #tpu.memory_space<vmem>>, %arg17: memref<1x128xf32, #tpu.memory_space<vmem>>, %arg18: memref<128x128xf32, #tpu.memory_space<vmem>>, %arg19: memref<1x128xf32, #tpu.memory_space<vmem>>, %arg20: memref<128x128xf32, #tpu.memory_space<vmem>>, %arg21: memref<1x128xf32, #tpu.memory_space<vmem>>, %arg22: memref<1x128xf32, #tpu.memory_space<vmem>>, %arg23: memref<1x128xf32, #tpu.memory_space<vmem>>, %arg24: memref<1x12x128xf32, #tpu.memory_space<vmem>>) attributes {dimension_semantics = [#tpu.dimension_semantics<parallel>], iteration_bounds = array<i64: 2>, scalar_prefetch = 0 : i64, scratch_operands = 0 : i64, tpu.core_type = #tpu.core_type<tc>, window_params = [{transform_indices = @transform_0, window_bounds = array<i64: 1, 12, 128>}, {transform_indices = @transform_1, window_bounds = array<i64: 1, 12, 128>}, {transform_indices = @transform_2, window_bounds = array<i64: 1, 8, 128>}, {pipeline_mode = #tpu.pipeline_mode<synchronous>, transform_indices = @transform_3, window_bounds = array<i64: 128, 128>}, {pipeline_mode = #tpu.pipeline_mode<synchronous>, transform_indices = @transform_4, window_bounds = array<i64: 1, 128>}, {pipeline_mode = #tpu.pipeline_mode<synchronous>, transform_indices = @transform_5, window_bounds = array<i64: 1, 128>}, {pipeline_mode = #tpu.pipeline_mode<synchronous>, transform_indices = @transform_6, window_bounds = array<i64: 1, 128>}, {pipeline_mode = #tpu.pipeline_mode<synchronous>, transform_indices = @transform_7, window_bounds = array<i64: 128, 128>}, {pipeline_mode = #tpu.pipeline_mode<synchronous>, transform_indices = @transform_8, window_bounds = array<i64: 1, 128>}, {pipeline_mode = #tpu.pipeline_mode<synchronous>, transform_indices = @transform_9, window_bounds = array<i64: 128, 128>}, {pipeline_mode = #tpu.pipeline_mode<synchronous>, transform_indices = @transform_10, window_bounds = array<i64: 1, 128>}, {pipeline_mode = #tpu.pipeline_mode<synchronous>, transform_indices = @transform_11, window_bounds = array<i64: 128, 128>}, {pipeline_mode = #tpu.pipeline_mode<synchronous>, transform_indices = @transform_12, window_bounds = array<i64: 1, 128>}, {pipeline_mode = #tpu.pipeline_mode<synchronous>, transform_indices = @transform_13, window_bounds = array<i64: 128, 128>}, {pipeline_mode = #tpu.pipeline_mode<synchronous>, transform_indices = @transform_14, window_bounds = array<i64: 1, 128>}, {pipeline_mode = #tpu.pipeline_mode<synchronous>, transform_indices = @transform_15, window_bounds = array<i64: 1, 128>}, {pipeline_mode = #tpu.pipeline_mode<synchronous>, transform_indices = @transform_16, window_bounds = array<i64: 1, 128>}, {pipeline_mode = #tpu.pipeline_mode<synchronous>, transform_indices = @transform_17, window_bounds = array<i64: 128, 128>}, {pipeline_mode = #tpu.pipeline_mode<synchronous>, transform_indices = @transform_18, window_bounds = array<i64: 1, 128>}, {pipeline_mode = #tpu.pipeline_mode<synchronous>, transform_indices = @transform_19, window_bounds = array<i64: 128, 128>}, {pipeline_mode = #tpu.pipeline_mode<synchronous>, transform_indices = @transform_20, window_bounds = array<i64: 1, 128>}, {pipeline_mode = #tpu.pipeline_mode<synchronous>, transform_indices = @transform_21, window_bounds = array<i64: 1, 128>}, {pipeline_mode = #tpu.pipeline_mode<synchronous>, transform_indices = @transform_22, window_bounds = array<i64: 1, 128>}, {transform_indices = @transform_23, window_bounds = array<i64: 1, 12, 128>}]} {
    %c0 = arith.constant 0 : index
    %c0_0 = arith.constant 0 : index
    %c0_1 = arith.constant 0 : index
    %0 = vector.load %arg1[%c0, %c0_0, %c0_1] : memref<1x12x128xf32, #tpu.memory_space<vmem>>, vector<1x12x128xf32>
    %1 = vector.shape_cast %0 : vector<1x12x128xf32> to vector<12x128xf32>
    %c0_2 = arith.constant 0 : index
    %c0_3 = arith.constant 0 : index
    %c0_4 = arith.constant 0 : index
    %2 = vector.load %arg3[%c0_2, %c0_3, %c0_4] : memref<1x8x128xf32, #tpu.memory_space<vmem>>, vector<1x8x128xf32>
    %3 = vector.shape_cast %2 : vector<1x8x128xf32> to vector<8x128xf32>
    %c0_5 = arith.constant 0 : index
    %c0_6 = arith.constant 0 : index
    %c0_7 = arith.constant 0 : index
    %4 = vector.load %arg2[%c0_5, %c0_6, %c0_7] : memref<1x12x128xf32, #tpu.memory_space<vmem>>, vector<1x12x128xf32>
    %5 = vector.shape_cast %4 : vector<1x12x128xf32> to vector<12x128xf32>
    %c0_8 = arith.constant 0 : index
    %c0_9 = arith.constant 0 : index
    %6 = vector.load %arg4[%c0_8, %c0_9] : memref<128x128xf32, #tpu.memory_space<vmem>>, vector<128x128xf32>
    %cst = arith.constant dense<0.000000e+00> : vector<12x128xf32>
    %7 = tpu.matmul %5, %6, %cst {dimension_numbers = #tpu.dot_dimension_numbers<[1], [0], [0], [1], [0, 0, 1, 1], [], []>} : vector<12x128xf32>, vector<128x128xf32>, vector<12x128xf32> -> vector<12x128xf32>
    %c0_10 = arith.constant 0 : index
    %c0_11 = arith.constant 0 : index
    %8 = vector.load %arg5[%c0_10, %c0_11] : memref<1x128xf32, #tpu.memory_space<vmem>>, vector<1x128xf32>
    %9 = vector.broadcast %8 : vector<1x128xf32> to vector<12x128xf32>
    %10 = arith.addf %7, %9 : vector<12x128xf32>
    %11 = arith.addf %1, %10 : vector<12x128xf32>
    %c0_12 = arith.constant 0 : index
    %c0_13 = arith.constant 0 : index
    %12 = vector.load %arg6[%c0_12, %c0_13] : memref<1x128xf32, #tpu.memory_space<vmem>>, vector<1x128xf32>
    %c0_14 = arith.constant 0 : index
    %c0_15 = arith.constant 0 : index
    %13 = vector.load %arg7[%c0_14, %c0_15] : memref<1x128xf32, #tpu.memory_space<vmem>>, vector<1x128xf32>
    %cst_16 = arith.constant dense<0.000000e+00> : vector<12xf32>
    %14 = vector.multi_reduction <add>, %11, %cst_16 [1] : vector<12x128xf32> to vector<12xf32>
    %15 = vector.shape_cast %14 : vector<12xf32> to vector<12x1xf32>
    %cst_17 = arith.constant 1.280000e+02 : f32
    %16 = vector.broadcast %cst_17 : f32 to vector<12x1xf32>
    %17 = arith.divf %15, %16 : vector<12x1xf32>
    %18 = vector.broadcast %17 : vector<12x1xf32> to vector<12x128xf32>
    %19 = arith.subf %11, %18 : vector<12x128xf32>
    %20 = arith.mulf %19, %19 : vector<12x128xf32>
    %cst_18 = arith.constant dense<0.000000e+00> : vector<12xf32>
    %21 = vector.multi_reduction <add>, %20, %cst_18 [1] : vector<12x128xf32> to vector<12xf32>
    %22 = vector.shape_cast %21 : vector<12xf32> to vector<12x1xf32>
    %cst_19 = arith.constant 1.280000e+02 : f32
    %23 = vector.broadcast %cst_19 : f32 to vector<12x1xf32>
    %24 = arith.divf %22, %23 : vector<12x1xf32>
    %cst_20 = arith.constant 9.99999974E-6 : f32
    %25 = vector.broadcast %cst_20 : f32 to vector<12x1xf32>
    %26 = arith.addf %24, %25 : vector<12x1xf32>
    %27 = math.rsqrt %26 : vector<12x1xf32>
    %28 = vector.broadcast %27 : vector<12x1xf32> to vector<12x128xf32>
    %29 = arith.mulf %19, %28 : vector<12x128xf32>
    %30 = vector.broadcast %12 : vector<1x128xf32> to vector<12x128xf32>
    %31 = arith.mulf %29, %30 : vector<12x128xf32>
    %32 = vector.broadcast %13 : vector<1x128xf32> to vector<12x128xf32>
    %33 = arith.addf %31, %32 : vector<12x128xf32>
    %c0_21 = arith.constant 0 : index
    %c0_22 = arith.constant 0 : index
    %34 = vector.load %arg8[%c0_21, %c0_22] : memref<128x128xf32, #tpu.memory_space<vmem>>, vector<128x128xf32>
    %cst_23 = arith.constant dense<0.000000e+00> : vector<12x128xf32>
    %35 = tpu.matmul %33, %34, %cst_23 {dimension_numbers = #tpu.dot_dimension_numbers<[1], [0], [0], [1], [0, 0, 1, 1], [], []>} : vector<12x128xf32>, vector<128x128xf32>, vector<12x128xf32> -> vector<12x128xf32>
    %c0_24 = arith.constant 0 : index
    %c0_25 = arith.constant 0 : index
    %36 = vector.load %arg9[%c0_24, %c0_25] : memref<1x128xf32, #tpu.memory_space<vmem>>, vector<1x128xf32>
    %37 = vector.broadcast %36 : vector<1x128xf32> to vector<12x128xf32>
    %38 = arith.addf %35, %37 : vector<12x128xf32>
    %c0_26 = arith.constant 0 : index
    %c0_27 = arith.constant 0 : index
    %39 = vector.load %arg10[%c0_26, %c0_27] : memref<128x128xf32, #tpu.memory_space<vmem>>, vector<128x128xf32>
    %cst_28 = arith.constant dense<0.000000e+00> : vector<8x128xf32>
    %40 = tpu.matmul %3, %39, %cst_28 {dimension_numbers = #tpu.dot_dimension_numbers<[1], [0], [0], [1], [0, 0, 1, 1], [], []>} : vector<8x128xf32>, vector<128x128xf32>, vector<8x128xf32> -> vector<8x128xf32>
    %c0_29 = arith.constant 0 : index
    %c0_30 = arith.constant 0 : index
    %41 = vector.load %arg11[%c0_29, %c0_30] : memref<1x128xf32, #tpu.memory_space<vmem>>, vector<1x128xf32>
    %42 = vector.broadcast %41 : vector<1x128xf32> to vector<8x128xf32>
    %43 = arith.addf %40, %42 : vector<8x128xf32>
    %c0_31 = arith.constant 0 : index
    %c0_32 = arith.constant 0 : index
    %44 = vector.load %arg12[%c0_31, %c0_32] : memref<128x128xf32, #tpu.memory_space<vmem>>, vector<128x128xf32>
    %cst_33 = arith.constant dense<0.000000e+00> : vector<8x128xf32>
    %45 = tpu.matmul %3, %44, %cst_33 {dimension_numbers = #tpu.dot_dimension_numbers<[1], [0], [0], [1], [0, 0, 1, 1], [], []>} : vector<8x128xf32>, vector<128x128xf32>, vector<8x128xf32> -> vector<8x128xf32>
    %c0_34 = arith.constant 0 : index
    %c0_35 = arith.constant 0 : index
    %46 = vector.load %arg13[%c0_34, %c0_35] : memref<1x128xf32, #tpu.memory_space<vmem>>, vector<1x128xf32>
    %47 = vector.broadcast %46 : vector<1x128xf32> to vector<8x128xf32>
    %48 = arith.addf %45, %47 : vector<8x128xf32>
    %49 = vector.extract_strided_slice %38 {offsets = [0, 0], sizes = [12, 32], strides = [1, 1]} : vector<12x128xf32> to vector<12x32xf32>
    %50 = vector.extract_strided_slice %43 {offsets = [0, 0], sizes = [8, 32], strides = [1, 1]} : vector<8x128xf32> to vector<8x32xf32>
    %51 = vector.extract_strided_slice %48 {offsets = [0, 0], sizes = [8, 32], strides = [1, 1]} : vector<8x128xf32> to vector<8x32xf32>
    %cst_36 = arith.constant dense<0.000000e+00> : vector<12x8xf32>
    %52 = tpu.matmul %49, %50, %cst_36 {dimension_numbers = #tpu.dot_dimension_numbers<[1], [1], [0], [0], [0, 0, 1, 0], [], []>} : vector<12x32xf32>, vector<8x32xf32>, vector<12x8xf32> -> vector<12x8xf32>
    %cst_37 = arith.constant 0.176776692 : f32
    %53 = vector.broadcast %cst_37 : f32 to vector<12x8xf32>
    %54 = arith.mulf %52, %53 : vector<12x8xf32>
    %cst_38 = arith.constant dense<0xFF800000> : vector<12xf32>
    %55 = vector.multi_reduction <maximumf>, %54, %cst_38 [1] : vector<12x8xf32> to vector<12xf32>
    %56 = vector.shape_cast %55 : vector<12xf32> to vector<12x1xf32>
    %57 = vector.broadcast %56 : vector<12x1xf32> to vector<12x8xf32>
    %58 = arith.subf %54, %57 : vector<12x8xf32>
    %59 = math.exp %58 : vector<12x8xf32>
    %cst_39 = arith.constant dense<0.000000e+00> : vector<12xf32>
    %60 = vector.multi_reduction <add>, %59, %cst_39 [1] : vector<12x8xf32> to vector<12xf32>
    %61 = vector.shape_cast %60 : vector<12xf32> to vector<12x1xf32>
    %62 = vector.broadcast %61 : vector<12x1xf32> to vector<12x8xf32>
    %63 = arith.divf %59, %62 : vector<12x8xf32>
    %cst_40 = arith.constant dense<0.000000e+00> : vector<12x32xf32>
    %64 = tpu.matmul %63, %51, %cst_40 {dimension_numbers = #tpu.dot_dimension_numbers<[1], [0], [0], [1], [0, 0, 1, 1], [], []>} : vector<12x8xf32>, vector<8x32xf32>, vector<12x32xf32> -> vector<12x32xf32>
    %65 = vector.extract_strided_slice %38 {offsets = [0, 32], sizes = [12, 32], strides = [1, 1]} : vector<12x128xf32> to vector<12x32xf32>
    %66 = vector.extract_strided_slice %43 {offsets = [0, 32], sizes = [8, 32], strides = [1, 1]} : vector<8x128xf32> to vector<8x32xf32>
    %67 = vector.extract_strided_slice %48 {offsets = [0, 32], sizes = [8, 32], strides = [1, 1]} : vector<8x128xf32> to vector<8x32xf32>
    %cst_41 = arith.constant dense<0.000000e+00> : vector<12x8xf32>
    %68 = tpu.matmul %65, %66, %cst_41 {dimension_numbers = #tpu.dot_dimension_numbers<[1], [1], [0], [0], [0, 0, 1, 0], [], []>} : vector<12x32xf32>, vector<8x32xf32>, vector<12x8xf32> -> vector<12x8xf32>
    %cst_42 = arith.constant 0.176776692 : f32
    %69 = vector.broadcast %cst_42 : f32 to vector<12x8xf32>
    %70 = arith.mulf %68, %69 : vector<12x8xf32>
    %cst_43 = arith.constant dense<0xFF800000> : vector<12xf32>
    %71 = vector.multi_reduction <maximumf>, %70, %cst_43 [1] : vector<12x8xf32> to vector<12xf32>
    %72 = vector.shape_cast %71 : vector<12xf32> to vector<12x1xf32>
    %73 = vector.broadcast %72 : vector<12x1xf32> to vector<12x8xf32>
    %74 = arith.subf %70, %73 : vector<12x8xf32>
    %75 = math.exp %74 : vector<12x8xf32>
    %cst_44 = arith.constant dense<0.000000e+00> : vector<12xf32>
    %76 = vector.multi_reduction <add>, %75, %cst_44 [1] : vector<12x8xf32> to vector<12xf32>
    %77 = vector.shape_cast %76 : vector<12xf32> to vector<12x1xf32>
    %78 = vector.broadcast %77 : vector<12x1xf32> to vector<12x8xf32>
    %79 = arith.divf %75, %78 : vector<12x8xf32>
    %cst_45 = arith.constant dense<0.000000e+00> : vector<12x32xf32>
    %80 = tpu.matmul %79, %67, %cst_45 {dimension_numbers = #tpu.dot_dimension_numbers<[1], [0], [0], [1], [0, 0, 1, 1], [], []>} : vector<12x8xf32>, vector<8x32xf32>, vector<12x32xf32> -> vector<12x32xf32>
    %81 = vector.extract_strided_slice %38 {offsets = [0, 64], sizes = [12, 32], strides = [1, 1]} : vector<12x128xf32> to vector<12x32xf32>
    %82 = vector.extract_strided_slice %43 {offsets = [0, 64], sizes = [8, 32], strides = [1, 1]} : vector<8x128xf32> to vector<8x32xf32>
    %83 = vector.extract_strided_slice %48 {offsets = [0, 64], sizes = [8, 32], strides = [1, 1]} : vector<8x128xf32> to vector<8x32xf32>
    %cst_46 = arith.constant dense<0.000000e+00> : vector<12x8xf32>
    %84 = tpu.matmul %81, %82, %cst_46 {dimension_numbers = #tpu.dot_dimension_numbers<[1], [1], [0], [0], [0, 0, 1, 0], [], []>} : vector<12x32xf32>, vector<8x32xf32>, vector<12x8xf32> -> vector<12x8xf32>
    %cst_47 = arith.constant 0.176776692 : f32
    %85 = vector.broadcast %cst_47 : f32 to vector<12x8xf32>
    %86 = arith.mulf %84, %85 : vector<12x8xf32>
    %cst_48 = arith.constant dense<0xFF800000> : vector<12xf32>
    %87 = vector.multi_reduction <maximumf>, %86, %cst_48 [1] : vector<12x8xf32> to vector<12xf32>
    %88 = vector.shape_cast %87 : vector<12xf32> to vector<12x1xf32>
    %89 = vector.broadcast %88 : vector<12x1xf32> to vector<12x8xf32>
    %90 = arith.subf %86, %89 : vector<12x8xf32>
    %91 = math.exp %90 : vector<12x8xf32>
    %cst_49 = arith.constant dense<0.000000e+00> : vector<12xf32>
    %92 = vector.multi_reduction <add>, %91, %cst_49 [1] : vector<12x8xf32> to vector<12xf32>
    %93 = vector.shape_cast %92 : vector<12xf32> to vector<12x1xf32>
    %94 = vector.broadcast %93 : vector<12x1xf32> to vector<12x8xf32>
    %95 = arith.divf %91, %94 : vector<12x8xf32>
    %cst_50 = arith.constant dense<0.000000e+00> : vector<12x32xf32>
    %96 = tpu.matmul %95, %83, %cst_50 {dimension_numbers = #tpu.dot_dimension_numbers<[1], [0], [0], [1], [0, 0, 1, 1], [], []>} : vector<12x8xf32>, vector<8x32xf32>, vector<12x32xf32> -> vector<12x32xf32>
    %97 = vector.extract_strided_slice %38 {offsets = [0, 96], sizes = [12, 32], strides = [1, 1]} : vector<12x128xf32> to vector<12x32xf32>
    %98 = vector.extract_strided_slice %43 {offsets = [0, 96], sizes = [8, 32], strides = [1, 1]} : vector<8x128xf32> to vector<8x32xf32>
    %99 = vector.extract_strided_slice %48 {offsets = [0, 96], sizes = [8, 32], strides = [1, 1]} : vector<8x128xf32> to vector<8x32xf32>
    %cst_51 = arith.constant dense<0.000000e+00> : vector<12x8xf32>
    %100 = tpu.matmul %97, %98, %cst_51 {dimension_numbers = #tpu.dot_dimension_numbers<[1], [1], [0], [0], [0, 0, 1, 0], [], []>} : vector<12x32xf32>, vector<8x32xf32>, vector<12x8xf32> -> vector<12x8xf32>
    %cst_52 = arith.constant 0.176776692 : f32
    %101 = vector.broadcast %cst_52 : f32 to vector<12x8xf32>
    %102 = arith.mulf %100, %101 : vector<12x8xf32>
    %cst_53 = arith.constant dense<0xFF800000> : vector<12xf32>
    %103 = vector.multi_reduction <maximumf>, %102, %cst_53 [1] : vector<12x8xf32> to vector<12xf32>
    %104 = vector.shape_cast %103 : vector<12xf32> to vector<12x1xf32>
    %105 = vector.broadcast %104 : vector<12x1xf32> to vector<12x8xf32>
    %106 = arith.subf %102, %105 : vector<12x8xf32>
    %107 = math.exp %106 : vector<12x8xf32>
    %cst_54 = arith.constant dense<0.000000e+00> : vector<12xf32>
    %108 = vector.multi_reduction <add>, %107, %cst_54 [1] : vector<12x8xf32> to vector<12xf32>
    %109 = vector.shape_cast %108 : vector<12xf32> to vector<12x1xf32>
    %110 = vector.broadcast %109 : vector<12x1xf32> to vector<12x8xf32>
    %111 = arith.divf %107, %110 : vector<12x8xf32>
    %cst_55 = arith.constant dense<0.000000e+00> : vector<12x32xf32>
    %112 = tpu.matmul %111, %99, %cst_55 {dimension_numbers = #tpu.dot_dimension_numbers<[1], [0], [0], [1], [0, 0, 1, 1], [], []>} : vector<12x8xf32>, vector<8x32xf32>, vector<12x32xf32> -> vector<12x32xf32>
    %113 = tpu.concatenate %64, %80, %96, %112 in 1 : vector<12x32xf32>, vector<12x32xf32>, vector<12x32xf32>, vector<12x32xf32> -> vector<12x128xf32>
    %c0_56 = arith.constant 0 : index
    %c0_57 = arith.constant 0 : index
    %114 = vector.load %arg14[%c0_56, %c0_57] : memref<128x128xf32, #tpu.memory_space<vmem>>, vector<128x128xf32>
    %cst_58 = arith.constant dense<0.000000e+00> : vector<12x128xf32>
    %115 = tpu.matmul %113, %114, %cst_58 {dimension_numbers = #tpu.dot_dimension_numbers<[1], [0], [0], [1], [0, 0, 1, 1], [], []>} : vector<12x128xf32>, vector<128x128xf32>, vector<12x128xf32> -> vector<12x128xf32>
    %c0_59 = arith.constant 0 : index
    %c0_60 = arith.constant 0 : index
    %116 = vector.load %arg15[%c0_59, %c0_60] : memref<1x128xf32, #tpu.memory_space<vmem>>, vector<1x128xf32>
    %117 = vector.broadcast %116 : vector<1x128xf32> to vector<12x128xf32>
    %118 = arith.addf %115, %117 : vector<12x128xf32>
    %119 = arith.addf %33, %118 : vector<12x128xf32>
    %c0_61 = arith.constant 0 : index
    %c0_62 = arith.constant 0 : index
    %120 = vector.load %arg16[%c0_61, %c0_62] : memref<1x128xf32, #tpu.memory_space<vmem>>, vector<1x128xf32>
    %c0_63 = arith.constant 0 : index
    %c0_64 = arith.constant 0 : index
    %121 = vector.load %arg17[%c0_63, %c0_64] : memref<1x128xf32, #tpu.memory_space<vmem>>, vector<1x128xf32>
    %cst_65 = arith.constant dense<0.000000e+00> : vector<12xf32>
    %122 = vector.multi_reduction <add>, %119, %cst_65 [1] : vector<12x128xf32> to vector<12xf32>
    %123 = vector.shape_cast %122 : vector<12xf32> to vector<12x1xf32>
    %cst_66 = arith.constant 1.280000e+02 : f32
    %124 = vector.broadcast %cst_66 : f32 to vector<12x1xf32>
    %125 = arith.divf %123, %124 : vector<12x1xf32>
    %126 = vector.broadcast %125 : vector<12x1xf32> to vector<12x128xf32>
    %127 = arith.subf %119, %126 : vector<12x128xf32>
    %128 = arith.mulf %127, %127 : vector<12x128xf32>
    %cst_67 = arith.constant dense<0.000000e+00> : vector<12xf32>
    %129 = vector.multi_reduction <add>, %128, %cst_67 [1] : vector<12x128xf32> to vector<12xf32>
    %130 = vector.shape_cast %129 : vector<12xf32> to vector<12x1xf32>
    %cst_68 = arith.constant 1.280000e+02 : f32
    %131 = vector.broadcast %cst_68 : f32 to vector<12x1xf32>
    %132 = arith.divf %130, %131 : vector<12x1xf32>
    %cst_69 = arith.constant 9.99999974E-6 : f32
    %133 = vector.broadcast %cst_69 : f32 to vector<12x1xf32>
    %134 = arith.addf %132, %133 : vector<12x1xf32>
    %135 = math.rsqrt %134 : vector<12x1xf32>
    %136 = vector.broadcast %135 : vector<12x1xf32> to vector<12x128xf32>
    %137 = arith.mulf %127, %136 : vector<12x128xf32>
    %138 = vector.broadcast %120 : vector<1x128xf32> to vector<12x128xf32>
    %139 = arith.mulf %137, %138 : vector<12x128xf32>
    %140 = vector.broadcast %121 : vector<1x128xf32> to vector<12x128xf32>
    %141 = arith.addf %139, %140 : vector<12x128xf32>
    %c0_70 = arith.constant 0 : index
    %c0_71 = arith.constant 0 : index
    %142 = vector.load %arg18[%c0_70, %c0_71] : memref<128x128xf32, #tpu.memory_space<vmem>>, vector<128x128xf32>
    %cst_72 = arith.constant dense<0.000000e+00> : vector<12x128xf32>
    %143 = tpu.matmul %141, %142, %cst_72 {dimension_numbers = #tpu.dot_dimension_numbers<[1], [0], [0], [1], [0, 0, 1, 1], [], []>} : vector<12x128xf32>, vector<128x128xf32>, vector<12x128xf32> -> vector<12x128xf32>
    %c0_73 = arith.constant 0 : index
    %c0_74 = arith.constant 0 : index
    %144 = vector.load %arg19[%c0_73, %c0_74] : memref<1x128xf32, #tpu.memory_space<vmem>>, vector<1x128xf32>
    %145 = vector.broadcast %144 : vector<1x128xf32> to vector<12x128xf32>
    %146 = arith.addf %143, %145 : vector<12x128xf32>
    %cst_75 = arith.constant 5.000000e-01 : f32
    %147 = vector.broadcast %cst_75 : f32 to vector<12x128xf32>
    %148 = arith.mulf %147, %146 : vector<12x128xf32>
    %cst_76 = arith.constant 4.471500e-02 : f32
    %149 = vector.broadcast %cst_76 : f32 to vector<12x128xf32>
    %150 = arith.mulf %149, %146 : vector<12x128xf32>
    %151 = arith.mulf %150, %146 : vector<12x128xf32>
    %152 = arith.mulf %151, %146 : vector<12x128xf32>
    %153 = arith.addf %146, %152 : vector<12x128xf32>
    %cst_77 = arith.constant 0.797884583 : f32
    %154 = vector.broadcast %cst_77 : f32 to vector<12x128xf32>
    %155 = arith.mulf %154, %153 : vector<12x128xf32>
    %156 = math.tanh %155 : vector<12x128xf32>
    %cst_78 = arith.constant 1.000000e+00 : f32
    %157 = vector.broadcast %cst_78 : f32 to vector<12x128xf32>
    %158 = arith.addf %157, %156 : vector<12x128xf32>
    %159 = arith.mulf %148, %158 : vector<12x128xf32>
    %c0_79 = arith.constant 0 : index
    %c0_80 = arith.constant 0 : index
    %160 = vector.load %arg20[%c0_79, %c0_80] : memref<128x128xf32, #tpu.memory_space<vmem>>, vector<128x128xf32>
    %cst_81 = arith.constant dense<0.000000e+00> : vector<12x128xf32>
    %161 = tpu.matmul %159, %160, %cst_81 {dimension_numbers = #tpu.dot_dimension_numbers<[1], [0], [0], [1], [0, 0, 1, 1], [], []>} : vector<12x128xf32>, vector<128x128xf32>, vector<12x128xf32> -> vector<12x128xf32>
    %c0_82 = arith.constant 0 : index
    %c0_83 = arith.constant 0 : index
    %162 = vector.load %arg21[%c0_82, %c0_83] : memref<1x128xf32, #tpu.memory_space<vmem>>, vector<1x128xf32>
    %163 = vector.broadcast %162 : vector<1x128xf32> to vector<12x128xf32>
    %164 = arith.addf %161, %163 : vector<12x128xf32>
    %165 = arith.addf %141, %164 : vector<12x128xf32>
    %c0_84 = arith.constant 0 : index
    %c0_85 = arith.constant 0 : index
    %166 = vector.load %arg22[%c0_84, %c0_85] : memref<1x128xf32, #tpu.memory_space<vmem>>, vector<1x128xf32>
    %c0_86 = arith.constant 0 : index
    %c0_87 = arith.constant 0 : index
    %167 = vector.load %arg23[%c0_86, %c0_87] : memref<1x128xf32, #tpu.memory_space<vmem>>, vector<1x128xf32>
    %cst_88 = arith.constant dense<0.000000e+00> : vector<12xf32>
    %168 = vector.multi_reduction <add>, %165, %cst_88 [1] : vector<12x128xf32> to vector<12xf32>
    %169 = vector.shape_cast %168 : vector<12xf32> to vector<12x1xf32>
    %cst_89 = arith.constant 1.280000e+02 : f32
    %170 = vector.broadcast %cst_89 : f32 to vector<12x1xf32>
    %171 = arith.divf %169, %170 : vector<12x1xf32>
    %172 = vector.broadcast %171 : vector<12x1xf32> to vector<12x128xf32>
    %173 = arith.subf %165, %172 : vector<12x128xf32>
    %174 = arith.mulf %173, %173 : vector<12x128xf32>
    %cst_90 = arith.constant dense<0.000000e+00> : vector<12xf32>
    %175 = vector.multi_reduction <add>, %174, %cst_90 [1] : vector<12x128xf32> to vector<12xf32>
    %176 = vector.shape_cast %175 : vector<12xf32> to vector<12x1xf32>
    %cst_91 = arith.constant 1.280000e+02 : f32
    %177 = vector.broadcast %cst_91 : f32 to vector<12x1xf32>
    %178 = arith.divf %176, %177 : vector<12x1xf32>
    %cst_92 = arith.constant 9.99999974E-6 : f32
    %179 = vector.broadcast %cst_92 : f32 to vector<12x1xf32>
    %180 = arith.addf %178, %179 : vector<12x1xf32>
    %181 = math.rsqrt %180 : vector<12x1xf32>
    %182 = vector.broadcast %181 : vector<12x1xf32> to vector<12x128xf32>
    %183 = arith.mulf %173, %182 : vector<12x128xf32>
    %184 = vector.broadcast %166 : vector<1x128xf32> to vector<12x128xf32>
    %185 = arith.mulf %183, %184 : vector<12x128xf32>
    %186 = vector.broadcast %167 : vector<1x128xf32> to vector<12x128xf32>
    %187 = arith.addf %185, %186 : vector<12x128xf32>
    %c0_93 = arith.constant 0 : index
    %c0_94 = arith.constant 0 : index
    %c0_95 = arith.constant 0 : index
    %188 = vector.load %arg24[%c0_93, %c0_94, %c0_95] : memref<1x12x128xf32, #tpu.memory_space<vmem>>, vector<1x12x128xf32>
    %189 = vector.shape_cast %188 : vector<1x12x128xf32> to vector<12x128xf32>
    %190 = vector.shape_cast %187 : vector<12x128xf32> to vector<1x12x128xf32>
    tpu.vector_store %arg24[%c0_93, %c0_94, %c0_95], %190 {strides = array<i32>} : memref<1x12x128xf32, #tpu.memory_space<vmem>>, vector<1x12x128xf32>,
    return
  }
  func.func @transform_0(%arg0: i32) -> (i32, i32, i32) {
    %c0_i32 = arith.constant 0 : i32
    %c0_i32_0 = arith.constant 0 : i32
    %c0_i32_1 = arith.constant 0 : i32
    return %arg0, %c0_i32, %c0_i32_0 : i32, i32, i32
  }
  func.func @transform_1(%arg0: i32) -> (i32, i32, i32) {
    %c0_i32 = arith.constant 0 : i32
    %c0_i32_0 = arith.constant 0 : i32
    %c0_i32_1 = arith.constant 0 : i32
    return %arg0, %c0_i32, %c0_i32_0 : i32, i32, i32
  }
  func.func @transform_2(%arg0: i32) -> (i32, i32, i32) {
    %c0_i32 = arith.constant 0 : i32
    %c0_i32_0 = arith.constant 0 : i32
    %c0_i32_1 = arith.constant 0 : i32
    return %arg0, %c0_i32, %c0_i32_0 : i32, i32, i32
  }
  func.func @transform_3(%arg0: i32) -> (i32, i32) {
    %c0_i32 = arith.constant 0 : i32
    %c0_i32_0 = arith.constant 0 : i32
    %c0_i32_1 = arith.constant 0 : i32
    return %c0_i32, %c0_i32_0 : i32, i32
  }
  func.func @transform_4(%arg0: i32) -> (i32, i32) {
    %c0_i32 = arith.constant 0 : i32
    %c0_i32_0 = arith.constant 0 : i32
    %c0_i32_1 = arith.constant 0 : i32
    return %c0_i32, %c0_i32_0 : i32, i32
  }
  func.func @transform_5(%arg0: i32) -> (i32, i32) {
    %c0_i32 = arith.constant 0 : i32
    %c0_i32_0 = arith.constant 0 : i32
    %c0_i32_1 = arith.constant 0 : i32
    return %c0_i32, %c0_i32_0 : i32, i32
  }
  func.func @transform_6(%arg0: i32) -> (i32, i32) {
    %c0_i32 = arith.constant 0 : i32
    %c0_i32_0 = arith.constant 0 : i32
    %c0_i32_1 = arith.constant 0 : i32
    return %c0_i32, %c0_i32_0 : i32, i32
  }
  func.func @transform_7(%arg0: i32) -> (i32, i32) {
    %c0_i32 = arith.constant 0 : i32
    %c0_i32_0 = arith.constant 0 : i32
    %c0_i32_1 = arith.constant 0 : i32
    return %c0_i32, %c0_i32_0 : i32, i32
  }
  func.func @transform_8(%arg0: i32) -> (i32, i32) {
    %c0_i32 = arith.constant 0 : i32
    %c0_i32_0 = arith.constant 0 : i32
    %c0_i32_1 = arith.constant 0 : i32
    return %c0_i32, %c0_i32_0 : i32, i32
  }
  func.func @transform_9(%arg0: i32) -> (i32, i32) {
    %c0_i32 = arith.constant 0 : i32
    %c0_i32_0 = arith.constant 0 : i32
    %c0_i32_1 = arith.constant 0 : i32
    return %c0_i32, %c0_i32_0 : i32, i32
  }
  func.func @transform_10(%arg0: i32) -> (i32, i32) {
    %c0_i32 = arith.constant 0 : i32
    %c0_i32_0 = arith.constant 0 : i32
    %c0_i32_1 = arith.constant 0 : i32
    return %c0_i32, %c0_i32_0 : i32, i32
  }
  func.func @transform_11(%arg0: i32) -> (i32, i32) {
    %c0_i32 = arith.constant 0 : i32
    %c0_i32_0 = arith.constant 0 : i32
    %c0_i32_1 = arith.constant 0 : i32
    return %c0_i32, %c0_i32_0 : i32, i32
  }
  func.func @transform_12(%arg0: i32) -> (i32, i32) {
    %c0_i32 = arith.constant 0 : i32
    %c0_i32_0 = arith.constant 0 : i32
    %c0_i32_1 = arith.constant 0 : i32
    return %c0_i32, %c0_i32_0 : i32, i32
  }
  func.func @transform_13(%arg0: i32) -> (i32, i32) {
    %c0_i32 = arith.constant 0 : i32
    %c0_i32_0 = arith.constant 0 : i32
    %c0_i32_1 = arith.constant 0 : i32
    return %c0_i32, %c0_i32_0 : i32, i32
  }
  func.func @transform_14(%arg0: i32) -> (i32, i32) {
    %c0_i32 = arith.constant 0 : i32
    %c0_i32_0 = arith.constant 0 : i32
    %c0_i32_1 = arith.constant 0 : i32
    return %c0_i32, %c0_i32_0 : i32, i32
  }
  func.func @transform_15(%arg0: i32) -> (i32, i32) {
    %c0_i32 = arith.constant 0 : i32
    %c0_i32_0 = arith.constant 0 : i32
    %c0_i32_1 = arith.constant 0 : i32
    return %c0_i32, %c0_i32_0 : i32, i32
  }
  func.func @transform_16(%arg0: i32) -> (i32, i32) {
    %c0_i32 = arith.constant 0 : i32
    %c0_i32_0 = arith.constant 0 : i32
    %c0_i32_1 = arith.constant 0 : i32
    return %c0_i32, %c0_i32_0 : i32, i32
  }
  func.func @transform_17(%arg0: i32) -> (i32, i32) {
    %c0_i32 = arith.constant 0 : i32
    %c0_i32_0 = arith.constant 0 : i32
    %c0_i32_1 = arith.constant 0 : i32
    return %c0_i32, %c0_i32_0 : i32, i32
  }
  func.func @transform_18(%arg0: i32) -> (i32, i32) {
    %c0_i32 = arith.constant 0 : i32
    %c0_i32_0 = arith.constant 0 : i32
    %c0_i32_1 = arith.constant 0 : i32
    return %c0_i32, %c0_i32_0 : i32, i32
  }
  func.func @transform_19(%arg0: i32) -> (i32, i32) {
    %c0_i32 = arith.constant 0 : i32
    %c0_i32_0 = arith.constant 0 : i32
    %c0_i32_1 = arith.constant 0 : i32
    return %c0_i32, %c0_i32_0 : i32, i32
  }
  func.func @transform_20(%arg0: i32) -> (i32, i32) {
    %c0_i32 = arith.constant 0 : i32
    %c0_i32_0 = arith.constant 0 : i32
    %c0_i32_1 = arith.constant 0 : i32
    return %c0_i32, %c0_i32_0 : i32, i32
  }
  func.func @transform_21(%arg0: i32) -> (i32, i32) {
    %c0_i32 = arith.constant 0 : i32
    %c0_i32_0 = arith.constant 0 : i32
    %c0_i32_1 = arith.constant 0 : i32
    return %c0_i32, %c0_i32_0 : i32, i32
  }
  func.func @transform_22(%arg0: i32) -> (i32, i32) {
    %c0_i32 = arith.constant 0 : i32
    %c0_i32_0 = arith.constant 0 : i32
    %c0_i32_1 = arith.constant 0 : i32
    return %c0_i32, %c0_i32_0 : i32, i32
  }
  func.func @transform_23(%arg0: i32) -> (i32, i32, i32) {
    %c0_i32 = arith.constant 0 : i32
    %c0_i32_0 = arith.constant 0 : i32
    %c0_i32_1 = arith.constant 0 : i32
    return %arg0, %c0_i32, %c0_i32_0 : i32, i32, i32
  }
}

</mosaic_0001>

<bundles_post_ra>
// kernel: informer_forward.10
= control target key start
LH: loop header
LB: loop body
LE: loop exit
PB: predicated region body
PF: predicated region fallthrough
CT: control target
= control target key end

     0   :  { %s731_s21 = smov 0   ;;  %s780_s0 = inlined_call_operand.vmem [shape: f32[2,12,4], index: 0, kind: input, shape index: {}]   ;;  %s781_s1 = inlined_call_operand.vmem [shape: f32[2,12,128], index: 1, kind: input, shape index: {}]   ;;  %s782_s2 = inlined_call_operand.vmem [shape: f32[4,128], index: 2, kind: input, shape index: {}]   ;;  %s783_s3 = inlined_call_operand.vmem [shape: f32[4,128], index: 3, kind: input, shape index: {}]   ;;  %s784_s4 = inlined_call_operand.vmem [shape: f32[4,128], index: 4, kind: input, shape index: {}]   ;;  %s785_s5 = inlined_call_operand.vmem [shape: f32[1,128], index: 5, kind: input, shape index: {}]   ;;  %s786_s6 = inlined_call_operand.vmem [shape: f32[2,12,128], index: 6, kind: output, shape index: {}]  }
   0x1 LB: > { %s630_s22 = sadd.s32 4294967295, %s694_s21   ;;  %p634_p0 = scmp.ge.s32.totalorder %s694_s21, 1  ;;  %s694_s21 = sphi %s731_s21, %s16_s21  }
   0x2   : > { %p222_p1 = scmp.lt.s32.totalorder %s694_s21, 3 }
   0x4   : > { %p223_p2 = pnand %p634_p0, %p222_p1 }
   0x5   : > { %p257_p3 = scmp.lt.s32.totalorder (!%p223_p2), %s630_s22, 1 }
   0x6   : > { %226 = sbr.rel (%p223_p2) target bundleno = 224 (0xe0), region = 44 }
   0xb   : > { %v294_v0 = vld [vmem:[%s783_s3] sm:$0xf]  ;;  %vm300_vm0 = vcmask 1043456   ;;  %s788_s22 = smov (!%p257_p3, %s630_s22), 1  ;;  %vm295_vm1 = vcmask 31744   ;;  %vm278_vm2 = vcmask 1040384  }
   0xc   : > { %665 = vmatprep.subr.msk.mxu0 %vm300_vm0, %v294_v0  ;;  %v462_v1 = vld [vmem:[%s784_s4] sm:$0xf]  ;;  %s753_s29 = sshll.u32 %s788_s22, 4  ;;  %vm284_vm3 = vcmask 1046528   ;;  %vm291_vm4 = vcmask 1042432  }
   0xd   : > { %v293_v2 = vld [vmem:[%s782_s2] sm:$0xf]  ;;  %666 = vmatpush3.msk.msra.mxu0 %vm300_vm0, %v294_v0  ;;  %s261_s8 = scalar_lea.vmem %s780_s0, %s753_s29  ;;  %s266_s11 = scalar_lea.vmem %s781_s1, %s753_s29 }
   0xe   : > { %670 = vmatprep.subr.msk.mxu1 %vm300_vm0, %v293_v2  ;;  %675 = vmatprep.subr.msk.mxu0 %vm300_vm0, %v462_v1  ;;  %v272_v3 = vld [vmem:[%s261_s8] sm:$0xff]  ;;  %v273_v4 = vld [vmem:[%s261_s8 + $0x8] sm:$0xf]  ;;  %s271_s16 = scalar_lea.vmem %s786_s6, %s753_s29 }
   0xf   : > { %671 = vmatpush3.msk.msra.mxu1 %vm300_vm0, %v293_v2  ;;  %v285_v5 = vrot.slane %v272_v3, 1  ;;  %v289_v6 = vrot.slane %v272_v3, 5  ;;  %667 = vmatprep.mubr.msk.f32.mxu0 %vm295_vm1, %v272_v3  ;;  %v280_v7 = vrot.slane %v273_v4, 7  ;;  %v286_v8 = vrot.slane %v273_v4, 1  ;;  %v650_v20 = vld [vmem:[%s785_s5] ss:$0 sm:$0xff] }
  0x10   : > { %668 = vmatmul.mubr.msk.f32.vlgmr.msra.gmra.mxu0 %vm295_vm1, %v273_v4  ;;  %v275_v9 = vrot.slane %v273_v4, 3  ;;  %v279_v10 = vrot.slane %v272_v3, 7  ;;  %v558_v25 = vld [vmem:[%s266_s11 + $0x8] sm:$0xf]  ;;  %v557_v28 = vld [vmem:[%s266_s11] sm:$0xff] }
  0x11   : > { %676 = vmatpush3.msk.msra.mxu0 %vm300_vm0, %v462_v1  ;;  %v287_v11 = vsel %vm284_vm3, %v285_v5, %v286_v8  ;;  %v292_v12 = vsel %vm291_vm4, %v286_v8, %v289_v6 }
  0x12   : > { %v283_v13 = vsel %vm278_vm2, %v275_v9, %v279_v10  ;;  %v281_v14 = vsel %vm278_vm2, %v279_v10, %v280_v7  ;;  %677 = vmatprep.mubr.msk.f32.mxu0 %vm295_vm1, %v287_v11 }
  0x13   : > { %672 = vmatprep.mubr.msk.f32.mxu1 %vm295_vm1, %v283_v13 }
  0x14   : > { %673 = vmatmul.mubr.msk.f32.vlgmr.msra.gmra.mxu1 %vm295_vm1, %v281_v14  ;;  %678 = vmatmul.mubr.msk.f32.vlgmr.msra.gmra.mxu0 %vm295_vm1, %v292_v12 }
  0xd0   : > { %v669_v15 = vpop.f32.mrf.mxu0 }
  0xd2   : > { %v370_v16 = vpop.f32.mrf.mxu0 }
  0xd4   : > { %v674_v17 = vpop.f32.mrf.mxu1  ;;  %v679_v18 = vpop.f32.mrf.mxu0 }
  0xd5   : > { %v459_v19 = vadd.f32 %v674_v17, %v669_v15 }
  0xd6   : > { %v453_v21 = vpop.f32.mrf.mxu1  ;;  %v537_v22 = vpop.f32.mrf.mxu0 }
  0xd7   : > { %v547_v23 = vadd.f32 %v679_v18, %v459_v19  ;;  %v454_v24 = vadd.f32 %v453_v21, %v370_v16 }
  0xd9   : > { %v556_v26 = vadd.f32 %v650_v20, %v547_v23  ;;  %v546_v27 = vadd.f32 %v537_v22, %v454_v24 }
  0xdb   : > { %v560_v29 = vadd.f32 %v558_v25, %v556_v26  ;;  %v555_v30 = vadd.f32 %v650_v20, %v546_v27 }
  0xdd   : > { %562 = vst [vmem:[%s271_s16 + $0x8] sm:$0xf] %v560_v29  ;;  %v559_v31 = vadd.f32 %v557_v28, %v555_v30 }
  0xdf   : > { %561 = vst [vmem:[%s271_s16] sm:$0xff] %v559_v31 }
  0xe0 PF: > { %s16_s21 = sadd.s32 1, %s694_s21  }
  0xe1   : > { %p13_p4 = scmp.ge.s32.totalorder %s16_s21, 4  }
  0xe3   :  { %15 = sbr.rel (!%p13_p4) target bundleno = 1 (0x1), region = 77 }

// kernel: informer_forward.15
= control target key start
LH: loop header
LB: loop body
LE: loop exit
PB: predicated region body
PF: predicated region fallthrough
CT: control target
= control target key end

     0   :  { %s1847_s24 = smov 0   ;;  %s2197_s0 = inlined_call_operand.vmem [shape: f32[2,12,128], index: 0, kind: input, shape index: {}]   ;;  %s2198_s1 = inlined_call_operand.vmem [shape: f32[128,128], index: 1, kind: input, shape index: {}]   ;;  %s2199_s2 = inlined_call_operand.vmem [shape: f32[1,128], index: 2, kind: input, shape index: {}]   ;;  %s2200_s3 = inlined_call_operand.vmem [shape: f32[128,128], index: 3, kind: input, shape index: {}]   ;;  %s2201_s4 = inlined_call_operand.vmem [shape: f32[1,128], index: 4, kind: input, shape index: {}]   ;;  %s2202_s5 = inlined_call_operand.vmem [shape: f32[128,128], index: 5, kind: input, shape index: {}]   ;;  %s2203_s6 = inlined_call_operand.vmem [shape: f32[1,128], index: 6, kind: input, shape index: {}]   ;;  %s2204_s7 = inlined_call_operand.vmem [shape: f32[2,48,32], index: 7, kind: output, shape index: {}]  }
   0x1 LB: > { %s1463_s25 = sadd.s32 4294967295, %s1802_s24   ;;  %p1467_p0 = scmp.ge.s32.totalorder %s1802_s24, 1  ;;  %s1802_s24 = sphi %s1847_s24, %s17_s24  }
   0x2   : > { %p237_p1 = scmp.lt.s32.totalorder %s1802_s24, 3 }
   0x4   : > { %p238_p2 = pnand %p1467_p0, %p237_p1 }
   0x5   : > { %p269_p3 = scmp.lt.s32.totalorder (!%p238_p2), %s1463_s25, 1  ;;  %s1804_s26 = smov (!%p238_p2), 96  }
   0x6   : > { %241 = sbr.rel (%p238_p2) target bundleno = 2013 (0x7dd), region = 48  ;;  %s1806_s10 = smov (!%p238_p2), 32  }
   0xb   : > { %v394_v0 = vld [vmem:[%s2200_s3 + $0x78] sm:$0xff]  ;;  %v393_v1 = vld [vmem:[%s2200_s3 + $0x70] sm:$0xff]  ;;  %v392_v4 = vld [vmem:[%s2200_s3 + $0x68] sm:$0xff]  ;;  %s2206_s25 = smov (!%p269_p3, %s1463_s25), 1  ;;  %vm580_vm0 = vcmask 261120   ;;  %v575_v60 = vlaneseq  ;;  %vm674_vm2 = vcmask 97280  }
   0xc   : > { %v296_v2 = vld [vmem:[%s2198_s1 + $0x78] sm:$0xff]  ;;  %1626 = vmatprep.subr.mxu1 %v394_v0  ;;  %v295_v3 = vld [vmem:[%s2198_s1 + $0x70] sm:$0xff]  ;;  %v294_v5 = vld [vmem:[%s2198_s1 + $0x68] sm:$0xff]  ;;  %s1504_s9 = sshll.u32 %s2206_s25, 4  ;;  %vm678_vm4 = vcmask 93184   ;;  %vm704_vm5 = vcmask 1043456  }
   0xd   : > { %1591 = vmatprep.subr.mxu0 %v296_v2  ;;  %1627 = vmatpush3.msra.mxu1 %v394_v0  ;;  %v391_v6 = vld [vmem:[%s2200_s3 + $0x60] sm:$0xff]  ;;  %v390_v8 = vld [vmem:[%s2200_s3 + $0x58] sm:$0xff]  ;;  %v389_v10 = vld [vmem:[%s2200_s3 + $0x50] sm:$0xff]  ;;  %s273_s20 = scalar_lea.vmem %s2197_s0, %s1504_s9  ;;  %v2044_v61 = vshrl.u32 %v575_v60, 7  ;;  %v2046_v63 = vand.u32 127, %v575_v60  ;;  %s1752_s29 = smul.u32 48, %s2206_s25 }
   0xe   : > { %1592 = vmatpush3.msra.mxu0 %v296_v2  ;;  %1628 = vmatprep.subr.mxu1 %v393_v1  ;;  %v293_v7 = vld [vmem:[%s2198_s1 + $0x60] sm:$0xff]  ;;  %v292_v9 = vld [vmem:[%s2198_s1 + $0x58] sm:$0xff]  ;;  %v291_v11 = vld [vmem:[%s2198_s1 + $0x50] sm:$0xff]  ;;  %vm1400_vm6 = vcmask 257024   ;;  %s1805_s25 = smov 64  }
   0xf   : > { %1593 = vmatprep.subr.mxu0 %v295_v3  ;;  %1629 = vmatpush3.msra.mxu1 %v393_v1  ;;  %v388_v12 = vld [vmem:[%s2200_s3 + $0x48] sm:$0xff]  ;;  %v387_v14 = vld [vmem:[%s2200_s3 + $0x40] sm:$0xff]  ;;  %v386_v16 = vld [vmem:[%s2200_s3 + $0x38] sm:$0xff]  ;;  %v2049_v0 = vadd.s32 8, %v2044_v61  ;;  %vm670_vm1 = vcmp.gt.s32.totalorder %v2046_v63, %v2044_v61  ;;  %s2094_s9 = scalar_lea.vmem %s2204_s7, %s1752_s29 }
  0x10   : > { %1594 = vmatpush3.msra.mxu0 %v295_v3  ;;  %1630 = vmatprep.subr.mxu1 %v392_v4  ;;  %v290_v13 = vld [vmem:[%s2198_s1 + $0x48] sm:$0xff]  ;;  %v289_v15 = vld [vmem:[%s2198_s1 + $0x40] sm:$0xff]  ;;  %v288_v17 = vld [vmem:[%s2198_s1 + $0x38] sm:$0xff] }
  0x11   : > { %1595 = vmatprep.subr.mxu0 %v294_v5  ;;  %1631 = vmatpush3.msra.mxu1 %v392_v4  ;;  %v385_v18 = vld [vmem:[%s2200_s3 + $0x30] sm:$0xff]  ;;  %v384_v20 = vld [vmem:[%s2200_s3 + $0x28] sm:$0xff]  ;;  %v383_v22 = vld [vmem:[%s2200_s3 + $0x20] sm:$0xff]  ;;  %vm671_vm3 = vcmp.gt.s32.totalorder %v2046_v63, %v2049_v0 }
  0x12   : > { %1596 = vmatpush3.msra.mxu0 %v294_v5  ;;  %1632 = vmatprep.subr.mxu1 %v391_v6  ;;  %v287_v19 = vld [vmem:[%s2198_s1 + $0x30] sm:$0xff]  ;;  %v286_v21 = vld [vmem:[%s2198_s1 + $0x28] sm:$0xff]  ;;  %v285_v23 = vld [vmem:[%s2198_s1 + $0x20] sm:$0xff] }
  0x13   : > { %1597 = vmatprep.subr.mxu0 %v293_v7  ;;  %1633 = vmatpush3.msra.mxu1 %v391_v6  ;;  %v382_v24 = vld [vmem:[%s2200_s3 + $0x18] sm:$0xff]  ;;  %v381_v26 = vld [vmem:[%s2200_s3 + $0x10] sm:$0xff]  ;;  %v380_v28 = vld [vmem:[%s2200_s3 + $0x8] sm:$0xff] }
  0x14   : > { %1598 = vmatpush3.msra.mxu0 %v293_v7  ;;  %1634 = vmatprep.subr.mxu1 %v390_v8  ;;  %v284_v25 = vld [vmem:[%s2198_s1 + $0x18] sm:$0xff]  ;;  %v283_v27 = vld [vmem:[%s2198_s1 + $0x10] sm:$0xff]  ;;  %v282_v29 = vld [vmem:[%s2198_s1 + $0x8] sm:$0xff] }
  0x15   : > { %1599 = vmatprep.subr.mxu0 %v292_v9  ;;  %1635 = vmatpush3.msra.mxu1 %v390_v8  ;;  %v279_v30 = vld [vmem:[%s273_s20] sm:$0xff]  ;;  %v1961_v33 = vld [vmem:[%s273_s20 + $0x8] sm:$0xf]  ;;  %v492_v34 = vld [vmem:[%s2202_s5 + $0x78] sm:$0xff] }
  0x16   : > { %1600 = vmatpush3.msra.mxu0 %v292_v9  ;;  %1636 = vmatprep.subr.mxu1 %v389_v10  ;;  %v379_v31 = vld [vmem:[%s2200_s3] sm:$0xff]  ;;  %v491_v35 = vld [vmem:[%s2202_s5 + $0x70] sm:$0xff]  ;;  %v490_v36 = vld [vmem:[%s2202_s5 + $0x68] sm:$0xff] }
  0x17   : > { %1601 = vmatprep.subr.mxu0 %v291_v11  ;;  %1637 = vmatpush3.msra.mxu1 %v389_v10  ;;  %v281_v32 = vld [vmem:[%s2198_s1] sm:$0xff]  ;;  %v488_v41 = vld [vmem:[%s2202_s5 + $0x58] sm:$0xff]  ;;  %v487_v47 = vld [vmem:[%s2202_s5 + $0x50] sm:$0xff] }
  0x18   : > { %1602 = vmatpush3.msra.mxu0 %v291_v11  ;;  %1638 = vmatprep.subr.mxu1 %v388_v12  ;;  %v1472_v37 = vld [vmem:[%s2201_s4] ss:$0 sm:$0xff]  ;;  %v486_v49 = vld [vmem:[%s2202_s5 + $0x48] sm:$0xff]  ;;  %v484_v52 = vld [vmem:[%s2202_s5 + $0x38] sm:$0xff] }
  0x19   : > { %1603 = vmatprep.subr.mxu0 %v290_v13  ;;  %1639 = vmatpush3.msra.mxu1 %v388_v12  ;;  %v489_v38 = vld [vmem:[%s2202_s5 + $0x60] sm:$0xff]  ;;  %v483_v53 = vld [vmem:[%s2202_s5 + $0x30] sm:$0xff]  ;;  %v482_v54 = vld [vmem:[%s2202_s5 + $0x28] sm:$0xff] }
  0x1a   : > { %1604 = vmatpush3.msra.mxu0 %v290_v13  ;;  %1640 = vmatprep.subr.mxu1 %v387_v14  ;;  %v1471_v44 = vld [vmem:[%s2199_s2] ss:$0 sm:$0xff]  ;;  %v480_v56 = vld [vmem:[%s2202_s5 + $0x18] sm:$0xff]  ;;  %v479_v57 = vld [vmem:[%s2202_s5 + $0x10] sm:$0xff] }
  0x1b   : > { %1605 = vmatprep.subr.mxu0 %v289_v15  ;;  %1641 = vmatpush3.msra.mxu1 %v387_v14  ;;  %v485_v50 = vld [vmem:[%s2202_s5 + $0x40] sm:$0xff]  ;;  %v478_v58 = vld [vmem:[%s2202_s5 + $0x8] sm:$0xff] }
  0x1c   : > { %1606 = vmatpush3.msra.mxu0 %v289_v15  ;;  %1642 = vmatprep.subr.mxu1 %v386_v16  ;;  %v481_v55 = vld [vmem:[%s2202_s5 + $0x20] sm:$0xff] }
  0x1d   : > { %1607 = vmatprep.subr.mxu0 %v288_v17  ;;  %1643 = vmatpush3.msra.mxu1 %v386_v16  ;;  %v477_v59 = vld [vmem:[%s2202_s5] sm:$0xff] }
  0x1e   : > { %1608 = vmatpush3.msra.mxu0 %v288_v17  ;;  %1644 = vmatprep.subr.mxu1 %v385_v18  ;;  %v1473_v9 = vld [vmem:[%s2203_s6] ss:$0 sm:$0xff] }
  0x1f   : > { %1609 = vmatprep.subr.mxu0 %v287_v19  ;;  %1645 = vmatpush3.msra.mxu1 %v385_v18 }
  0x20   : > { %1610 = vmatpush3.msra.mxu0 %v287_v19  ;;  %1646 = vmatprep.subr.mxu1 %v384_v20 }
  0x21   : > { %1611 = vmatprep.subr.mxu0 %v286_v21  ;;  %1647 = vmatpush3.msra.mxu1 %v384_v20 }
  0x22   : > { %1612 = vmatpush3.msra.mxu0 %v286_v21  ;;  %1648 = vmatprep.subr.mxu1 %v383_v22 }
  0x23   : > { %1613 = vmatprep.subr.mxu0 %v285_v23  ;;  %1649 = vmatpush3.msra.mxu1 %v383_v22 }
  0x24   : > { %1614 = vmatpush3.msra.mxu0 %v285_v23  ;;  %1650 = vmatprep.subr.mxu1 %v382_v24 }
  0x25   : > { %1615 = vmatprep.subr.mxu0 %v284_v25  ;;  %1651 = vmatpush3.msra.mxu1 %v382_v24 }
  0x26   : > { %1616 = vmatpush3.msra.mxu0 %v284_v25  ;;  %1652 = vmatprep.subr.mxu1 %v381_v26 }
  0x27   : > { %1617 = vmatprep.subr.mxu0 %v283_v27  ;;  %1653 = vmatpush3.msra.mxu1 %v381_v26 }
  0x28   : > { %1618 = vmatpush3.msra.mxu0 %v283_v27  ;;  %1654 = vmatprep.subr.mxu1 %v380_v28 }
  0x29   : > { %1619 = vmatprep.subr.mxu0 %v282_v29  ;;  %1655 = vmatpush3.msra.mxu1 %v380_v28 }
  0x2a   : > { %1658 = vmatprep.mubr.f32.mxu1 %v279_v30  ;;  %1656 = vmatprep.subr.mxu1 %v379_v31 }
  0x2b   : > { %1620 = vmatpush3.msra.mxu0 %v282_v29  ;;  %1657 = vmatpush3.msra.mxu1 %v379_v31 }
  0x2c   : > { %1621 = vmatprep.subr.mxu0 %v281_v32  ;;  %1659 = vmatmul.mubr.f32.vlgmr.msra.gmra.mxu1 %v1961_v33 }
  0x2d   : > { %1622 = vmatpush3.msra.mxu0 %v281_v32  ;;  %1623 = vmatprep.mubr.f32.mxu0 %v279_v30 }
  0x2e   : > { %1624 = vmatmul.mubr.f32.vlgmr.msra.gmra.mxu0 %v1961_v33  ;;  %1661 = vmatprep.subr.mxu0 %v492_v34 }
  0x2f   : > { %1693 = vmatprep.mubr.f32.mxu0 %v279_v30  ;;  %1662 = vmatpush3.msra.mxu0 %v492_v34 }
  0x30   : > { %1663 = vmatprep.subr.mxu0 %v491_v35 }
  0x31   : > { %1664 = vmatpush3.msra.mxu0 %v491_v35 }
  0x32   : > { %1665 = vmatprep.subr.mxu0 %v490_v36 }
  0x33   : > { %1666 = vmatpush3.msra.mxu0 %v490_v36 }
  0x34   : > { %1667 = vmatprep.subr.mxu0 %v489_v38 }
  0x35   : > { %1668 = vmatpush3.msra.mxu0 %v489_v38 }
  0x36   : > { %1669 = vmatprep.subr.mxu0 %v488_v41 }
  0x37   : > { %1670 = vmatpush3.msra.mxu0 %v488_v41 }
  0x38   : > { %1671 = vmatprep.subr.mxu0 %v487_v47 }
  0x39   : > { %1672 = vmatpush3.msra.mxu0 %v487_v47 }
  0x3a   : > { %1673 = vmatprep.subr.mxu0 %v486_v49 }
  0x3b   : > { %1674 = vmatpush3.msra.mxu0 %v486_v49 }
  0x3c   : > { %1675 = vmatprep.subr.mxu0 %v485_v50 }
  0x3d   : > { %1676 = vmatpush3.msra.mxu0 %v485_v50 }
  0x3e   : > { %1677 = vmatprep.subr.mxu0 %v484_v52 }
  0x3f   : > { %1678 = vmatpush3.msra.mxu0 %v484_v52 }
  0x40   : > { %1679 = vmatprep.subr.mxu0 %v483_v53 }
  0x41   : > { %1680 = vmatpush3.msra.mxu0 %v483_v53 }
  0x42   : > { %1681 = vmatprep.subr.mxu0 %v482_v54 }
  0x43   : > { %1682 = vmatpush3.msra.mxu0 %v482_v54 }
  0x44   : > { %1683 = vmatprep.subr.mxu0 %v481_v55 }
  0x45   : > { %1684 = vmatpush3.msra.mxu0 %v481_v55 }
  0x46   : > { %1685 = vmatprep.subr.mxu0 %v480_v56 }
  0x47   : > { %1686 = vmatpush3.msra.mxu0 %v480_v56 }
  0x48   : > { %1687 = vmatprep.subr.mxu0 %v479_v57 }
  0x49   : > { %1688 = vmatpush3.msra.mxu0 %v479_v57 }
  0x4a   : > { %1689 = vmatprep.subr.mxu0 %v478_v58 }
  0x4b   : > { %1690 = vmatpush3.msra.mxu0 %v478_v58 }
  0x4c   : > { %1691 = vmatprep.subr.mxu0 %v477_v59 }
  0x4d   : > { %1692 = vmatpush3.msra.mxu0 %v477_v59 }
  0x4e   : > { %1694 = vmatmul.mubr.f32.vlgmr.msra.gmra.mxu0 %v1961_v33 }
  0xec   : > { %v1660_v39 = vpop.f32.mrf.mxu1 }
  0xed   : > { %v1980_v40 = vadd.f32 %v1660_v39, %v1472_v37 }
  0xee   : > { %v468_v42 = vpop.f32.mrf.mxu1  ;;  %v1625_v43 = vpop.f32.mrf.mxu0 }
  0xef   : > { %v1988_v45 = vadd.f32 %v1472_v37, %v468_v42  ;;  %1696 = vmatprep.subr.msk.mxu1 %vm580_vm0, %v1980_v40  ;;  %v2013_v51 = vadd.f32 %v1625_v43, %v1471_v44 }
  0xf0   : > { %1697 = vmatpush3.xpose.msk.msra.mxu1 %vm580_vm0, %v1980_v40  ;;  %v370_v46 = vpop.f32.mrf.mxu0 }
  0xf1   : > { %787 = vrot.lane.b32.xlu1 %v1988_v45, %s1804_s26  ;;  %v1999_v48 = vadd.f32 %v1471_v44, %v370_v46  ;;  %1698 = vmatprep.subr.msk.mxu1 %vm580_vm0, %v1988_v45 }
  0xf3   : > { %1700 = vmatprep.mubr.msk.f32.mxu1 %vm580_vm0, %v1999_v48 }
  0xf4   : > { %1699 = vmatpush3.xpose.msk.msra.mxu1 %vm580_vm0, %v1988_v45 }
  0xf5   : > { %783 = vrot.lane.b32.xlu1 %v1999_v48, %s1804_s26 }
  0xf7   : > { %1701 = vmatmul.mubr.msk.f32.vlgmr.msra.gmra.mxu1 %vm580_vm0, %v2013_v51 }
 0x10e   : > { %v1695_v8 = vpop.f32.mrf.mxu0 }
 0x10f   : > { %v2066_v10 = vadd.f32 %v1695_v8, %v1473_v9 }
 0x110   : > { %v566_v11 = vpop.f32.mrf.mxu0 }
 0x111   : > { %v2068_v12 = vadd.f32 %v1473_v9, %v566_v11  ;;  %1703 = vmatprep.subr.msk.mxu1 %vm704_vm5, %v2066_v10 }
 0x112   : > { %1704 = vmatpush3.msk.msra.mxu1 %vm704_vm5, %v2066_v10 }
 0x113   : > { %1705 = vmatprep.subr.mxu1 %v2068_v12 }
 0x114   : > { %1706 = vmatpush3.msra.mxu1 %v2068_v12 }
 0x163   : > { %v788_v24 = vpop.permute.xlu1 %787 }
 0x167   : > { %v784_v25 = vpop.permute.xlu1 %783 }
 0x1b7   : > { %v1702_v62 = vpop.f32.mrf.mxu1 }
 0x1b8   : > { %v669_v2 = vmul.f32 0.17677669, %v1702_v62 }
 0x1b9   : > { %v659_v1 = vpop.f32.mrf.mxu1 }
 0x1ba   : > { %v668_v3 = vmul.f32 0.17677669, %v659_v1  ;;  %v673_v6 = vsel %vm671_vm3, -inf, %v669_v2 }
 0x1bb   : > { %v679_v7 = vsel %vm678_vm4, %v673_v6, -inf }
 0x1bc   : > { %v672_v4 = vsel %vm670_vm1, -inf, %v668_v3 }
 0x1bd   : > { %v675_v5 = vsel %vm674_vm2, %v672_v4, -inf }
 0x1be   : > { %676 = vmax.xlane.f32.xlu0 %v675_v5 }
 0x1c2   : > { %680 = vmax.xlane.f32.xlu0 %v679_v7 }
 0x1d8   : > { %789 = vrot.lane.b32.xlu0 %v1980_v40, %s1804_s26 }
 0x247   : > { %v677_v13 = vpop.xlane.xlu0 %676 }
 0x248   : > { %v682_v14 = vsub.f32 %v672_v4, %v677_v13 }
 0x24a   : > { %v684_v17 = vmul.f32 1.442695, %v682_v14 }
 0x24b   : > { %v681_v15 = vpop.xlane.xlu0 %680 }
 0x24c   : > { %v683_v16 = vsub.f32 %v673_v6, %v681_v15 }
 0x24e   : > { %v686_v18 = vmul.f32 1.442695, %v683_v16 }
 0x24f   : > { %v790_v19 = vpop.permute.xlu0 %789 }
 0x250   : > { %1764 = vpow2.f32 %v686_v18  ;;  %1710 = vmatprep.subr.msk.mxu1 %vm580_vm0, %v790_v19 }
 0x251   : > { %1766 = vpow2.f32 %v684_v17 }
 0x25d   : > { %v1765_v20 = vpop.eup %1764 }
 0x25e   : > { %v691_v21 = vsel %vm678_vm4, %v1765_v20, 0.0  ;;  %v1767_v22 = vpop.eup %1766 }
 0x25f   : > { %692 = vadd.xlane.f32.xlu1 %v691_v21  ;;  %v688_v23 = vsel %vm674_vm2, %v1767_v22, 0.0 }
 0x263   : > { %689 = vadd.xlane.f32.xlu1 %v688_v23 }
 0x274   : > { %785 = vrot.lane.b32.xlu1 %v2013_v51, %s1804_s26 }
 0x2e8   : > { %v693_v26 = vpop.xlane.xlu1 %692 }
 0x2e9   : > { %1768 = vrcp.f32 %v693_v26 }
 0x2ec   : > { %v690_v27 = vpop.xlane.xlu1 %689 }
 0x2ed   : > { %1770 = vrcp.f32 %v690_v27 }
 0x2f0   : > { %v786_v32 = vpop.permute.xlu1 %785 }
 0x2f6   : > { %v1769_v28 = vpop.eup %1768 }
 0x2f7   : > { %v697_v31 = vmul.f32 %v1769_v28, %v1765_v20 }
 0x2fa   : > { %v1771_v29 = vpop.eup %1770 }
 0x2fb   : > { %v695_v30 = vmul.f32 %v1771_v29, %v1767_v22 }
 0x2fd   : > { %1707 = vmatprep.mubr.msk.f32.mxu1 %vm674_vm2, %v695_v30 }
 0x2fe   : > { %1708 = vmatmul.mubr.msk.f32.vlgmr.msra.gmra.mxu1 %vm674_vm2, %v697_v31 }
 0x2ff   : > { %1711 = vmatpush3.xpose.msk.msra.mxu1 %vm580_vm0, %v790_v19  ;;  %1714 = vmatprep.mubr.msk.f32.mxu1 %vm580_vm0, %v784_v25 }
 0x300   : > { %1712 = vmatprep.subr.msk.mxu1 %vm580_vm0, %v788_v24 }
 0x303   : > { %1713 = vmatpush3.xpose.msk.msra.mxu1 %vm580_vm0, %v788_v24 }
 0x306   : > { %1715 = vmatmul.mubr.msk.f32.vlgmr.msra.gmra.mxu1 %vm580_vm0, %v786_v32 }
 0x3be   : > { %v1709_v33 = vpop.f32.mrf.mxu1 }
 0x3bf   : > { %1401 = vst.msk [vmem:[%s2094_s9 + $0x8] sm:$0xf] %vm1400_vm6, %v1709_v33 }
 0x3c0   : > { %v774_v34 = vpop.f32.mrf.mxu1 }
 0x3c1   : > { %1399 = vst.msk [vmem:[%s2094_s9] sm:$0xff] %vm580_vm0, %v774_v34 }
 0x3c6   : > { %v1716_v35 = vpop.f32.mrf.mxu1 }
 0x3c7   : > { %v875_v36 = vmul.f32 0.17677669, %v1716_v35 }
 0x3c8   : > { %v865_v37 = vpop.f32.mrf.mxu1 }
 0x3c9   : > { %v874_v38 = vmul.f32 0.17677669, %v865_v37  ;;  %v877_v39 = vsel %vm671_vm3, -inf, %v875_v36 }
 0x3ca   : > { %v881_v41 = vsel %vm678_vm4, %v877_v39, -inf }
 0x3cb   : > { %882 = vmax.xlane.f32.xlu1 %v881_v41  ;;  %v876_v42 = vsel %vm670_vm1, -inf, %v874_v38 }
 0x3cc   : > { %v878_v43 = vsel %vm674_vm2, %v876_v42, -inf }
 0x3cd   : > { %879 = vmax.xlane.f32.xlu0 %v878_v43 }
 0x3dc   : > { %901 = vrot.lane.b32.xlu1 %v2068_v12, %s1804_s26 }
 0x3e0   : > { %995 = vrot.lane.b32.xlu1 %v1980_v40, %s1805_s25 }
 0x3e4   : > { %993 = vrot.lane.b32.xlu1 %v1988_v45, %s1805_s25 }
 0x3e8   : > { %1200 = vrot.lane.b32.xlu1 %v1980_v40, %s1806_s10 }
 0x3ec   : > { %1198 = vrot.lane.b32.xlu1 %v1988_v45, %s1806_s10 }
 0x3f0   : > { %1196 = vrot.lane.b32.xlu1 %v2013_v51, %s1806_s10 }
 0x454   : > { %v883_v44 = vpop.xlane.xlu1 %882 }
 0x455   : > { %v885_v46 = vsub.f32 %v877_v39, %v883_v44 }
 0x456   : > { %v880_v47 = vpop.xlane.xlu0 %879 }
 0x457   : > { %v888_v49 = vmul.f32 1.442695, %v885_v46  ;;  %v884_v50 = vsub.f32 %v876_v42, %v880_v47 }
 0x458   : > { %v902_v57 = vpop.permute.xlu1 %901 }
 0x459   : > { %1772 = vpow2.f32 %v888_v49  ;;  %v886_v52 = vmul.f32 1.442695, %v884_v50 }
 0x45b   : > { %1774 = vpow2.f32 %v886_v52 }
 0x45c   : > { %v996_v59 = vpop.permute.xlu1 %995 }
 0x460   : > { %v994_v1 = vpop.permute.xlu1 %993 }
 0x464   : > { %v1201_v4 = vpop.permute.xlu1 %1200 }
 0x466   : > { %v1773_v53 = vpop.eup %1772 }
 0x467   : > { %v893_v54 = vsel %vm678_vm4, %v1773_v53, 0.0 }
 0x468   : > { %v1775_v55 = vpop.eup %1774  ;;  %894 = vadd.xlane.f32.xlu0 %v893_v54  ;;  %v1199_v6 = vpop.permute.xlu1 %1198 }
 0x469   : > { %v890_v40 = vsel %vm674_vm2, %v1775_v55, 0.0 }
 0x46c   : > { %891 = vadd.xlane.f32.xlu0 %v890_v40  ;;  %v1197_v7 = vpop.permute.xlu1 %1196 }
 0x482   : > { %903 = vrot.lane.b32.xlu0 %v2066_v10, %s1804_s26 }
 0x486   : > { %989 = vrot.lane.b32.xlu0 %v1999_v48, %s1805_s25 }
 0x48a   : > { %991 = vrot.lane.b32.xlu0 %v2013_v51, %s1805_s25 }
 0x48e   : > { %1194 = vrot.lane.b32.xlu0 %v1999_v48, %s1806_s10 }
 0x4f1   : > { %v895_v45 = vpop.xlane.xlu0 %894 }
 0x4f2   : > { %1776 = vrcp.f32 %v895_v45 }
 0x4f5   : > { %v892_v56 = vpop.xlane.xlu0 %891 }
 0x4f6   : > { %1778 = vrcp.f32 %v892_v56 }
 0x4f9   : > { %v904_v58 = vpop.permute.xlu0 %903 }
 0x4fa   : > { %1717 = vmatprep.subr.msk.mxu1 %vm704_vm5, %v904_v58 }
 0x4fb   : > { %1718 = vmatpush3.msk.msra.mxu1 %vm704_vm5, %v904_v58 }
 0x4fc   : > { %1719 = vmatprep.subr.mxu1 %v902_v57 }
 0x4fd   : > { %1720 = vmatpush3.msra.mxu1 %v902_v57  ;;  %v990_v62 = vpop.permute.xlu0 %989 }
 0x4fe   : > { %1724 = vmatprep.subr.msk.mxu1 %vm580_vm0, %v996_v59 }
 0x4ff   : > { %v1777_v60 = vpop.eup %1776 }
 0x500   : > { %v899_v2 = vmul.f32 %v1777_v60, %v1773_v53 }
 0x501   : > { %v992_v3 = vpop.permute.xlu0 %991 }
 0x503   : > { %v1779_v51 = vpop.eup %1778 }
 0x504   : > { %v897_v48 = vmul.f32 %v1779_v51, %v1775_v55 }
 0x505   : > { %v1195_v5 = vpop.permute.xlu0 %1194 }
 0x506   : > { %1721 = vmatprep.mubr.msk.f32.mxu1 %vm674_vm2, %v897_v48 }
 0x507   : > { %1722 = vmatmul.mubr.msk.f32.vlgmr.msra.gmra.mxu1 %vm674_vm2, %v899_v2 }
 0x508   : > { %1725 = vmatpush3.xpose.msk.msra.mxu1 %vm580_vm0, %v996_v59  ;;  %1728 = vmatprep.mubr.msk.f32.mxu1 %vm580_vm0, %v990_v62 }
 0x509   : > { %1726 = vmatprep.subr.msk.mxu1 %vm580_vm0, %v994_v1 }
 0x50c   : > { %1727 = vmatpush3.xpose.msk.msra.mxu1 %vm580_vm0, %v994_v1 }
 0x50d   : > { %1738 = vmatprep.subr.msk.mxu1 %vm580_vm0, %v1201_v4 }
 0x50f   : > { %1729 = vmatmul.mubr.msk.f32.vlgmr.msra.gmra.mxu1 %vm580_vm0, %v992_v3 }
 0x510   : > { %1739 = vmatpush3.xpose.msk.msra.mxu1 %vm580_vm0, %v1201_v4  ;;  %1742 = vmatprep.mubr.msk.f32.mxu1 %vm580_vm0, %v1195_v5 }
 0x511   : > { %1740 = vmatprep.subr.msk.mxu1 %vm580_vm0, %v1199_v6 }
 0x514   : > { %1741 = vmatpush3.xpose.msk.msra.mxu1 %vm580_vm0, %v1199_v6 }
 0x517   : > { %1743 = vmatmul.mubr.msk.f32.vlgmr.msra.gmra.mxu1 %vm580_vm0, %v1197_v7 }
 0x5c7   : > { %v1723_v8 = vpop.f32.mrf.mxu1 }
 0x5c8   : > { %1403 = vst.msk [vmem:[%s2094_s9 + $0x14] sm:$0xf] %vm1400_vm6, %v1723_v8 }
 0x5c9   : > { %v980_v9 = vpop.f32.mrf.mxu1 }
 0x5ca   : > { %1402 = vst.msk [vmem:[%s2094_s9 + $0xc] sm:$0xff] %vm580_vm0, %v980_v9 }
 0x5cf   : > { %v1730_v11 = vpop.f32.mrf.mxu1 }
 0x5d0   : > { %v1081_v13 = vmul.f32 0.17677669, %v1730_v11 }
 0x5d1   : > { %v1071_v14 = vpop.f32.mrf.mxu1 }
 0x5d2   : > { %v1080_v15 = vmul.f32 0.17677669, %v1071_v14  ;;  %v1083_v16 = vsel %vm671_vm3, -inf, %v1081_v13 }
 0x5d3   : > { %v1087_v17 = vsel %vm678_vm4, %v1083_v16, -inf }
 0x5d4   : > { %1088 = vmax.xlane.f32.xlu1 %v1087_v17  ;;  %v1082_v18 = vsel %vm670_vm1, -inf, %v1080_v15 }
 0x5d5   : > { %v1084_v19 = vsel %vm674_vm2, %v1082_v18, -inf }
 0x5d6   : > { %1085 = vmax.xlane.f32.xlu0 %v1084_v19 }
 0x5d7   : > { %v1744_v20 = vpop.f32.mrf.mxu1 }
 0x5d8   : > { %v1286_v22 = vmul.f32 0.17677669, %v1744_v20 }
 0x5d9   : > { %v1276_v21 = vpop.f32.mrf.mxu1 }
 0x5da   : > { %v1285_v23 = vmul.f32 0.17677669, %v1276_v21  ;;  %v1288_v26 = vsel %vm671_vm3, -inf, %v1286_v22 }
 0x5db   : > { %v1292_v27 = vsel %vm678_vm4, %v1288_v26, -inf }
 0x5dc   : > { %v1287_v24 = vsel %vm670_vm1, -inf, %v1285_v23 }
 0x5dd   : > { %v1289_v25 = vsel %vm674_vm2, %v1287_v24, -inf }
 0x5de   : > { %1290 = vmax.xlane.f32.xlu0 %v1289_v25 }
 0x5e2   : > { %1293 = vmax.xlane.f32.xlu0 %v1292_v27 }
 0x65d   : > { %v1089_v28 = vpop.xlane.xlu1 %1088 }
 0x65e   : > { %v1091_v29 = vsub.f32 %v1083_v16, %v1089_v28 }
 0x65f   : > { %v1086_v30 = vpop.xlane.xlu0 %1085 }
 0x660   : > { %v1094_v31 = vmul.f32 1.442695, %v1091_v29  ;;  %v1090_v32 = vsub.f32 %v1082_v18, %v1086_v30 }
 0x662   : > { %1780 = vpow2.f32 %v1094_v31  ;;  %v1092_v33 = vmul.f32 1.442695, %v1090_v32 }
 0x664   : > { %1782 = vpow2.f32 %v1092_v33 }
 0x667   : > { %v1291_v61 = vpop.xlane.xlu0 %1290 }
 0x668   : > { %v1295_v34 = vsub.f32 %v1287_v24, %v1291_v61 }
 0x66a   : > { %v1297_v35 = vmul.f32 1.442695, %v1295_v34 }
 0x66b   : > { %v1294_v36 = vpop.xlane.xlu0 %1293 }
 0x66c   : > { %1784 = vpow2.f32 %v1297_v35  ;;  %v1296_v37 = vsub.f32 %v1288_v26, %v1294_v36 }
 0x66e   : > { %v1299_v38 = vmul.f32 1.442695, %v1296_v37 }
 0x66f   : > { %v1781_v63 = vpop.eup %1780 }
 0x670   : > { %1786 = vpow2.f32 %v1299_v38  ;;  %v1099_v0 = vsel %vm678_vm4, %v1781_v63, 0.0 }
 0x671   : > { %v1783_v39 = vpop.eup %1782  ;;  %1100 = vadd.xlane.f32.xlu1 %v1099_v0 }
 0x672   : > { %v1096_v41 = vsel %vm674_vm2, %v1783_v39, 0.0 }
 0x673   : > { %1097 = vadd.xlane.f32.xlu0 %v1096_v41 }
 0x679   : > { %v1785_v42 = vpop.eup %1784 }
 0x67a   : > { %v1301_v43 = vsel %vm674_vm2, %v1785_v42, 0.0 }
 0x67b   : > { %1302 = vadd.xlane.f32.xlu0 %v1301_v43 }
 0x67d   : > { %v1787_v44 = vpop.eup %1786 }
 0x67e   : > { %v1304_v46 = vsel %vm678_vm4, %v1787_v44, 0.0 }
 0x67f   : > { %1305 = vadd.xlane.f32.xlu1 %v1304_v46 }
 0x690   : > { %1106 = vrot.lane.b32.xlu1 %v2068_v12, %s1805_s25 }
 0x691   : > { %1108 = vrot.lane.b32.xlu0 %v2066_v10, %s1805_s25 }
 0x694   : > { %1313 = vrot.lane.b32.xlu1 %v2066_v10, %s1806_s10 }
 0x698   : > { %1311 = vrot.lane.b32.xlu1 %v2068_v12, %s1806_s10 }
 0x6fa   : > { %v1101_v47 = vpop.xlane.xlu1 %1100 }
 0x6fb   : > { %1788 = vrcp.f32 %v1101_v47 }
 0x6fc   : > { %v1098_v49 = vpop.xlane.xlu0 %1097 }
 0x6fd   : > { %1790 = vrcp.f32 %v1098_v49 }
 0x704   : > { %v1303_v50 = vpop.xlane.xlu0 %1302 }
 0x705   : > { %1792 = vrcp.f32 %v1303_v50 }
 0x708   : > { %v1306_v52 = vpop.xlane.xlu1 %1305  ;;  %v1109_v53 = vpop.permute.xlu0 %1108 }
 0x709   : > { %v1789_v54 = vpop.eup %1788  ;;  %1794 = vrcp.f32 %v1306_v52  ;;  %1731 = vmatprep.subr.msk.mxu0 %vm704_vm5, %v1109_v53 }
 0x70a   : > { %v1791_v55 = vpop.eup %1790  ;;  %1732 = vmatpush3.msk.msra.mxu0 %vm704_vm5, %v1109_v53  ;;  %v1105_v12 = vmul.f32 %v1789_v54, %v1781_v63 }
 0x70b   : > { %v1103_v40 = vmul.f32 %v1791_v55, %v1783_v39 }
 0x70c   : > { %v1107_v10 = vpop.permute.xlu1 %1106 }
 0x70d   : > { %1733 = vmatprep.subr.mxu0 %v1107_v10  ;;  %1735 = vmatprep.mubr.msk.f32.mxu0 %vm674_vm2, %v1103_v40 }
 0x70e   : > { %1734 = vmatpush3.msra.mxu0 %v1107_v10 }
 0x70f   : > { %1736 = vmatmul.mubr.msk.f32.vlgmr.msra.gmra.mxu0 %vm674_vm2, %v1105_v12 }
 0x710   : > { %v1314_v45 = vpop.permute.xlu1 %1313 }
 0x711   : > { %1745 = vmatprep.subr.msk.mxu0 %vm704_vm5, %v1314_v45 }
 0x712   : > { %v1793_v56 = vpop.eup %1792  ;;  %1746 = vmatpush3.msk.msra.mxu0 %vm704_vm5, %v1314_v45 }
 0x713   : > { %v1308_v57 = vmul.f32 %v1793_v56, %v1785_v42 }
 0x714   : > { %v1312_v58 = vpop.permute.xlu1 %1311 }
 0x715   : > { %1747 = vmatprep.subr.mxu0 %v1312_v58  ;;  %1749 = vmatprep.mubr.msk.f32.mxu0 %vm674_vm2, %v1308_v57 }
 0x716   : > { %v1795_v59 = vpop.eup %1794  ;;  %1748 = vmatpush3.msra.mxu0 %v1312_v58 }
 0x717   : > { %v1310_v60 = vmul.f32 %v1795_v59, %v1787_v44 }
 0x719   : > { %1750 = vmatmul.mubr.msk.f32.vlgmr.msra.gmra.mxu0 %vm674_vm2, %v1310_v60 }
 0x7cf   : > { %v1737_v51 = vpop.f32.mrf.mxu0 }
 0x7d0   : > { %1405 = vst.msk [vmem:[%s2094_s9 + $0x20] sm:$0xf] %vm1400_vm6, %v1737_v51 }
 0x7d1   : > { %v1185_v62 = vpop.f32.mrf.mxu0 }
 0x7d2   : > { %1404 = vst.msk [vmem:[%s2094_s9 + $0x18] sm:$0xff] %vm580_vm0, %v1185_v62 }
 0x7d9   : > { %v1751_v1 = vpop.f32.mrf.mxu0 }
 0x7da   : > { %1407 = vst.msk [vmem:[%s2094_s9 + $0x2c] sm:$0xf] %vm1400_vm6, %v1751_v1 }
 0x7db   : > { %v1390_v48 = vpop.f32.mrf.mxu0 }
 0x7dc   : > { %1406 = vst.msk [vmem:[%s2094_s9 + $0x24] sm:$0xff] %vm580_vm0, %v1390_v48 }
 0x7dd PF: > { %s17_s24 = sadd.s32 1, %s1802_s24  }
 0x7de   : > { %p14_p4 = scmp.ge.s32.totalorder %s17_s24, 4  }
 0x7e0   :  { %16 = sbr.rel (!%p14_p4) target bundleno = 1 (0x1), region = 78 }

// kernel: informer_forward.9
= control target key start
LH: loop header
LB: loop body
LE: loop exit
PB: predicated region body
PF: predicated region fallthrough
CT: control target
= control target key end

     0   :  { %s728_s21 = smov 0   ;;  %s777_s0 = inlined_call_operand.vmem [shape: f32[2,16,4], index: 0, kind: input, shape index: {}]   ;;  %s778_s1 = inlined_call_operand.vmem [shape: f32[2,16,128], index: 1, kind: input, shape index: {}]   ;;  %s779_s2 = inlined_call_operand.vmem [shape: f32[4,128], index: 2, kind: input, shape index: {}]   ;;  %s780_s3 = inlined_call_operand.vmem [shape: f32[4,128], index: 3, kind: input, shape index: {}]   ;;  %s781_s4 = inlined_call_operand.vmem [shape: f32[4,128], index: 4, kind: input, shape index: {}]   ;;  %s782_s5 = inlined_call_operand.vmem [shape: f32[1,128], index: 5, kind: input, shape index: {}]   ;;  %s783_s6 = inlined_call_operand.vmem [shape: f32[2,16,128], index: 6, kind: output, shape index: {}]  }
   0x1 LB: > { %s627_s22 = sadd.s32 4294967295, %s691_s21   ;;  %p631_p0 = scmp.ge.s32.totalorder %s691_s21, 1  ;;  %s691_s21 = sphi %s728_s21, %s16_s21  }
   0x2   : > { %p222_p1 = scmp.lt.s32.totalorder %s691_s21, 3 }
   0x4   : > { %p223_p2 = pnand %p631_p0, %p222_p1 }
   0x5   : > { %p257_p3 = scmp.lt.s32.totalorder (!%p223_p2), %s627_s22, 1 }
   0x6   : > { %226 = sbr.rel (%p223_p2) target bundleno = 223 (0xdf), region = 44 }
   0xb   : > { %v291_v0 = vld [vmem:[%s780_s3] sm:$0xf]  ;;  %vm297_vm0 = vcmask 1043456   ;;  %s785_s22 = smov (!%p257_p3, %s627_s22), 1  ;;  %vm292_vm1 = vcmask 31744   ;;  %vm278_vm2 = vcmask 1040384  }
   0xc   : > { %662 = vmatprep.subr.msk.mxu0 %vm297_vm0, %v291_v0  ;;  %v459_v1 = vld [vmem:[%s781_s4] sm:$0xf]  ;;  %s750_s29 = sshll.u32 %s785_s22, 4  ;;  %vm283_vm3 = vcmask 1046528  }
   0xd   : > { %v290_v2 = vld [vmem:[%s779_s2] sm:$0xf]  ;;  %663 = vmatpush3.msk.msra.mxu0 %vm297_vm0, %v291_v0  ;;  %s261_s8 = scalar_lea.vmem %s777_s0, %s750_s29  ;;  %s266_s11 = scalar_lea.vmem %s778_s1, %s750_s29 }
   0xe   : > { %667 = vmatprep.subr.msk.mxu1 %vm297_vm0, %v290_v2  ;;  %672 = vmatprep.subr.msk.mxu0 %vm297_vm0, %v459_v1  ;;  %v272_v3 = vld [vmem:[%s261_s8] sm:$0xff]  ;;  %v273_v4 = vld [vmem:[%s261_s8 + $0x8] sm:$0xff]  ;;  %s271_s16 = scalar_lea.vmem %s783_s6, %s750_s29 }
   0xf   : > { %668 = vmatpush3.msk.msra.mxu1 %vm297_vm0, %v290_v2  ;;  %v279_v5 = vrot.slane %v272_v3, 7  ;;  %v284_v6 = vrot.slane %v272_v3, 1  ;;  %664 = vmatprep.mubr.msk.f32.mxu0 %vm292_vm1, %v272_v3  ;;  %v285_v7 = vrot.slane %v273_v4, 1  ;;  %v275_v8 = vrot.slane %v273_v4, 7  ;;  %v647_v18 = vld [vmem:[%s782_s5] ss:$0 sm:$0xff] }
  0x10   : > { %665 = vmatmul.mubr.msk.f32.vlgmr.msra.gmra.mxu0 %vm292_vm1, %v273_v4  ;;  %v555_v23 = vld [vmem:[%s266_s11 + $0x8] sm:$0xff]  ;;  %v554_v26 = vld [vmem:[%s266_s11] sm:$0xff] }
  0x11   : > { %673 = vmatpush3.msk.msra.mxu0 %vm297_vm0, %v459_v1  ;;  %v282_v9 = vsel %vm278_vm2, %v275_v8, %v279_v5  ;;  %v280_v10 = vsel %vm278_vm2, %v279_v5, %v275_v8  ;;  %v286_v11 = vsel %vm283_vm3, %v284_v6, %v285_v7  ;;  %v289_v12 = vsel %vm283_vm3, %v285_v7, %v284_v6 }
  0x12   : > { %669 = vmatprep.mubr.msk.f32.mxu1 %vm292_vm1, %v282_v9  ;;  %674 = vmatprep.mubr.msk.f32.mxu0 %vm292_vm1, %v286_v11 }
  0x13   : > { %670 = vmatmul.mubr.msk.f32.vlgmr.msra.gmra.mxu1 %vm292_vm1, %v280_v10 }
  0x14   : > { %675 = vmatmul.mubr.msk.f32.vlgmr.msra.gmra.mxu0 %vm292_vm1, %v289_v12 }
  0xd0   : > { %v666_v13 = vpop.f32.mrf.mxu0 }
  0xd2   : > { %v367_v14 = vpop.f32.mrf.mxu0 }
  0xd3   : > { %v671_v15 = vpop.f32.mrf.mxu1 }
  0xd4   : > { %v456_v16 = vadd.f32 %v671_v15, %v666_v13  ;;  %v676_v17 = vpop.f32.mrf.mxu0 }
  0xd5   : > { %v450_v19 = vpop.f32.mrf.mxu1 }
  0xd6   : > { %v544_v20 = vadd.f32 %v676_v17, %v456_v16  ;;  %v451_v21 = vadd.f32 %v450_v19, %v367_v14  ;;  %v534_v22 = vpop.f32.mrf.mxu0 }
  0xd8   : > { %v553_v24 = vadd.f32 %v647_v18, %v544_v20  ;;  %v543_v25 = vadd.f32 %v534_v22, %v451_v21 }
  0xda   : > { %v557_v27 = vadd.f32 %v555_v23, %v553_v24  ;;  %v552_v28 = vadd.f32 %v647_v18, %v543_v25 }
  0xdc   : > { %559 = vst [vmem:[%s271_s16 + $0x8] sm:$0xff] %v557_v27  ;;  %v556_v29 = vadd.f32 %v554_v26, %v552_v28 }
  0xde   : > { %558 = vst [vmem:[%s271_s16] sm:$0xff] %v556_v29 }
  0xdf PF: > { %s16_s21 = sadd.s32 1, %s691_s21  }
  0xe0   : > { %p13_p4 = scmp.ge.s32.totalorder %s16_s21, 4  }
  0xe2   :  { %15 = sbr.rel (!%p13_p4) target bundleno = 1 (0x1), region = 77 }

// kernel: informer_forward.11
= control target key start
LH: loop header
LB: loop body
LE: loop exit
PB: predicated region body
PF: predicated region fallthrough
CT: control target
= control target key end

     0   :  { %s2757_s24 = smov 0   ;;  %s3249_s0 = inlined_call_operand.vmem [shape: f32[2,16,128], index: 0, kind: input, shape index: {}]   ;;  %s3250_s1 = inlined_call_operand.vmem [shape: f32[128,128], index: 1, kind: input, shape index: {}]   ;;  %s3251_s2 = inlined_call_operand.vmem [shape: f32[1,128], index: 2, kind: input, shape index: {}]   ;;  %s3252_s3 = inlined_call_operand.vmem [shape: f32[128,128], index: 3, kind: input, shape index: {}]   ;;  %s3253_s4 = inlined_call_operand.vmem [shape: f32[1,128], index: 4, kind: input, shape index: {}]   ;;  %s3254_s5 = inlined_call_operand.vmem [shape: f32[128,128], index: 5, kind: input, shape index: {}]   ;;  %s3255_s6 = inlined_call_operand.vmem [shape: f32[1,128], index: 6, kind: input, shape index: {}]   ;;  %s3256_s7 = inlined_call_operand.vmem [shape: f32[128,128], index: 7, kind: input, shape index: {}]   ;;  %s3257_s8 = inlined_call_operand.vmem [shape: f32[1,128], index: 8, kind: input, shape index: {}]   ;;  %s3258_s9 = inlined_call_operand.vmem [shape: f32[1,128], index: 9, kind: input, shape index: {}]   ;;  %s3259_s10 = inlined_call_operand.vmem [shape: f32[1,128], index: 10, kind: input, shape index: {}]   ;;  %s3260_s11 = inlined_call_operand.vmem [shape: f32[128,128], index: 11, kind: input, shape index: {}]   ;;  %s3261_s12 = inlined_call_operand.vmem [shape: f32[1,128], index: 12, kind: input, shape index: {}]   ;;  %s3262_s13 = inlined_call_operand.vmem [shape: f32[128,128], index: 13, kind: input, shape index: {}]   ;;  %s3263_s14 = inlined_call_operand.vmem [shape: f32[1,128], index: 14, kind: input, shape index: {}]   ;;  %s3264_s15 = inlined_call_operand.vmem [shape: f32[1,128], index: 15, kind: input, shape index: {}]   ;;  %s3265_s16 = inlined_call_operand.vmem [shape: f32[1,128], index: 16, kind: input, shape index: {}]   ;;  %s3266_s17 = inlined_call_operand.vmem [shape: f32[2,16,128], index: 17, kind: output, shape index: {}]  }
   0x1   :  { %3268 = sst [smem:[#allocation2_spill]] %s3249_s0 }
   0x2   :  { %3269 = sst [smem:[#allocation3_spill]] %s3250_s1 }
   0x3 LB: > { %s2133_s25 = sadd.s32 4294967295, %s2662_s24   ;;  %p2137_p0 = scmp.ge.s32.totalorder %s2662_s24, 1  ;;  %s2662_s24 = sphi %s2757_s24, %s27_s24  }
   0x4   : > { %p487_p1 = scmp.lt.s32.totalorder %s2662_s24, 3 }
   0x6   : > { %p488_p2 = pnand %p2137_p0, %p487_p1 }
   0x7   : > { %s3270_s18 = sld [smem:[#allocation3_spill]] (!%p488_p2)  ;;  %p539_p3 = scmp.lt.s32.totalorder (!%p488_p2), %s2133_s25, 1 }
   0x8   : > { %491 = sbr.rel (%p488_p2) target bundleno = 3884 (0xf2c), region = 88  ;;  %s3271_s23 = sld [smem:[#allocation2_spill]] (!%p488_p2) }
   0x9   : > { %s2664_s0 = smov (!%p488_p2), 96   ;;  %s2665_s1 = smov (!%p488_p2), 64  }
   0xa   : > { %s2666_s20 = smov (!%p488_p2), 32  }
   0xd   : > { %v664_v0 = vld [vmem:[%s3252_s3 + $0x78] sm:$0xff]  ;;  %v663_v1 = vld [vmem:[%s3252_s3 + $0x70] sm:$0xff]  ;;  %v662_v4 = vld [vmem:[%s3252_s3 + $0x68] sm:$0xff]  ;;  %s3273_s25 = smov (!%p539_p3, %s2133_s25), 1  ;;  %vm845_vm0 = vcmask 261120   ;;  %vm935_vm1 = vcmask 130048  }
   0xe   : > { %v566_v2 = vld [vmem:[%s3270_s18 + $0x78] sm:$0xff]  ;;  %2355 = vmatprep.subr.mxu1 %v664_v0  ;;  %v565_v3 = vld [vmem:[%s3270_s18 + $0x70] sm:$0xff]  ;;  %v564_v5 = vld [vmem:[%s3270_s18 + $0x68] sm:$0xff]  ;;  %s2178_s26 = sshll.u32 %s3273_s25, 4  ;;  %vm1673_vm2 = vcmask 523264   ;;  %vm1676_vm3 = vcmask 785408  }
   0xf   : > { %2320 = vmatprep.subr.mxu0 %v566_v2  ;;  %2356 = vmatpush3.msra.mxu1 %v664_v0  ;;  %v661_v6 = vld [vmem:[%s3252_s3 + $0x60] sm:$0xff]  ;;  %v660_v8 = vld [vmem:[%s3252_s3 + $0x58] sm:$0xff]  ;;  %v659_v10 = vld [vmem:[%s3252_s3 + $0x50] sm:$0xff]  ;;  %s543_s27 = scalar_lea.vmem %s3271_s23, %s2178_s26 }
  0x10   : > { %2321 = vmatpush3.msra.mxu0 %v566_v2  ;;  %2357 = vmatprep.subr.mxu1 %v663_v1  ;;  %v563_v7 = vld [vmem:[%s3270_s18 + $0x60] sm:$0xff]  ;;  %v562_v9 = vld [vmem:[%s3270_s18 + $0x58] sm:$0xff]  ;;  %v561_v11 = vld [vmem:[%s3270_s18 + $0x50] sm:$0xff] }
  0x11   : > { %2322 = vmatprep.subr.mxu0 %v565_v3  ;;  %2358 = vmatpush3.msra.mxu1 %v663_v1  ;;  %v658_v12 = vld [vmem:[%s3252_s3 + $0x48] sm:$0xff]  ;;  %v657_v14 = vld [vmem:[%s3252_s3 + $0x40] sm:$0xff]  ;;  %v656_v16 = vld [vmem:[%s3252_s3 + $0x38] sm:$0xff] }
  0x12   : > { %2323 = vmatpush3.msra.mxu0 %v565_v3  ;;  %2359 = vmatprep.subr.mxu1 %v662_v4  ;;  %v560_v13 = vld [vmem:[%s3270_s18 + $0x48] sm:$0xff]  ;;  %v559_v15 = vld [vmem:[%s3270_s18 + $0x40] sm:$0xff]  ;;  %v558_v17 = vld [vmem:[%s3270_s18 + $0x38] sm:$0xff] }
  0x13   : > { %2324 = vmatprep.subr.mxu0 %v564_v5  ;;  %2360 = vmatpush3.msra.mxu1 %v662_v4  ;;  %v655_v18 = vld [vmem:[%s3252_s3 + $0x30] sm:$0xff]  ;;  %v654_v20 = vld [vmem:[%s3252_s3 + $0x28] sm:$0xff]  ;;  %v653_v22 = vld [vmem:[%s3252_s3 + $0x20] sm:$0xff] }
  0x14   : > { %2325 = vmatpush3.msra.mxu0 %v564_v5  ;;  %2361 = vmatprep.subr.mxu1 %v661_v6  ;;  %v557_v19 = vld [vmem:[%s3270_s18 + $0x30] sm:$0xff]  ;;  %v556_v21 = vld [vmem:[%s3270_s18 + $0x28] sm:$0xff]  ;;  %v555_v23 = vld [vmem:[%s3270_s18 + $0x20] sm:$0xff] }
  0x15   : > { %2326 = vmatprep.subr.mxu0 %v563_v7  ;;  %2362 = vmatpush3.msra.mxu1 %v661_v6  ;;  %v652_v24 = vld [vmem:[%s3252_s3 + $0x18] sm:$0xff]  ;;  %v651_v26 = vld [vmem:[%s3252_s3 + $0x10] sm:$0xff]  ;;  %v650_v28 = vld [vmem:[%s3252_s3 + $0x8] sm:$0xff] }
  0x16   : > { %2327 = vmatpush3.msra.mxu0 %v563_v7  ;;  %2363 = vmatprep.subr.mxu1 %v660_v8  ;;  %v554_v25 = vld [vmem:[%s3270_s18 + $0x18] sm:$0xff]  ;;  %v553_v27 = vld [vmem:[%s3270_s18 + $0x10] sm:$0xff]  ;;  %v552_v29 = vld [vmem:[%s3270_s18 + $0x8] sm:$0xff] }
  0x17   : > { %2328 = vmatprep.subr.mxu0 %v562_v9  ;;  %2364 = vmatpush3.msra.mxu1 %v660_v8  ;;  %v2867_v30 = vld [vmem:[%s543_s27] sm:$0xff]  ;;  %v2876_v33 = vld [vmem:[%s543_s27 + $0x8] sm:$0xff]  ;;  %v762_v34 = vld [vmem:[%s3254_s5 + $0x78] sm:$0xff]  ;;  %s548_s27 = scalar_lea.vmem %s3266_s17, %s2178_s26 }
  0x18   : > { %2329 = vmatpush3.msra.mxu0 %v562_v9  ;;  %2365 = vmatprep.subr.mxu1 %v659_v10  ;;  %v649_v31 = vld [vmem:[%s3252_s3] sm:$0xff]  ;;  %v761_v35 = vld [vmem:[%s3254_s5 + $0x70] sm:$0xff]  ;;  %v760_v36 = vld [vmem:[%s3254_s5 + $0x68] sm:$0xff] }
  0x19   : > { %2330 = vmatprep.subr.mxu0 %v561_v11  ;;  %2366 = vmatpush3.msra.mxu1 %v659_v10  ;;  %v551_v32 = vld [vmem:[%s3270_s18] sm:$0xff]  ;;  %v758_v41 = vld [vmem:[%s3254_s5 + $0x58] sm:$0xff]  ;;  %v757_v47 = vld [vmem:[%s3254_s5 + $0x50] sm:$0xff] }
  0x1a   : > { %2331 = vmatpush3.msra.mxu0 %v561_v11  ;;  %2367 = vmatprep.subr.mxu1 %v658_v12  ;;  %v2143_v37 = vld [vmem:[%s3253_s4] ss:$0 sm:$0xff]  ;;  %v756_v49 = vld [vmem:[%s3254_s5 + $0x48] sm:$0xff]  ;;  %v754_v52 = vld [vmem:[%s3254_s5 + $0x38] sm:$0xff] }
  0x1b   : > { %2332 = vmatprep.subr.mxu0 %v560_v13  ;;  %2368 = vmatpush3.msra.mxu1 %v658_v12  ;;  %v759_v38 = vld [vmem:[%s3254_s5 + $0x60] sm:$0xff]  ;;  %v753_v53 = vld [vmem:[%s3254_s5 + $0x30] sm:$0xff]  ;;  %v752_v54 = vld [vmem:[%s3254_s5 + $0x28] sm:$0xff] }
  0x1c   : > { %2333 = vmatpush3.msra.mxu0 %v560_v13  ;;  %2369 = vmatprep.subr.mxu1 %v657_v14  ;;  %v2142_v44 = vld [vmem:[%s3251_s2] ss:$0 sm:$0xff]  ;;  %v750_v56 = vld [vmem:[%s3254_s5 + $0x18] sm:$0xff]  ;;  %v749_v57 = vld [vmem:[%s3254_s5 + $0x10] sm:$0xff] }
  0x1d   : > { %2334 = vmatprep.subr.mxu0 %v559_v15  ;;  %2370 = vmatpush3.msra.mxu1 %v657_v14  ;;  %v755_v50 = vld [vmem:[%s3254_s5 + $0x40] sm:$0xff]  ;;  %v748_v58 = vld [vmem:[%s3254_s5 + $0x8] sm:$0xff] }
  0x1e   : > { %2335 = vmatpush3.msra.mxu0 %v559_v15  ;;  %2371 = vmatprep.subr.mxu1 %v656_v16  ;;  %v751_v55 = vld [vmem:[%s3254_s5 + $0x20] sm:$0xff] }
  0x1f   : > { %2336 = vmatprep.subr.mxu0 %v558_v17  ;;  %2372 = vmatpush3.msra.mxu1 %v656_v16  ;;  %v747_v59 = vld [vmem:[%s3254_s5] sm:$0xff] }
  0x20   : > { %2337 = vmatpush3.msra.mxu0 %v558_v17  ;;  %2373 = vmatprep.subr.mxu1 %v655_v18  ;;  %v2144_v2 = vld [vmem:[%s3255_s6] ss:$0 sm:$0xff] }
  0x21   : > { %2338 = vmatprep.subr.mxu0 %v557_v19  ;;  %2374 = vmatpush3.msra.mxu1 %v655_v18 }
  0x22   : > { %2339 = vmatpush3.msra.mxu0 %v557_v19  ;;  %2375 = vmatprep.subr.mxu1 %v654_v20 }
  0x23   : > { %2340 = vmatprep.subr.mxu0 %v556_v21  ;;  %2376 = vmatpush3.msra.mxu1 %v654_v20 }
  0x24   : > { %2341 = vmatpush3.msra.mxu0 %v556_v21  ;;  %2377 = vmatprep.subr.mxu1 %v653_v22 }
  0x25   : > { %2342 = vmatprep.subr.mxu0 %v555_v23  ;;  %2378 = vmatpush3.msra.mxu1 %v653_v22 }
  0x26   : > { %2343 = vmatpush3.msra.mxu0 %v555_v23  ;;  %2379 = vmatprep.subr.mxu1 %v652_v24 }
  0x27   : > { %2344 = vmatprep.subr.mxu0 %v554_v25  ;;  %2380 = vmatpush3.msra.mxu1 %v652_v24 }
  0x28   : > { %2345 = vmatpush3.msra.mxu0 %v554_v25  ;;  %2381 = vmatprep.subr.mxu1 %v651_v26 }
  0x29   : > { %2346 = vmatprep.subr.mxu0 %v553_v27  ;;  %2382 = vmatpush3.msra.mxu1 %v651_v26 }
  0x2a   : > { %2347 = vmatpush3.msra.mxu0 %v553_v27  ;;  %2383 = vmatprep.subr.mxu1 %v650_v28 }
  0x2b   : > { %2348 = vmatprep.subr.mxu0 %v552_v29  ;;  %2384 = vmatpush3.msra.mxu1 %v650_v28 }
  0x2c   : > { %2387 = vmatprep.mubr.f32.mxu1 %v2867_v30  ;;  %2385 = vmatprep.subr.mxu1 %v649_v31 }
  0x2d   : > { %2349 = vmatpush3.msra.mxu0 %v552_v29  ;;  %2386 = vmatpush3.msra.mxu1 %v649_v31 }
  0x2e   : > { %2350 = vmatprep.subr.mxu0 %v551_v32  ;;  %2388 = vmatmul.mubr.f32.vlgmr.msra.gmra.mxu1 %v2876_v33 }
  0x2f   : > { %2351 = vmatpush3.msra.mxu0 %v551_v32  ;;  %2352 = vmatprep.mubr.f32.mxu0 %v2867_v30 }
  0x30   : > { %2353 = vmatmul.mubr.f32.vlgmr.msra.gmra.mxu0 %v2876_v33  ;;  %2390 = vmatprep.subr.mxu0 %v762_v34 }
  0x31   : > { %2422 = vmatprep.mubr.f32.mxu0 %v2867_v30  ;;  %2391 = vmatpush3.msra.mxu0 %v762_v34 }
  0x32   : > { %2392 = vmatprep.subr.mxu0 %v761_v35 }
  0x33   : > { %2393 = vmatpush3.msra.mxu0 %v761_v35 }
  0x34   : > { %2394 = vmatprep.subr.mxu0 %v760_v36 }
  0x35   : > { %2395 = vmatpush3.msra.mxu0 %v760_v36 }
  0x36   : > { %2396 = vmatprep.subr.mxu0 %v759_v38 }
  0x37   : > { %2397 = vmatpush3.msra.mxu0 %v759_v38 }
  0x38   : > { %2398 = vmatprep.subr.mxu0 %v758_v41 }
  0x39   : > { %2399 = vmatpush3.msra.mxu0 %v758_v41 }
  0x3a   : > { %2400 = vmatprep.subr.mxu0 %v757_v47 }
  0x3b   : > { %2401 = vmatpush3.msra.mxu0 %v757_v47 }
  0x3c   : > { %2402 = vmatprep.subr.mxu0 %v756_v49 }
  0x3d   : > { %2403 = vmatpush3.msra.mxu0 %v756_v49 }
  0x3e   : > { %2404 = vmatprep.subr.mxu0 %v755_v50 }
  0x3f   : > { %2405 = vmatpush3.msra.mxu0 %v755_v50 }
  0x40   : > { %2406 = vmatprep.subr.mxu0 %v754_v52 }
  0x41   : > { %2407 = vmatpush3.msra.mxu0 %v754_v52 }
  0x42   : > { %2408 = vmatprep.subr.mxu0 %v753_v53 }
  0x43   : > { %2409 = vmatpush3.msra.mxu0 %v753_v53 }
  0x44   : > { %2410 = vmatprep.subr.mxu0 %v752_v54 }
  0x45   : > { %2411 = vmatpush3.msra.mxu0 %v752_v54 }
  0x46   : > { %2412 = vmatprep.subr.mxu0 %v751_v55 }
  0x47   : > { %2413 = vmatpush3.msra.mxu0 %v751_v55 }
  0x48   : > { %2414 = vmatprep.subr.mxu0 %v750_v56 }
  0x49   : > { %2415 = vmatpush3.msra.mxu0 %v750_v56 }
  0x4a   : > { %2416 = vmatprep.subr.mxu0 %v749_v57 }
  0x4b   : > { %2417 = vmatpush3.msra.mxu0 %v749_v57 }
  0x4c   : > { %2418 = vmatprep.subr.mxu0 %v748_v58 }
  0x4d   : > { %2419 = vmatpush3.msra.mxu0 %v748_v58 }
  0x4e   : > { %2420 = vmatprep.subr.mxu0 %v747_v59 }
  0x4f   : > { %2421 = vmatpush3.msra.mxu0 %v747_v59 }
  0x50   : > { %2423 = vmatmul.mubr.f32.vlgmr.msra.gmra.mxu0 %v2876_v33 }
  0xee   : > { %v2389_v39 = vpop.f32.mrf.mxu1 }
  0xef   : > { %v2897_v40 = vadd.f32 %v2389_v39, %v2143_v37 }
  0xf0   : > { %v738_v42 = vpop.f32.mrf.mxu1  ;;  %v2354_v43 = vpop.f32.mrf.mxu0 }
  0xf1   : > { %v2905_v45 = vadd.f32 %v2143_v37, %v738_v42  ;;  %2425 = vmatprep.subr.msk.mxu1 %vm845_vm0, %v2897_v40  ;;  %v2930_v51 = vadd.f32 %v2354_v43, %v2142_v44 }
  0xf2   : > { %2426 = vmatpush3.xpose.msk.msra.mxu1 %vm845_vm0, %v2897_v40  ;;  %v640_v46 = vpop.f32.mrf.mxu0 }
  0xf3   : > { %1043 = vrot.lane.b32.xlu1 %v2905_v45, %s2664_s0  ;;  %v2916_v48 = vadd.f32 %v2142_v44, %v640_v46  ;;  %2427 = vmatprep.subr.msk.mxu1 %vm845_vm0, %v2905_v45 }
  0xf5   : > { %2429 = vmatprep.mubr.msk.f32.mxu1 %vm845_vm0, %v2916_v48 }
  0xf6   : > { %2428 = vmatpush3.xpose.msk.msra.mxu1 %vm845_vm0, %v2905_v45 }
  0xf7   : > { %1039 = vrot.lane.b32.xlu1 %v2916_v48, %s2664_s0 }
  0xf9   : > { %2430 = vmatmul.mubr.msk.f32.vlgmr.msra.gmra.mxu1 %vm845_vm0, %v2930_v51 }
 0x110   : > { %v2424_v3 = vpop.f32.mrf.mxu0 }
 0x111   : > { %v2966_v4 = vadd.f32 %v2424_v3, %v2144_v2 }
 0x112   : > { %v836_v5 = vpop.f32.mrf.mxu0 }
 0x113   : > { %v2968_v6 = vadd.f32 %v2144_v2, %v836_v5  ;;  %2432 = vmatprep.subr.mxu1 %v2966_v4 }
 0x114   : > { %2433 = vmatpush3.msra.mxu1 %v2966_v4 }
 0x115   : > { %2434 = vmatprep.subr.mxu1 %v2968_v6 }
 0x116   : > { %2435 = vmatpush3.msra.mxu1 %v2968_v6 }
 0x165   : > { %v1044_v18 = vpop.permute.xlu1 %1043 }
 0x169   : > { %v1040_v19 = vpop.permute.xlu1 %1039 }
 0x1b9   : > { %v2431_v60 = vpop.f32.mrf.mxu1 }
 0x1ba   : > { %v934_v63 = vmul.f32 0.17677669, %v2431_v60 }
 0x1bb   : > { %v924_v61 = vpop.f32.mrf.mxu1 }
 0x1bc   : > { %v933_v62 = vmul.f32 0.17677669, %v924_v61  ;;  %v939_v1 = vsel %vm935_vm1, %v934_v63, -inf }
 0x1be   : > { %v936_v0 = vsel %vm935_vm1, %v933_v62, -inf }
 0x1bf   : > { %937 = vmax.xlane.f32.xlu0 %v936_v0 }
 0x1c3   : > { %940 = vmax.xlane.f32.xlu0 %v939_v1 }
 0x1d9   : > { %1045 = vrot.lane.b32.xlu0 %v2897_v40, %s2664_s0 }
 0x248   : > { %v938_v7 = vpop.xlane.xlu0 %937 }
 0x249   : > { %v942_v8 = vsub.f32 %v933_v62, %v938_v7 }
 0x24b   : > { %v944_v11 = vmul.f32 1.442695, %v942_v8 }
 0x24c   : > { %v941_v9 = vpop.xlane.xlu0 %940 }
 0x24d   : > { %v943_v10 = vsub.f32 %v934_v63, %v941_v9 }
 0x24f   : > { %v946_v12 = vmul.f32 1.442695, %v943_v10 }
 0x250   : > { %v1046_v13 = vpop.permute.xlu0 %1045 }
 0x251   : > { %2612 = vpow2.f32 %v946_v12  ;;  %2439 = vmatprep.subr.msk.mxu1 %vm845_vm0, %v1046_v13 }
 0x252   : > { %2614 = vpow2.f32 %v944_v11 }
 0x25e   : > { %v2613_v14 = vpop.eup %2612 }
 0x25f   : > { %v951_v15 = vsel %vm935_vm1, %v2613_v14, 0.0  ;;  %v2615_v16 = vpop.eup %2614 }
 0x260   : > { %952 = vadd.xlane.f32.xlu1 %v951_v15  ;;  %v948_v17 = vsel %vm935_vm1, %v2615_v16, 0.0 }
 0x264   : > { %949 = vadd.xlane.f32.xlu1 %v948_v17 }
 0x275   : > { %1041 = vrot.lane.b32.xlu1 %v2930_v51, %s2664_s0 }
 0x2e9   : > { %v953_v20 = vpop.xlane.xlu1 %952 }
 0x2ea   : > { %2616 = vrcp.f32 %v953_v20 }
 0x2ed   : > { %v950_v21 = vpop.xlane.xlu1 %949 }
 0x2ee   : > { %2618 = vrcp.f32 %v950_v21 }
 0x2f1   : > { %v1042_v26 = vpop.permute.xlu1 %1041 }
 0x2f7   : > { %v2617_v22 = vpop.eup %2616 }
 0x2f8   : > { %v957_v25 = vmul.f32 %v2617_v22, %v2613_v14 }
 0x2fb   : > { %v2619_v23 = vpop.eup %2618 }
 0x2fc   : > { %v955_v24 = vmul.f32 %v2619_v23, %v2615_v16 }
 0x2fe   : > { %2436 = vmatprep.mubr.msk.f32.mxu1 %vm935_vm1, %v955_v24 }
 0x2ff   : > { %2437 = vmatmul.mubr.msk.f32.vlgmr.msra.gmra.mxu1 %vm935_vm1, %v957_v25 }
 0x300   : > { %2440 = vmatpush3.xpose.msk.msra.mxu1 %vm845_vm0, %v1046_v13  ;;  %2443 = vmatprep.mubr.msk.f32.mxu1 %vm845_vm0, %v1040_v19 }
 0x301   : > { %2441 = vmatprep.subr.msk.mxu1 %vm845_vm0, %v1044_v18 }
 0x304   : > { %2442 = vmatpush3.xpose.msk.msra.mxu1 %vm845_vm0, %v1044_v18 }
 0x307   : > { %2444 = vmatmul.mubr.msk.f32.vlgmr.msra.gmra.mxu1 %vm845_vm0, %v1042_v26 }
 0x3bf   : > { %v2988_v27 = vpop.f32.mrf.mxu1 }
 0x3c1   : > { %v2990_v28 = vpop.f32.mrf.mxu1 }
 0x3c7   : > { %v2445_v29 = vpop.f32.mrf.mxu1 }
 0x3c8   : > { %v1131_v31 = vmul.f32 0.17677669, %v2445_v29 }
 0x3c9   : > { %v1121_v32 = vpop.f32.mrf.mxu1 }
 0x3ca   : > { %v1130_v34 = vmul.f32 0.17677669, %v1121_v32  ;;  %v1135_v35 = vsel %vm935_vm1, %v1131_v31, -inf }
 0x3cb   : > { %1136 = vmax.xlane.f32.xlu1 %v1135_v35 }
 0x3cc   : > { %v1132_v36 = vsel %vm935_vm1, %v1130_v34, -inf }
 0x3cd   : > { %1133 = vmax.xlane.f32.xlu0 %v1132_v36 }
 0x3dc   : > { %1156 = vrot.lane.b32.xlu1 %v2968_v6, %s2664_s0 }
 0x3e0   : > { %1249 = vrot.lane.b32.xlu1 %v2897_v40, %s2665_s1 }
 0x3e4   : > { %1247 = vrot.lane.b32.xlu1 %v2905_v45, %s2665_s1 }
 0x3e8   : > { %1245 = vrot.lane.b32.xlu1 %v2930_v51, %s2665_s1 }
 0x454   : > { %v1137_v37 = vpop.xlane.xlu1 %1136 }
 0x455   : > { %v1139_v38 = vsub.f32 %v1131_v31, %v1137_v37 }
 0x456   : > { %v1134_v39 = vpop.xlane.xlu0 %1133 }
 0x457   : > { %v1142_v41 = vmul.f32 1.442695, %v1139_v38  ;;  %v1138_v42 = vsub.f32 %v1130_v34, %v1134_v39 }
 0x458   : > { %v1157_v53 = vpop.permute.xlu1 %1156 }
 0x459   : > { %2620 = vpow2.f32 %v1142_v41  ;;  %v1140_v43 = vmul.f32 1.442695, %v1138_v42 }
 0x45b   : > { %2622 = vpow2.f32 %v1140_v43 }
 0x45c   : > { %v1250_v55 = vpop.permute.xlu1 %1249 }
 0x460   : > { %v1248_v61 = vpop.permute.xlu1 %1247 }
 0x464   : > { %v1246_v62 = vpop.permute.xlu1 %1245 }
 0x466   : > { %v2621_v44 = vpop.eup %2620 }
 0x467   : > { %v1147_v46 = vsel %vm935_vm1, %v2621_v44, 0.0 }
 0x468   : > { %v2623_v47 = vpop.eup %2622  ;;  %1148 = vadd.xlane.f32.xlu0 %v1147_v46 }
 0x469   : > { %v1144_v49 = vsel %vm935_vm1, %v2623_v47, 0.0 }
 0x46c   : > { %1145 = vadd.xlane.f32.xlu0 %v1144_v49 }
 0x482   : > { %1158 = vrot.lane.b32.xlu0 %v2966_v4, %s2664_s0 }
 0x486   : > { %1243 = vrot.lane.b32.xlu0 %v2916_v48, %s2665_s1 }
 0x4f1   : > { %v1149_v50 = vpop.xlane.xlu0 %1148 }
 0x4f2   : > { %2624 = vrcp.f32 %v1149_v50 }
 0x4f5   : > { %v1146_v52 = vpop.xlane.xlu0 %1145 }
 0x4f6   : > { %2626 = vrcp.f32 %v1146_v52 }
 0x4f9   : > { %v1159_v54 = vpop.permute.xlu0 %1158 }
 0x4fa   : > { %2446 = vmatprep.subr.mxu1 %v1159_v54 }
 0x4fb   : > { %2447 = vmatpush3.msra.mxu1 %v1159_v54 }
 0x4fc   : > { %2448 = vmatprep.subr.mxu1 %v1157_v53 }
 0x4fd   : > { %2449 = vmatpush3.msra.mxu1 %v1157_v53  ;;  %v1244_v60 = vpop.permute.xlu0 %1243 }
 0x4fe   : > { %2453 = vmatprep.subr.msk.mxu1 %vm845_vm0, %v1250_v55 }
 0x4ff   : > { %v2625_v56 = vpop.eup %2624 }
 0x500   : > { %v1153_v59 = vmul.f32 %v2625_v56, %v2621_v44 }
 0x503   : > { %v2627_v57 = vpop.eup %2626 }
 0x504   : > { %v1151_v58 = vmul.f32 %v2627_v57, %v2623_v47 }
 0x506   : > { %2450 = vmatprep.mubr.msk.f32.mxu1 %vm935_vm1, %v1151_v58 }
 0x507   : > { %2451 = vmatmul.mubr.msk.f32.vlgmr.msra.gmra.mxu1 %vm935_vm1, %v1153_v59 }
 0x508   : > { %2454 = vmatpush3.xpose.msk.msra.mxu1 %vm845_vm0, %v1250_v55  ;;  %2457 = vmatprep.mubr.msk.f32.mxu1 %vm845_vm0, %v1244_v60 }
 0x509   : > { %2455 = vmatprep.subr.msk.mxu1 %vm845_vm0, %v1248_v61 }
 0x50c   : > { %2456 = vmatpush3.xpose.msk.msra.mxu1 %vm845_vm0, %v1248_v61 }
 0x50f   : > { %2458 = vmatmul.mubr.msk.f32.vlgmr.msra.gmra.mxu1 %vm845_vm0, %v1246_v62  ;;  %v1693_v62 = vld [vmem:[%s3256_s7 + $0x70] sm:$0xff] }
 0x5c7   : > { %v3016_v63 = vpop.f32.mrf.mxu1 }
 0x5c9   : > { %v3018_v0 = vpop.f32.mrf.mxu1 }
 0x5ca   : > { %v2597_v1 = vpack.i.bf16 %v3016_v63, %v3018_v0  ;;  %v1692_v63 = vld [vmem:[%s3256_s7 + $0x68] sm:$0xff]  ;;  %v1691_v0 = vld [vmem:[%s3256_s7 + $0x60] sm:$0xff] }
 0x5cf   : > { %v2459_v2 = vpop.f32.mrf.mxu1 }
 0x5d0   : > { %v1335_v3 = vmul.f32 0.17677669, %v2459_v2  ;;  %v1689_v2 = vld [vmem:[%s3256_s7 + $0x50] sm:$0xff] }
 0x5d1   : > { %v1325_v5 = vpop.f32.mrf.mxu1 }
 0x5d2   : > { %v1334_v7 = vmul.f32 0.17677669, %v1325_v5  ;;  %v1339_v8 = vsel %vm935_vm1, %v1335_v3, -inf  ;;  %v1687_v5 = vld [vmem:[%s3256_s7 + $0x40] sm:$0xff] }
 0x5d3   : > { %1340 = vmax.xlane.f32.xlu1 %v1339_v8  ;;  %v1685_v8 = vld [vmem:[%s3256_s7 + $0x30] sm:$0xff] }
 0x5d4   : > { %v1336_v9 = vsel %vm935_vm1, %v1334_v7, -inf }
 0x5d5   : > { %1337 = vmax.xlane.f32.xlu0 %v1336_v9  ;;  %v1684_v9 = vld [vmem:[%s3256_s7 + $0x28] sm:$0xff] }
 0x5e4   : > { %1358 = vrot.lane.b32.xlu1 %v2968_v6, %s2665_s1 }
 0x5e8   : > { %1451 = vrot.lane.b32.xlu1 %v2897_v40, %s2666_s20 }
 0x5ec   : > { %1449 = vrot.lane.b32.xlu1 %v2905_v45, %s2666_s20 }
 0x5f0   : > { %1447 = vrot.lane.b32.xlu1 %v2930_v51, %s2666_s20 }
 0x65c   : > { %v1341_v10 = vpop.xlane.xlu1 %1340 }
 0x65d   : > { %v1343_v11 = vsub.f32 %v1335_v3, %v1341_v10  ;;  %v1688_v3 = vld [vmem:[%s3256_s7 + $0x48] sm:$0xff]  ;;  %v1683_v10 = vld [vmem:[%s3256_s7 + $0x20] sm:$0xff] }
 0x65e   : > { %v1338_v12 = vpop.xlane.xlu0 %1337 }
 0x65f   : > { %v1346_v13 = vmul.f32 1.442695, %v1343_v11  ;;  %v1342_v14 = vsub.f32 %v1334_v7, %v1338_v12  ;;  %v1686_v7 = vld [vmem:[%s3256_s7 + $0x38] sm:$0xff]  ;;  %v1681_v12 = vld [vmem:[%s3256_s7 + $0x10] sm:$0xff] }
 0x660   : > { %v1359_v19 = vpop.permute.xlu1 %1358  ;;  %v1682_v11 = vld [vmem:[%s3256_s7 + $0x18] sm:$0xff] }
 0x661   : > { %2628 = vpow2.f32 %v1346_v13  ;;  %v1344_v15 = vmul.f32 1.442695, %v1342_v14  ;;  %v1680_v13 = vld [vmem:[%s3256_s7 + $0x8] sm:$0xff]  ;;  %v1679_v14 = vld [vmem:[%s3256_s7] sm:$0xff] }
 0x663   : > { %2630 = vpow2.f32 %v1344_v15 }
 0x664   : > { %v1452_v21 = vpop.permute.xlu1 %1451 }
 0x668   : > { %v1450_v26 = vpop.permute.xlu1 %1449 }
 0x66c   : > { %v1448_v29 = vpop.permute.xlu1 %1447 }
 0x66e   : > { %v2629_v16 = vpop.eup %2628 }
 0x66f   : > { %v1351_v17 = vsel %vm935_vm1, %v2629_v16, 0.0 }
 0x670   : > { %v2631_v18 = vpop.eup %2630  ;;  %1352 = vadd.xlane.f32.xlu0 %v1351_v17 }
 0x671   : > { %v1348_v40 = vsel %vm935_vm1, %v2631_v18, 0.0 }
 0x674   : > { %1349 = vadd.xlane.f32.xlu0 %v1348_v40 }
 0x68a   : > { %1360 = vrot.lane.b32.xlu0 %v2966_v4, %s2665_s1 }
 0x68e   : > { %1445 = vrot.lane.b32.xlu0 %v2916_v48, %s2666_s20 }
 0x6f9   : > { %v1353_v45 = vpop.xlane.xlu0 %1352 }
 0x6fa   : > { %2632 = vrcp.f32 %v1353_v45 }
 0x6fd   : > { %v1350_v51 = vpop.xlane.xlu0 %1349 }
 0x6fe   : > { %2634 = vrcp.f32 %v1350_v51 }
 0x701   : > { %v1361_v20 = vpop.permute.xlu0 %1360 }
 0x702   : > { %2460 = vmatprep.subr.mxu1 %v1361_v20 }
 0x703   : > { %2461 = vmatpush3.msra.mxu1 %v1361_v20 }
 0x704   : > { %2462 = vmatprep.subr.mxu1 %v1359_v19 }
 0x705   : > { %2463 = vmatpush3.msra.mxu1 %v1359_v19  ;;  %v1446_v48 = vpop.permute.xlu0 %1445 }
 0x706   : > { %2467 = vmatprep.subr.msk.mxu1 %vm845_vm0, %v1452_v21 }
 0x707   : > { %v2633_v22 = vpop.eup %2632 }
 0x708   : > { %v1357_v25 = vmul.f32 %v2633_v22, %v2629_v16 }
 0x70b   : > { %v2635_v23 = vpop.eup %2634 }
 0x70c   : > { %v1355_v24 = vmul.f32 %v2635_v23, %v2631_v18 }
 0x70e   : > { %2464 = vmatprep.mubr.msk.f32.mxu1 %vm935_vm1, %v1355_v24 }
 0x70f   : > { %2465 = vmatmul.mubr.msk.f32.vlgmr.msra.gmra.mxu1 %vm935_vm1, %v1357_v25 }
 0x710   : > { %2468 = vmatpush3.xpose.msk.msra.mxu1 %vm845_vm0, %v1452_v21  ;;  %2471 = vmatprep.mubr.msk.f32.mxu1 %vm845_vm0, %v1446_v48 }
 0x711   : > { %2469 = vmatprep.subr.msk.mxu1 %vm845_vm0, %v1450_v26 }
 0x714   : > { %2470 = vmatpush3.xpose.msk.msra.mxu1 %vm845_vm0, %v1450_v26 }
 0x717   : > { %2472 = vmatmul.mubr.msk.f32.vlgmr.msra.gmra.mxu1 %vm845_vm0, %v1448_v29 }
 0x7cf   : > { %v2466_v31 = vpop.f32.mrf.mxu1 }
 0x7d1   : > { %v1436_v32 = vpop.f32.mrf.mxu1 }
 0x7d2   : > { %v2602_v41 = vpack.i.bf16 %v2466_v31, %v1436_v32  ;;  %v2169_v32 = vld [vmem:[%s3257_s8] ss:$0 sm:$0xff] }
 0x7d7   : > { %v2473_v34 = vpop.f32.mrf.mxu1 }
 0x7d8   : > { %v1537_v35 = vmul.f32 0.17677669, %v2473_v34 }
 0x7d9   : > { %v1527_v36 = vpop.f32.mrf.mxu1 }
 0x7da   : > { %v1536_v37 = vmul.f32 0.17677669, %v1527_v36  ;;  %v1541_v38 = vsel %vm935_vm1, %v1537_v35, -inf }
 0x7db   : > { %1542 = vmax.xlane.f32.xlu1 %v1541_v38 }
 0x7dc   : > { %v1538_v39 = vsel %vm935_vm1, %v1536_v37, -inf }
 0x7dd   : > { %1539 = vmax.xlane.f32.xlu0 %v1538_v39  ;;  %v1834_v39 = vld [vmem:[%s3260_s11 + $0x70] sm:$0xff] }
 0x7ec   : > { %1560 = vrot.lane.b32.xlu1 %v2968_v6, %s2666_s20 }
 0x7f0   : > { %2598 = vrot.lane.b32.xlu1 %v2597_v1, %s2666_s20  ;;  %v1690_v1 = vld [vmem:[%s3256_s7 + $0x58] sm:$0xff] }
 0x7f4   : > { %2603 = vrot.lane.b32.xlu1 %v2602_v41, %s2665_s1 }
 0x864   : > { %v1543_v42 = vpop.xlane.xlu1 %1542 }
 0x865   : > { %v1545_v43 = vsub.f32 %v1537_v35, %v1543_v42 }
 0x866   : > { %v1540_v44 = vpop.xlane.xlu0 %1539 }
 0x867   : > { %v1548_v46 = vmul.f32 1.442695, %v1545_v43  ;;  %v1544_v47 = vsub.f32 %v1536_v37, %v1540_v44 }
 0x868   : > { %v1561_v57 = vpop.permute.xlu1 %1560 }
 0x869   : > { %2636 = vpow2.f32 %v1548_v46  ;;  %v1546_v49 = vmul.f32 1.442695, %v1544_v47 }
 0x86b   : > { %2638 = vpow2.f32 %v1546_v49  ;;  %v1833_v49 = vld [vmem:[%s3260_s11 + $0x68] sm:$0xff] }
 0x86c   : > { %v2599_v18 = vpop.permute.xlu1 %2598 }
 0x86d   : > { %v2601_v45 = vunpack.i.h.bf16 %v2599_v18  ;;  %v2600_v51 = vunpack.i.l.bf16 %v2599_v18  ;;  %v1949_v18 = vld [vmem:[%s3262_s13 + $0x68] sm:$0xff] }
 0x86f   : > { %v1672_v22 = vsel %vm845_vm0, %v2988_v27, %v2601_v45  ;;  %v1671_v25 = vsel %vm845_vm0, %v2990_v28, %v2600_v51  ;;  %v1835_v28 = vld [vmem:[%s3260_s11 + $0x78] sm:$0xff]  ;;  %v1946_v51 = vld [vmem:[%s3262_s13 + $0x50] sm:$0xff] }
 0x870   : > { %v2604_v40 = vpop.permute.xlu1 %2603  ;;  %v1947_v45 = vld [vmem:[%s3262_s13 + $0x58] sm:$0xff] }
 0x871   : > { %v2606_v19 = vunpack.i.h.bf16 %v2604_v40  ;;  %v2605_v20 = vunpack.i.l.bf16 %v2604_v40  ;;  %v1948_v40 = vld [vmem:[%s3262_s13 + $0x60] sm:$0xff] }
 0x873   : > { %v1674_v48 = vsel %vm1673_vm2, %v1671_v25, %v2605_v20  ;;  %v1675_v26 = vsel %vm1673_vm2, %v1672_v22, %v2606_v19  ;;  %v1945_v19 = vld [vmem:[%s3262_s13 + $0x48] sm:$0xff]  ;;  %v1944_v20 = vld [vmem:[%s3262_s13 + $0x40] sm:$0xff]  ;;  %v1942_v22 = vld [vmem:[%s3262_s13 + $0x30] sm:$0xff] }
 0x874   : > { %v1939_v25 = vld [vmem:[%s3262_s13 + $0x18] sm:$0xff] }
 0x876   : > { %v2637_v50 = vpop.eup %2636 }
 0x877   : > { %v1553_v52 = vsel %vm935_vm1, %v2637_v50, 0.0 }
 0x878   : > { %v2639_v6 = vpop.eup %2638  ;;  %1554 = vadd.xlane.f32.xlu0 %v1553_v52  ;;  %v1831_v52 = vld [vmem:[%s3260_s11 + $0x58] sm:$0xff] }
 0x879   : > { %v1550_v53 = vsel %vm935_vm1, %v2639_v6, 0.0 }
 0x87c   : > { %1551 = vadd.xlane.f32.xlu0 %v1550_v53  ;;  %v1829_v53 = vld [vmem:[%s3260_s11 + $0x48] sm:$0xff] }
 0x892   : > { %1562 = vrot.lane.b32.xlu0 %v2966_v4, %s2666_s20  ;;  %v1694_v4 = vld [vmem:[%s3256_s7 + $0x78] sm:$0xff] }
 0x893   : > { %2481 = vmatprep.subr.mxu0 %v1694_v4 }
 0x894   : > { %2482 = vmatpush3.msra.mxu0 %v1694_v4  ;;  %v1820_v4 = vld [vmem:[%s3260_s11] sm:$0xff] }
 0x895   : > { %2483 = vmatprep.subr.mxu0 %v1693_v62 }
 0x896   : > { %2484 = vmatpush3.msra.mxu0 %v1693_v62 }
 0x897   : > { %2485 = vmatprep.subr.mxu0 %v1692_v63 }
 0x898   : > { %2486 = vmatpush3.msra.mxu0 %v1692_v63 }
 0x899   : > { %2487 = vmatprep.subr.mxu0 %v1691_v0 }
 0x89a   : > { %2488 = vmatpush3.msra.mxu0 %v1691_v0 }
 0x89b   : > { %2489 = vmatprep.subr.mxu0 %v1690_v1 }
 0x89c   : > { %2490 = vmatpush3.msra.mxu0 %v1690_v1 }
 0x89d   : > { %2491 = vmatprep.subr.mxu0 %v1689_v2 }
 0x89e   : > { %2492 = vmatpush3.msra.mxu0 %v1689_v2 }
 0x89f   : > { %2493 = vmatprep.subr.mxu0 %v1688_v3 }
 0x8a0   : > { %2494 = vmatpush3.msra.mxu0 %v1688_v3 }
 0x8a1   : > { %2495 = vmatprep.subr.mxu0 %v1687_v5 }
 0x8a2   : > { %2496 = vmatpush3.msra.mxu0 %v1687_v5 }
 0x8a3   : > { %2497 = vmatprep.subr.mxu0 %v1686_v7 }
 0x8a4   : > { %2498 = vmatpush3.msra.mxu0 %v1686_v7  ;;  %v2170_v7 = vld [vmem:[%s3258_s9] ss:$0 sm:$0xff] }
 0x8a5   : > { %2499 = vmatprep.subr.mxu0 %v1685_v8 }
 0x8a6   : > { %2500 = vmatpush3.msra.mxu0 %v1685_v8 }
 0x8a7   : > { %2501 = vmatprep.subr.mxu0 %v1684_v9 }
 0x8a8   : > { %2502 = vmatpush3.msra.mxu0 %v1684_v9  ;;  %v2171_v9 = vld [vmem:[%s3259_s10] ss:$0 sm:$0xff] }
 0x8a9   : > { %2503 = vmatprep.subr.mxu0 %v1683_v10 }
 0x8aa   : > { %2504 = vmatpush3.msra.mxu0 %v1683_v10 }
 0x8ab   : > { %2505 = vmatprep.subr.mxu0 %v1682_v11 }
 0x8ac   : > { %2506 = vmatpush3.msra.mxu0 %v1682_v11 }
 0x8ad   : > { %2507 = vmatprep.subr.mxu0 %v1681_v12 }
 0x8ae   : > { %2508 = vmatpush3.msra.mxu0 %v1681_v12 }
 0x8af   : > { %2509 = vmatprep.subr.mxu0 %v1680_v13 }
 0x8b0   : > { %2510 = vmatpush3.msra.mxu0 %v1680_v13 }
 0x8b1   : > { %2511 = vmatprep.subr.mxu0 %v1679_v14 }
 0x8b2   : > { %2512 = vmatpush3.msra.mxu0 %v1679_v14 }
 0x901   : > { %v1555_v54 = vpop.xlane.xlu0 %1554 }
 0x902   : > { %2640 = vrcp.f32 %v1555_v54  ;;  %v1828_v54 = vld [vmem:[%s3260_s11 + $0x40] sm:$0xff] }
 0x905   : > { %v1552_v55 = vpop.xlane.xlu0 %1551 }
 0x906   : > { %2642 = vrcp.f32 %v1552_v55  ;;  %v1827_v55 = vld [vmem:[%s3260_s11 + $0x38] sm:$0xff] }
 0x909   : > { %v1563_v56 = vpop.permute.xlu0 %1562 }
 0x90a   : > { %2474 = vmatprep.subr.mxu1 %v1563_v56 }
 0x90b   : > { %2475 = vmatpush3.msra.mxu1 %v1563_v56  ;;  %v1826_v56 = vld [vmem:[%s3260_s11 + $0x30] sm:$0xff] }
 0x90c   : > { %2476 = vmatprep.subr.mxu1 %v1561_v57 }
 0x90d   : > { %2477 = vmatpush3.msra.mxu1 %v1561_v57  ;;  %v1825_v57 = vld [vmem:[%s3260_s11 + $0x28] sm:$0xff] }
 0x90e   : > { %2516 = vmatprep.subr.mxu1 %v1835_v28 }
 0x90f   : > { %v2641_v58 = vpop.eup %2640 }
 0x910   : > { %v1559_v61 = vmul.f32 %v2641_v58, %v2637_v50  ;;  %v1832_v50 = vld [vmem:[%s3260_s11 + $0x60] sm:$0xff] }
 0x911   : > { %v1824_v58 = vld [vmem:[%s3260_s11 + $0x20] sm:$0xff] }
 0x913   : > { %v2643_v59 = vpop.eup %2642 }
 0x914   : > { %v1557_v60 = vmul.f32 %v2643_v59, %v2639_v6  ;;  %v1830_v6 = vld [vmem:[%s3260_s11 + $0x50] sm:$0xff]  ;;  %v1823_v59 = vld [vmem:[%s3260_s11 + $0x18] sm:$0xff] }
 0x916   : > { %2478 = vmatprep.mubr.msk.f32.mxu1 %vm935_vm1, %v1557_v60  ;;  %v1822_v60 = vld [vmem:[%s3260_s11 + $0x10] sm:$0xff] }
 0x917   : > { %2479 = vmatmul.mubr.msk.f32.vlgmr.msra.gmra.mxu1 %vm935_vm1, %v1559_v61  ;;  %v1821_v61 = vld [vmem:[%s3260_s11 + $0x8] sm:$0xff] }
 0x918   : > { %2517 = vmatpush3.msra.mxu1 %v1835_v28 }
 0x919   : > { %2518 = vmatprep.subr.mxu1 %v1834_v39 }
 0x91a   : > { %2519 = vmatpush3.msra.mxu1 %v1834_v39 }
 0x91b   : > { %2520 = vmatprep.subr.mxu1 %v1833_v49 }
 0x91c   : > { %2521 = vmatpush3.msra.mxu1 %v1833_v49 }
 0x91d   : > { %2522 = vmatprep.subr.mxu1 %v1832_v50 }
 0x91e   : > { %2523 = vmatpush3.msra.mxu1 %v1832_v50 }
 0x91f   : > { %2524 = vmatprep.subr.mxu1 %v1831_v52 }
 0x920   : > { %2525 = vmatpush3.msra.mxu1 %v1831_v52 }
 0x921   : > { %2526 = vmatprep.subr.mxu1 %v1830_v6 }
 0x922   : > { %2527 = vmatpush3.msra.mxu1 %v1830_v6 }
 0x923   : > { %2528 = vmatprep.subr.mxu1 %v1829_v53 }
 0x924   : > { %2529 = vmatpush3.msra.mxu1 %v1829_v53 }
 0x925   : > { %2530 = vmatprep.subr.mxu1 %v1828_v54 }
 0x926   : > { %2531 = vmatpush3.msra.mxu1 %v1828_v54  ;;  %v2173_v54 = vld [vmem:[%s3263_s14] ss:$0 sm:$0xff] }
 0x927   : > { %2532 = vmatprep.subr.mxu1 %v1827_v55 }
 0x928   : > { %2533 = vmatpush3.msra.mxu1 %v1827_v55 }
 0x929   : > { %2534 = vmatprep.subr.mxu1 %v1826_v56 }
 0x92a   : > { %2535 = vmatpush3.msra.mxu1 %v1826_v56 }
 0x92b   : > { %2536 = vmatprep.subr.mxu1 %v1825_v57 }
 0x92c   : > { %2537 = vmatpush3.msra.mxu1 %v1825_v57 }
 0x92d   : > { %2538 = vmatprep.subr.mxu1 %v1824_v58 }
 0x92e   : > { %2539 = vmatpush3.msra.mxu1 %v1824_v58 }
 0x92f   : > { %2540 = vmatprep.subr.mxu1 %v1823_v59 }
 0x930   : > { %2541 = vmatpush3.msra.mxu1 %v1823_v59 }
 0x931   : > { %2542 = vmatprep.subr.mxu1 %v1822_v60 }
 0x932   : > { %2543 = vmatpush3.msra.mxu1 %v1822_v60 }
 0x933   : > { %2544 = vmatprep.subr.mxu1 %v1821_v61 }
 0x934   : > { %2545 = vmatpush3.msra.mxu1 %v1821_v61 }
 0x935   : > { %2546 = vmatprep.subr.mxu1 %v1820_v4 }
 0x936   : > { %2547 = vmatpush3.msra.mxu1 %v1820_v4 }
 0x9d7   : > { %v2480_v15 = vpop.f32.mrf.mxu1 }
 0x9d9   : > { %v1638_v16 = vpop.f32.mrf.mxu1 }
 0x9da   : > { %v2607_v17 = vpack.i.bf16 %v2480_v15, %v1638_v16  ;;  %v1951_v16 = vld [vmem:[%s3262_s13 + $0x78] sm:$0xff] }
 0x9db   : > { %2551 = vmatprep.subr.mxu0 %v1951_v16 }
 0x9dc   : > { %2608 = vrot.lane.b32.xlu0 %v2607_v17, %s2664_s0  ;;  %v1950_v17 = vld [vmem:[%s3262_s13 + $0x70] sm:$0xff] }
 0xa4e   : > { %v2609_v21 = vpop.permute.xlu0 %2608 }
 0xa4f   : > { %v2611_v23 = vunpack.i.h.bf16 %v2609_v21  ;;  %v2610_v24 = vunpack.i.l.bf16 %v2609_v21  ;;  %v1943_v21 = vld [vmem:[%s3262_s13 + $0x38] sm:$0xff] }
 0xa51   : > { %v1677_v29 = vsel %vm1676_vm3, %v1674_v48, %v2610_v24  ;;  %v1678_v31 = vsel %vm1676_vm3, %v1675_v26, %v2611_v23  ;;  %v1941_v23 = vld [vmem:[%s3262_s13 + $0x28] sm:$0xff]  ;;  %v1940_v24 = vld [vmem:[%s3262_s13 + $0x20] sm:$0xff]  ;;  %v1938_v48 = vld [vmem:[%s3262_s13 + $0x10] sm:$0xff] }
 0xa52   : > { %2513 = vmatprep.mubr.f32.mxu0 %v1677_v29  ;;  %v1937_v26 = vld [vmem:[%s3262_s13 + $0x8] sm:$0xff]  ;;  %v1936_v29 = vld [vmem:[%s3262_s13] sm:$0xff] }
 0xa53   : > { %2514 = vmatmul.mubr.f32.vlgmr.msra.gmra.mxu0 %v1678_v31  ;;  %v2172_v31 = vld [vmem:[%s3261_s12] ss:$0 sm:$0xff] }
 0xa54   : > { %2552 = vmatpush3.msra.mxu0 %v1951_v16  ;;  %v2175_v16 = vld [vmem:[%s3265_s16] ss:$0 sm:$0xff] }
 0xa55   : > { %2553 = vmatprep.subr.mxu0 %v1950_v17 }
 0xa56   : > { %2554 = vmatpush3.msra.mxu0 %v1950_v17 }
 0xa57   : > { %2555 = vmatprep.subr.mxu0 %v1949_v18 }
 0xa58   : > { %2556 = vmatpush3.msra.mxu0 %v1949_v18 }
 0xa59   : > { %2557 = vmatprep.subr.mxu0 %v1948_v40 }
 0xa5a   : > { %2558 = vmatpush3.msra.mxu0 %v1948_v40 }
 0xa5b   : > { %2559 = vmatprep.subr.mxu0 %v1947_v45 }
 0xa5c   : > { %2560 = vmatpush3.msra.mxu0 %v1947_v45 }
 0xa5d   : > { %2561 = vmatprep.subr.mxu0 %v1946_v51 }
 0xa5e   : > { %2562 = vmatpush3.msra.mxu0 %v1946_v51 }
 0xa5f   : > { %2563 = vmatprep.subr.mxu0 %v1945_v19 }
 0xa60   : > { %2564 = vmatpush3.msra.mxu0 %v1945_v19 }
 0xa61   : > { %2565 = vmatprep.subr.mxu0 %v1944_v20 }
 0xa62   : > { %2566 = vmatpush3.msra.mxu0 %v1944_v20 }
 0xa63   : > { %2567 = vmatprep.subr.mxu0 %v1943_v21 }
 0xa64   : > { %2568 = vmatpush3.msra.mxu0 %v1943_v21 }
 0xa65   : > { %2569 = vmatprep.subr.mxu0 %v1942_v22 }
 0xa66   : > { %2570 = vmatpush3.msra.mxu0 %v1942_v22 }
 0xa67   : > { %2571 = vmatprep.subr.mxu0 %v1941_v23 }
 0xa68   : > { %2572 = vmatpush3.msra.mxu0 %v1941_v23 }
 0xa69   : > { %2573 = vmatprep.subr.mxu0 %v1940_v24 }
 0xa6a   : > { %2574 = vmatpush3.msra.mxu0 %v1940_v24 }
 0xa6b   : > { %2575 = vmatprep.subr.mxu0 %v1939_v25 }
 0xa6c   : > { %2576 = vmatpush3.msra.mxu0 %v1939_v25 }
 0xa6d   : > { %2577 = vmatprep.subr.mxu0 %v1938_v48 }
 0xa6e   : > { %2578 = vmatpush3.msra.mxu0 %v1938_v48 }
 0xa6f   : > { %2579 = vmatprep.subr.mxu0 %v1937_v26 }
 0xa70   : > { %2580 = vmatpush3.msra.mxu0 %v1937_v26 }
 0xa71   : > { %2581 = vmatprep.subr.mxu0 %v1936_v29 }
 0xa72   : > { %2582 = vmatpush3.msra.mxu0 %v1936_v29 }
 0xb13   : > { %v2515_v34 = vpop.f32.mrf.mxu0 }
 0xb14   : > { %v1774_v35 = vadd.f32 %v2515_v34, %v2169_v32 }
 0xb15   : > { %v1768_v36 = vpop.f32.mrf.mxu0 }
 0xb16   : > { %v1769_v37 = vadd.f32 %v2169_v32, %v1768_v36  ;;  %v1778_v27 = vadd.f32 %v1774_v35, %v2876_v33 }
 0xb18   : > { %1783 = vadd.xlane.f32.xlu0 %v1778_v27  ;;  %v1777_v38 = vadd.f32 %v1769_v37, %v2867_v30 }
 0xb1a   : > { %1781 = vadd.xlane.f32.xlu1 %v1777_v38 }
 0xba1   : > { %v1784_v41 = vpop.xlane.xlu0 %1783 }
 0xba2   : > { %v1787_v43 = vmul.f32 0.0078125, %v1784_v41 }
 0xba3   : > { %v1782_v42 = vpop.xlane.xlu1 %1781 }
 0xba4   : > { %v1786_v33 = vmul.f32 0.0078125, %v1782_v42  ;;  %v1789_v46 = vsub.f32 %v1778_v27, %v1787_v43 }
 0xba6   : > { %v1788_v44 = vsub.f32 %v1777_v38, %v1786_v33  ;;  %v1791_v47 = vmul.f32 %v1789_v46, %v1789_v46 }
 0xba8   : > { %v1790_v30 = vmul.f32 %v1788_v44, %v1788_v44 }
 0xbaa   : > { %1792 = vadd.xlane.f32.xlu0 %v1790_v30 }
 0xbae   : > { %1794 = vadd.xlane.f32.xlu0 %v1791_v47 }
 0xc33   : > { %v1793_v62 = vpop.xlane.xlu0 %1792 }
 0xc34   : > { %v1796_v63 = vmul.f32 0.0078125, %v1793_v62 }
 0xc36   : > { %v1798_v0 = vadd.f32 1e-05, %v1796_v63 }
 0xc37   : > { %v1795_v1 = vpop.xlane.xlu0 %1794 }
 0xc38   : > { %2644 = vrsqrt.f32 %v1798_v0  ;;  %v1797_v2 = vmul.f32 0.0078125, %v1795_v1 }
 0xc3a   : > { %v1799_v3 = vadd.f32 1e-05, %v1797_v2 }
 0xc3c   : > { %2646 = vrsqrt.f32 %v1799_v3 }
 0xc45   : > { %v2645_v5 = vpop.eup %2644 }
 0xc46   : > { %v1802_v8 = vmul.f32 %v2645_v5, %v1788_v44 }
 0xc48   : > { %v1810_v10 = vmul.f32 %v2170_v7, %v1802_v8 }
 0xc49   : > { %v2647_v11 = vpop.eup %2646 }
 0xc4a   : > { %v1803_v12 = vmul.f32 %v2647_v11, %v1789_v46  ;;  %v3173_v13 = vadd.f32 %v2171_v9, %v1810_v10 }
 0xc4c   : > { %v1811_v14 = vmul.f32 %v2170_v7, %v1803_v12  ;;  %2548 = vmatprep.mubr.f32.mxu1 %v3173_v13 }
 0xc4e   : > { %v3176_v15 = vadd.f32 %v2171_v9, %v1811_v14 }
 0xc50   : > { %2549 = vmatmul.mubr.f32.vlgmr.msra.gmra.mxu1 %v3176_v15 }
 0xd10   : > { %v2550_v32 = vpop.f32.mrf.mxu1 }
 0xd11   : > { %v1915_v34 = vadd.f32 %v2550_v32, %v2172_v31 }
 0xd12   : > { %v1909_v35 = vpop.f32.mrf.mxu1 }
 0xd13   : > { %v1921_v36 = vmul.f32 0.044715, %v1915_v34  ;;  %v1910_v37 = vadd.f32 %v2172_v31, %v1909_v35  ;;  %v1919_v52 = vmul.f32 0.5, %v1915_v34 }
 0xd15   : > { %v1923_v27 = vmul.f32 %v1921_v36, %v1915_v34  ;;  %v1920_v38 = vmul.f32 0.044715, %v1910_v37  ;;  %v1918_v49 = vmul.f32 0.5, %v1910_v37 }
 0xd17   : > { %v1925_v28 = vmul.f32 %v1923_v27, %v1915_v34  ;;  %v1922_v39 = vmul.f32 %v1920_v38, %v1910_v37 }
 0xd19   : > { %v1927_v41 = vadd.f32 %v1925_v28, %v1915_v34  ;;  %v1924_v42 = vmul.f32 %v1922_v39, %v1910_v37 }
 0xd1b   : > { %v1926_v43 = vadd.f32 %v1924_v42, %v1910_v37  ;;  %v1929_v33 = vmul.f32 0.7978846, %v1927_v41 }
 0xd1d   : > { %v1928_v44 = vmul.f32 0.7978846, %v1926_v43  ;;  %2648 = vtanh.f32 %v1929_v33 }
 0xd1f   : > { %2650 = vtanh.f32 %v1928_v44 }
 0xd2a   : > { %v2649_v46 = vpop.eup %2648 }
 0xd2b   : > { %v1933_v47 = vadd.f32 1.0, %v2649_v46 }
 0xd2c   : > { %v2651_v30 = vpop.eup %2650 }
 0xd2d   : > { %v1932_v50 = vadd.f32 1.0, %v2651_v30  ;;  %v1935_v53 = vmul.f32 %v1933_v47, %v1919_v52 }
 0xd2f   : > { %v1934_v6 = vmul.f32 %v1932_v50, %v1918_v49 }
 0xd31   : > { %2583 = vmatprep.mubr.f32.mxu0 %v1934_v6 }
 0xd32   : > { %2584 = vmatmul.mubr.f32.vlgmr.msra.gmra.mxu0 %v1935_v53 }
 0xdf2   : > { %v2585_v55 = vpop.f32.mrf.mxu0 }
 0xdf3   : > { %v2031_v56 = vadd.f32 %v2585_v55, %v2173_v54 }
 0xdf4   : > { %v2025_v57 = vpop.f32.mrf.mxu0 }
 0xdf5   : > { %v2026_v58 = vadd.f32 %v2173_v54, %v2025_v57  ;;  %v2035_v59 = vadd.f32 %v2031_v56, %v3176_v15 }
 0xdf7   : > { %2040 = vadd.xlane.f32.xlu0 %v2035_v59  ;;  %v2034_v60 = vadd.f32 %v2026_v58, %v3173_v13  ;;  %v2174_v13 = vld [vmem:[%s3264_s15] ss:$0 sm:$0xff] }
 0xdf9   : > { %2038 = vadd.xlane.f32.xlu1 %v2034_v60 }
 0xe80   : > { %v2041_v61 = vpop.xlane.xlu0 %2040 }
 0xe81   : > { %v2043_v4 = vmul.f32 0.0078125, %v2041_v61 }
 0xe82   : > { %v2039_v62 = vpop.xlane.xlu1 %2038 }
 0xe83   : > { %v2045_v63 = vsub.f32 %v2035_v59, %v2043_v4  ;;  %v2042_v0 = vmul.f32 0.0078125, %v2039_v62 }
 0xe85   : > { %v2044_v1 = vsub.f32 %v2034_v60, %v2042_v0  ;;  %v2047_v2 = vmul.f32 %v2045_v63, %v2045_v63 }
 0xe87   : > { %2050 = vadd.xlane.f32.xlu0 %v2047_v2  ;;  %v2046_v3 = vmul.f32 %v2044_v1, %v2044_v1 }
 0xe89   : > { %2048 = vadd.xlane.f32.xlu1 %v2046_v3 }
 0xf10   : > { %v2051_v5 = vpop.xlane.xlu0 %2050 }
 0xf11   : > { %v2053_v7 = vmul.f32 0.0078125, %v2051_v5 }
 0xf12   : > { %v2049_v8 = vpop.xlane.xlu1 %2048 }
 0xf13   : > { %v2055_v9 = vadd.f32 1e-05, %v2053_v7  ;;  %v2052_v10 = vmul.f32 0.0078125, %v2049_v8 }
 0xf15   : > { %2652 = vrsqrt.f32 %v2055_v9  ;;  %v2054_v11 = vadd.f32 1e-05, %v2052_v10 }
 0xf17   : > { %2654 = vrsqrt.f32 %v2054_v11 }
 0xf22   : > { %v2653_v12 = vpop.eup %2652 }
 0xf23   : > { %v2059_v14 = vmul.f32 %v2653_v12, %v2045_v63 }
 0xf24   : > { %v2655_v15 = vpop.eup %2654 }
 0xf25   : > { %v2067_v17 = vmul.f32 %v2174_v13, %v2059_v14  ;;  %v2058_v18 = vmul.f32 %v2655_v15, %v2044_v1 }
 0xf27   : > { %v2075_v40 = vadd.f32 %v2175_v16, %v2067_v17  ;;  %v2066_v45 = vmul.f32 %v2174_v13, %v2058_v18 }
 0xf29   : > { %2077 = vst [vmem:[%s548_s27 + $0x8] sm:$0xff] %v2075_v40  ;;  %v2074_v51 = vadd.f32 %v2175_v16, %v2066_v45 }
 0xf2b   : > { %2076 = vst [vmem:[%s548_s27] sm:$0xff] %v2074_v51 }
 0xf2c PF: > { %s27_s24 = sadd.s32 1, %s2662_s24  }
 0xf2d   : > { %p24_p4 = scmp.ge.s32.totalorder %s27_s24, 4  }
 0xf2f   :  { %26 = sbr.rel (!%p24_p4) target bundleno = 3 (0x3), region = 118 }

// kernel: informer_forward.12
= control target key start
LH: loop header
LB: loop body
LE: loop exit
PB: predicated region body
PF: predicated region fallthrough
CT: control target
= control target key end

     0   :  { %s1028_s30 = smov 0   ;;  %s1236_s0 = inlined_call_operand.vmem [shape: f32[2,16,128], index: 0, kind: input, shape index: {}]   ;;  %s1237_s1 = inlined_call_operand.vmem [shape: f32[128,128], index: 1, kind: input, shape index: {}]   ;;  %s1238_s2 = inlined_call_operand.vmem [shape: f32[128,128], index: 2, kind: input, shape index: {}]   ;;  %s1239_s3 = inlined_call_operand.vmem [shape: f32[128,128], index: 3, kind: input, shape index: {}]   ;;  %s1240_s4 = inlined_call_operand.vmem [shape: f32[1,128], index: 4, kind: input, shape index: {}]   ;;  %s1241_s5 = inlined_call_operand.vmem [shape: f32[1,128], index: 5, kind: input, shape index: {}]   ;;  %s1242_s6 = inlined_call_operand.vmem [shape: f32[1,128], index: 6, kind: input, shape index: {}]   ;;  %s1243_s7 = inlined_call_operand.vmem [shape: f32[1,128], index: 7, kind: input, shape index: {}]   ;;  %s1244_s8 = inlined_call_operand.vmem [shape: f32[1,128], index: 8, kind: input, shape index: {}]   ;;  %s1245_s9 = inlined_call_operand.vmem [shape: f32[2,8,128], index: 9, kind: output, shape index: {}]  }
   0x1 LB: > { %s780_s10 = sadd.s32 4294967295, %s976_s30   ;;  %p784_p0 = scmp.ge.s32.totalorder %s976_s30, 1  ;;  %s976_s30 = sphi %s1028_s30, %s19_s30  }
   0x2   : > { %p287_p1 = scmp.lt.s32.totalorder %s976_s30, 3 }
   0x4   : > { %p288_p2 = pnand %p784_p0, %p287_p1 }
   0x5   : > { %p322_p3 = scmp.lt.s32.totalorder (!%p288_p2), %s780_s10, 1 }
   0x6   : > { %291 = sbr.rel (%p288_p2) target bundleno = 319 (0x13f), region = 56 }
   0xb   : > { %v382_v0 = vld [vmem:[%s1238_s2 + $0x78] sm:$0xff]  ;;  %v381_v2 = vld [vmem:[%s1238_s2 + $0x70] sm:$0xff]  ;;  %v380_v4 = vld [vmem:[%s1238_s2 + $0x68] sm:$0xff]  ;;  %s1247_s10 = smov (!%p322_p3, %s780_s10), 1  ;;  %vm337_vm0 = vcmask 1040384   ;;  %vm343_vm1 = vcmask 1046528   ;;  %v648_v60 = vlaneseq }
   0xc   : > { %v366_v1 = vld [vmem:[%s1237_s1 + $0x78] sm:$0xff]  ;;  %851 = vmatprep.subr.mxu0 %v382_v0  ;;  %v365_v3 = vld [vmem:[%s1237_s1 + $0x70] sm:$0xff]  ;;  %v364_v5 = vld [vmem:[%s1237_s1 + $0x68] sm:$0xff]  ;;  %s796_s13 = sshll.u32 %s1247_s10, 4  ;;  %vm715_vm4 = vcmask 1041408   ;;  %vm717_vm5 = vcmask 1042432  }
   0xd   : > { %886 = vmatprep.subr.mxu1 %v366_v1  ;;  %852 = vmatpush3.msra.mxu0 %v382_v0  ;;  %v379_v6 = vld [vmem:[%s1238_s2 + $0x60] sm:$0xff]  ;;  %v378_v8 = vld [vmem:[%s1238_s2 + $0x58] sm:$0xff]  ;;  %v377_v10 = vld [vmem:[%s1238_s2 + $0x50] sm:$0xff]  ;;  %s326_s24 = scalar_lea.vmem %s1236_s0, %s796_s13  ;;  %v649_v63 = vshrl.u32 %v648_v60, 7  ;;  %vm719_vm6 = vcmask 1043456   ;;  %s787_s26 = sshll.u32 %s1247_s10, 3 }
   0xe   : > { %887 = vmatpush3.msra.mxu1 %v366_v1  ;;  %853 = vmatprep.subr.mxu0 %v381_v2  ;;  %v363_v7 = vld [vmem:[%s1237_s1 + $0x60] sm:$0xff]  ;;  %v362_v9 = vld [vmem:[%s1237_s1 + $0x58] sm:$0xff]  ;;  %v361_v11 = vld [vmem:[%s1237_s1 + $0x50] sm:$0xff]  ;;  %vm721_vm7 = vcmask 1044480   ;;  %vm723_vm8 = vcmask 1045504   ;;  %s330_s29 = scalar_lea.vmem %s1245_s9, %s787_s26 }
   0xf   : > { %888 = vmatprep.subr.mxu1 %v365_v3  ;;  %854 = vmatpush3.msra.mxu0 %v381_v2  ;;  %v376_v12 = vld [vmem:[%s1238_s2 + $0x48] sm:$0xff]  ;;  %v375_v14 = vld [vmem:[%s1238_s2 + $0x40] sm:$0xff]  ;;  %v374_v16 = vld [vmem:[%s1238_s2 + $0x38] sm:$0xff] }
  0x10   : > { %889 = vmatpush3.msra.mxu1 %v365_v3  ;;  %855 = vmatprep.subr.mxu0 %v380_v4  ;;  %v360_v13 = vld [vmem:[%s1237_s1 + $0x48] sm:$0xff]  ;;  %v359_v15 = vld [vmem:[%s1237_s1 + $0x40] sm:$0xff]  ;;  %v358_v17 = vld [vmem:[%s1237_s1 + $0x38] sm:$0xff]  ;;  %v650_v3 = vsub.s32 0, %v649_v63 }
  0x11   : > { %890 = vmatprep.subr.mxu1 %v364_v5  ;;  %856 = vmatpush3.msra.mxu0 %v380_v4  ;;  %v373_v18 = vld [vmem:[%s1238_s2 + $0x30] sm:$0xff]  ;;  %v372_v20 = vld [vmem:[%s1238_s2 + $0x28] sm:$0xff]  ;;  %v371_v22 = vld [vmem:[%s1238_s2 + $0x20] sm:$0xff] }
  0x12   : > { %891 = vmatpush3.msra.mxu1 %v364_v5  ;;  %857 = vmatprep.subr.mxu0 %v379_v6  ;;  %v357_v19 = vld [vmem:[%s1237_s1 + $0x30] sm:$0xff]  ;;  %v356_v21 = vld [vmem:[%s1237_s1 + $0x28] sm:$0xff]  ;;  %v355_v23 = vld [vmem:[%s1237_s1 + $0x20] sm:$0xff] }
  0x13   : > { %892 = vmatprep.subr.mxu1 %v363_v7  ;;  %858 = vmatpush3.msra.mxu0 %v379_v6  ;;  %v370_v24 = vld [vmem:[%s1238_s2 + $0x18] sm:$0xff]  ;;  %v1124_v26 = vld [vmem:[%s326_s24] sm:$0xff]  ;;  %v1126_v27 = vld [vmem:[%s326_s24 + $0x8] sm:$0xff] }
  0x14   : > { %893 = vmatpush3.msra.mxu1 %v363_v7  ;;  %859 = vmatprep.subr.mxu0 %v378_v8  ;;  %v354_v25 = vld [vmem:[%s1237_s1 + $0x18] sm:$0xff]  ;;  %v369_v28 = vld [vmem:[%s1238_s2 + $0x10] sm:$0xff]  ;;  %v368_v30 = vld [vmem:[%s1238_s2 + $0x8] sm:$0xff]  ;;  %v338_v32 = vrot.slane %v1124_v26, 7  ;;  %v334_v33 = vrot.slane %v1126_v27, 7  ;;  %v344_v36 = vrot.slane %v1124_v26, 1 }
  0x15   : > { %894 = vmatprep.subr.mxu1 %v362_v9  ;;  %860 = vmatpush3.msra.mxu0 %v378_v8  ;;  %v353_v29 = vld [vmem:[%s1237_s1 + $0x10] sm:$0xff]  ;;  %v352_v31 = vld [vmem:[%s1237_s1 + $0x8] sm:$0xff]  ;;  %v367_v34 = vld [vmem:[%s1238_s2] sm:$0xff]  ;;  %v345_v37 = vrot.slane %v1126_v27, 1 }
  0x16   : > { %895 = vmatpush3.msra.mxu1 %v362_v9  ;;  %861 = vmatprep.subr.mxu0 %v377_v10  ;;  %v351_v35 = vld [vmem:[%s1237_s1] sm:$0xff]  ;;  %v342_v38 = vsel %vm337_vm0, %v334_v33, %v338_v32  ;;  %v339_v39 = vsel %vm337_vm0, %v338_v32, %v334_v33  ;;  %v548_v40 = vld [vmem:[%s1239_s3 + $0x78] sm:$0xff]  ;;  %v547_v42 = vld [vmem:[%s1239_s3 + $0x70] sm:$0xff] }
  0x17   : > { %896 = vmatprep.subr.mxu1 %v361_v11  ;;  %862 = vmatpush3.msra.mxu0 %v377_v10  ;;  %v346_v41 = vsel %vm343_vm1, %v344_v36, %v345_v37  ;;  %v546_v43 = vld [vmem:[%s1239_s3 + $0x68] sm:$0xff]  ;;  %v545_v44 = vld [vmem:[%s1239_s3 + $0x60] sm:$0xff]  ;;  %v544_v45 = vld [vmem:[%s1239_s3 + $0x58] sm:$0xff]  ;;  %v350_v57 = vsel %vm343_vm1, %v345_v37, %v344_v36 }
  0x18   : > { %897 = vmatpush3.msra.mxu1 %v361_v11  ;;  %863 = vmatprep.subr.mxu0 %v376_v12  ;;  %v543_v46 = vld [vmem:[%s1239_s3 + $0x50] sm:$0xff]  ;;  %v542_v47 = vld [vmem:[%s1239_s3 + $0x48] sm:$0xff]  ;;  %v541_v48 = vld [vmem:[%s1239_s3 + $0x40] sm:$0xff] }
  0x19   : > { %898 = vmatprep.subr.mxu1 %v360_v13  ;;  %864 = vmatpush3.msra.mxu0 %v376_v12  ;;  %v540_v49 = vld [vmem:[%s1239_s3 + $0x38] sm:$0xff]  ;;  %v539_v50 = vld [vmem:[%s1239_s3 + $0x30] sm:$0xff]  ;;  %v538_v51 = vld [vmem:[%s1239_s3 + $0x28] sm:$0xff] }
  0x1a   : > { %899 = vmatpush3.msra.mxu1 %v360_v13  ;;  %865 = vmatprep.subr.mxu0 %v375_v14  ;;  %v537_v52 = vld [vmem:[%s1239_s3 + $0x20] sm:$0xff]  ;;  %v536_v53 = vld [vmem:[%s1239_s3 + $0x18] sm:$0xff]  ;;  %v535_v54 = vld [vmem:[%s1239_s3 + $0x10] sm:$0xff] }
  0x1b   : > { %900 = vmatprep.subr.mxu1 %v359_v15  ;;  %866 = vmatpush3.msra.mxu0 %v375_v14  ;;  %v534_v55 = vld [vmem:[%s1239_s3 + $0x8] sm:$0xff]  ;;  %v533_v56 = vld [vmem:[%s1239_s3] sm:$0xff] }
  0x1c   : > { %901 = vmatpush3.msra.mxu1 %v359_v15  ;;  %867 = vmatprep.subr.mxu0 %v374_v16  ;;  %v644_v58 = vld [vmem:[%s1244_s8] sm:$0x1] }
  0x1d   : > { %902 = vmatprep.subr.mxu1 %v358_v17  ;;  %868 = vmatpush3.msra.mxu0 %v374_v16  ;;  %v645_v59 = vadd.f32 1e-05, %v644_v58  ;;  %v788_v6 = vld [vmem:[%s1240_s4] ss:$0 sm:$0xff] }
  0x1e   : > { %903 = vmatpush3.msra.mxu1 %v358_v17  ;;  %869 = vmatprep.subr.mxu0 %v373_v18  ;;  %v789_v9 = vld [vmem:[%s1243_s7] ss:$0 sm:$0xff] }
  0x1f   : > { %904 = vmatprep.subr.mxu1 %v357_v19  ;;  %870 = vmatpush3.msra.mxu0 %v373_v18  ;;  %964 = vrsqrt.f32 %v645_v59  ;;  %v790_v16 = vld [vmem:[%s1241_s5] ss:$0 sm:$0xff] }
  0x20   : > { %905 = vmatpush3.msra.mxu1 %v357_v19  ;;  %871 = vmatprep.subr.mxu0 %v372_v20  ;;  %v791_v19 = vld [vmem:[%s1242_s6] ss:$0 sm:$0xff] }
  0x21   : > { %906 = vmatprep.subr.mxu1 %v356_v21  ;;  %872 = vmatpush3.msra.mxu0 %v372_v20 }
  0x22   : > { %907 = vmatpush3.msra.mxu1 %v356_v21  ;;  %873 = vmatprep.subr.mxu0 %v371_v22 }
  0x23   : > { %908 = vmatprep.subr.mxu1 %v355_v23  ;;  %874 = vmatpush3.msra.mxu0 %v371_v22 }
  0x24   : > { %909 = vmatpush3.msra.mxu1 %v355_v23  ;;  %875 = vmatprep.subr.mxu0 %v370_v24 }
  0x25   : > { %910 = vmatprep.subr.mxu1 %v354_v25  ;;  %876 = vmatpush3.msra.mxu0 %v370_v24 }
  0x26   : > { %911 = vmatpush3.msra.mxu1 %v354_v25  ;;  %877 = vmatprep.subr.mxu0 %v369_v28 }
  0x27   : > { %912 = vmatprep.subr.mxu1 %v353_v29  ;;  %878 = vmatpush3.msra.mxu0 %v369_v28 }
  0x28   : > { %913 = vmatpush3.msra.mxu1 %v353_v29  ;;  %879 = vmatprep.subr.mxu0 %v368_v30 }
  0x29   : > { %914 = vmatprep.subr.mxu1 %v352_v31  ;;  %880 = vmatpush3.msra.mxu0 %v368_v30 }
  0x2a   : > { %915 = vmatpush3.msra.mxu1 %v352_v31  ;;  %881 = vmatprep.subr.mxu0 %v367_v34 }
  0x2b   : > { %916 = vmatprep.subr.mxu1 %v351_v35  ;;  %882 = vmatpush3.msra.mxu0 %v367_v34 }
  0x2c   : > { %883 = vmatprep.mubr.f32.mxu0 %v1124_v26  ;;  %917 = vmatpush3.msra.mxu1 %v351_v35  ;;  %v965_v4 = vpop.eup %964 }
  0x2d   : > { %918 = vmatprep.mubr.f32.mxu1 %v342_v38  ;;  %884 = vmatmul.mubr.f32.vlgmr.msra.gmra.mxu0 %v1126_v27  ;;  %v651_v12 = vrot.slane %v965_v4, %v650_v3 }
  0x2e   : > { %919 = vmatmul.mubr.f32.vlgmr.msra.gmra.mxu1 %v339_v39  ;;  %921 = vmatprep.subr.mxu0 %v548_v40 }
  0x2f   : > { %953 = vmatprep.mubr.f32.mxu0 %v346_v41  ;;  %922 = vmatpush3.msra.mxu0 %v548_v40 }
  0x30   : > { %923 = vmatprep.subr.mxu0 %v547_v42 }
  0x31   : > { %924 = vmatpush3.msra.mxu0 %v547_v42 }
  0x32   : > { %925 = vmatprep.subr.mxu0 %v546_v43 }
  0x33   : > { %926 = vmatpush3.msra.mxu0 %v546_v43 }
  0x34   : > { %927 = vmatprep.subr.mxu0 %v545_v44 }
  0x35   : > { %928 = vmatpush3.msra.mxu0 %v545_v44 }
  0x36   : > { %929 = vmatprep.subr.mxu0 %v544_v45 }
  0x37   : > { %930 = vmatpush3.msra.mxu0 %v544_v45 }
  0x38   : > { %931 = vmatprep.subr.mxu0 %v543_v46 }
  0x39   : > { %932 = vmatpush3.msra.mxu0 %v543_v46 }
  0x3a   : > { %933 = vmatprep.subr.mxu0 %v542_v47 }
  0x3b   : > { %934 = vmatpush3.msra.mxu0 %v542_v47 }
  0x3c   : > { %935 = vmatprep.subr.mxu0 %v541_v48 }
  0x3d   : > { %936 = vmatpush3.msra.mxu0 %v541_v48 }
  0x3e   : > { %937 = vmatprep.subr.mxu0 %v540_v49 }
  0x3f   : > { %938 = vmatpush3.msra.mxu0 %v540_v49 }
  0x40   : > { %939 = vmatprep.subr.mxu0 %v539_v50 }
  0x41   : > { %940 = vmatpush3.msra.mxu0 %v539_v50 }
  0x42   : > { %941 = vmatprep.subr.mxu0 %v538_v51 }
  0x43   : > { %942 = vmatpush3.msra.mxu0 %v538_v51 }
  0x44   : > { %943 = vmatprep.subr.mxu0 %v537_v52 }
  0x45   : > { %944 = vmatpush3.msra.mxu0 %v537_v52 }
  0x46   : > { %945 = vmatprep.subr.mxu0 %v536_v53 }
  0x47   : > { %946 = vmatpush3.msra.mxu0 %v536_v53 }
  0x48   : > { %947 = vmatprep.subr.mxu0 %v535_v54 }
  0x49   : > { %948 = vmatpush3.msra.mxu0 %v535_v54 }
  0x4a   : > { %949 = vmatprep.subr.mxu0 %v534_v55 }
  0x4b   : > { %950 = vmatpush3.msra.mxu0 %v534_v55 }
  0x4c   : > { %951 = vmatprep.subr.mxu0 %v533_v56 }
  0x4d   : > { %952 = vmatpush3.msra.mxu0 %v533_v56 }
  0x4e   : > { %954 = vmatmul.mubr.f32.vlgmr.msra.gmra.mxu0 %v350_v57 }
  0xed   : > { %v885_v61 = vpop.f32.mrf.mxu0 }
  0xee   : > { %v920_v62 = vpop.f32.mrf.mxu1 }
  0xef   : > { %v449_v0 = vpop.f32.mrf.mxu0  ;;  %v530_v2 = vadd.f32 %v920_v62, %v885_v61 }
  0xf0   : > { %v524_v1 = vpop.f32.mrf.mxu1 }
  0xf1   : > { %v525_v7 = vadd.f32 %v524_v1, %v449_v0 }
 0x10e   : > { %v955_v5 = vpop.f32.mrf.mxu0 }
 0x10f   : > { %v625_v8 = vadd.f32 %v955_v5, %v530_v2 }
 0x110   : > { %v615_v10 = vpop.f32.mrf.mxu0 }
 0x111   : > { %v634_v11 = vadd.f32 %v788_v6, %v625_v8  ;;  %v624_v13 = vadd.f32 %v615_v10, %v525_v7 }
 0x113   : > { %v643_v14 = vsub.f32 %v634_v11, %v789_v9  ;;  %v633_v15 = vadd.f32 %v788_v6, %v624_v13 }
 0x115   : > { %v654_v17 = vmul.f32 %v651_v12, %v643_v14  ;;  %v642_v18 = vsub.f32 %v633_v15, %v789_v9 }
 0x117   : > { %v663_v20 = vmul.f32 %v790_v16, %v654_v17  ;;  %v653_v21 = vmul.f32 %v651_v12, %v642_v18 }
 0x119   : > { %v672_v22 = vadd.f32 %v791_v19, %v663_v20  ;;  %v662_v23 = vmul.f32 %v790_v16, %v653_v21 }
 0x11b   : > { %v677_v24 = vmul.f32 1.442695, %v672_v22  ;;  %v671_v25 = vadd.f32 %v791_v19, %v662_v23  ;;  %vm674_vm2 = vcmp.gt.f32.partialorder %v672_v22, 0.0 }
 0x11d   : > { %966 = vpow2.f32 %v677_v24  ;;  %v675_v26 = vmul.f32 1.442695, %v671_v25  ;;  %vm673_vm3 = vcmp.gt.f32.partialorder %v671_v25, 0.0 }
 0x11f   : > { %968 = vpow2.f32 %v675_v26 }
 0x12a   : > { %v967_v27 = vpop.eup %966 }
 0x12b   : > { %v793_v28 = vadd.f32 -1.0, %v967_v27 }
 0x12c   : > { %v969_v29 = vpop.eup %968 }
 0x12d   : > { %v682_v30 = vsel %vm674_vm2, %v672_v22, %v793_v28  ;;  %v792_v31 = vadd.f32 -1.0, %v969_v29 }
 0x12e   : > { %v691_v32 = vrot.slane %v682_v30, 1  ;;  %v694_v37 = vrot.slane %v682_v30, 2 }
 0x12f   : > { %v681_v33 = vsel %vm673_vm3, %v671_v25, %v792_v31 }
 0x130   : > { %v684_v34 = vrot.slane %v681_v33, 1  ;;  %v693_v35 = vmax.f32 %v681_v33, %v691_v32  ;;  %v697_v36 = vmax.f32 %v682_v30, %v691_v32  ;;  %v687_v39 = vrot.slane %v681_v33, 2 }
 0x132   : > { %v686_v38 = vmax.f32 %v681_v33, %v684_v34  ;;  %v696_v41 = vmax.f32 %v693_v35, %v694_v37  ;;  %v698_v42 = vmax.f32 %v697_v36, %v694_v37 }
 0x134   : > { %v689_v40 = vmax.f32 %v686_v38, %v687_v39  ;;  %v705_v46 = vrot.slane %v696_v41, 3  ;;  %v708_v48 = vrot.slane %v698_v42, 4  ;;  %v710_v50 = vrot.slane %v698_v42, 5 }
 0x135   : > { %v712_v52 = vrot.slane %v698_v42, 6 }
 0x136   : > { %v700_v43 = vrot.slane %v689_v40, 1  ;;  %v702_v44 = vrot.slane %v689_v40, 2  ;;  %v714_v45 = vsel %vm337_vm0, %v686_v38, %v689_v40 }
 0x138   : > { %v716_v47 = vsel %vm715_vm4, %v714_v45, %v700_v43 }
 0x139   : > { %v718_v49 = vsel %vm717_vm5, %v716_v47, %v702_v44 }
 0x13a   : > { %v720_v51 = vsel %vm719_vm6, %v718_v49, %v705_v46 }
 0x13b   : > { %v722_v53 = vsel %vm721_vm7, %v720_v51, %v708_v48 }
 0x13c   : > { %v724_v54 = vsel %vm723_vm8, %v722_v53, %v710_v50 }
 0x13d   : > { %v725_v55 = vsel %vm343_vm1, %v724_v54, %v712_v52 }
 0x13e   : > { %726 = vst [vmem:[%s330_s29] sm:$0xff] %v725_v55 }
 0x13f PF: > { %s19_s30 = sadd.s32 1, %s976_s30  }
 0x140   : > { %p16_p4 = scmp.ge.s32.totalorder %s19_s30, 4  }
 0x142   :  { %18 = sbr.rel (!%p16_p4) target bundleno = 1 (0x1), region = 86 }

// kernel: informer_forward.14
= control target key start
LH: loop header
LB: loop body
LE: loop exit
PB: predicated region body
PF: predicated region fallthrough
CT: control target
= control target key end

     0   :  { %8 = vsyncpa [#allocation3], 0  ;;  %s495_s0 = inlined_call_operand.vmem [shape: f32[2,8,128], index: 0, kind: input, shape index: {}]   ;;  %s496_s1 = inlined_call_operand.hbm [shape: f32[1,128], index: 1, kind: input, shape index: {}]   ;;  %s497_s2 = inlined_call_operand.hbm [shape: f32[1,128], index: 2, kind: input, shape index: {}]   ;;  %s498_s3 = inlined_call_operand.vmem [shape: f32[2,8,128], index: 3, kind: output, shape index: {}]  }
   0x1   :  { %9 = vsyncpa [#allocation5], 0  ;;  %s433_s12 = smov 0  }
   0x2 LB: > { %s439_s13 = sadd.s32 4294967295, %s409_s12   ;;  %p299_p0 = scmp.ge.s32.totalorder %s409_s12, 1  ;;  %s409_s12 = sphi %s433_s12, %s15_s12  }
   0x3   : > { %p114_p1 = scmp.lt.s32.totalorder %s409_s12, 3  ;;  %p499_p2 = scmp.eq.s32.totalorder %s439_s13, 0 }
   0x4   : > { %s411_s15 = smov [#allocation2]   ;;  %s412_s17 = smov [#allocation4]  }
   0x5   : > { %p444_p3 = pnand %p299_p0, %p114_p1  ;;  %s127_s16 = sshll.u32 %s411_s15, 4  ;;  %s128_s16 = int_to_ptr.vmem [resolvable:$true] %s127_s16 }
   0x6   : > { %s138_s18 = sshll.u32 %s412_s17, 4  ;;  %s354_s20 = scalar_lea.vmem %s128_s16, 16  ;;  %s139_s18 = int_to_ptr.vmem [resolvable:$true] %s138_s18 }
   0x7   : > { %p320_p4 = pneg %p444_p3  ;;  %p355_p7 = scmp.ne.s32.totalorder %s128_s16, %s354_s20 }
   0x8   : > { %s361_s21 = scalar_lea.vmem %s128_s16, 32  ;;  %p362_p10 = scmp.lt.s32.totalorder %s128_s16, %s128_s16 }
   0x9   : > { %p452_p5 = pnand %p499_p2, %p320_p4  ;;  %p363_p11 = scmp.lt.s32.totalorder %s361_s21, %s354_s20 }
   0xb   : > { %p345_p6 = pneg %p452_p5  ;;  %p364_p12 = por %p363_p11, %p362_p10 }
   0xd   : > { %p357_p8 = pnand %p355_p7, %p345_p6 }
   0xf   : > { %p358_p9 = pneg %p357_p8 }
  0x11   : > { %p365_p13 = pnand %p364_p12, %p358_p9 }
  0x13   : > { %368 = shalt.err (!%p365_p13)
}
  0x14   : > { %323 = dma.hbm_to_vmem [thread:$0]  (!%p452_p5), %s496_s1, 16, %s128_s16, [#allocation3]  }
  0x15   : > { %s380_s24 = scalar_lea.vmem %s139_s18, 16  ;;  %s387_s25 = scalar_lea.vmem %s139_s18, 32 }
  0x16   : > { %p381_p0 = scmp.ne.s32.totalorder %s139_s18, %s380_s24  ;;  %p388_p7 = scmp.lt.s32.totalorder %s139_s18, %s139_s18 }
  0x17   : > { %p389_p8 = scmp.lt.s32.totalorder %s387_s25, %s380_s24 }
  0x18   : > { %p383_p1 = pnand %p381_p0, %p345_p6 }
  0x19   : > { %p390_p2 = por %p389_p8, %p388_p7 }
  0x1a   : > { %p384_p4 = pneg %p383_p1 }
  0x1c   : > { %p391_p10 = pnand %p390_p2, %p384_p4 }
  0x1e   : > { %394 = shalt.err (!%p391_p10)
}
  0x1f   : > { %326 = dma.hbm_to_vmem [thread:$0]  (!%p452_p5), %s497_s2, 16, %s139_s18, [#allocation5]  }
  0x20   : > { %158 = sbr.rel (%p444_p3) target bundleno = 355 (0x163), region = 32  ;;  %p502_p9 = scmp.eq.s32.totalorder (!%p444_p3), %s439_s13, 0 }
  0x25   : > { %400 = dma.done.wait (%p502_p9), [#allocation3], 16   ;;  %p503_p6 = pmov %p502_p9 }
  0x27   : > { %402 = vsyncadd (%p503_p6), [#allocation3], 4294967280  ;;  %p504_p11 = pmov %p503_p6 }
  0x28   : > { %p505_p2 = pmov %p503_p6 }
  0x29   : > { %404 = dma.done.wait (%p504_p11), [#allocation5], 16  }
  0x2a   : > { %406 = vsyncadd (%p505_p2), [#allocation5], 4294967280  ;;  %p184_p12 = scmp.lt.s32.totalorder %s439_s13, 1  ;;  %v308_v9 = vld [vmem:[#allocation2] ss:$0 sm:$0xff] }
  0x2b   : > { %v309_v11 = vld [vmem:[#allocation4] ss:$0 sm:$0xff] }
  0x2c   : > { %s507_s13 = smov (!%p184_p12, %s439_s13), 1 }
  0x2d   : > { %s306_s28 = sshll.u32 %s507_s13, 3 }
  0x2e   : > { %s187_s4 = scalar_lea.vmem %s495_s0, %s306_s28  ;;  %s191_s7 = scalar_lea.vmem %s498_s3, %s306_s28 }
  0x2f   : > { %v192_v0 = vld [vmem:[%s187_s4] sm:$0xff] }
  0x30   : > { %195 = vadd.xlane.f32.xlu0 %v192_v0 }
  0xb9   : > { %v196_v1 = vpop.xlane.xlu0 %195 }
  0xba   : > { %v198_v2 = vmul.f32 0.0078125, %v196_v1 }
  0xbc   : > { %v199_v3 = vsub.f32 %v192_v0, %v198_v2 }
  0xbe   : > { %v200_v4 = vmul.f32 %v199_v3, %v199_v3 }
  0xc0   : > { %201 = vadd.xlane.f32.xlu0 %v200_v4 }
 0x149   : > { %v202_v5 = vpop.xlane.xlu0 %201 }
 0x14a   : > { %v203_v6 = vmul.f32 0.0078125, %v202_v5 }
 0x14c   : > { %v204_v7 = vadd.f32 1e-05, %v203_v6 }
 0x14e   : > { %341 = vrsqrt.f32 %v204_v7 }
 0x15b   : > { %v342_v8 = vpop.eup %341 }
 0x15c   : > { %v206_v10 = vmul.f32 %v342_v8, %v199_v3 }
 0x15e   : > { %v213_v12 = vmul.f32 %v308_v9, %v206_v10 }
 0x160   : > { %v220_v13 = vadd.f32 %v309_v11, %v213_v12 }
 0x162   : > { %221 = vst [vmem:[%s191_s7] sm:$0xff] %v220_v13 }
 0x163 PF: > { %s15_s12 = sadd.s32 1, %s409_s12  }
 0x164   : > { %p12_p3 = scmp.ge.s32.totalorder %s15_s12, 4  }
 0x166   :  { %14 = sbr.rel (!%p12_p3) target bundleno = 2 (0x2), region = 71 }
 0x16b   :  { %241 = vsyncpa [#allocation3], 1 }
 0x16c   :  { %243 = vsyncpa [#allocation3 + $0x1], 1 }
 0x16d   :  { %244 = vsyncpa [#allocation5], 1 }

// kernel: informer_forward.13
= control target key start
LH: loop header
LB: loop body
LE: loop exit
PB: predicated region body
PF: predicated region fallthrough
CT: control target
= control target key end

     0   :  { %s2439_s24 = smov 0   ;;  %s2981_s0 = inlined_call_operand.vmem [shape: f32[2,8,128], index: 0, kind: input, shape index: {}]   ;;  %s2982_s1 = inlined_call_operand.vmem [shape: f32[128,128], index: 1, kind: input, shape index: {}]   ;;  %s2983_s2 = inlined_call_operand.vmem [shape: f32[1,128], index: 2, kind: input, shape index: {}]   ;;  %s2984_s3 = inlined_call_operand.vmem [shape: f32[128,128], index: 3, kind: input, shape index: {}]   ;;  %s2985_s4 = inlined_call_operand.vmem [shape: f32[1,128], index: 4, kind: input, shape index: {}]   ;;  %s2986_s5 = inlined_call_operand.vmem [shape: f32[128,128], index: 5, kind: input, shape index: {}]   ;;  %s2987_s6 = inlined_call_operand.vmem [shape: f32[1,128], index: 6, kind: input, shape index: {}]   ;;  %s2988_s7 = inlined_call_operand.vmem [shape: f32[128,128], index: 7, kind: input, shape index: {}]   ;;  %s2989_s8 = inlined_call_operand.vmem [shape: f32[1,128], index: 8, kind: input, shape index: {}]   ;;  %s2990_s9 = inlined_call_operand.vmem [shape: f32[1,128], index: 9, kind: input, shape index: {}]   ;;  %s2991_s10 = inlined_call_operand.vmem [shape: f32[1,128], index: 10, kind: input, shape index: {}]   ;;  %s2992_s11 = inlined_call_operand.vmem [shape: f32[128,128], index: 11, kind: input, shape index: {}]   ;;  %s2993_s12 = inlined_call_operand.vmem [shape: f32[1,128], index: 12, kind: input, shape index: {}]   ;;  %s2994_s13 = inlined_call_operand.vmem [shape: f32[128,128], index: 13, kind: input, shape index: {}]   ;;  %s2995_s14 = inlined_call_operand.vmem [shape: f32[1,128], index: 14, kind: input, shape index: {}]   ;;  %s2996_s15 = inlined_call_operand.vmem [shape: f32[1,128], index: 15, kind: input, shape index: {}]   ;;  %s2997_s16 = inlined_call_operand.vmem [shape: f32[1,128], index: 16, kind: input, shape index: {}]   ;;  %s2998_s17 = inlined_call_operand.vmem [shape: f32[2,8,128], index: 17, kind: output, shape index: {}]  }
   0x1   :  { %3000 = sst [smem:[#allocation2_spill]] %s2981_s0 }
   0x2   :  { %3001 = sst [smem:[#allocation3_spill]] %s2982_s1 }
   0x3 LB: > { %s1902_s25 = sadd.s32 4294967295, %s2342_s24   ;;  %p1906_p0 = scmp.ge.s32.totalorder %s2342_s24, 1  ;;  %s2342_s24 = sphi %s2439_s24, %s27_s24  }
   0x4   : > { %p486_p1 = scmp.lt.s32.totalorder %s2342_s24, 3 }
   0x6   : > { %p487_p2 = pnand %p1906_p0, %p486_p1 }
   0x7   : > { %s3002_s0 = sld [smem:[#allocation3_spill]] (!%p487_p2)  ;;  %p536_p3 = scmp.lt.s32.totalorder (!%p487_p2), %s1902_s25, 1 }
   0x8   : > { %490 = sbr.rel (%p487_p2) target bundleno = 3823 (0xeef), region = 88  ;;  %s3003_s29 = sld [smem:[#allocation2_spill]] (!%p487_p2) }
   0x9   : > { %s2346_s28 = smov (!%p487_p2), 96   ;;  %s2347_s20 = smov (!%p487_p2), 64  }
   0xa   : > { %s2348_s21 = smov (!%p487_p2), 32  }
   0xd   : > { %v653_v0 = vld [vmem:[%s2984_s3 + $0x78] sm:$0xff]  ;;  %v2344_v2 = vmov 0.0   ;;  %v652_v3 = vld [vmem:[%s2984_s3 + $0x70] sm:$0xff]  ;;  %v651_v5 = vld [vmem:[%s2984_s3 + $0x68] sm:$0xff]  ;;  %s3005_s25 = smov (!%p536_p3, %s1902_s25), 1  ;;  %vm2345_vm0 = vmmov 0  }
   0xe   : > { %v560_v1 = vld [vmem:[%s3002_s0 + $0x78] sm:$0xff]  ;;  %2086 = vmatprep.subr.mxu1 %v2344_v2  ;;  %2051 = vmatprep.subr.mxu0 %v2344_v2  ;;  %v559_v4 = vld [vmem:[%s3002_s0 + $0x70] sm:$0xff]  ;;  %v558_v6 = vld [vmem:[%s3002_s0 + $0x68] sm:$0xff]  ;;  %s1907_s30 = sshll.u32 %s3005_s25, 3  ;;  %vm824_vm1 = vcmask 261120   ;;  %vm902_vm2 = vcmask 64512  }
   0xf   : > { %2087 = vmatpush3.msra.mxu1 %v653_v0  ;;  %2052 = vmatpush3.msra.mxu0 %v560_v1  ;;  %v650_v7 = vld [vmem:[%s2984_s3 + $0x60] sm:$0xff]  ;;  %v649_v9 = vld [vmem:[%s2984_s3 + $0x58] sm:$0xff]  ;;  %v648_v11 = vld [vmem:[%s2984_s3 + $0x50] sm:$0xff]  ;;  %s539_s18 = scalar_lea.vmem %s3003_s29, %s1907_s30  ;;  %vm1499_vm3 = vcmask 523264   ;;  %vm1501_vm4 = vcmask 785408   ;;  %s543_s29 = scalar_lea.vmem %s2998_s17, %s1907_s30 }
  0x10   : > { %2088 = vmatprep.subr.mxu1 %v2344_v2  ;;  %2053 = vmatprep.subr.mxu0 %v2344_v2  ;;  %v557_v8 = vld [vmem:[%s3002_s0 + $0x60] sm:$0xff]  ;;  %v556_v10 = vld [vmem:[%s3002_s0 + $0x58] sm:$0xff]  ;;  %v555_v12 = vld [vmem:[%s3002_s0 + $0x50] sm:$0xff] }
  0x11   : > { %2089 = vmatpush3.msra.mxu1 %v652_v3  ;;  %2054 = vmatpush3.msra.mxu0 %v559_v4  ;;  %v647_v13 = vld [vmem:[%s2984_s3 + $0x48] sm:$0xff]  ;;  %v646_v15 = vld [vmem:[%s2984_s3 + $0x40] sm:$0xff]  ;;  %v645_v17 = vld [vmem:[%s2984_s3 + $0x38] sm:$0xff] }
  0x12   : > { %2090 = vmatprep.subr.mxu1 %v2344_v2  ;;  %2055 = vmatprep.subr.mxu0 %v2344_v2  ;;  %v554_v14 = vld [vmem:[%s3002_s0 + $0x48] sm:$0xff]  ;;  %v553_v16 = vld [vmem:[%s3002_s0 + $0x40] sm:$0xff]  ;;  %v552_v18 = vld [vmem:[%s3002_s0 + $0x38] sm:$0xff] }
  0x13   : > { %2091 = vmatpush3.msra.mxu1 %v651_v5  ;;  %2056 = vmatpush3.msra.mxu0 %v558_v6  ;;  %v644_v19 = vld [vmem:[%s2984_s3 + $0x30] sm:$0xff]  ;;  %v643_v21 = vld [vmem:[%s2984_s3 + $0x28] sm:$0xff]  ;;  %v642_v23 = vld [vmem:[%s2984_s3 + $0x20] sm:$0xff] }
  0x14   : > { %2092 = vmatprep.subr.mxu1 %v2344_v2  ;;  %2057 = vmatprep.subr.mxu0 %v2344_v2  ;;  %v551_v20 = vld [vmem:[%s3002_s0 + $0x30] sm:$0xff]  ;;  %v550_v22 = vld [vmem:[%s3002_s0 + $0x28] sm:$0xff]  ;;  %v549_v24 = vld [vmem:[%s3002_s0 + $0x20] sm:$0xff] }
  0x15   : > { %2093 = vmatpush3.msra.mxu1 %v650_v7  ;;  %2058 = vmatpush3.msra.mxu0 %v557_v8  ;;  %v641_v25 = vld [vmem:[%s2984_s3 + $0x18] sm:$0xff]  ;;  %v640_v27 = vld [vmem:[%s2984_s3 + $0x10] sm:$0xff]  ;;  %v639_v29 = vld [vmem:[%s2984_s3 + $0x8] sm:$0xff] }
  0x16   : > { %2094 = vmatprep.subr.mxu1 %v2344_v2  ;;  %2059 = vmatprep.subr.mxu0 %v2344_v2  ;;  %v548_v26 = vld [vmem:[%s3002_s0 + $0x18] sm:$0xff]  ;;  %v547_v28 = vld [vmem:[%s3002_s0 + $0x10] sm:$0xff]  ;;  %v546_v30 = vld [vmem:[%s3002_s0 + $0x8] sm:$0xff] }
  0x17   : > { %2095 = vmatpush3.msra.mxu1 %v649_v9  ;;  %2060 = vmatpush3.msra.mxu0 %v556_v10  ;;  %v638_v31 = vld [vmem:[%s2984_s3] sm:$0xff]  ;;  %v746_v42 = vld [vmem:[%s2986_s5 + $0x78] sm:$0xff]  ;;  %v745_v43 = vld [vmem:[%s2986_s5 + $0x70] sm:$0xff] }
  0x18   : > { %2096 = vmatprep.subr.mxu1 %v2344_v2  ;;  %2061 = vmatprep.subr.mxu0 %v2344_v2  ;;  %v2582_v32 = vld [vmem:[%s539_s18] sm:$0xff]  ;;  %v744_v44 = vld [vmem:[%s2986_s5 + $0x68] sm:$0xff]  ;;  %v742_v46 = vld [vmem:[%s2986_s5 + $0x58] sm:$0xff] }
  0x19   : > { %2097 = vmatpush3.msra.mxu1 %v648_v11  ;;  %2062 = vmatpush3.msra.mxu0 %v555_v12  ;;  %v545_v33 = vld [vmem:[%s3002_s0] sm:$0xff]  ;;  %v741_v47 = vld [vmem:[%s2986_s5 + $0x50] sm:$0xff]  ;;  %v740_v48 = vld [vmem:[%s2986_s5 + $0x48] sm:$0xff] }
  0x1a   : > { %2098 = vmatprep.subr.mxu1 %v2344_v2  ;;  %2063 = vmatprep.subr.mxu0 %v2344_v2  ;;  %v1910_v34 = vld [vmem:[%s2985_s4] ss:$0 sm:$0xff]  ;;  %v738_v50 = vld [vmem:[%s2986_s5 + $0x38] sm:$0xff]  ;;  %v737_v51 = vld [vmem:[%s2986_s5 + $0x30] sm:$0xff] }
  0x1b   : > { %2099 = vmatpush3.msra.mxu1 %v647_v13  ;;  %2064 = vmatpush3.msra.mxu0 %v554_v14  ;;  %v1909_v36 = vld [vmem:[%s2983_s2] ss:$0 sm:$0xff]  ;;  %v736_v52 = vld [vmem:[%s2986_s5 + $0x28] sm:$0xff]  ;;  %v734_v54 = vld [vmem:[%s2986_s5 + $0x18] sm:$0xff] }
  0x1c   : > { %2100 = vmatprep.subr.mxu1 %v2344_v2  ;;  %2065 = vmatprep.subr.mxu0 %v2344_v2  ;;  %v743_v45 = vld [vmem:[%s2986_s5 + $0x60] sm:$0xff]  ;;  %v733_v55 = vld [vmem:[%s2986_s5 + $0x10] sm:$0xff]  ;;  %v732_v56 = vld [vmem:[%s2986_s5 + $0x8] sm:$0xff] }
  0x1d   : > { %2101 = vmatpush3.msra.mxu1 %v646_v15  ;;  %2066 = vmatpush3.msra.mxu0 %v553_v16  ;;  %v739_v49 = vld [vmem:[%s2986_s5 + $0x40] sm:$0xff] }
  0x1e   : > { %2102 = vmatprep.subr.mxu1 %v2344_v2  ;;  %2067 = vmatprep.subr.mxu0 %v2344_v2  ;;  %v735_v53 = vld [vmem:[%s2986_s5 + $0x20] sm:$0xff] }
  0x1f   : > { %2103 = vmatpush3.msra.mxu1 %v645_v17  ;;  %2068 = vmatpush3.msra.mxu0 %v552_v18  ;;  %v731_v57 = vld [vmem:[%s2986_s5] sm:$0xff] }
  0x20   : > { %2104 = vmatprep.subr.mxu1 %v2344_v2  ;;  %2069 = vmatprep.subr.mxu0 %v2344_v2  ;;  %v1911_v4 = vld [vmem:[%s2987_s6] ss:$0 sm:$0xff] }
  0x21   : > { %2105 = vmatpush3.msra.mxu1 %v644_v19  ;;  %2070 = vmatpush3.msra.mxu0 %v551_v20 }
  0x22   : > { %2106 = vmatprep.subr.mxu1 %v2344_v2  ;;  %2071 = vmatprep.subr.mxu0 %v2344_v2 }
  0x23   : > { %2107 = vmatpush3.msra.mxu1 %v643_v21  ;;  %2072 = vmatpush3.msra.mxu0 %v550_v22 }
  0x24   : > { %2108 = vmatprep.subr.mxu1 %v2344_v2  ;;  %2073 = vmatprep.subr.mxu0 %v2344_v2 }
  0x25   : > { %2109 = vmatpush3.msra.mxu1 %v642_v23  ;;  %2074 = vmatpush3.msra.mxu0 %v549_v24 }
  0x26   : > { %2110 = vmatprep.subr.mxu1 %v2344_v2  ;;  %2075 = vmatprep.subr.mxu0 %v2344_v2 }
  0x27   : > { %2111 = vmatpush3.msra.mxu1 %v641_v25  ;;  %2076 = vmatpush3.msra.mxu0 %v548_v26 }
  0x28   : > { %2112 = vmatprep.subr.mxu1 %v2344_v2  ;;  %2077 = vmatprep.subr.mxu0 %v2344_v2 }
  0x29   : > { %2113 = vmatpush3.msra.mxu1 %v640_v27  ;;  %2078 = vmatpush3.msra.mxu0 %v547_v28 }
  0x2a   : > { %2114 = vmatprep.subr.mxu1 %v2344_v2  ;;  %2079 = vmatprep.subr.mxu0 %v2344_v2 }
  0x2b   : > { %2115 = vmatpush3.msra.mxu1 %v639_v29  ;;  %2080 = vmatpush3.msra.mxu0 %v546_v30 }
  0x2c   : > { %2116 = vmatprep.subr.mxu1 %v2344_v2  ;;  %2118 = vmatprep.mubr.msk.f32.mxu1 %vm2345_vm0, %v2344_v2 }
  0x2d   : > { %2117 = vmatpush3.msra.mxu1 %v638_v31  ;;  %2081 = vmatprep.subr.mxu0 %v2344_v2 }
  0x2e   : > { %2119 = vmatmul.mubr.f32.vlgmr.msra.gmra.mxu1 %v2582_v32  ;;  %2082 = vmatpush3.msra.mxu0 %v545_v33 }
  0x2f   : > { %2083 = vmatprep.mubr.msk.f32.mxu0 %vm2345_vm0, %v2344_v2  ;;  %2156 = vmatprep.subr.mxu1 %v2344_v2 }
  0x30   : > { %2084 = vmatmul.mubr.f32.vlgmr.msra.gmra.mxu0 %v2582_v32  ;;  %2158 = vmatprep.mubr.msk.f32.mxu1 %vm2345_vm0, %v2344_v2 }
  0x31   : > { %2121 = vmatprep.subr.mxu0 %v2344_v2  ;;  %2153 = vmatprep.mubr.msk.f32.mxu0 %vm2345_vm0, %v2344_v2 }
  0x32   : > { %2122 = vmatpush3.msra.mxu0 %v746_v42 }
  0x33   : > { %2123 = vmatprep.subr.mxu0 %v2344_v2 }
  0x34   : > { %2124 = vmatpush3.msra.mxu0 %v745_v43 }
  0x35   : > { %2125 = vmatprep.subr.mxu0 %v2344_v2 }
  0x36   : > { %2126 = vmatpush3.msra.mxu0 %v744_v44 }
  0x37   : > { %2127 = vmatprep.subr.mxu0 %v2344_v2 }
  0x38   : > { %2128 = vmatpush3.msra.mxu0 %v743_v45 }
  0x39   : > { %2129 = vmatprep.subr.mxu0 %v2344_v2 }
  0x3a   : > { %2130 = vmatpush3.msra.mxu0 %v742_v46 }
  0x3b   : > { %2131 = vmatprep.subr.mxu0 %v2344_v2 }
  0x3c   : > { %2132 = vmatpush3.msra.mxu0 %v741_v47 }
  0x3d   : > { %2133 = vmatprep.subr.mxu0 %v2344_v2 }
  0x3e   : > { %2134 = vmatpush3.msra.mxu0 %v740_v48 }
  0x3f   : > { %2135 = vmatprep.subr.mxu0 %v2344_v2 }
  0x40   : > { %2136 = vmatpush3.msra.mxu0 %v739_v49 }
  0x41   : > { %2137 = vmatprep.subr.mxu0 %v2344_v2 }
  0x42   : > { %2138 = vmatpush3.msra.mxu0 %v738_v50 }
  0x43   : > { %2139 = vmatprep.subr.mxu0 %v2344_v2 }
  0x44   : > { %2140 = vmatpush3.msra.mxu0 %v737_v51 }
  0x45   : > { %2141 = vmatprep.subr.mxu0 %v2344_v2 }
  0x46   : > { %2142 = vmatpush3.msra.mxu0 %v736_v52 }
  0x47   : > { %2143 = vmatprep.subr.mxu0 %v2344_v2 }
  0x48   : > { %2144 = vmatpush3.msra.mxu0 %v735_v53 }
  0x49   : > { %2145 = vmatprep.subr.mxu0 %v2344_v2 }
  0x4a   : > { %2146 = vmatpush3.msra.mxu0 %v734_v54 }
  0x4b   : > { %2147 = vmatprep.subr.mxu0 %v2344_v2 }
  0x4c   : > { %2148 = vmatpush3.msra.mxu0 %v733_v55 }
  0x4d   : > { %2149 = vmatprep.subr.mxu0 %v2344_v2 }
  0x4e   : > { %2150 = vmatpush3.msra.mxu0 %v732_v56 }
  0x4f   : > { %2151 = vmatprep.subr.mxu0 %v2344_v2 }
  0x50   : > { %2152 = vmatpush3.msra.mxu0 %v731_v57 }
  0x51   : > { %2154 = vmatmul.mubr.f32.vlgmr.msra.gmra.mxu0 %v2582_v32  ;;  %2196 = vmatprep.subr.mxu0 %v2344_v2 }
  0x52   : > { %2228 = vmatprep.mubr.msk.f32.mxu0 %vm2345_vm0, %v2344_v2 }
  0xee   : > { %v727_v35 = vpop.f32.mrf.mxu1 }
  0xef   : > { %v2607_v37 = vadd.f32 %v1910_v34, %v727_v35 }
  0xf0   : > { %v634_v38 = vpop.f32.mrf.mxu0  ;;  %v2120_v39 = vpop.f32.mrf.mxu1 }
  0xf1   : > { %v2609_v40 = vadd.f32 %v1909_v36, %v634_v38  ;;  %989 = vrot.lane.b32.xlu1 %v2607_v37, %s2346_s28  ;;  %2157 = vmatpush3.xpose.msk.msra.mxu1 %vm824_vm1, %v2607_v37 }
  0xf2   : > { %v2085_v41 = vpop.f32.mrf.mxu0  ;;  %2161 = vmatprep.subr.mxu1 %v2344_v2 }
  0xf4   : > { %2159 = vmatmul.mubr.msk.f32.vlgmr.msra.gmra.mxu1 %vm824_vm1, %v2609_v40 }
  0xf5   : > { %987 = vrot.lane.b32.xlu1 %v2609_v40, %s2346_s28  ;;  %2163 = vmatprep.mubr.msk.f32.mxu1 %vm2345_vm0, %v2344_v2 }
 0x111   : > { %v820_v5 = vpop.f32.mrf.mxu0 }
 0x112   : > { %v2694_v6 = vadd.f32 %v1911_v4, %v820_v5  ;;  %v1514_v4 = vld [vmem:[%s2988_s7 + $0x58] sm:$0xff]  ;;  %v1513_v5 = vld [vmem:[%s2988_s7 + $0x50] sm:$0xff] }
 0x113   : > { %v2155_v7 = vpop.f32.mrf.mxu0 }
 0x114   : > { %2162 = vmatpush3.msra.mxu1 %v2694_v6  ;;  %v1511_v7 = vld [vmem:[%s2988_s7 + $0x40] sm:$0xff] }
 0x115   : > { %2166 = vmatprep.subr.mxu1 %v2344_v2 }
 0x163   : > { %v990_v10 = vpop.permute.xlu1 %989 }
 0x167   : > { %v988_v12 = vpop.permute.xlu1 %987 }
 0x1b4   : > { %v897_v58 = vpop.f32.mrf.mxu1 }
 0x1b5   : > { %v901_v59 = vmul.f32 0.17677669, %v897_v58 }
 0x1b6   : > { %v2160_v60 = vpop.f32.mrf.mxu1 }
 0x1b7   : > { %v903_v61 = vsel %vm902_vm2, %v901_v59, -inf }
 0x1b8   : > { %904 = vmax.xlane.f32.xlu0 %v903_v61 }
 0x241   : > { %v905_v62 = vpop.xlane.xlu0 %904 }
 0x242   : > { %v906_v63 = vsub.f32 %v901_v59, %v905_v62 }
 0x244   : > { %v907_v0 = vmul.f32 1.442695, %v906_v63  ;;  %v1518_v63 = vld [vmem:[%s2988_s7 + $0x78] sm:$0xff] }
 0x245   : > { %2197 = vmatpush3.msra.mxu0 %v1518_v63  ;;  %v1737_v63 = vld [vmem:[%s2994_s13 + $0x50] sm:$0xff] }
 0x246   : > { %2314 = vpow2.f32 %v907_v0  ;;  %v1517_v0 = vld [vmem:[%s2988_s7 + $0x70] sm:$0xff]  ;;  %2198 = vmatprep.subr.mxu0 %v2344_v2 }
 0x247   : > { %2199 = vmatpush3.msra.mxu0 %v1517_v0  ;;  %v1736_v0 = vld [vmem:[%s2994_s13 + $0x48] sm:$0xff] }
 0x248   : > { %2200 = vmatprep.subr.mxu0 %v2344_v2 }
 0x253   : > { %v2315_v1 = vpop.eup %2314 }
 0x254   : > { %v909_v3 = vsel %vm902_vm2, %v2315_v1, 0.0 }
 0x255   : > { %910 = vadd.xlane.f32.xlu0 %v909_v3  ;;  %v1515_v3 = vld [vmem:[%s2988_s7 + $0x60] sm:$0xff] }
 0x2de   : > { %v911_v8 = vpop.xlane.xlu0 %910 }
 0x2df   : > { %2316 = vrcp.f32 %v911_v8  ;;  %v1510_v8 = vld [vmem:[%s2988_s7 + $0x38] sm:$0xff] }
 0x2ec   : > { %v2317_v9 = vpop.eup %2316 }
 0x2ed   : > { %v913_v11 = vmul.f32 %v2317_v9, %v2315_v1  ;;  %v1516_v1 = vld [vmem:[%s2988_s7 + $0x68] sm:$0xff]  ;;  %v1509_v9 = vld [vmem:[%s2988_s7 + $0x30] sm:$0xff] }
 0x2ee   : > { %2201 = vmatpush3.msra.mxu0 %v1516_v1  ;;  %v1735_v1 = vld [vmem:[%s2994_s13 + $0x40] sm:$0xff] }
 0x2ef   : > { %2164 = vmatmul.mubr.msk.f32.vlgmr.msra.gmra.mxu1 %vm902_vm2, %v913_v11  ;;  %2202 = vmatprep.subr.mxu0 %v2344_v2  ;;  %v1507_v11 = vld [vmem:[%s2988_s7 + $0x20] sm:$0xff] }
 0x2f0   : > { %2167 = vmatpush3.xpose.msk.msra.mxu1 %vm824_vm1, %v990_v10  ;;  %2168 = vmatprep.mubr.msk.f32.mxu1 %vm2345_vm0, %v2344_v2  ;;  %v1508_v10 = vld [vmem:[%s2988_s7 + $0x28] sm:$0xff] }
 0x2f1   : > { %2171 = vmatprep.subr.mxu1 %v2344_v2  ;;  %2203 = vmatpush3.msra.mxu0 %v1515_v3  ;;  %v1734_v3 = vld [vmem:[%s2994_s13 + $0x38] sm:$0xff] }
 0x2f2   : > { %2204 = vmatprep.subr.mxu0 %v2344_v2 }
 0x2f3   : > { %2169 = vmatmul.mubr.msk.f32.vlgmr.msra.gmra.mxu1 %vm824_vm1, %v988_v12  ;;  %2205 = vmatpush3.msra.mxu0 %v1514_v4  ;;  %v1506_v12 = vld [vmem:[%s2988_s7 + $0x18] sm:$0xff]  ;;  %v1733_v4 = vld [vmem:[%s2994_s13 + $0x30] sm:$0xff] }
 0x2f4   : > { %2173 = vmatprep.mubr.msk.f32.mxu1 %vm2345_vm0, %v2344_v2  ;;  %2206 = vmatprep.subr.mxu0 %v2344_v2 }
 0x2f5   : > { %2207 = vmatpush3.msra.mxu0 %v1513_v5  ;;  %v1732_v5 = vld [vmem:[%s2994_s13 + $0x28] sm:$0xff] }
 0x2f6   : > { %2208 = vmatprep.subr.mxu0 %v2344_v2 }
 0x3af   : > { %v2706_v13 = vpop.f32.mrf.mxu1 }
 0x3b1   : > { %v2165_v14 = vpop.f32.mrf.mxu1 }
 0x3b2   : > { %v1505_v14 = vld [vmem:[%s2988_s7 + $0x10] sm:$0xff] }
 0x3b3   : > { %v1061_v15 = vpop.f32.mrf.mxu1 }
 0x3b4   : > { %v1065_v16 = vmul.f32 0.17677669, %v1061_v15  ;;  %v1504_v15 = vld [vmem:[%s2988_s7 + $0x8] sm:$0xff] }
 0x3b5   : > { %v2170_v17 = vpop.f32.mrf.mxu1 }
 0x3b6   : > { %v1066_v18 = vsel %vm902_vm2, %v1065_v16, -inf }
 0x3b7   : > { %1067 = vmax.xlane.f32.xlu0 %v1066_v18 }
 0x3cd   : > { %1078 = vrot.lane.b32.xlu0 %v2694_v6, %s2346_s28 }
 0x3d1   : > { %1156 = vrot.lane.b32.xlu0 %v2607_v37, %s2347_s20 }
 0x3d5   : > { %1154 = vrot.lane.b32.xlu0 %v2609_v40, %s2347_s20 }
 0x440   : > { %v1068_v19 = vpop.xlane.xlu0 %1067 }
 0x441   : > { %v1069_v20 = vsub.f32 %v1065_v16, %v1068_v19  ;;  %v1503_v16 = vld [vmem:[%s2988_s7] sm:$0xff] }
 0x443   : > { %v1070_v21 = vmul.f32 1.442695, %v1069_v20 }
 0x444   : > { %v1079_v22 = vpop.permute.xlu0 %1078 }
 0x445   : > { %2318 = vpow2.f32 %v1070_v21  ;;  %2172 = vmatpush3.msra.mxu1 %v1079_v22 }
 0x446   : > { %2176 = vmatprep.subr.mxu1 %v2344_v2 }
 0x448   : > { %v1157_v27 = vpop.permute.xlu0 %1156 }
 0x44c   : > { %v1155_v29 = vpop.permute.xlu0 %1154 }
 0x452   : > { %v2319_v23 = vpop.eup %2318 }
 0x453   : > { %v1072_v24 = vsel %vm902_vm2, %v2319_v23, 0.0 }
 0x454   : > { %1073 = vadd.xlane.f32.xlu1 %v1072_v24 }
 0x465   : > { %1244 = vrot.lane.b32.xlu1 %v2694_v6, %s2347_s20 }
 0x469   : > { %1322 = vrot.lane.b32.xlu1 %v2607_v37, %s2348_s21 }
 0x4dd   : > { %v1074_v25 = vpop.xlane.xlu1 %1073 }
 0x4de   : > { %2320 = vrcp.f32 %v1074_v25  ;;  %v1924_v25 = vld [vmem:[%s2989_s8] ss:$0 sm:$0xff] }
 0x4e1   : > { %v1245_v30 = vpop.permute.xlu1 %1244 }
 0x4e5   : > { %v1323_v44 = vpop.permute.xlu1 %1322 }
 0x4eb   : > { %v2321_v26 = vpop.eup %2320 }
 0x4ec   : > { %v1076_v28 = vmul.f32 %v2321_v26, %v2319_v23 }
 0x4ee   : > { %2174 = vmatmul.mubr.msk.f32.vlgmr.msra.gmra.mxu1 %vm902_vm2, %v1076_v28 }
 0x4ef   : > { %2177 = vmatpush3.xpose.msk.msra.mxu1 %vm824_vm1, %v1157_v27  ;;  %2178 = vmatprep.mubr.msk.f32.mxu1 %vm2345_vm0, %v2344_v2 }
 0x4f0   : > { %2181 = vmatprep.subr.mxu1 %v2344_v2 }
 0x4f2   : > { %2179 = vmatmul.mubr.msk.f32.vlgmr.msra.gmra.mxu1 %vm824_vm1, %v1155_v29 }
 0x4f3   : > { %2182 = vmatpush3.msra.mxu1 %v1245_v30  ;;  %2183 = vmatprep.mubr.msk.f32.mxu1 %vm2345_vm0, %v2344_v2  ;;  %v1639_v30 = vld [vmem:[%s2992_s11 + $0x70] sm:$0xff] }
 0x4f4   : > { %2186 = vmatprep.subr.mxu1 %v2344_v2 }
 0x5ae   : > { %v1150_v31 = vpop.f32.mrf.mxu1 }
 0x5b0   : > { %v2175_v33 = vpop.f32.mrf.mxu1 }
 0x5b2   : > { %v1228_v34 = vpop.f32.mrf.mxu1 }
 0x5b3   : > { %v1232_v35 = vmul.f32 0.17677669, %v1228_v34 }
 0x5b4   : > { %v2180_v36 = vpop.f32.mrf.mxu1 }
 0x5b5   : > { %v1233_v37 = vsel %vm902_vm2, %v1232_v35, -inf }
 0x5b6   : > { %1234 = vmax.xlane.f32.xlu0 %v1233_v37  ;;  %v1636_v37 = vld [vmem:[%s2992_s11 + $0x58] sm:$0xff] }
 0x63f   : > { %v1235_v38 = vpop.xlane.xlu0 %1234 }
 0x640   : > { %v1236_v39 = vsub.f32 %v1232_v35, %v1235_v38  ;;  %v1635_v38 = vld [vmem:[%s2992_s11 + $0x50] sm:$0xff] }
 0x642   : > { %v1237_v41 = vmul.f32 1.442695, %v1236_v39  ;;  %v1634_v39 = vld [vmem:[%s2992_s11 + $0x48] sm:$0xff] }
 0x644   : > { %2322 = vpow2.f32 %v1237_v41  ;;  %v1633_v41 = vld [vmem:[%s2992_s11 + $0x40] sm:$0xff] }
 0x651   : > { %v2323_v42 = vpop.eup %2322 }
 0x652   : > { %v1239_v43 = vsel %vm902_vm2, %v2323_v42, 0.0 }
 0x653   : > { %1240 = vadd.xlane.f32.xlu1 %v1239_v43  ;;  %v1631_v43 = vld [vmem:[%s2992_s11 + $0x30] sm:$0xff] }
 0x664   : > { %1320 = vrot.lane.b32.xlu1 %v2609_v40, %s2348_s21 }
 0x6dc   : > { %v1241_v45 = vpop.xlane.xlu1 %1240 }
 0x6dd   : > { %2324 = vrcp.f32 %v1241_v45  ;;  %v1629_v45 = vld [vmem:[%s2992_s11 + $0x20] sm:$0xff] }
 0x6e0   : > { %v1321_v48 = vpop.permute.xlu1 %1320 }
 0x6ea   : > { %v2325_v46 = vpop.eup %2324 }
 0x6eb   : > { %v1243_v47 = vmul.f32 %v2325_v46, %v2323_v42  ;;  %v1632_v42 = vld [vmem:[%s2992_s11 + $0x38] sm:$0xff] }
 0x6ec   : > { %v1628_v46 = vld [vmem:[%s2992_s11 + $0x18] sm:$0xff] }
 0x6ed   : > { %2184 = vmatmul.mubr.msk.f32.vlgmr.msra.gmra.mxu1 %vm902_vm2, %v1243_v47  ;;  %v1627_v47 = vld [vmem:[%s2992_s11 + $0x10] sm:$0xff] }
 0x6ee   : > { %2187 = vmatpush3.xpose.msk.msra.mxu1 %vm824_vm1, %v1323_v44  ;;  %2188 = vmatprep.mubr.msk.f32.mxu1 %vm2345_vm0, %v2344_v2  ;;  %v1630_v44 = vld [vmem:[%s2992_s11 + $0x28] sm:$0xff] }
 0x6ef   : > { %2191 = vmatprep.subr.mxu1 %v2344_v2 }
 0x6f1   : > { %2189 = vmatmul.mubr.msk.f32.vlgmr.msra.gmra.mxu1 %vm824_vm1, %v1321_v48  ;;  %v1626_v48 = vld [vmem:[%s2992_s11 + $0x8] sm:$0xff] }
 0x6f2   : > { %2193 = vmatprep.mubr.msk.f32.mxu1 %vm2345_vm0, %v2344_v2 }
 0x7ad   : > { %v1316_v40 = vpop.f32.mrf.mxu1 }
 0x7af   : > { %v2185_v49 = vpop.f32.mrf.mxu1 }
 0x7b1   : > { %v1394_v50 = vpop.f32.mrf.mxu1 }
 0x7b2   : > { %v1398_v51 = vmul.f32 0.17677669, %v1394_v50 }
 0x7b3   : > { %v2190_v52 = vpop.f32.mrf.mxu1 }
 0x7b4   : > { %v1399_v53 = vsel %vm902_vm2, %v1398_v51, -inf }
 0x7b5   : > { %1400 = vmax.xlane.f32.xlu0 %v1399_v53  ;;  %v1925_v53 = vld [vmem:[%s2990_s9] ss:$0 sm:$0xff] }
 0x7cb   : > { %1410 = vrot.lane.b32.xlu0 %v2694_v6, %s2348_s21  ;;  %v1512_v6 = vld [vmem:[%s2988_s7 + $0x48] sm:$0xff] }
 0x7cc   : > { %2209 = vmatpush3.msra.mxu0 %v1512_v6  ;;  %v1731_v6 = vld [vmem:[%s2994_s13 + $0x20] sm:$0xff] }
 0x7cd   : > { %2210 = vmatprep.subr.mxu0 %v2344_v2 }
 0x7ce   : > { %2211 = vmatpush3.msra.mxu0 %v1511_v7  ;;  %v1730_v7 = vld [vmem:[%s2994_s13 + $0x18] sm:$0xff] }
 0x7cf   : > { %1487 = vrot.lane.b32.xlu0 %v1150_v31, %s2348_s21  ;;  %2212 = vmatprep.subr.mxu0 %v2344_v2  ;;  %v1638_v31 = vld [vmem:[%s2992_s11 + $0x68] sm:$0xff] }
 0x7d0   : > { %2213 = vmatpush3.msra.mxu0 %v1510_v8  ;;  %v1729_v8 = vld [vmem:[%s2994_s13 + $0x10] sm:$0xff] }
 0x7d1   : > { %2214 = vmatprep.subr.mxu0 %v2344_v2 }
 0x7d2   : > { %2215 = vmatpush3.msra.mxu0 %v1509_v9  ;;  %v1728_v9 = vld [vmem:[%s2994_s13 + $0x8] sm:$0xff] }
 0x7d3   : > { %1491 = vrot.lane.b32.xlu0 %v1316_v40, %s2347_s20  ;;  %2216 = vmatprep.subr.mxu0 %v2344_v2  ;;  %v1625_v40 = vld [vmem:[%s2992_s11] sm:$0xff] }
 0x7d4   : > { %2217 = vmatpush3.msra.mxu0 %v1508_v10  ;;  %v1727_v10 = vld [vmem:[%s2994_s13] sm:$0xff] }
 0x7d5   : > { %2218 = vmatprep.subr.mxu0 %v2344_v2 }
 0x7d6   : > { %2219 = vmatpush3.msra.mxu0 %v1507_v11  ;;  %v1927_v11 = vld [vmem:[%s2993_s12] ss:$0 sm:$0xff] }
 0x7d7   : > { %2220 = vmatprep.subr.mxu0 %v2344_v2 }
 0x7d8   : > { %2221 = vmatpush3.msra.mxu0 %v1506_v12 }
 0x7d9   : > { %2222 = vmatprep.subr.mxu0 %v2344_v2 }
 0x7da   : > { %2223 = vmatpush3.msra.mxu0 %v1505_v14 }
 0x7db   : > { %2224 = vmatprep.subr.mxu0 %v2344_v2 }
 0x7dc   : > { %2225 = vmatpush3.msra.mxu0 %v1504_v15 }
 0x7dd   : > { %2226 = vmatprep.subr.mxu0 %v2344_v2 }
 0x7de   : > { %2227 = vmatpush3.msra.mxu0 %v1503_v16 }
 0x7df   : > { %2266 = vmatprep.subr.mxu0 %v2344_v2 }
 0x83e   : > { %v1401_v54 = vpop.xlane.xlu0 %1400 }
 0x83f   : > { %v1402_v55 = vsub.f32 %v1398_v51, %v1401_v54 }
 0x841   : > { %v1403_v56 = vmul.f32 1.442695, %v1402_v55  ;;  %v1926_v55 = vld [vmem:[%s2991_s10] ss:$0 sm:$0xff] }
 0x842   : > { %v1411_v57 = vpop.permute.xlu0 %1410 }
 0x843   : > { %2326 = vpow2.f32 %v1403_v56  ;;  %2192 = vmatpush3.msra.mxu1 %v1411_v57 }
 0x844   : > { %2231 = vmatprep.subr.mxu1 %v2344_v2 }
 0x846   : > { %v1488_v19 = vpop.permute.xlu0 %1487 }
 0x847   : > { %v1498_v21 = vsel %vm824_vm1, %v2706_v13, %v1488_v19  ;;  %v1640_v13 = vld [vmem:[%s2992_s11 + $0x78] sm:$0xff] }
 0x84a   : > { %v1492_v20 = vpop.permute.xlu0 %1491 }
 0x84b   : > { %v1500_v22 = vsel %vm1499_vm3, %v1498_v21, %v1492_v20 }
 0x850   : > { %v2327_v58 = vpop.eup %2326 }
 0x851   : > { %v1405_v59 = vsel %vm902_vm2, %v2327_v58, 0.0 }
 0x852   : > { %1406 = vadd.xlane.f32.xlu1 %v1405_v59  ;;  %v1741_v59 = vld [vmem:[%s2994_s13 + $0x70] sm:$0xff] }
 0x8db   : > { %v1407_v60 = vpop.xlane.xlu1 %1406 }
 0x8dc   : > { %2328 = vrcp.f32 %v1407_v60  ;;  %v1740_v60 = vld [vmem:[%s2994_s13 + $0x68] sm:$0xff] }
 0x8e9   : > { %v2329_v61 = vpop.eup %2328 }
 0x8ea   : > { %v1409_v62 = vmul.f32 %v2329_v61, %v2327_v58  ;;  %v1742_v58 = vld [vmem:[%s2994_s13 + $0x78] sm:$0xff]  ;;  %v1739_v61 = vld [vmem:[%s2994_s13 + $0x60] sm:$0xff] }
 0x8ec   : > { %2194 = vmatmul.mubr.msk.f32.vlgmr.msra.gmra.mxu1 %vm902_vm2, %v1409_v62  ;;  %v1738_v62 = vld [vmem:[%s2994_s13 + $0x58] sm:$0xff] }
 0x8ed   : > { %2263 = vmatprep.mubr.msk.f32.mxu1 %vm2345_vm0, %v2344_v2  ;;  %2232 = vmatpush3.msra.mxu1 %v1640_v13 }
 0x8ee   : > { %2233 = vmatprep.subr.mxu1 %v2344_v2 }
 0x8ef   : > { %2234 = vmatpush3.msra.mxu1 %v1639_v30 }
 0x8f0   : > { %2235 = vmatprep.subr.mxu1 %v2344_v2 }
 0x8f1   : > { %2236 = vmatpush3.msra.mxu1 %v1638_v31 }
 0x8f2   : > { %2237 = vmatprep.subr.mxu1 %v2344_v2 }
 0x9ac   : > { %v1482_v17 = vpop.f32.mrf.mxu1 }
 0x9ad   : > { %1495 = vrot.lane.b32.xlu0 %v1482_v17, %s2346_s28 }
 0x9ae   : > { %v2195_v18 = vpop.f32.mrf.mxu1 }
 0xa1f   : > { %v1496_v23 = vpop.permute.xlu0 %1495 }
 0xa20   : > { %v1502_v24 = vsel %vm1501_vm4, %v1500_v22, %v1496_v23 }
 0xa21   : > { %2229 = vmatmul.mubr.f32.vlgmr.msra.gmra.mxu0 %v1502_v24 }
 0xa22   : > { %2298 = vmatprep.mubr.msk.f32.mxu0 %vm2345_vm0, %v2344_v2  ;;  %2267 = vmatpush3.msra.mxu0 %v1742_v58 }
 0xa23   : > { %2268 = vmatprep.subr.mxu0 %v2344_v2 }
 0xa24   : > { %2269 = vmatpush3.msra.mxu0 %v1741_v59 }
 0xa25   : > { %2270 = vmatprep.subr.mxu0 %v2344_v2 }
 0xa26   : > { %2271 = vmatpush3.msra.mxu0 %v1740_v60 }
 0xa27   : > { %2272 = vmatprep.subr.mxu0 %v2344_v2 }
 0xa28   : > { %2273 = vmatpush3.msra.mxu0 %v1739_v61 }
 0xa29   : > { %2274 = vmatprep.subr.mxu0 %v2344_v2 }
 0xa2a   : > { %2275 = vmatpush3.msra.mxu0 %v1738_v62 }
 0xa2b   : > { %2276 = vmatprep.subr.mxu0 %v2344_v2 }
 0xa2c   : > { %2277 = vmatpush3.msra.mxu0 %v1737_v63 }
 0xa2d   : > { %2278 = vmatprep.subr.mxu0 %v2344_v2 }
 0xa2e   : > { %2279 = vmatpush3.msra.mxu0 %v1736_v0 }
 0xa2f   : > { %2280 = vmatprep.subr.mxu0 %v2344_v2 }
 0xa30   : > { %2281 = vmatpush3.msra.mxu0 %v1735_v1 }
 0xa31   : > { %2282 = vmatprep.subr.mxu0 %v2344_v2 }
 0xa32   : > { %2283 = vmatpush3.msra.mxu0 %v1734_v3 }
 0xa33   : > { %2284 = vmatprep.subr.mxu0 %v2344_v2 }
 0xa34   : > { %2285 = vmatpush3.msra.mxu0 %v1733_v4 }
 0xa35   : > { %2286 = vmatprep.subr.mxu0 %v2344_v2 }
 0xa36   : > { %2287 = vmatpush3.msra.mxu0 %v1732_v5 }
 0xa37   : > { %2288 = vmatprep.subr.mxu0 %v2344_v2 }
 0xa38   : > { %2289 = vmatpush3.msra.mxu0 %v1731_v6 }
 0xa39   : > { %2290 = vmatprep.subr.mxu0 %v2344_v2 }
 0xa3a   : > { %2291 = vmatpush3.msra.mxu0 %v1730_v7 }
 0xa3b   : > { %2292 = vmatprep.subr.mxu0 %v2344_v2 }
 0xa3c   : > { %2293 = vmatpush3.msra.mxu0 %v1729_v8 }
 0xa3d   : > { %2294 = vmatprep.subr.mxu0 %v2344_v2 }
 0xa3e   : > { %2295 = vmatpush3.msra.mxu0 %v1728_v9 }
 0xa3f   : > { %2296 = vmatprep.subr.mxu0 %v2344_v2 }
 0xa40   : > { %2297 = vmatpush3.msra.mxu0 %v1727_v10 }
 0xae1   : > { %v1592_v26 = vpop.f32.mrf.mxu0 }
 0xae2   : > { %v1593_v27 = vadd.f32 %v1924_v25, %v1592_v26 }
 0xae3   : > { %v2230_v28 = vpop.f32.mrf.mxu0 }
 0xae4   : > { %v1596_v29 = vadd.f32 %v1593_v27, %v2582_v32  ;;  %v1637_v32 = vld [vmem:[%s2992_s11 + $0x60] sm:$0xff] }
 0xae5   : > { %2238 = vmatpush3.msra.mxu1 %v1637_v32 }
 0xae6   : > { %1599 = vadd.xlane.f32.xlu1 %v1596_v29  ;;  %2239 = vmatprep.subr.mxu1 %v2344_v2 }
 0xae7   : > { %2240 = vmatpush3.msra.mxu1 %v1636_v37 }
 0xae8   : > { %2241 = vmatprep.subr.mxu1 %v2344_v2 }
 0xae9   : > { %2242 = vmatpush3.msra.mxu1 %v1635_v38  ;;  %v1930_v38 = vld [vmem:[%s2997_s16] ss:$0 sm:$0xff] }
 0xaea   : > { %2243 = vmatprep.subr.mxu1 %v2344_v2 }
 0xaeb   : > { %2244 = vmatpush3.msra.mxu1 %v1634_v39 }
 0xaec   : > { %2245 = vmatprep.subr.mxu1 %v2344_v2 }
 0xaed   : > { %2246 = vmatpush3.msra.mxu1 %v1633_v41 }
 0xaee   : > { %2247 = vmatprep.subr.mxu1 %v2344_v2 }
 0xaef   : > { %2248 = vmatpush3.msra.mxu1 %v1632_v42 }
 0xaf0   : > { %2249 = vmatprep.subr.mxu1 %v2344_v2 }
 0xaf1   : > { %2250 = vmatpush3.msra.mxu1 %v1631_v43 }
 0xaf2   : > { %2251 = vmatprep.subr.mxu1 %v2344_v2 }
 0xaf3   : > { %2252 = vmatpush3.msra.mxu1 %v1630_v44 }
 0xaf4   : > { %2253 = vmatprep.subr.mxu1 %v2344_v2 }
 0xaf5   : > { %2254 = vmatpush3.msra.mxu1 %v1629_v45 }
 0xaf6   : > { %2255 = vmatprep.subr.mxu1 %v2344_v2 }
 0xaf7   : > { %2256 = vmatpush3.msra.mxu1 %v1628_v46 }
 0xaf8   : > { %2257 = vmatprep.subr.mxu1 %v2344_v2 }
 0xaf9   : > { %2258 = vmatpush3.msra.mxu1 %v1627_v47 }
 0xafa   : > { %2259 = vmatprep.subr.mxu1 %v2344_v2 }
 0xafb   : > { %2260 = vmatpush3.msra.mxu1 %v1626_v48 }
 0xafc   : > { %2261 = vmatprep.subr.mxu1 %v2344_v2  ;;  %v1928_v2 = vld [vmem:[%s2995_s14] ss:$0 sm:$0xff] }
 0xafd   : > { %2262 = vmatpush3.msra.mxu1 %v1625_v40 }
 0xb6f   : > { %v1600_v33 = vpop.xlane.xlu1 %1599 }
 0xb70   : > { %v1602_v34 = vmul.f32 0.0078125, %v1600_v33 }
 0xb72   : > { %v1603_v35 = vsub.f32 %v1596_v29, %v1602_v34 }
 0xb74   : > { %v1604_v36 = vmul.f32 %v1603_v35, %v1603_v35 }
 0xb76   : > { %1605 = vadd.xlane.f32.xlu0 %v1604_v36  ;;  %v1929_v36 = vld [vmem:[%s2996_s15] ss:$0 sm:$0xff] }
 0xbff   : > { %v1606_v49 = vpop.xlane.xlu0 %1605 }
 0xc00   : > { %v1607_v50 = vmul.f32 0.0078125, %v1606_v49 }
 0xc02   : > { %v1608_v51 = vadd.f32 1e-05, %v1607_v50 }
 0xc04   : > { %2330 = vrsqrt.f32 %v1608_v51 }
 0xc11   : > { %v2331_v52 = vpop.eup %2330 }
 0xc12   : > { %v1610_v54 = vmul.f32 %v2331_v52, %v1603_v35 }
 0xc14   : > { %v1617_v56 = vmul.f32 %v1925_v53, %v1610_v54 }
 0xc16   : > { %v2894_v57 = vadd.f32 %v1926_v55, %v1617_v56 }
 0xc18   : > { %2264 = vmatmul.mubr.f32.vlgmr.msra.gmra.mxu1 %v2894_v57 }
 0xcd8   : > { %v1714_v12 = vpop.f32.mrf.mxu1 }
 0xcd9   : > { %v1715_v14 = vadd.f32 %v1927_v11, %v1714_v12 }
 0xcda   : > { %v2265_v15 = vpop.f32.mrf.mxu1 }
 0xcdb   : > { %v1719_v16 = vmul.f32 0.044715, %v1715_v14  ;;  %v1718_v22 = vmul.f32 0.5, %v1715_v14 }
 0xcdd   : > { %v1720_v17 = vmul.f32 %v1719_v16, %v1715_v14 }
 0xcdf   : > { %v1721_v18 = vmul.f32 %v1720_v17, %v1715_v14 }
 0xce1   : > { %v1722_v19 = vadd.f32 %v1721_v18, %v1715_v14 }
 0xce3   : > { %v1723_v20 = vmul.f32 0.7978846, %v1722_v19 }
 0xce5   : > { %2332 = vtanh.f32 %v1723_v20 }
 0xcf2   : > { %v2333_v21 = vpop.eup %2332 }
 0xcf3   : > { %v1725_v23 = vadd.f32 1.0, %v2333_v21 }
 0xcf5   : > { %v1726_v24 = vmul.f32 %v1725_v23, %v1718_v22 }
 0xcf7   : > { %2299 = vmatmul.mubr.f32.vlgmr.msra.gmra.mxu0 %v1726_v24 }
 0xdb7   : > { %v1816_v25 = vpop.f32.mrf.mxu0 }
 0xdb8   : > { %v1817_v26 = vadd.f32 %v1928_v2, %v1816_v25 }
 0xdb9   : > { %v2300_v27 = vpop.f32.mrf.mxu0 }
 0xdba   : > { %v1820_v28 = vadd.f32 %v1817_v26, %v2894_v57 }
 0xdbc   : > { %1823 = vadd.xlane.f32.xlu1 %v1820_v28 }
 0xe45   : > { %v1824_v29 = vpop.xlane.xlu1 %1823 }
 0xe46   : > { %v1825_v13 = vmul.f32 0.0078125, %v1824_v29 }
 0xe48   : > { %v1826_v30 = vsub.f32 %v1820_v28, %v1825_v13 }
 0xe4a   : > { %v1827_v31 = vmul.f32 %v1826_v30, %v1826_v30 }
 0xe4c   : > { %1828 = vadd.xlane.f32.xlu1 %v1827_v31 }
 0xed5   : > { %v1829_v32 = vpop.xlane.xlu1 %1828 }
 0xed6   : > { %v1830_v33 = vmul.f32 0.0078125, %v1829_v32 }
 0xed8   : > { %v1831_v34 = vadd.f32 1e-05, %v1830_v33 }
 0xeda   : > { %2334 = vrsqrt.f32 %v1831_v34 }
 0xee7   : > { %v2335_v35 = vpop.eup %2334 }
 0xee8   : > { %v1833_v37 = vmul.f32 %v2335_v35, %v1826_v30 }
 0xeea   : > { %v1840_v39 = vmul.f32 %v1929_v36, %v1833_v37 }
 0xeec   : > { %v1847_v41 = vadd.f32 %v1930_v38, %v1840_v39 }
 0xeee   : > { %1848 = vst [vmem:[%s543_s29] sm:$0xff] %v1847_v41 }
 0xeef PF: > { %s27_s24 = sadd.s32 1, %s2342_s24  }
 0xef0   : > { %p24_p4 = scmp.ge.s32.totalorder %s27_s24, 4  }
 0xef2   :  { %26 = sbr.rel (!%p24_p4) target bundleno = 3 (0x3), region = 118 }

// kernel: informer_forward.17
= control target key start
LH: loop header
LB: loop body
LE: loop exit
PB: predicated region body
PF: predicated region fallthrough
CT: control target
= control target key end

     0   :  { %10 = vsyncpa [#allocation3], 0  ;;  %s797_s0 = inlined_call_operand.vmem [shape: f32[2,12,128], index: 0, kind: input, shape index: {}]   ;;  %s798_s1 = inlined_call_operand.vmem [shape: f32[1,128], index: 1, kind: input, shape index: {}]   ;;  %s799_s2 = inlined_call_operand.vmem [shape: f32[1,128], index: 2, kind: input, shape index: {}]   ;;  %s800_s3 = inlined_call_operand.vmem [shape: f32[128,4], index: 3, kind: input, shape index: {}]   ;;  %s801_s4 = inlined_call_operand.vmem [shape: f32[1,4], index: 4, kind: input, shape index: {}]   ;;  %s802_s5 = inlined_call_operand.hbm [shape: f32[2,4,4], index: 5, kind: output, shape index: {}]  }
   0x1   :  { %12 = vsyncpa [#allocation3 + $0x1], 0  ;;  %s645_s18 = smov 0   ;;  %s647_s19 = smov 0  }
   0x2   :  { %s649_s20 = smov 0   ;;  %s651_s21 = smov 0  }
   0x3 LB: > { %s666_s22 = sadd.s32 4294967295, %s612_s21   ;;  %s441_s23 = sadd.s32 4294967294, %s612_s21   ;;  %s612_s21 = sphi %s651_s21, %s808_s21   ;;  %s608_s20 = sphi %s649_s20, %s807_s20   ;;  %s604_s19 = sphi %s647_s19, %s806_s19   ;;  %s600_s18 = sphi %s645_s18, %s805_s18  }
   0x4   : > { %s670_s24 = sadd.s32 1, %s612_s21   ;;  %s135_s25 = sadd.s32 1, %s608_s20 }
   0x5   : > { %s132_s26 = ssub.s32 %s612_s21, %s670_s24  ;;  %p145_p0 = scmp.ne.s32.totalorder %s608_s20, %s604_s19 }
   0x6   : > { %p133_p1 = scmp.eq.s32.totalorder %s132_s26, 0  ;;  %p146_p2 = scmp.eq.s32.totalorder %s666_s22, 1 }
   0x7   : > { %p151_p3 = scmp.ne.s32.totalorder %s604_s19, %s600_s18  ;;  %p152_p4 = scmp.eq.s32.totalorder %s441_s23, 1 }
   0x8   : > { %s681_s27 = scalar_select %p133_p1, %s608_s20, %s135_s25  }
   0x9   : > { %p683_p5 = por %p146_p2, %p145_p0  ;;  %p687_p6 = por %p152_p4, %p151_p3 }
   0xa   : > { %p444_p7 = scmp.ge.s32.totalorder %s612_s21, 1  ;;  %p190_p8 = scmp.lt.s32.totalorder %s612_s21, 3 }
   0xc   : > { %p191_p9 = pnand %p444_p7, %p190_p8 }
   0xd   : > { %p218_p10 = scmp.lt.s32.totalorder (!%p191_p9), %s666_s22, 1  ;;  %s215_s14 = sand.u32 (!%p191_p9), 1, %s604_s19  }
   0xe   : > { %194 = sbr.rel (%p191_p9) target bundleno = 543 (0x21f), region = 40  ;;  %s445_s15 = sshll.u32 (!%p191_p9), %s215_s14, 2 }
   0xf   : > { %s452_s23 = sshll.u32 (!%p191_p9), %s666_s22, 6  ;;  %s217_s25 = scalar_lea.vmem (!%p191_p9), [#allocation2], %s445_s15 }
  0x10   : > { %s382_s26 = sshll.u32 (!%p191_p9), %s217_s25, 4  ;;  %s762_s7 = scalar_lea.hbm (!%p191_p9), %s802_s5, %s452_s23  ;;  %s383_s26 = int_to_ptr.vmem [resolvable:$true] %s382_s26 }
  0x11   : > { %s369_s8 = scalar_lea.sflag (!%p191_p9), [#allocation3], %s215_s14 }
  0x13   : > { %s219_s30 = scalar_select %p218_p10, %s666_s22, 1  ;;  %vm229_vm0 = vcmask 1043456   ;;  %v284_v3 = vld [vmem:[%s800_s3 + $0x78] sm:$0xff]  ;;  %v283_v4 = vld [vmem:[%s800_s3 + $0x70] sm:$0xff]  ;;  %v282_v14 = vld [vmem:[%s800_s3 + $0x68] sm:$0xff]  ;;  %vm366_vm1 = vcmask 27648  }
  0x14   : > { %474 = vmatprep.subr.mxu0 %v284_v3  ;;  %v281_v15 = vld [vmem:[%s800_s3 + $0x60] sm:$0xff]  ;;  %v280_v16 = vld [vmem:[%s800_s3 + $0x58] sm:$0xff]  ;;  %v279_v17 = vld [vmem:[%s800_s3 + $0x50] sm:$0xff]  ;;  %s614_s22 = smov [#allocation2]  }
  0x15   : > { %s455_s6 = sshll.u32 %s219_s30, 4  ;;  %475 = vmatpush3.msra.mxu0 %v284_v3  ;;  %v278_v18 = vld [vmem:[%s800_s3 + $0x48] sm:$0xff]  ;;  %v277_v19 = vld [vmem:[%s800_s3 + $0x40] sm:$0xff]  ;;  %v276_v20 = vld [vmem:[%s800_s3 + $0x38] sm:$0xff]  ;;  %s556_s10 = sshll.u32 %s614_s22, 4  ;;  %s557_s10 = int_to_ptr.vmem [resolvable:$false] %s556_s10 }
  0x16   : > { %s222_s9 = scalar_lea.vmem %s797_s0, %s455_s6  ;;  %476 = vmatprep.subr.mxu0 %v283_v4  ;;  %v275_v21 = vld [vmem:[%s800_s3 + $0x30] sm:$0xff]  ;;  %v274_v22 = vld [vmem:[%s800_s3 + $0x28] sm:$0xff]  ;;  %v273_v23 = vld [vmem:[%s800_s3 + $0x20] sm:$0xff]  ;;  %s558_s11 = scalar_lea.vmem %s557_s10, 128 }
  0x17   : > { %v223_v0 = vld [vmem:[%s222_s9] sm:$0xff]  ;;  %v224_v1 = vld [vmem:[%s222_s9 + $0x8] sm:$0xf]  ;;  %477 = vmatpush3.msra.mxu0 %v283_v4  ;;  %v272_v24 = vld [vmem:[%s800_s3 + $0x18] sm:$0xff]  ;;  %s552_s9 = scalar_lea.vmem %s383_s26, 64  ;;  %p559_p0 = scmp.lt.s32.totalorder %s383_s26, %s557_s10 }
  0x18   : > { %227 = vadd.xlane.f32.xlu0 %v223_v0  ;;  %v230_v2 = vsel %vm229_vm0, %v224_v1, 0.0  ;;  %478 = vmatprep.subr.mxu0 %v282_v14  ;;  %v271_v25 = vld [vmem:[%s800_s3 + $0x10] sm:$0xff]  ;;  %v270_v26 = vld [vmem:[%s800_s3 + $0x8] sm:$0xff]  ;;  %v269_v27 = vld [vmem:[%s800_s3] sm:$0xff]  ;;  %p553_p11 = scmp.ne.s32.totalorder %s383_s26, %s552_s9  ;;  %p560_p1 = scmp.lt.s32.totalorder %s558_s11, %s552_s9 }
  0x19   : > { %479 = vmatpush3.msra.mxu0 %v282_v14  ;;  %v448_v35 = vld [vmem:[%s798_s1] ss:$0 sm:$0xff] }
  0x1a   : > { %480 = vmatprep.subr.mxu0 %v281_v15  ;;  %v449_v37 = vld [vmem:[%s799_s2] ss:$0 sm:$0xff]  ;;  %p554_p12 = pnand %p553_p11, %p683_p5  ;;  %p561_p2 = por %p560_p1, %p559_p0 }
  0x1b   : > { %481 = vmatpush3.msra.mxu0 %v281_v15  ;;  %v450_v44 = vld [vmem:[%s801_s4] ss:$0 sm:$0xff] }
  0x1c   : > { %231 = vadd.xlane.f32.xlu0 %v230_v2  ;;  %482 = vmatprep.subr.mxu0 %v280_v16  ;;  %p555_p13 = pneg %p554_p12 }
  0x1d   : > { %483 = vmatpush3.msra.mxu0 %v280_v16 }
  0x1e   : > { %484 = vmatprep.subr.mxu0 %v279_v17  ;;  %p562_p3 = pnand %p561_p2, %p555_p13 }
  0x1f   : > { %485 = vmatpush3.msra.mxu0 %v279_v17 }
  0x20   : > { %486 = vmatprep.subr.mxu0 %v278_v18 }
  0x21   : > { %487 = vmatpush3.msra.mxu0 %v278_v18 }
  0x22   : > { %488 = vmatprep.subr.mxu0 %v277_v19 }
  0x23   : > { %489 = vmatpush3.msra.mxu0 %v277_v19 }
  0x24   : > { %490 = vmatprep.subr.mxu0 %v276_v20 }
  0x25   : > { %491 = vmatpush3.msra.mxu0 %v276_v20 }
  0x26   : > { %492 = vmatprep.subr.mxu0 %v275_v21 }
  0x27   : > { %493 = vmatpush3.msra.mxu0 %v275_v21 }
  0x28   : > { %494 = vmatprep.subr.mxu0 %v274_v22 }
  0x29   : > { %495 = vmatpush3.msra.mxu0 %v274_v22 }
  0x2a   : > { %496 = vmatprep.subr.mxu0 %v273_v23 }
  0x2b   : > { %497 = vmatpush3.msra.mxu0 %v273_v23 }
  0x2c   : > { %498 = vmatprep.subr.mxu0 %v272_v24 }
  0x2d   : > { %499 = vmatpush3.msra.mxu0 %v272_v24 }
  0x2e   : > { %500 = vmatprep.subr.mxu0 %v271_v25 }
  0x2f   : > { %501 = vmatpush3.msra.mxu0 %v271_v25 }
  0x30   : > { %502 = vmatprep.subr.mxu0 %v270_v26 }
  0x31   : > { %503 = vmatpush3.msra.mxu0 %v270_v26 }
  0x32   : > { %504 = vmatprep.subr.mxu0 %v269_v27 }
  0x33   : > { %505 = vmatpush3.msra.mxu0 %v269_v27 }
  0xa1   : > { %v228_v5 = vpop.xlane.xlu0 %227 }
  0xa2   : > { %v234_v6 = vmul.f32 0.0078125, %v228_v5 }
  0xa4   : > { %v236_v7 = vsub.f32 %v223_v0, %v234_v6 }
  0xa5   : > { %v232_v8 = vpop.xlane.xlu0 %231 }
  0xa6   : > { %v235_v9 = vmul.f32 0.0078125, %v232_v8  ;;  %v238_v10 = vmul.f32 %v236_v7, %v236_v7 }
  0xa8   : > { %v237_v11 = vsub.f32 %v224_v1, %v235_v9  ;;  %240 = vadd.xlane.f32.xlu1 %v238_v10 }
  0xaa   : > { %v239_v12 = vmul.f32 %v237_v11, %v237_v11 }
  0xac   : > { %v242_v13 = vsel %vm229_vm0, %v239_v12, 0.0 }
  0xad   : > { %243 = vadd.xlane.f32.xlu1 %v242_v13 }
 0x131   : > { %v241_v28 = vpop.xlane.xlu1 %240 }
 0x132   : > { %v245_v29 = vmul.f32 0.0078125, %v241_v28 }
 0x134   : > { %v247_v30 = vadd.f32 1e-05, %v245_v29 }
 0x136   : > { %548 = vrsqrt.f32 %v247_v30  ;;  %v244_v31 = vpop.xlane.xlu1 %243 }
 0x137   : > { %v246_v32 = vmul.f32 0.0078125, %v244_v31 }
 0x139   : > { %v248_v33 = vadd.f32 1e-05, %v246_v32 }
 0x13b   : > { %550 = vrsqrt.f32 %v248_v33 }
 0x143   : > { %v549_v34 = vpop.eup %548 }
 0x144   : > { %v251_v36 = vmul.f32 %v549_v34, %v236_v7 }
 0x146   : > { %v259_v38 = vmul.f32 %v448_v35, %v251_v36 }
 0x148   : > { %v551_v39 = vpop.eup %550  ;;  %v267_v40 = vadd.f32 %v449_v37, %v259_v38 }
 0x149   : > { %v252_v41 = vmul.f32 %v551_v39, %v237_v11 }
 0x14a   : > { %506 = vmatprep.mubr.f32.mxu0 %v267_v40 }
 0x14b   : > { %v260_v42 = vmul.f32 %v448_v35, %v252_v41 }
 0x14d   : > { %v268_v43 = vadd.f32 %v449_v37, %v260_v42 }
 0x14f   : > { %507 = vmatmul.mubr.f32.vlgmr.msra.gmra.mxu0 %v268_v43 }
 0x20f   : > { %v508_v45 = vpop.f32.mrf.mxu0 }
 0x210   : > { %v363_v46 = vadd.f32 %v508_v45, %v450_v44 }
 0x211   : > { %v358_v47 = vpop.f32.mrf.mxu0 }
 0x212   : > { %367 = vst.msk [vmem:[%s217_s25] sm:$0xf] %vm366_vm1, %v363_v46 }
 0x213   : > { %565 = shalt.err (!%p562_p3)
}
 0x214   : > { %s566_s12 = scalar_lea.hbm %s762_s7, 64  ;;  %s570_s15 = scalar_lea.hbm %s802_s5, 128 }
 0x215   : > { %p567_p4 = scmp.ne.s32.totalorder %s762_s7, %s566_s12  ;;  %p571_p9 = scmp.lt.s32.totalorder %s762_s7, %s802_s5 }
 0x216   : > { %p572_p10 = scmp.lt.s32.totalorder %s570_s15, %s566_s12 }
 0x217   : > { %p568_p7 = pnand %p567_p4, %p683_p5 }
 0x218   : > { %p573_p11 = por %p572_p10, %p571_p9 }
 0x219   : > { %p569_p8 = pneg %p568_p7 }
 0x21b   : > { %p574_p12 = pnand %p573_p11, %p569_p8 }
 0x21d   : > { %577 = shalt.err (!%p574_p12)
}
 0x21e   : > { %509 = dma.vmem_to_hbm [thread:$0]  (%p683_p5), %s383_s26, 64, %s762_s7, %s369_s8  }
 0x21f PF: > { %p515_p13 = scmp.ge.s32.totalorder %s612_s21, 2  ;;  %s394_s23 = sand.u32 1, %s600_s18  }
 0x220   : > { %s395_s25 = scalar_lea.sflag [#allocation3], %s394_s23 }
 0x221   : > { %p512_p0 = pnand %p515_p13, %p687_p6 }
 0x223   : > { %p513_p1 = pneg %p512_p0 }
 0x225   : > { %595 = dma.done.wait (%p513_p1), %s395_s25, 64  }
 0x226   : > { %597 = vsyncadd (%p513_p1), %s395_s25, 4294967232  ;;  %p15_p2 = scmp.ge.s32.totalorder %s670_s24, 4   ;;  %s805_s18 = smov %s604_s19 }
 0x227   : > { %s806_s19 = smov %s608_s20  ;;  %s807_s20 = smov %s681_s27 }
 0x228   : > { %s808_s21 = smov %s670_s24  ;;  %17 = sbr.rel (!%p15_p2) target bundleno = 3 (0x3), region = 75 }
 0x22d   :  { %400 = vsyncpa [#allocation3], 1 }
 0x22e   :  { %402 = vsyncpa [#allocation3 + $0x1], 1 }

// kernel: informer_forward.16
= control target key start
LH: loop header
LB: loop body
LE: loop exit
PB: predicated region body
PF: predicated region fallthrough
CT: control target
= control target key end

     0   :  { %s4640_s0 = inlined_call_operand.vmem [shape: f32[2,12,128], index: 0, kind: input, shape index: {}]   ;;  %s4641_s1 = inlined_call_operand.vmem [shape: f32[2,12,128], index: 1, kind: input, shape index: {}]   ;;  %s4642_s2 = inlined_call_operand.vmem [shape: f32[2,8,128], index: 2, kind: input, shape index: {}]   ;;  %s4643_s3 = inlined_call_operand.vmem [shape: f32[128,128], index: 3, kind: input, shape index: {}]   ;;  %s4644_s4 = inlined_call_operand.vmem [shape: f32[1,128], index: 4, kind: input, shape index: {}]   ;;  %s4645_s5 = inlined_call_operand.hbm [shape: f32[1,128], index: 5, kind: input, shape index: {}]   ;;  %s4646_s6 = inlined_call_operand.hbm [shape: f32[1,128], index: 6, kind: input, shape index: {}]   ;;  %s4647_s7 = inlined_call_operand.vmem [shape: f32[128,128], index: 7, kind: input, shape index: {}]   ;;  %s4648_s8 = inlined_call_operand.hbm [shape: f32[1,128], index: 8, kind: input, shape index: {}]   ;;  %s4649_s9 = inlined_call_operand.vmem [shape: f32[128,128], index: 9, kind: input, shape index: {}]   ;;  %s4650_s10 = inlined_call_operand.hbm [shape: f32[1,128], index: 10, kind: input, shape index: {}]   ;;  %s4651_s11 = inlined_call_operand.vmem [shape: f32[128,128], index: 11, kind: input, shape index: {}]   ;;  %s4652_s12 = inlined_call_operand.hbm [shape: f32[1,128], index: 12, kind: input, shape index: {}]   ;;  %s4653_s13 = inlined_call_operand.vmem [shape: f32[128,128], index: 13, kind: input, shape index: {}]   ;;  %s4654_s14 = inlined_call_operand.hbm [shape: f32[1,128], index: 14, kind: input, shape index: {}]   ;;  %s4655_s15 = inlined_call_operand.hbm [shape: f32[1,128], index: 15, kind: input, shape index: {}]   ;;  %s4656_s16 = inlined_call_operand.hbm [shape: f32[1,128], index: 16, kind: input, shape index: {}]   ;;  %s4657_s17 = inlined_call_operand.vmem [shape: f32[128,128], index: 17, kind: input, shape index: {}]   ;;  %s4658_s18 = inlined_call_operand.hbm [shape: f32[1,128], index: 18, kind: input, shape index: {}]   ;;  %s4659_s19 = inlined_call_operand.vmem [shape: f32[128,128], index: 19, kind: input, shape index: {}]   ;;  %s4660_s20 = inlined_call_operand.hbm [shape: f32[1,128], index: 20, kind: input, shape index: {}]   ;;  %s4661_s21 = inlined_call_operand.hbm [shape: f32[1,128], index: 21, kind: input, shape index: {}]   ;;  %s4662_s22 = inlined_call_operand.hbm [shape: f32[1,128], index: 22, kind: input, shape index: {}]   ;;  %s4663_s23 = inlined_call_operand.vmem [shape: f32[2,12,128], index: 23, kind: output, shape index: {}]  }
   0x1   :  { %4667 = sst [smem:[#allocation28_spill]] %s4640_s0 }
   0x2   :  { %4668 = sst [smem:[#allocation29_spill]] %s4641_s1 }
   0x3   :  { %4669 = sst [smem:[#allocation30_spill]] %s4642_s2 }
   0x4   :  { %4670 = sst [smem:[#allocation31_spill]] %s4643_s3 }
   0x5   :  { %4671 = sst [smem:[#allocation32_spill]] %s4644_s4 }
   0x6   :  { %4672 = sst [smem:[#allocation33_spill]] %s4645_s5 }
   0x7   :  { %4673 = sst [smem:[#allocation34_spill]] %s4646_s6 }
   0x8   :  { %4674 = sst [smem:[#allocation35_spill]] %s4647_s7 }
   0x9   :  { %4675 = sst [smem:[#allocation36_spill]] %s4650_s10 }
   0xa   :  { %28 = vsyncpa [#allocation3], 0 }
   0xb   :  { %29 = vsyncpa [#allocation5], 0 }
   0xc   :  { %30 = vsyncpa [#allocation8], 0 }
   0xd   :  { %31 = vsyncpa [#allocation11], 0 }
   0xe   :  { %32 = vsyncpa [#allocation14], 0 }
   0xf   :  { %33 = vsyncpa [#allocation17], 0 }
  0x10   :  { %34 = vsyncpa [#allocation20], 0  ;;  %s3929_s4 = smov 0  }
  0x11 LB: > { %s3792_s30 = smov [#allocation4]   ;;  %s3935_s25 = sadd.s32 4294967295, %s3790_s4   ;;  %s3790_s4 = sphi %s3929_s4, %s40_s4  }
  0x12   : > { %s599_s24 = sshll.u32 %s3792_s30, 4  ;;  %p2742_p0 = scmp.ge.s32.totalorder %s3790_s4, 1  ;;  %s600_s24 = int_to_ptr.vmem [resolvable:$true] %s599_s24 }
  0x13   : > { %p569_p1 = scmp.lt.s32.totalorder %s3790_s4, 3  ;;  %p4666_p2 = scmp.eq.s32.totalorder %s3935_s25, 0 }
  0x14   : > { %s3793_s1 = smov [#allocation7]   ;;  %s3794_s2 = smov [#allocation10]  }
  0x15   : > { %p3940_p3 = pnand %p2742_p0, %p569_p1  ;;  %s627_s26 = sshll.u32 %s3793_s1, 4  ;;  %s3946_s26 = int_to_ptr.vmem [resolvable:$true] %s627_s26 }
  0x16   : > { %s655_s6 = sshll.u32 %s3794_s2, 4  ;;  %s3795_s7 = smov [#allocation13]   ;;  %s3954_s6 = int_to_ptr.vmem [resolvable:$true] %s655_s6 }
  0x17   : > { %p3295_p4 = pneg %p3940_p3  ;;  %s677_s28 = sshll.u32 %s3795_s7, 4  ;;  %s3956_s28 = int_to_ptr.vmem [resolvable:$true] %s677_s28 }
  0x18   : > { %s3455_s3 = scalar_lea.vmem %s600_s24, 16  ;;  %s3462_s0 = scalar_lea.vmem %s600_s24, 32 }
  0x19   : > { %p3950_p5 = pnand %p4666_p2, %p3295_p4  ;;  %p3456_p7 = scmp.ne.s32.totalorder %s600_s24, %s3455_s3 }
  0x1a   : > { %p3463_p10 = scmp.lt.s32.totalorder %s600_s24, %s600_s24  ;;  %p3464_p11 = scmp.lt.s32.totalorder %s3462_s0, %s3455_s3 }
  0x1b   : > { %p3960_p6 = pneg %p3950_p5 }
  0x1c   : > { %p3465_p12 = por %p3464_p11, %p3463_p10 }
  0x1d   : > { %p3458_p8 = pnand %p3456_p7, %p3960_p6 }
  0x1f   : > { %p3459_p9 = pneg %p3458_p8 }
  0x21   : > { %p3466_p13 = pnand %p3465_p12, %p3459_p9 }
  0x23   : > { %3469 = shalt.err (!%p3466_p13)
}
  0x24   : > { %s4679_s2 = sld [smem:[#allocation34_spill]]  ;;  %s3481_s7 = scalar_lea.vmem %s3946_s26, 16 }
  0x25   : > { %p3482_p0 = scmp.ne.s32.totalorder %s3946_s26, %s3481_s7  ;;  %s3488_s3 = scalar_lea.vmem %s3946_s26, 32 }
  0x26   : > { %p3489_p7 = scmp.lt.s32.totalorder %s3946_s26, %s3946_s26  ;;  %p3490_p8 = scmp.lt.s32.totalorder %s3488_s3, %s3481_s7 }
  0x27   : > { %p3484_p1 = pnand %p3482_p0, %p3960_p6 }
  0x28   : > { %p3491_p9 = por %p3490_p8, %p3489_p7 }
  0x29   : > { %p3485_p4 = pneg %p3484_p1 }
  0x2a   : > { %3301 = dma.hbm_to_vmem [thread:$0]  (!%p3950_p5), %s4679_s2, 16, %s600_s24, [#allocation5]  }
  0x2b   : > { %p3492_p10 = pnand %p3491_p9, %p3485_p4 }
  0x2d   : > { %3495 = shalt.err (!%p3492_p10)
}
  0x2e   : > { %s4680_s10 = sld [smem:[#allocation36_spill]]  ;;  %s3507_s24 = scalar_lea.vmem %s3954_s6, 16 }
  0x2f   : > { %p3508_p11 = scmp.ne.s32.totalorder %s3954_s6, %s3507_s24  ;;  %s3514_s1 = scalar_lea.vmem %s3954_s6, 32 }
  0x30   : > { %p3515_p0 = scmp.lt.s32.totalorder %s3954_s6, %s3954_s6  ;;  %p3516_p1 = scmp.lt.s32.totalorder %s3514_s1, %s3507_s24 }
  0x31   : > { %p3510_p12 = pnand %p3508_p11, %p3960_p6 }
  0x32   : > { %p3517_p4 = por %p3516_p1, %p3515_p0 }
  0x33   : > { %p3511_p13 = pneg %p3510_p12 }
  0x34   : > { %3307 = dma.hbm_to_vmem [thread:$0]  (!%p3950_p5), %s4680_s10, 16, %s3946_s26, [#allocation8]  }
  0x35   : > { %p3518_p7 = pnand %p3517_p4, %p3511_p13 }
  0x37   : > { %3521 = shalt.err (!%p3518_p7)
}
  0x38   : > { %3313 = dma.hbm_to_vmem [thread:$0]  (!%p3950_p5), %s4654_s14, 16, %s3954_s6, [#allocation11]  }
  0x39   : > { %s3533_s26 = scalar_lea.vmem %s3956_s28, 16  ;;  %s3540_s3 = scalar_lea.vmem %s3956_s28, 32 }
  0x3a   : > { %p3534_p8 = scmp.ne.s32.totalorder %s3956_s28, %s3533_s26  ;;  %p3541_p11 = scmp.lt.s32.totalorder %s3956_s28, %s3956_s28 }
  0x3b   : > { %p3542_p12 = scmp.lt.s32.totalorder %s3540_s3, %s3533_s26 }
  0x3c   : > { %p3536_p9 = pnand %p3534_p8, %p3960_p6 }
  0x3d   : > { %p3543_p13 = por %p3542_p12, %p3541_p11 }
  0x3e   : > { %p3537_p10 = pneg %p3536_p9 }
  0x40   : > { %p3544_p0 = pnand %p3543_p13, %p3537_p10 }
  0x42   : > { %3547 = shalt.err (!%p3544_p0)
}
  0x43   : > { %3319 = dma.hbm_to_vmem [thread:$0]  (!%p3950_p5), %s4656_s16, 16, %s3956_s28, [#allocation14]  }
  0x44   : > { %s3796_s6 = smov [#allocation16]   ;;  %s3797_s1 = smov [#allocation2]  }
  0x45   : > { %s705_s24 = sshll.u32 %s3796_s6, 4  ;;  %s588_s2 = sshll.u32 %s3797_s1, 4  ;;  %s706_s24 = int_to_ptr.vmem [resolvable:$true] %s705_s24  ;;  %s589_s2 = int_to_ptr.vmem [resolvable:$true] %s588_s2 }
  0x46   : > { %s3559_s7 = scalar_lea.vmem %s706_s24, 16  ;;  %s3566_s26 = scalar_lea.vmem %s706_s24, 32 }
  0x47   : > { %p3560_p1 = scmp.ne.s32.totalorder %s706_s24, %s3559_s7  ;;  %p3567_p8 = scmp.lt.s32.totalorder %s706_s24, %s706_s24 }
  0x48   : > { %p3568_p9 = scmp.lt.s32.totalorder %s3566_s26, %s3559_s7 }
  0x49   : > { %p3562_p4 = pnand %p3560_p1, %p3960_p6 }
  0x4a   : > { %p3569_p10 = por %p3568_p9, %p3567_p8 }
  0x4b   : > { %p3563_p7 = pneg %p3562_p4 }
  0x4d   : > { %p3570_p11 = pnand %p3569_p10, %p3563_p7 }
  0x4f   : > { %3573 = shalt.err (!%p3570_p11)
}
  0x50   : > { %3325 = dma.hbm_to_vmem [thread:$0]  (!%p3950_p5), %s4660_s20, 16, %s706_s24, [#allocation17]  }
  0x51   : > { %s3585_s0 = scalar_lea.vmem %s589_s2, 16  ;;  %s3592_s30 = scalar_lea.vmem %s589_s2, 32 }
  0x52   : > { %p3586_p12 = scmp.ne.s32.totalorder %s589_s2, %s3585_s0  ;;  %p3593_p1 = scmp.lt.s32.totalorder %s589_s2, %s589_s2 }
  0x53   : > { %p3594_p4 = scmp.lt.s32.totalorder %s3592_s30, %s3585_s0 }
  0x54   : > { %p3588_p13 = pnand %p3586_p12, %p3960_p6 }
  0x55   : > { %p3595_p2 = por %p3594_p4, %p3593_p1 }
  0x56   : > { %p3589_p0 = pneg %p3588_p13 }
  0x58   : > { %p3596_p8 = pnand %p3595_p2, %p3589_p0 }
  0x5a   : > { %3599 = shalt.err (!%p3596_p8)
}
  0x5b   : > { %s4681_s7 = sld [smem:[#allocation33_spill]]  ;;  %s3798_s24 = smov [#allocation6]  }
  0x5c   : > { %s613_s26 = sshll.u32 %s3798_s24, 4  ;;  %s3799_s3 = smov [#allocation9]   ;;  %s614_s26 = int_to_ptr.vmem [resolvable:$true] %s613_s26 }
  0x5d   : > { %s641_s28 = sshll.u32 %s3799_s3, 4  ;;  %s3611_s10 = scalar_lea.vmem %s614_s26, 16  ;;  %s642_s28 = int_to_ptr.vmem [resolvable:$true] %s641_s28 }
  0x5e   : > { %p3612_p7 = scmp.ne.s32.totalorder %s614_s26, %s3611_s10  ;;  %s3618_s0 = scalar_lea.vmem %s614_s26, 32 }
  0x5f   : > { %p3619_p2 = scmp.lt.s32.totalorder %s614_s26, %s614_s26  ;;  %p3620_p11 = scmp.lt.s32.totalorder %s3618_s0, %s3611_s10 }
  0x60   : > { %p3614_p9 = pnand %p3612_p7, %p3960_p6 }
  0x61   : > { %3298 = dma.hbm_to_vmem [thread:$0]  (!%p3950_p5), %s4681_s7, 16, %s589_s2, [#allocation3]  }
  0x62   : > { %p3615_p10 = pneg %p3614_p9  ;;  %p3621_p12 = por %p3620_p11, %p3619_p2 }
  0x64   : > { %p3622_p13 = pnand %p3621_p12, %p3615_p10 }
  0x66   : > { %3625 = shalt.err (!%p3622_p13)
}
  0x67   : > { %3304 = dma.hbm_to_vmem [thread:$0]  (!%p3950_p5), %s4648_s8, 16, %s614_s26, [#allocation5]  }
  0x68   : > { %s3637_s6 = scalar_lea.vmem %s642_s28, 16  ;;  %s3644_s1 = scalar_lea.vmem %s642_s28, 32 }
  0x69   : > { %p3638_p0 = scmp.ne.s32.totalorder %s642_s28, %s3637_s6  ;;  %p3645_p8 = scmp.lt.s32.totalorder %s642_s28, %s642_s28 }
  0x6a   : > { %p3646_p7 = scmp.lt.s32.totalorder %s3644_s1, %s3637_s6 }
  0x6b   : > { %p3640_p1 = pnand %p3638_p0, %p3960_p6 }
  0x6c   : > { %p3647_p9 = por %p3646_p7, %p3645_p8 }
  0x6d   : > { %p3641_p4 = pneg %p3640_p1 }
  0x6f   : > { %p3648_p2 = pnand %p3647_p9, %p3641_p4 }
  0x71   : > { %3651 = shalt.err (!%p3648_p2)
}
  0x72   : > { %3310 = dma.hbm_to_vmem [thread:$0]  (!%p3950_p5), %s4652_s12, 16, %s642_s28, [#allocation8]  }
  0x73   : > { %s3800_s24 = smov [#allocation12]   ;;  %s3801_s3 = smov [#allocation15]  }
  0x74   : > { %s666_s26 = sshll.u32 %s3800_s24, 4  ;;  %s691_s0 = sshll.u32 %s3801_s3, 4  ;;  %s667_s26 = int_to_ptr.vmem [resolvable:$true] %s666_s26  ;;  %s692_s0 = int_to_ptr.vmem [resolvable:$true] %s691_s0 }
  0x75   : > { %s3663_s30 = scalar_lea.vmem %s667_s26, 16  ;;  %s3670_s2 = scalar_lea.vmem %s667_s26, 32 }
  0x76   : > { %p3664_p10 = scmp.ne.s32.totalorder %s667_s26, %s3663_s30  ;;  %p3671_p13 = scmp.lt.s32.totalorder %s667_s26, %s667_s26 }
  0x77   : > { %p3672_p0 = scmp.lt.s32.totalorder %s3670_s2, %s3663_s30 }
  0x78   : > { %p3666_p11 = pnand %p3664_p10, %p3960_p6 }
  0x79   : > { %p3673_p1 = por %p3672_p0, %p3671_p13 }
  0x7a   : > { %p3667_p12 = pneg %p3666_p11 }
  0x7c   : > { %p3674_p4 = pnand %p3673_p1, %p3667_p12 }
  0x7e   : > { %3677 = shalt.err (!%p3674_p4)
}
  0x7f   : > { %3316 = dma.hbm_to_vmem [thread:$0]  (!%p3950_p5), %s4655_s15, 16, %s667_s26, [#allocation11]  }
  0x80   : > { %s3689_s1 = scalar_lea.vmem %s692_s0, 16  ;;  %s3696_s10 = scalar_lea.vmem %s692_s0, 32 }
  0x81   : > { %p3690_p8 = scmp.ne.s32.totalorder %s692_s0, %s3689_s1  ;;  %p3697_p2 = scmp.lt.s32.totalorder %s692_s0, %s692_s0 }
  0x82   : > { %p3698_p10 = scmp.lt.s32.totalorder %s3696_s10, %s3689_s1 }
  0x83   : > { %p3692_p7 = pnand %p3690_p8, %p3960_p6 }
  0x84   : > { %p3699_p11 = por %p3698_p10, %p3697_p2 }
  0x85   : > { %p3693_p9 = pneg %p3692_p7 }
  0x87   : > { %p3700_p13 = pnand %p3699_p11, %p3693_p9 }
  0x89   : > { %3703 = shalt.err (!%p3700_p13)
}
  0x8a   : > { %3322 = dma.hbm_to_vmem [thread:$0]  (!%p3950_p5), %s4658_s18, 16, %s692_s0, [#allocation14]  }
  0x8b   : > { %s3802_s26 = smov [#allocation18]   ;;  %s3803_s30 = smov [#allocation19]  }
  0x8c   : > { %s716_s3 = sshll.u32 %s3802_s26, 4  ;;  %s727_s2 = sshll.u32 %s3803_s30, 4  ;;  %s717_s3 = int_to_ptr.vmem [resolvable:$true] %s716_s3  ;;  %s728_s2 = int_to_ptr.vmem [resolvable:$true] %s727_s2 }
  0x8d   : > { %s3715_s6 = scalar_lea.vmem %s717_s3, 16  ;;  %s3722_s28 = scalar_lea.vmem %s717_s3, 32 }
  0x8e   : > { %p3716_p12 = scmp.ne.s32.totalorder %s717_s3, %s3715_s6  ;;  %p3723_p4 = scmp.lt.s32.totalorder %s717_s3, %s717_s3 }
  0x8f   : > { %p3724_p8 = scmp.lt.s32.totalorder %s3722_s28, %s3715_s6 }
  0x90   : > { %p3718_p0 = pnand %p3716_p12, %p3960_p6 }
  0x91   : > { %p3725_p7 = por %p3724_p8, %p3723_p4 }
  0x92   : > { %p3719_p1 = pneg %p3718_p0 }
  0x94   : > { %p3726_p9 = pnand %p3725_p7, %p3719_p1 }
  0x96   : > { %3729 = shalt.err (!%p3726_p9)
}
  0x97   : > { %3328 = dma.hbm_to_vmem [thread:$0]  (!%p3950_p5), %s4661_s21, 16, %s717_s3, [#allocation17]  }
  0x98   : > { %s3741_s10 = scalar_lea.vmem %s728_s2, 16  ;;  %s3748_s7 = scalar_lea.vmem %s728_s2, 32 }
  0x99   : > { %p3742_p2 = scmp.ne.s32.totalorder %s728_s2, %s3741_s10  ;;  %p3749_p13 = scmp.lt.s32.totalorder %s728_s2, %s728_s2 }
  0x9a   : > { %p3750_p12 = scmp.lt.s32.totalorder %s3748_s7, %s3741_s10 }
  0x9b   : > { %p3744_p10 = pnand %p3742_p2, %p3960_p6 }
  0x9c   : > { %p3751_p0 = por %p3750_p12, %p3749_p13 }
  0x9d   : > { %p3745_p11 = pneg %p3744_p10 }
  0x9f   : > { %p3752_p4 = pnand %p3751_p0, %p3745_p11 }
  0xa1   : > { %3755 = shalt.err (!%p3752_p4)
}
  0xa2   : > { %3331 = dma.hbm_to_vmem [thread:$0]  (!%p3950_p5), %s4662_s22, 16, %s728_s2, [#allocation20]  }
  0xa3   : > { %763 = sbr.rel (%p3940_p3) target bundleno = 4551 (0x11c7), region = 112  ;;  %p4682_p1 = scmp.eq.s32.totalorder (!%p3940_p3), %s3935_s25, 0 }
  0xa8   : > { %3761 = dma.done.wait (%p4682_p1), [#allocation3], 16   ;;  %p4683_p6 = pmov %p4682_p1 }
  0xa9   : > { %p4684_p8 = pmov %p4682_p1 }
  0xaa   : > { %3763 = vsyncadd (%p4683_p6), [#allocation3], 4294967280 }
  0xab   : > { %3765 = dma.done.wait (%p4684_p8), [#allocation5], 32   ;;  %p4685_p7 = pmov %p4682_p1 }
  0xac   : > { %p4686_p9 = pmov %p4682_p1 }
  0xad   : > { %3767 = vsyncadd (%p4685_p7), [#allocation5], 4294967264 }
  0xae   : > { %3769 = dma.done.wait (%p4686_p9), [#allocation8], 32   ;;  %p4687_p5 = pmov %p4682_p1 }
  0xaf   : > { %p4688_p3 = pmov %p4682_p1 }
  0xb0   : > { %3771 = vsyncadd (%p4687_p5), [#allocation8], 4294967264 }
  0xb1   : > { %3773 = dma.done.wait (%p4688_p3), [#allocation11], 32   ;;  %p4689_p2 = pmov %p4682_p1 }
  0xb2   : > { %p4690_p10 = pmov %p4682_p1 }
  0xb3   : > { %3775 = vsyncadd (%p4689_p2), [#allocation11], 4294967264 }
  0xb4   : > { %3777 = dma.done.wait (%p4690_p10), [#allocation14], 32   ;;  %p4691_p11 = pmov %p4682_p1 }
  0xb5   : > { %p4692_p13 = pmov %p4682_p1 }
  0xb6   : > { %3779 = vsyncadd (%p4691_p11), [#allocation14], 4294967264 }
  0xb7   : > { %3781 = dma.done.wait (%p4692_p13), [#allocation17], 32   ;;  %p4693_p12 = pmov %p4682_p1 }
  0xb8   : > { %p4694_p0 = pmov %p4682_p1 }
  0xb9   : > { %3783 = vsyncadd (%p4693_p12), [#allocation17], 4294967264 }
  0xba   : > { %3785 = dma.done.wait (%p4694_p0), [#allocation20], 16   ;;  %p4695_p4 = pmov %p4694_p0 }
  0xbb   : > { %p880_p1 = scmp.lt.s32.totalorder %s3935_s25, 1  ;;  %s4696_s3 = sld [smem:[#allocation31_spill]]  ;;  %vm1008_vm0 = vcmask 1043456   ;;  %v1161_v28 = vld [vmem:[%s4649_s9 + $0x78] sm:$0xff]  ;;  %v3804_v30 = vmov 0.0   ;;  %v1160_v31 = vld [vmem:[%s4649_s9 + $0x70] sm:$0xff] }
  0xbc   : > { %3787 = vsyncadd (%p4695_p4), [#allocation20], 4294967280  ;;  %s4697_s10 = sld [smem:[#allocation29_spill]]  ;;  %v1159_v33 = vld [vmem:[%s4649_s9 + $0x68] sm:$0xff]  ;;  %v1158_v43 = vld [vmem:[%s4649_s9 + $0x60] sm:$0xff]  ;;  %vm3805_vm1 = vmmov 0  }
  0xbd   : > { %s4703_s25 = smov (!%p880_p1, %s3935_s25), 1  ;;  %s4698_s6 = sld [smem:[#allocation32_spill]]  ;;  %v1157_v45 = vld [vmem:[%s4649_s9 + $0x58] sm:$0xff]  ;;  %v1156_v47 = vld [vmem:[%s4649_s9 + $0x50] sm:$0xff]  ;;  %v1155_v49 = vld [vmem:[%s4649_s9 + $0x48] sm:$0xff]  ;;  %vm1332_vm2 = vcmask 261120  }
  0xbe   : > { %s4101_s5 = sshll.u32 %s4703_s25, 4  ;;  %s4699_s0 = sld [smem:[#allocation28_spill]]  ;;  %v1154_v51 = vld [vmem:[%s4649_s9 + $0x40] sm:$0xff]  ;;  %v1153_v53 = vld [vmem:[%s4649_s9 + $0x38] sm:$0xff]  ;;  %v1152_v55 = vld [vmem:[%s4649_s9 + $0x30] sm:$0xff]  ;;  %vm1423_vm3 = vcmask 60416  }
  0xbf   : > { %s4700_s29 = sld [smem:[#allocation35_spill]]  ;;  %v1151_v57 = vld [vmem:[%s4649_s9 + $0x28] sm:$0xff]  ;;  %v1150_v59 = vld [vmem:[%s4649_s9 + $0x20] sm:$0xff]  ;;  %v1149_v61 = vld [vmem:[%s4649_s9 + $0x18] sm:$0xff]  ;;  %s2773_s27 = sshll.u32 %s4703_s25, 3  ;;  %vm1419_vm4 = vcmask 64512  }
  0xc0   : > { %v1148_v63 = vld [vmem:[%s4649_s9 + $0x10] sm:$0xff]  ;;  %s3808_s25 = smov 32   ;;  %vm2136_vm5 = vcmask 523264   ;;  %vm2139_vm6 = vcmask 785408   ;;  %s898_s2 = scalar_lea.vmem %s4663_s23, %s4101_s5 }
  0xc1   : > { %v919_v0 = vld [vmem:[%s4696_s3 + $0x78] sm:$0xff]  ;;  %v918_v1 = vld [vmem:[%s4696_s3 + $0x70] sm:$0xff]  ;;  %v917_v2 = vld [vmem:[%s4696_s3 + $0x68] sm:$0xff] }
  0xc2   : > { %2962 = vmatprep.subr.mxu0 %v919_v0  ;;  %s4116_s7 = scalar_lea.vmem %s4697_s10, %s4101_s5  ;;  %v916_v3 = vld [vmem:[%s4696_s3 + $0x60] sm:$0xff]  ;;  %v915_v5 = vld [vmem:[%s4696_s3 + $0x58] sm:$0xff]  ;;  %v914_v6 = vld [vmem:[%s4696_s3 + $0x50] sm:$0xff] }
  0xc3   : > { %2963 = vmatpush3.msra.mxu0 %v919_v0  ;;  %v902_v4 = vld [vmem:[%s4116_s7] sm:$0xff]  ;;  %v913_v7 = vld [vmem:[%s4696_s3 + $0x48] sm:$0xff]  ;;  %v911_v9 = vld [vmem:[%s4696_s3 + $0x38] sm:$0xff] }
  0xc4   : > { %2964 = vmatprep.subr.mxu0 %v918_v1  ;;  %2994 = vmatprep.mubr.f32.mxu0 %v902_v4  ;;  %v912_v8 = vld [vmem:[%s4696_s3 + $0x40] sm:$0xff]  ;;  %v910_v10 = vld [vmem:[%s4696_s3 + $0x30] sm:$0xff]  ;;  %v909_v11 = vld [vmem:[%s4696_s3 + $0x28] sm:$0xff]  ;;  %s884_s10 = scalar_lea.vmem %s4699_s0, %s4101_s5 }
  0xc5   : > { %2965 = vmatpush3.msra.mxu0 %v918_v1  ;;  %v908_v12 = vld [vmem:[%s4696_s3 + $0x20] sm:$0xff]  ;;  %v907_v13 = vld [vmem:[%s4696_s3 + $0x18] sm:$0xff]  ;;  %v906_v14 = vld [vmem:[%s4696_s3 + $0x10] sm:$0xff] }
  0xc6   : > { %2966 = vmatprep.subr.mxu0 %v917_v2  ;;  %v905_v15 = vld [vmem:[%s4696_s3 + $0x8] sm:$0xff]  ;;  %v904_v16 = vld [vmem:[%s4696_s3] sm:$0xff]  ;;  %v1063_v29 = vld [vmem:[%s4700_s29 + $0x78] sm:$0xff] }
  0xc7   : > { %2967 = vmatpush3.msra.mxu0 %v917_v2  ;;  %v903_v17 = vld [vmem:[%s4116_s7 + $0x8] sm:$0xf]  ;;  %v2776_v18 = vld [vmem:[%s4698_s6] ss:$0 sm:$0xff]  ;;  %2997 = vmatprep.subr.mxu1 %v1063_v29  ;;  %v1062_v32 = vld [vmem:[%s4700_s29 + $0x70] sm:$0xff] }
  0xc8   : > { %2968 = vmatprep.subr.mxu0 %v916_v3  ;;  %v899_v22 = vld [vmem:[%s884_s10] sm:$0xff]  ;;  %v900_v24 = vld [vmem:[%s884_s10 + $0x8] sm:$0xf]  ;;  %2998 = vmatpush3.msra.mxu1 %v1063_v29  ;;  %v1059_v48 = vld [vmem:[%s4700_s29 + $0x58] sm:$0xff]  ;;  %s4701_s10 = sld [smem:[#allocation30_spill]] }
  0xc9   : > { %2969 = vmatpush3.msra.mxu0 %v916_v3  ;;  %2999 = vmatprep.subr.mxu1 %v1062_v32  ;;  %v1061_v44 = vld [vmem:[%s4700_s29 + $0x68] sm:$0xff]  ;;  %v1060_v46 = vld [vmem:[%s4700_s29 + $0x60] sm:$0xff]  ;;  %v1058_v50 = vld [vmem:[%s4700_s29 + $0x50] sm:$0xff] }
  0xca   : > { %2970 = vmatprep.subr.mxu0 %v915_v5  ;;  %3000 = vmatpush3.msra.mxu1 %v1062_v32  ;;  %v1057_v52 = vld [vmem:[%s4700_s29 + $0x48] sm:$0xff]  ;;  %v1056_v54 = vld [vmem:[%s4700_s29 + $0x40] sm:$0xff]  ;;  %v1055_v56 = vld [vmem:[%s4700_s29 + $0x38] sm:$0xff] }
  0xcb   : > { %2971 = vmatpush3.msra.mxu0 %v915_v5  ;;  %3001 = vmatprep.subr.mxu1 %v1061_v44  ;;  %v1054_v58 = vld [vmem:[%s4700_s29 + $0x30] sm:$0xff]  ;;  %v1053_v60 = vld [vmem:[%s4700_s29 + $0x28] sm:$0xff]  ;;  %v1052_v62 = vld [vmem:[%s4700_s29 + $0x20] sm:$0xff] }
  0xcc   : > { %2972 = vmatprep.subr.mxu0 %v914_v6  ;;  %3002 = vmatpush3.msra.mxu1 %v1061_v44  ;;  %v1051_v0 = vld [vmem:[%s4700_s29 + $0x18] sm:$0xff]  ;;  %v1147_v1 = vld [vmem:[%s4649_s9 + $0x8] sm:$0xff]  ;;  %v1050_v2 = vld [vmem:[%s4700_s29 + $0x10] sm:$0xff] }
  0xcd   : > { %2973 = vmatpush3.msra.mxu0 %v914_v6  ;;  %3003 = vmatprep.subr.mxu1 %v1060_v46  ;;  %v1146_v3 = vld [vmem:[%s4649_s9] sm:$0xff]  ;;  %v1049_v4 = vld [vmem:[%s4700_s29 + $0x8] sm:$0xff]  ;;  %v1246_v32 = vld [vmem:[%s4651_s11 + $0x38] sm:$0xff] }
  0xce   : > { %2974 = vmatprep.subr.mxu0 %v913_v7  ;;  %3004 = vmatpush3.msra.mxu1 %v1060_v46  ;;  %s893_s7 = scalar_lea.vmem %s4701_s10, %s2773_s27  ;;  %v1048_v6 = vld [vmem:[%s4700_s29] sm:$0xff]  ;;  %v1248_v29 = vld [vmem:[%s4651_s11 + $0x48] sm:$0xff]  ;;  %s3806_s10 = smov 96  }
  0xcf   : > { %2975 = vmatpush3.msra.mxu0 %v913_v7  ;;  %3005 = vmatprep.subr.mxu1 %v1059_v48  ;;  %v4291_v5 = vld [vmem:[%s893_s7] sm:$0xff]  ;;  %s3807_s7 = smov 64  }
  0xd0   : > { %2976 = vmatprep.subr.mxu0 %v912_v8  ;;  %3006 = vmatpush3.msra.mxu1 %v1059_v48  ;;  %v2781_v48 = vld [vmem:[#allocation9] ss:$0 sm:$0xff] }
  0xd1   : > { %2977 = vmatpush3.msra.mxu0 %v912_v8  ;;  %3007 = vmatprep.subr.mxu1 %v1058_v50 }
  0xd2   : > { %2978 = vmatprep.subr.mxu0 %v911_v9  ;;  %3008 = vmatpush3.msra.mxu1 %v1058_v50 }
  0xd3   : > { %2979 = vmatpush3.msra.mxu0 %v911_v9  ;;  %3009 = vmatprep.subr.mxu1 %v1057_v52 }
  0xd4   : > { %2980 = vmatprep.subr.mxu0 %v910_v10  ;;  %3010 = vmatpush3.msra.mxu1 %v1057_v52 }
  0xd5   : > { %2981 = vmatpush3.msra.mxu0 %v910_v10  ;;  %3011 = vmatprep.subr.mxu1 %v1056_v54 }
  0xd6   : > { %2982 = vmatprep.subr.mxu0 %v909_v11  ;;  %3012 = vmatpush3.msra.mxu1 %v1056_v54 }
  0xd7   : > { %2983 = vmatpush3.msra.mxu0 %v909_v11  ;;  %3013 = vmatprep.subr.mxu1 %v1055_v56 }
  0xd8   : > { %2984 = vmatprep.subr.mxu0 %v908_v12  ;;  %3014 = vmatpush3.msra.mxu1 %v1055_v56 }
  0xd9   : > { %2985 = vmatpush3.msra.mxu0 %v908_v12  ;;  %3015 = vmatprep.subr.mxu1 %v1054_v58 }
  0xda   : > { %2986 = vmatprep.subr.mxu0 %v907_v13  ;;  %3016 = vmatpush3.msra.mxu1 %v1054_v58 }
  0xdb   : > { %2987 = vmatpush3.msra.mxu0 %v907_v13  ;;  %3017 = vmatprep.subr.mxu1 %v1053_v60 }
  0xdc   : > { %2988 = vmatprep.subr.mxu0 %v906_v14  ;;  %3018 = vmatpush3.msra.mxu1 %v1053_v60 }
  0xdd   : > { %2989 = vmatpush3.msra.mxu0 %v906_v14  ;;  %3019 = vmatprep.subr.mxu1 %v1052_v62  ;;  %v2777_v14 = vld [vmem:[#allocation2] ss:$0 sm:$0xff] }
  0xde   : > { %2990 = vmatprep.subr.mxu0 %v905_v15  ;;  %3020 = vmatpush3.msra.mxu1 %v1052_v62 }
  0xdf   : > { %2991 = vmatpush3.msra.mxu0 %v905_v15  ;;  %3021 = vmatprep.subr.mxu1 %v1051_v0 }
  0xe0   : > { %2992 = vmatprep.subr.mxu0 %v904_v16  ;;  %3022 = vmatpush3.msra.mxu1 %v1051_v0 }
  0xe1   : > { %2993 = vmatpush3.msra.mxu0 %v904_v16  ;;  %3023 = vmatprep.subr.mxu1 %v1050_v2  ;;  %v2778_v16 = vld [vmem:[#allocation4] ss:$0 sm:$0xff] }
  0xe2   : > { %2995 = vmatmul.mubr.f32.vlgmr.msra.gmra.mxu0 %v903_v17  ;;  %3032 = vmatprep.subr.mxu0 %v3804_v30 }
  0xe3   : > { %3033 = vmatpush3.msra.mxu0 %v1161_v28  ;;  %3024 = vmatpush3.msra.mxu1 %v1050_v2  ;;  %v1249_v28 = vld [vmem:[%s4651_s11 + $0x50] sm:$0xff] }
  0xe4   : > { %3034 = vmatprep.subr.mxu0 %v3804_v30  ;;  %3064 = vmatprep.mubr.msk.f32.mxu0 %vm3805_vm1, %v3804_v30 }
  0xe5   : > { %3035 = vmatpush3.msra.mxu0 %v1160_v31  ;;  %3025 = vmatprep.subr.mxu1 %v1049_v4  ;;  %v1247_v31 = vld [vmem:[%s4651_s11 + $0x40] sm:$0xff] }
  0xe6   : > { %3036 = vmatprep.subr.mxu0 %v3804_v30  ;;  %3026 = vmatpush3.msra.mxu1 %v1049_v4 }
  0xe7   : > { %3037 = vmatpush3.msra.mxu0 %v1159_v33  ;;  %3027 = vmatprep.subr.mxu1 %v1048_v6  ;;  %v1245_v33 = vld [vmem:[%s4651_s11 + $0x30] sm:$0xff] }
  0xe8   : > { %3038 = vmatprep.subr.mxu0 %v3804_v30  ;;  %3028 = vmatpush3.msra.mxu1 %v1048_v6 }
  0xe9   : > { %3039 = vmatpush3.msra.mxu0 %v1158_v43  ;;  %3067 = vmatprep.subr.mxu1 %v3804_v30 }
  0xea   : > { %3040 = vmatprep.subr.mxu0 %v3804_v30 }
  0xeb   : > { %3041 = vmatpush3.msra.mxu0 %v1157_v45  ;;  %v2779_v45 = vld [vmem:[#allocation6] ss:$0 sm:$0xff] }
  0xec   : > { %3042 = vmatprep.subr.mxu0 %v3804_v30 }
  0xed   : > { %3043 = vmatpush3.msra.mxu0 %v1156_v47 }
  0xee   : > { %3044 = vmatprep.subr.mxu0 %v3804_v30 }
  0xef   : > { %3045 = vmatpush3.msra.mxu0 %v1155_v49 }
  0xf0   : > { %3046 = vmatprep.subr.mxu0 %v3804_v30 }
  0xf1   : > { %3047 = vmatpush3.msra.mxu0 %v1154_v51 }
  0xf2   : > { %3048 = vmatprep.subr.mxu0 %v3804_v30 }
  0xf3   : > { %3049 = vmatpush3.msra.mxu0 %v1153_v53 }
  0xf4   : > { %3050 = vmatprep.subr.mxu0 %v3804_v30 }
  0xf5   : > { %3051 = vmatpush3.msra.mxu0 %v1152_v55 }
  0xf6   : > { %3052 = vmatprep.subr.mxu0 %v3804_v30 }
  0xf7   : > { %3053 = vmatpush3.msra.mxu0 %v1151_v57 }
  0xf8   : > { %3054 = vmatprep.subr.mxu0 %v3804_v30 }
  0xf9   : > { %3055 = vmatpush3.msra.mxu0 %v1150_v59 }
  0xfa   : > { %3056 = vmatprep.subr.mxu0 %v3804_v30 }
  0xfb   : > { %3057 = vmatpush3.msra.mxu0 %v1149_v61 }
  0xfc   : > { %3058 = vmatprep.subr.mxu0 %v3804_v30 }
  0xfd   : > { %3059 = vmatpush3.msra.mxu0 %v1148_v63 }
  0xfe   : > { %3060 = vmatprep.subr.mxu0 %v3804_v30 }
  0xff   : > { %3061 = vmatpush3.msra.mxu0 %v1147_v1 }
 0x100   : > { %3062 = vmatprep.subr.mxu0 %v3804_v30 }
 0x101   : > { %3063 = vmatpush3.msra.mxu0 %v1146_v3 }
 0x102   : > { %3065 = vmatmul.mubr.f32.vlgmr.msra.gmra.mxu0 %v4291_v5 }
 0x1a2   : > { %v2996_v19 = vpop.f32.mrf.mxu0 }
 0x1a3   : > { %v999_v20 = vadd.f32 %v2996_v19, %v2776_v18 }
 0x1a4   : > { %v993_v21 = vpop.f32.mrf.mxu0 }
 0x1a5   : > { %v994_v23 = vadd.f32 %v2776_v18, %v993_v21  ;;  %v1003_v26 = vadd.f32 %v999_v20, %v900_v24  ;;  %v1253_v24 = vld [vmem:[%s4651_s11 + $0x70] sm:$0xff] }
 0x1a7   : > { %v1002_v25 = vadd.f32 %v994_v23, %v899_v22  ;;  %v1009_v27 = vsel %vm1008_vm0, %v1003_v26, 0.0  ;;  %v1254_v23 = vld [vmem:[%s4651_s11 + $0x78] sm:$0xff] }
 0x1a9   : > { %1006 = vadd.xlane.f32.xlu0 %v1002_v25 }
 0x1ad   : > { %1010 = vadd.xlane.f32.xlu0 %v1009_v27  ;;  %v1250_v27 = vld [vmem:[%s4651_s11 + $0x58] sm:$0xff] }
 0x232   : > { %v1007_v34 = vpop.xlane.xlu0 %1006 }
 0x233   : > { %v1013_v35 = vmul.f32 0.0078125, %v1007_v34  ;;  %v1244_v34 = vld [vmem:[%s4651_s11 + $0x28] sm:$0xff] }
 0x235   : > { %v4186_v36 = vsub.f32 %v1002_v25, %v1013_v35  ;;  %v1252_v25 = vld [vmem:[%s4651_s11 + $0x68] sm:$0xff]  ;;  %v1243_v35 = vld [vmem:[%s4651_s11 + $0x20] sm:$0xff] }
 0x236   : > { %v1011_v37 = vpop.xlane.xlu0 %1010 }
 0x237   : > { %v1014_v38 = vmul.f32 0.0078125, %v1011_v37  ;;  %v1017_v39 = vmul.f32 %v4186_v36, %v4186_v36  ;;  %v1241_v37 = vld [vmem:[%s4651_s11 + $0x10] sm:$0xff] }
 0x239   : > { %v4190_v40 = vsub.f32 %v1003_v26, %v1014_v38  ;;  %1019 = vadd.xlane.f32.xlu1 %v1017_v39  ;;  %v1251_v26 = vld [vmem:[%s4651_s11 + $0x60] sm:$0xff]  ;;  %v1240_v38 = vld [vmem:[%s4651_s11 + $0x8] sm:$0xff] }
 0x23a   : > { %v1239_v39 = vld [vmem:[%s4651_s11] sm:$0xff] }
 0x23b   : > { %v1018_v41 = vmul.f32 %v4190_v40, %v4190_v40 }
 0x23d   : > { %v1021_v42 = vsel %vm1008_vm0, %v1018_v41, 0.0  ;;  %v1235_v41 = vpop.f32.mrf.mxu0 }
 0x23e   : > { %1022 = vadd.xlane.f32.xlu1 %v1021_v42 }
 0x23f   : > { %v3066_v43 = vpop.f32.mrf.mxu0 }
 0x2c2   : > { %v1020_v7 = vpop.xlane.xlu1 %1019 }
 0x2c3   : > { %v1024_v8 = vmul.f32 0.0078125, %v1020_v7 }
 0x2c5   : > { %v1026_v9 = vadd.f32 1e-05, %v1024_v8 }
 0x2c7   : > { %3396 = vrsqrt.f32 %v1026_v9  ;;  %v1023_v10 = vpop.xlane.xlu1 %1022 }
 0x2c8   : > { %v1025_v11 = vmul.f32 0.0078125, %v1023_v10 }
 0x2ca   : > { %v1027_v12 = vadd.f32 1e-05, %v1025_v11 }
 0x2cc   : > { %3398 = vrsqrt.f32 %v1027_v12 }
 0x2d4   : > { %v3397_v13 = vpop.eup %3396 }
 0x2d5   : > { %v1030_v15 = vmul.f32 %v3397_v13, %v4186_v36  ;;  %v1242_v36 = vld [vmem:[%s4651_s11 + $0x18] sm:$0xff] }
 0x2d7   : > { %v1038_v17 = vmul.f32 %v2777_v14, %v1030_v15 }
 0x2d9   : > { %v3399_v18 = vpop.eup %3398  ;;  %v4299_v19 = vadd.f32 %v2778_v16, %v1038_v17 }
 0x2da   : > { %v1031_v20 = vmul.f32 %v3399_v18, %v4190_v40  ;;  %v2780_v40 = vld [vmem:[#allocation7] ss:$0 sm:$0xff] }
 0x2db   : > { %3029 = vmatprep.mubr.f32.mxu1 %v4299_v19  ;;  %v4372_v42 = vadd.f32 %v2780_v40, %v1235_v41 }
 0x2dc   : > { %v1039_v21 = vmul.f32 %v2777_v14, %v1031_v20 }
 0x2de   : > { %v4303_v22 = vadd.f32 %v2778_v16, %v1039_v21 }
 0x2e0   : > { %3030 = vmatmul.mubr.f32.vlgmr.msra.gmra.mxu1 %v4303_v22 }
 0x2e1   : > { %3068 = vmatpush3.msra.mxu1 %v1254_v23  ;;  %3099 = vmatprep.mubr.msk.f32.mxu1 %vm3805_vm1, %v3804_v30 }
 0x2e2   : > { %3069 = vmatprep.subr.mxu1 %v3804_v30 }
 0x2e3   : > { %3070 = vmatpush3.msra.mxu1 %v1253_v24 }
 0x2e4   : > { %3071 = vmatprep.subr.mxu1 %v3804_v30 }
 0x2e5   : > { %3072 = vmatpush3.msra.mxu1 %v1252_v25 }
 0x2e6   : > { %3073 = vmatprep.subr.mxu1 %v3804_v30 }
 0x2e7   : > { %3074 = vmatpush3.msra.mxu1 %v1251_v26 }
 0x2e8   : > { %3075 = vmatprep.subr.mxu1 %v3804_v30 }
 0x2e9   : > { %3076 = vmatpush3.msra.mxu1 %v1250_v27 }
 0x2ea   : > { %3077 = vmatprep.subr.mxu1 %v3804_v30 }
 0x2eb   : > { %3078 = vmatpush3.msra.mxu1 %v1249_v28 }
 0x2ec   : > { %3079 = vmatprep.subr.mxu1 %v3804_v30 }
 0x2ed   : > { %3080 = vmatpush3.msra.mxu1 %v1248_v29 }
 0x2ee   : > { %3081 = vmatprep.subr.mxu1 %v3804_v30 }
 0x2ef   : > { %3082 = vmatpush3.msra.mxu1 %v1247_v31 }
 0x2f0   : > { %3083 = vmatprep.subr.mxu1 %v3804_v30 }
 0x2f1   : > { %3084 = vmatpush3.msra.mxu1 %v1246_v32 }
 0x2f2   : > { %3085 = vmatprep.subr.mxu1 %v3804_v30 }
 0x2f3   : > { %3086 = vmatpush3.msra.mxu1 %v1245_v33 }
 0x2f4   : > { %3087 = vmatprep.subr.mxu1 %v3804_v30 }
 0x2f5   : > { %3088 = vmatpush3.msra.mxu1 %v1244_v34 }
 0x2f6   : > { %3089 = vmatprep.subr.mxu1 %v3804_v30 }
 0x2f7   : > { %3090 = vmatpush3.msra.mxu1 %v1243_v35 }
 0x2f8   : > { %3091 = vmatprep.subr.mxu1 %v3804_v30 }
 0x2f9   : > { %3092 = vmatpush3.msra.mxu1 %v1242_v36 }
 0x2fa   : > { %3093 = vmatprep.subr.mxu1 %v3804_v30 }
 0x2fb   : > { %3094 = vmatpush3.msra.mxu1 %v1241_v37 }
 0x2fc   : > { %3095 = vmatprep.subr.mxu1 %v3804_v30 }
 0x2fd   : > { %3096 = vmatpush3.msra.mxu1 %v1240_v38 }
 0x2fe   : > { %3097 = vmatprep.subr.mxu1 %v3804_v30 }
 0x2ff   : > { %3098 = vmatpush3.msra.mxu1 %v1239_v39 }
 0x300   : > { %3100 = vmatmul.mubr.f32.vlgmr.msra.gmra.mxu1 %v4291_v5  ;;  %3102 = vmatprep.subr.msk.mxu1 %vm1332_vm2, %v4372_v42 }
 0x301   : > { %3103 = vmatpush3.xpose.msk.msra.mxu1 %vm1332_vm2, %v4372_v42 }
 0x3a0   : > { %v3031_v44 = vpop.f32.mrf.mxu1 }
 0x3a1   : > { %v4380_v30 = vadd.f32 %v3031_v44, %v2779_v45 }
 0x3a2   : > { %v1137_v46 = vpop.f32.mrf.mxu1 }
 0x3a3   : > { %v4378_v47 = vadd.f32 %v2779_v45, %v1137_v46 }
 0x3a5   : > { %3104 = vmatprep.mubr.msk.f32.mxu1 %vm1332_vm2, %v4378_v47 }
 0x3a6   : > { %3105 = vmatmul.mubr.msk.f32.vlgmr.msra.gmra.mxu1 %vm1332_vm2, %v4380_v30 }
 0x3c0   : > { %v1328_v49 = vpop.f32.mrf.mxu1 }
 0x3c1   : > { %v4386_v50 = vadd.f32 %v2781_v48, %v1328_v49 }
 0x3c2   : > { %v3101_v51 = vpop.f32.mrf.mxu1 }
 0x3c3   : > { %3107 = vmatprep.subr.mxu1 %v4386_v50 }
 0x3c4   : > { %3108 = vmatpush3.msra.mxu1 %v4386_v50 }
 0x466   : > { %v3106_v52 = vpop.f32.mrf.mxu1 }
 0x467   : > { %v1418_v53 = vmul.f32 0.17677669, %v3106_v52 }
 0x468   : > { %v1408_v54 = vpop.f32.mrf.mxu1 }
 0x469   : > { %v1417_v55 = vmul.f32 0.17677669, %v1408_v54  ;;  %v1424_v56 = vsel %vm1423_vm3, %v1418_v53, -inf }
 0x46a   : > { %1425 = vmax.xlane.f32.xlu1 %v1424_v56 }
 0x46b   : > { %v1420_v57 = vsel %vm1419_vm4, %v1417_v55, -inf }
 0x46c   : > { %1421 = vmax.xlane.f32.xlu0 %v1420_v57 }
 0x4f3   : > { %v1426_v58 = vpop.xlane.xlu1 %1425 }
 0x4f4   : > { %v1428_v59 = vsub.f32 %v1418_v53, %v1426_v58 }
 0x4f5   : > { %v1422_v60 = vpop.xlane.xlu0 %1421 }
 0x4f6   : > { %v1431_v61 = vmul.f32 1.442695, %v1428_v59  ;;  %v1427_v62 = vsub.f32 %v1417_v55, %v1422_v60 }
 0x4f8   : > { %3400 = vpow2.f32 %v1431_v61  ;;  %v1429_v63 = vmul.f32 1.442695, %v1427_v62 }
 0x4fa   : > { %3402 = vpow2.f32 %v1429_v63 }
 0x505   : > { %v3401_v0 = vpop.eup %3400 }
 0x506   : > { %v1436_v1 = vsel %vm1423_vm3, %v3401_v0, 0.0 }
 0x507   : > { %v3403_v2 = vpop.eup %3402  ;;  %1437 = vadd.xlane.f32.xlu1 %v1436_v1 }
 0x508   : > { %v1433_v3 = vsel %vm1419_vm4, %v3403_v2, 0.0 }
 0x509   : > { %1434 = vadd.xlane.f32.xlu0 %v1433_v3 }
 0x518   : > { %1524 = vrot.lane.b32.xlu1 %v4378_v47, %s3806_s10 }
 0x51c   : > { %1526 = vrot.lane.b32.xlu1 %v4380_v30, %s3806_s10 }
 0x51f   : > { %1528 = vrot.lane.b32.xlu0 %v4372_v42, %s3806_s10 }
 0x590   : > { %v1438_v4 = vpop.xlane.xlu1 %1437 }
 0x591   : > { %3404 = vrcp.f32 %v1438_v4 }
 0x592   : > { %v1435_v5 = vpop.xlane.xlu0 %1434 }
 0x593   : > { %3406 = vrcp.f32 %v1435_v5 }
 0x594   : > { %v1525_v9 = vpop.permute.xlu1 %1524 }
 0x596   : > { %v1529_v6 = vpop.permute.xlu0 %1528 }
 0x597   : > { %3112 = vmatprep.subr.msk.mxu1 %vm1332_vm2, %v1529_v6 }
 0x598   : > { %v1527_v12 = vpop.permute.xlu1 %1526 }
 0x59e   : > { %v3405_v7 = vpop.eup %3404 }
 0x59f   : > { %v1442_v11 = vmul.f32 %v3405_v7, %v3401_v0 }
 0x5a0   : > { %v3407_v8 = vpop.eup %3406 }
 0x5a1   : > { %v1440_v10 = vmul.f32 %v3407_v8, %v3403_v2 }
 0x5a3   : > { %3109 = vmatprep.mubr.msk.f32.mxu1 %vm1419_vm4, %v1440_v10 }
 0x5a4   : > { %3110 = vmatmul.mubr.msk.f32.vlgmr.msra.gmra.mxu1 %vm1419_vm4, %v1442_v11 }
 0x5a5   : > { %3113 = vmatpush3.xpose.msk.msra.mxu1 %vm1332_vm2, %v1529_v6  ;;  %3114 = vmatprep.mubr.msk.f32.mxu1 %vm1332_vm2, %v1525_v9 }
 0x5a8   : > { %3115 = vmatmul.mubr.msk.f32.vlgmr.msra.gmra.mxu1 %vm1332_vm2, %v1527_v12 }
 0x664   : > { %v4406_v13 = vpop.f32.mrf.mxu1 }
 0x666   : > { %v4408_v14 = vpop.f32.mrf.mxu1 }
 0x668   : > { %v3116_v15 = vpop.f32.mrf.mxu1 }
 0x669   : > { %v1612_v16 = vmul.f32 0.17677669, %v3116_v15 }
 0x66a   : > { %v1602_v17 = vpop.f32.mrf.mxu1 }
 0x66b   : > { %v1611_v18 = vmul.f32 0.17677669, %v1602_v17  ;;  %v1616_v20 = vsel %vm1423_vm3, %v1612_v16, -inf }
 0x66c   : > { %1617 = vmax.xlane.f32.xlu0 %v1616_v20 }
 0x66d   : > { %v1613_v21 = vsel %vm1419_vm4, %v1611_v18, -inf }
 0x66e   : > { %1614 = vmax.xlane.f32.xlu1 %v1613_v21 }
 0x67f   : > { %1636 = vrot.lane.b32.xlu1 %v4386_v50, %s3806_s10 }
 0x683   : > { %1720 = vrot.lane.b32.xlu1 %v4378_v47, %s3807_s7 }
 0x687   : > { %1722 = vrot.lane.b32.xlu1 %v4380_v30, %s3807_s7 }
 0x6f5   : > { %v1618_v23 = vpop.xlane.xlu0 %1617 }
 0x6f6   : > { %v1620_v24 = vsub.f32 %v1612_v16, %v1618_v23 }
 0x6f7   : > { %v1615_v25 = vpop.xlane.xlu1 %1614 }
 0x6f8   : > { %v1623_v26 = vmul.f32 1.442695, %v1620_v24  ;;  %v1619_v27 = vsub.f32 %v1611_v18, %v1615_v25 }
 0x6fa   : > { %3408 = vpow2.f32 %v1623_v26  ;;  %v1621_v28 = vmul.f32 1.442695, %v1619_v27 }
 0x6fb   : > { %v1637_v29 = vpop.permute.xlu1 %1636 }
 0x6fc   : > { %3410 = vpow2.f32 %v1621_v28  ;;  %3117 = vmatprep.subr.mxu1 %v1637_v29 }
 0x6fd   : > { %3118 = vmatpush3.msra.mxu1 %v1637_v29 }
 0x6ff   : > { %v1721_v40 = vpop.permute.xlu1 %1720 }
 0x703   : > { %v1723_v44 = vpop.permute.xlu1 %1722 }
 0x707   : > { %v3409_v31 = vpop.eup %3408 }
 0x708   : > { %v1628_v32 = vsel %vm1423_vm3, %v3409_v31, 0.0 }
 0x709   : > { %v3411_v33 = vpop.eup %3410  ;;  %1629 = vadd.xlane.f32.xlu0 %v1628_v32 }
 0x70a   : > { %v1625_v34 = vsel %vm1419_vm4, %v3411_v33, 0.0 }
 0x70d   : > { %1626 = vadd.xlane.f32.xlu0 %v1625_v34 }
 0x723   : > { %1724 = vrot.lane.b32.xlu0 %v4372_v42, %s3807_s7 }
 0x792   : > { %v1630_v35 = vpop.xlane.xlu0 %1629 }
 0x793   : > { %3412 = vrcp.f32 %v1630_v35 }
 0x796   : > { %v1627_v36 = vpop.xlane.xlu0 %1626 }
 0x797   : > { %3414 = vrcp.f32 %v1627_v36 }
 0x79a   : > { %v1725_v37 = vpop.permute.xlu0 %1724 }
 0x79b   : > { %3122 = vmatprep.subr.msk.mxu1 %vm1332_vm2, %v1725_v37 }
 0x7a0   : > { %v3413_v38 = vpop.eup %3412 }
 0x7a1   : > { %v1634_v43 = vmul.f32 %v3413_v38, %v3409_v31 }
 0x7a4   : > { %v3415_v39 = vpop.eup %3414 }
 0x7a5   : > { %v1632_v41 = vmul.f32 %v3415_v39, %v3411_v33  ;;  %v2157_v39 = vld [vmem:[%s4653_s13 + $0x78] sm:$0xff] }
 0x7a6   : > { %3142 = vmatprep.subr.mxu0 %v2157_v39 }
 0x7a7   : > { %3119 = vmatprep.mubr.msk.f32.mxu1 %vm1419_vm4, %v1632_v41  ;;  %3143 = vmatpush3.msra.mxu0 %v2157_v39  ;;  %v2155_v41 = vld [vmem:[%s4653_s13 + $0x68] sm:$0xff]  ;;  %v2286_v39 = vld [vmem:[%s4657_s17 + $0x10] sm:$0xff] }
 0x7a8   : > { %3120 = vmatmul.mubr.msk.f32.vlgmr.msra.gmra.mxu1 %vm1419_vm4, %v1634_v43  ;;  %v2154_v43 = vld [vmem:[%s4653_s13 + $0x60] sm:$0xff] }
 0x7a9   : > { %3123 = vmatpush3.xpose.msk.msra.mxu1 %vm1332_vm2, %v1725_v37  ;;  %3124 = vmatprep.mubr.msk.f32.mxu1 %vm1332_vm2, %v1721_v40  ;;  %v2156_v40 = vld [vmem:[%s4653_s13 + $0x70] sm:$0xff] }
 0x7aa   : > { %3144 = vmatprep.subr.mxu0 %v2156_v40 }
 0x7ab   : > { %3145 = vmatpush3.msra.mxu0 %v2156_v40  ;;  %v2285_v40 = vld [vmem:[%s4657_s17 + $0x8] sm:$0xff] }
 0x7ac   : > { %3125 = vmatmul.mubr.msk.f32.vlgmr.msra.gmra.mxu1 %vm1332_vm2, %v1723_v44  ;;  %3146 = vmatprep.subr.mxu0 %v2155_v41  ;;  %v2153_v44 = vld [vmem:[%s4653_s13 + $0x58] sm:$0xff] }
 0x7ad   : > { %3147 = vmatpush3.msra.mxu0 %v2155_v41  ;;  %v2284_v41 = vld [vmem:[%s4657_s17] sm:$0xff] }
 0x7ae   : > { %3148 = vmatprep.subr.mxu0 %v2154_v43 }
 0x7af   : > { %3149 = vmatpush3.msra.mxu0 %v2154_v43 }
 0x7b0   : > { %3150 = vmatprep.subr.mxu0 %v2153_v44 }
 0x7b1   : > { %3151 = vmatpush3.msra.mxu0 %v2153_v44 }
 0x868   : > { %v4428_v45 = vpop.f32.mrf.mxu1 }
 0x86a   : > { %v4430_v46 = vpop.f32.mrf.mxu1 }
 0x86b   : > { %v3381_v48 = vpack.i.bf16 %v4428_v45, %v4430_v46  ;;  %v2152_v45 = vld [vmem:[%s4653_s13 + $0x50] sm:$0xff]  ;;  %v2151_v46 = vld [vmem:[%s4653_s13 + $0x48] sm:$0xff] }
 0x86c   : > { %v3126_v49 = vpop.f32.mrf.mxu1  ;;  %3152 = vmatprep.subr.mxu0 %v2152_v45 }
 0x86d   : > { %v1808_v51 = vmul.f32 0.17677669, %v3126_v49  ;;  %3153 = vmatpush3.msra.mxu0 %v2152_v45  ;;  %v2149_v49 = vld [vmem:[%s4653_s13 + $0x38] sm:$0xff] }
 0x86e   : > { %v1798_v52 = vpop.f32.mrf.mxu1  ;;  %3154 = vmatprep.subr.mxu0 %v2151_v46 }
 0x86f   : > { %v1807_v53 = vmul.f32 0.17677669, %v1798_v52  ;;  %v1812_v54 = vsel %vm1423_vm3, %v1808_v51, -inf  ;;  %3155 = vmatpush3.msra.mxu0 %v2151_v46  ;;  %v2147_v52 = vld [vmem:[%s4653_s13 + $0x28] sm:$0xff] }
 0x870   : > { %1813 = vmax.xlane.f32.xlu0 %v1812_v54  ;;  %v2145_v54 = vld [vmem:[%s4653_s13 + $0x18] sm:$0xff] }
 0x871   : > { %v1809_v55 = vsel %vm1419_vm4, %v1807_v53, -inf }
 0x872   : > { %1810 = vmax.xlane.f32.xlu1 %v1809_v55  ;;  %v2144_v55 = vld [vmem:[%s4653_s13 + $0x10] sm:$0xff] }
 0x883   : > { %1831 = vrot.lane.b32.xlu1 %v4386_v50, %s3807_s7 }
 0x887   : > { %1915 = vrot.lane.b32.xlu1 %v4378_v47, %s3808_s25 }
 0x88b   : > { %1917 = vrot.lane.b32.xlu1 %v4380_v30, %s3808_s25 }
 0x8f9   : > { %v1814_v56 = vpop.xlane.xlu0 %1813 }
 0x8fa   : > { %v1816_v57 = vsub.f32 %v1808_v51, %v1814_v56  ;;  %v2148_v51 = vld [vmem:[%s4653_s13 + $0x30] sm:$0xff]  ;;  %v2143_v56 = vld [vmem:[%s4653_s13 + $0x8] sm:$0xff] }
 0x8fb   : > { %v1811_v58 = vpop.xlane.xlu1 %1810 }
 0x8fc   : > { %v1819_v59 = vmul.f32 1.442695, %v1816_v57  ;;  %v1815_v60 = vsub.f32 %v1807_v53, %v1811_v58  ;;  %v2146_v53 = vld [vmem:[%s4653_s13 + $0x20] sm:$0xff] }
 0x8fd   : > { %v2142_v57 = vld [vmem:[%s4653_s13] sm:$0xff] }
 0x8fe   : > { %3416 = vpow2.f32 %v1819_v59  ;;  %v1817_v61 = vmul.f32 1.442695, %v1815_v60 }
 0x8ff   : > { %v1832_v62 = vpop.permute.xlu1 %1831 }
 0x900   : > { %3418 = vpow2.f32 %v1817_v61  ;;  %3127 = vmatprep.subr.mxu1 %v1832_v62 }
 0x901   : > { %3128 = vmatpush3.msra.mxu1 %v1832_v62 }
 0x903   : > { %v1916_v6 = vpop.permute.xlu1 %1915 }
 0x90b   : > { %v3417_v63 = vpop.eup %3416 }
 0x90c   : > { %v1824_v0 = vsel %vm1423_vm3, %v3417_v63, 0.0 }
 0x90d   : > { %v3419_v1 = vpop.eup %3418  ;;  %1825 = vadd.xlane.f32.xlu0 %v1824_v0 }
 0x90e   : > { %v1821_v47 = vsel %vm1419_vm4, %v3419_v1, 0.0 }
 0x911   : > { %1822 = vadd.xlane.f32.xlu0 %v1821_v47 }
 0x927   : > { %1919 = vrot.lane.b32.xlu0 %v4372_v42, %s3808_s25  ;;  %v1918_v42 = vpop.permute.xlu1 %1917 }
 0x996   : > { %v1826_v30 = vpop.xlane.xlu0 %1825 }
 0x997   : > { %3420 = vrcp.f32 %v1826_v30 }
 0x99a   : > { %v1823_v2 = vpop.xlane.xlu0 %1822 }
 0x99b   : > { %3422 = vrcp.f32 %v1823_v2 }
 0x99e   : > { %v1920_v3 = vpop.permute.xlu0 %1919 }
 0x99f   : > { %3132 = vmatprep.subr.msk.mxu1 %vm1332_vm2, %v1920_v3 }
 0x9a4   : > { %v3421_v4 = vpop.eup %3420 }
 0x9a5   : > { %v1830_v8 = vmul.f32 %v3421_v4, %v3417_v63 }
 0x9a8   : > { %v3423_v5 = vpop.eup %3422 }
 0x9a9   : > { %v1828_v7 = vmul.f32 %v3423_v5, %v3419_v1 }
 0x9ab   : > { %3129 = vmatprep.mubr.msk.f32.mxu1 %vm1419_vm4, %v1828_v7 }
 0x9ac   : > { %3130 = vmatmul.mubr.msk.f32.vlgmr.msra.gmra.mxu1 %vm1419_vm4, %v1830_v8 }
 0x9ad   : > { %3133 = vmatpush3.xpose.msk.msra.mxu1 %vm1332_vm2, %v1920_v3  ;;  %3134 = vmatprep.mubr.msk.f32.mxu1 %vm1332_vm2, %v1916_v6 }
 0x9b0   : > { %3135 = vmatmul.mubr.msk.f32.vlgmr.msra.gmra.mxu1 %vm1332_vm2, %v1918_v42 }
 0xa6c   : > { %v3131_v9 = vpop.f32.mrf.mxu1 }
 0xa6e   : > { %v1906_v10 = vpop.f32.mrf.mxu1 }
 0xa6f   : > { %v3386_v20 = vpack.i.bf16 %v3131_v9, %v1906_v10  ;;  %v2802_v9 = vld [vmem:[#allocation10] ss:$0 sm:$0xff] }
 0xa70   : > { %v3136_v11 = vpop.f32.mrf.mxu1 }
 0xa71   : > { %v2003_v12 = vmul.f32 0.17677669, %v3136_v11 }
 0xa72   : > { %v1993_v15 = vpop.f32.mrf.mxu1 }
 0xa73   : > { %v2002_v16 = vmul.f32 0.17677669, %v1993_v15  ;;  %v2007_v17 = vsel %vm1423_vm3, %v2003_v12, -inf }
 0xa74   : > { %2008 = vmax.xlane.f32.xlu0 %v2007_v17  ;;  %v2299_v17 = vld [vmem:[%s4657_s17 + $0x78] sm:$0xff] }
 0xa75   : > { %v2004_v18 = vsel %vm1419_vm4, %v2002_v16, -inf }
 0xa76   : > { %2005 = vmax.xlane.f32.xlu1 %v2004_v18  ;;  %v2298_v18 = vld [vmem:[%s4657_s17 + $0x70] sm:$0xff] }
 0xa87   : > { %2026 = vrot.lane.b32.xlu1 %v4386_v50, %s3808_s25 }
 0xa8b   : > { %3387 = vrot.lane.b32.xlu1 %v3386_v20, %s3807_s7 }
 0xafd   : > { %v2009_v21 = vpop.xlane.xlu0 %2008 }
 0xafe   : > { %v2011_v23 = vsub.f32 %v2003_v12, %v2009_v21 }
 0xaff   : > { %v2006_v24 = vpop.xlane.xlu1 %2005 }
 0xb00   : > { %v2010_v25 = vsub.f32 %v2002_v16, %v2006_v24  ;;  %v2014_v26 = vmul.f32 1.442695, %v2011_v23 }
 0xb02   : > { %v2012_v27 = vmul.f32 1.442695, %v2010_v25 }
 0xb03   : > { %v2027_v28 = vpop.permute.xlu1 %2026 }
 0xb04   : > { %3424 = vpow2.f32 %v2012_v27  ;;  %3137 = vmatprep.subr.mxu1 %v2027_v28 }
 0xb05   : > { %3138 = vmatpush3.msra.mxu1 %v2027_v28  ;;  %3426 = vpow2.f32 %v2014_v26  ;;  %v2297_v28 = vld [vmem:[%s4657_s17 + $0x68] sm:$0xff] }
 0xb06   : > { %3177 = vmatprep.subr.mxu1 %v2299_v17 }
 0xb07   : > { %v3388_v0 = vpop.permute.xlu1 %3387 }
 0xb08   : > { %v3390_v30 = vunpack.i.h.bf16 %v3388_v0  ;;  %v3389_v2 = vunpack.i.l.bf16 %v3388_v0  ;;  %v2412_v0 = vld [vmem:[%s4659_s19 + $0x60] sm:$0xff] }
 0xb11   : > { %v3425_v29 = vpop.eup %3424 }
 0xb12   : > { %v2016_v31 = vsel %vm1419_vm4, %v3425_v29, 0.0  ;;  %v3427_v32 = vpop.eup %3426 }
 0xb13   : > { %2017 = vadd.xlane.f32.xlu0 %v2016_v31  ;;  %v2019_v50 = vsel %vm1423_vm3, %v3427_v32, 0.0  ;;  %v2295_v31 = vld [vmem:[%s4657_s17 + $0x58] sm:$0xff] }
 0xb17   : > { %2020 = vadd.xlane.f32.xlu0 %v2019_v50  ;;  %v2293_v50 = vld [vmem:[%s4657_s17 + $0x48] sm:$0xff] }
 0xb2d   : > { %3382 = vrot.lane.b32.xlu0 %v3381_v48, %s3808_s25  ;;  %v2150_v48 = vld [vmem:[%s4653_s13 + $0x40] sm:$0xff] }
 0xb2e   : > { %3156 = vmatprep.subr.mxu0 %v2150_v48 }
 0xb2f   : > { %3157 = vmatpush3.msra.mxu0 %v2150_v48 }
 0xb30   : > { %3158 = vmatprep.subr.mxu0 %v2149_v49 }
 0xb31   : > { %3159 = vmatpush3.msra.mxu0 %v2149_v49 }
 0xb32   : > { %3160 = vmatprep.subr.mxu0 %v2148_v51 }
 0xb33   : > { %3161 = vmatpush3.msra.mxu0 %v2148_v51 }
 0xb34   : > { %3162 = vmatprep.subr.mxu0 %v2147_v52 }
 0xb35   : > { %3163 = vmatpush3.msra.mxu0 %v2147_v52  ;;  %v2803_v52 = vld [vmem:[#allocation12] ss:$0 sm:$0xff] }
 0xb36   : > { %3164 = vmatprep.subr.mxu0 %v2146_v53 }
 0xb37   : > { %3165 = vmatpush3.msra.mxu0 %v2146_v53 }
 0xb38   : > { %3166 = vmatprep.subr.mxu0 %v2145_v54 }
 0xb39   : > { %3167 = vmatpush3.msra.mxu0 %v2145_v54  ;;  %v2804_v54 = vld [vmem:[#allocation13] ss:$0 sm:$0xff] }
 0xb3a   : > { %3168 = vmatprep.subr.mxu0 %v2144_v55 }
 0xb3b   : > { %3169 = vmatpush3.msra.mxu0 %v2144_v55 }
 0xb3c   : > { %3170 = vmatprep.subr.mxu0 %v2143_v56 }
 0xb3d   : > { %3171 = vmatpush3.msra.mxu0 %v2143_v56 }
 0xb3e   : > { %3172 = vmatprep.subr.mxu0 %v2142_v57 }
 0xb3f   : > { %3173 = vmatpush3.msra.mxu0 %v2142_v57 }
 0xb9c   : > { %v2018_v33 = vpop.xlane.xlu0 %2017 }
 0xb9d   : > { %3428 = vrcp.f32 %v2018_v33  ;;  %v2292_v33 = vld [vmem:[%s4657_s17 + $0x40] sm:$0xff] }
 0xba0   : > { %v2021_v34 = vpop.xlane.xlu0 %2020 }
 0xba1   : > { %3430 = vrcp.f32 %v2021_v34  ;;  %v2291_v34 = vld [vmem:[%s4657_s17 + $0x38] sm:$0xff] }
 0xba4   : > { %v3383_v61 = vpop.permute.xlu0 %3382 }
 0xba5   : > { %v3385_v62 = vunpack.i.h.bf16 %v3383_v61  ;;  %v3384_v63 = vunpack.i.l.bf16 %v3383_v61  ;;  %v2415_v61 = vld [vmem:[%s4659_s19 + $0x78] sm:$0xff] }
 0xba6   : > { %3212 = vmatprep.subr.mxu0 %v2415_v61 }
 0xba7   : > { %v2135_v1 = vsel %vm1332_vm2, %v4406_v13, %v3385_v62  ;;  %v2134_v47 = vsel %vm1332_vm2, %v4408_v14, %v3384_v63  ;;  %v2414_v62 = vld [vmem:[%s4659_s19 + $0x70] sm:$0xff]  ;;  %v2413_v63 = vld [vmem:[%s4659_s19 + $0x68] sm:$0xff] }
 0xba8   : > { %v2137_v6 = vsel %vm2136_vm5, %v2134_v47, %v3389_v2  ;;  %v2138_v7 = vsel %vm2136_vm5, %v2135_v1, %v3390_v30  ;;  %v2411_v1 = vld [vmem:[%s4659_s19 + $0x58] sm:$0xff]  ;;  %v2410_v47 = vld [vmem:[%s4659_s19 + $0x50] sm:$0xff]  ;;  %v2409_v30 = vld [vmem:[%s4659_s19 + $0x48] sm:$0xff] }
 0xba9   : > { %v2408_v2 = vld [vmem:[%s4659_s19 + $0x40] sm:$0xff] }
 0xbaa   : > { %v3429_v35 = vpop.eup %3428 }
 0xbab   : > { %v2023_v36 = vmul.f32 %v3429_v35, %v3425_v29  ;;  %v2296_v29 = vld [vmem:[%s4657_s17 + $0x60] sm:$0xff]  ;;  %v2290_v35 = vld [vmem:[%s4657_s17 + $0x30] sm:$0xff] }
 0xbad   : > { %3139 = vmatprep.mubr.msk.f32.mxu1 %vm1419_vm4, %v2023_v36  ;;  %v2289_v36 = vld [vmem:[%s4657_s17 + $0x28] sm:$0xff] }
 0xbae   : > { %v3431_v37 = vpop.eup %3430 }
 0xbaf   : > { %v2025_v38 = vmul.f32 %v3431_v37, %v3427_v32  ;;  %v2294_v32 = vld [vmem:[%s4657_s17 + $0x50] sm:$0xff]  ;;  %v2288_v37 = vld [vmem:[%s4657_s17 + $0x20] sm:$0xff] }
 0xbb1   : > { %3140 = vmatmul.mubr.msk.f32.vlgmr.msra.gmra.mxu1 %vm1419_vm4, %v2025_v38  ;;  %v2287_v38 = vld [vmem:[%s4657_s17 + $0x18] sm:$0xff] }
 0xbb2   : > { %3178 = vmatpush3.msra.mxu1 %v2299_v17 }
 0xbb3   : > { %3179 = vmatprep.subr.mxu1 %v2298_v18 }
 0xbb4   : > { %3180 = vmatpush3.msra.mxu1 %v2298_v18 }
 0xbb5   : > { %3181 = vmatprep.subr.mxu1 %v2297_v28 }
 0xbb6   : > { %3182 = vmatpush3.msra.mxu1 %v2297_v28 }
 0xbb7   : > { %3183 = vmatprep.subr.mxu1 %v2296_v29 }
 0xbb8   : > { %3184 = vmatpush3.msra.mxu1 %v2296_v29 }
 0xbb9   : > { %3185 = vmatprep.subr.mxu1 %v2295_v31 }
 0xbba   : > { %3186 = vmatpush3.msra.mxu1 %v2295_v31 }
 0xbbb   : > { %3187 = vmatprep.subr.mxu1 %v2294_v32 }
 0xbbc   : > { %3188 = vmatpush3.msra.mxu1 %v2294_v32 }
 0xbbd   : > { %3189 = vmatprep.subr.mxu1 %v2293_v50 }
 0xbbe   : > { %3190 = vmatpush3.msra.mxu1 %v2293_v50 }
 0xbbf   : > { %3191 = vmatprep.subr.mxu1 %v2292_v33 }
 0xbc0   : > { %3192 = vmatpush3.msra.mxu1 %v2292_v33  ;;  %v2806_v33 = vld [vmem:[#allocation16] ss:$0 sm:$0xff] }
 0xbc1   : > { %3193 = vmatprep.subr.mxu1 %v2291_v34 }
 0xbc2   : > { %3194 = vmatpush3.msra.mxu1 %v2291_v34 }
 0xbc3   : > { %3195 = vmatprep.subr.mxu1 %v2290_v35 }
 0xbc4   : > { %3196 = vmatpush3.msra.mxu1 %v2290_v35 }
 0xbc5   : > { %3197 = vmatprep.subr.mxu1 %v2289_v36 }
 0xbc6   : > { %3198 = vmatpush3.msra.mxu1 %v2289_v36 }
 0xbc7   : > { %3199 = vmatprep.subr.mxu1 %v2288_v37 }
 0xbc8   : > { %3200 = vmatpush3.msra.mxu1 %v2288_v37 }
 0xbc9   : > { %3201 = vmatprep.subr.mxu1 %v2287_v38 }
 0xbca   : > { %3202 = vmatpush3.msra.mxu1 %v2287_v38 }
 0xbcb   : > { %3203 = vmatprep.subr.mxu1 %v2286_v39 }
 0xbcc   : > { %3204 = vmatpush3.msra.mxu1 %v2286_v39 }
 0xbcd   : > { %3205 = vmatprep.subr.mxu1 %v2285_v40 }
 0xbce   : > { %3206 = vmatpush3.msra.mxu1 %v2285_v40 }
 0xbcf   : > { %3207 = vmatprep.subr.mxu1 %v2284_v41 }
 0xbd0   : > { %3208 = vmatpush3.msra.mxu1 %v2284_v41 }
 0xc71   : > { %v3141_v58 = vpop.f32.mrf.mxu1 }
 0xc73   : > { %v2101_v59 = vpop.f32.mrf.mxu1 }
 0xc74   : > { %v3391_v60 = vpack.i.bf16 %v3141_v58, %v2101_v59 }
 0xc76   : > { %3392 = vrot.lane.b32.xlu1 %v3391_v60, %s3806_s10 }
 0xce8   : > { %v3393_v3 = vpop.permute.xlu1 %3392 }
 0xce9   : > { %v3395_v4 = vunpack.i.h.bf16 %v3393_v3  ;;  %v3394_v5 = vunpack.i.l.bf16 %v3393_v3  ;;  %v2407_v3 = vld [vmem:[%s4659_s19 + $0x38] sm:$0xff] }
 0xceb   : > { %v2140_v8 = vsel %vm2139_vm6, %v2137_v6, %v3394_v5  ;;  %v2141_v42 = vsel %vm2139_vm6, %v2138_v7, %v3395_v4  ;;  %v2406_v4 = vld [vmem:[%s4659_s19 + $0x30] sm:$0xff]  ;;  %v2405_v5 = vld [vmem:[%s4659_s19 + $0x28] sm:$0xff]  ;;  %v2404_v6 = vld [vmem:[%s4659_s19 + $0x20] sm:$0xff] }
 0xcec   : > { %3174 = vmatprep.mubr.f32.mxu0 %v2140_v8  ;;  %v2403_v7 = vld [vmem:[%s4659_s19 + $0x18] sm:$0xff]  ;;  %v2402_v8 = vld [vmem:[%s4659_s19 + $0x10] sm:$0xff] }
 0xced   : > { %3175 = vmatmul.mubr.f32.vlgmr.msra.gmra.mxu0 %v2141_v42  ;;  %v2401_v42 = vld [vmem:[%s4659_s19 + $0x8] sm:$0xff] }
 0xcee   : > { %3213 = vmatpush3.msra.mxu0 %v2415_v61 }
 0xcef   : > { %3214 = vmatprep.subr.mxu0 %v2414_v62 }
 0xcf0   : > { %3215 = vmatpush3.msra.mxu0 %v2414_v62 }
 0xcf1   : > { %3216 = vmatprep.subr.mxu0 %v2413_v63 }
 0xcf2   : > { %3217 = vmatpush3.msra.mxu0 %v2413_v63  ;;  %v2808_v63 = vld [vmem:[#allocation19] ss:$0 sm:$0xff] }
 0xcf3   : > { %3218 = vmatprep.subr.mxu0 %v2412_v0 }
 0xcf4   : > { %3219 = vmatpush3.msra.mxu0 %v2412_v0 }
 0xcf5   : > { %3220 = vmatprep.subr.mxu0 %v2411_v1 }
 0xcf6   : > { %3221 = vmatpush3.msra.mxu0 %v2411_v1 }
 0xcf7   : > { %3222 = vmatprep.subr.mxu0 %v2410_v47 }
 0xcf8   : > { %3223 = vmatpush3.msra.mxu0 %v2410_v47 }
 0xcf9   : > { %3224 = vmatprep.subr.mxu0 %v2409_v30 }
 0xcfa   : > { %3225 = vmatpush3.msra.mxu0 %v2409_v30 }
 0xcfb   : > { %3226 = vmatprep.subr.mxu0 %v2408_v2 }
 0xcfc   : > { %3227 = vmatpush3.msra.mxu0 %v2408_v2 }
 0xcfd   : > { %3228 = vmatprep.subr.mxu0 %v2407_v3 }
 0xcfe   : > { %3229 = vmatpush3.msra.mxu0 %v2407_v3 }
 0xcff   : > { %3230 = vmatprep.subr.mxu0 %v2406_v4 }
 0xd00   : > { %3231 = vmatpush3.msra.mxu0 %v2406_v4 }
 0xd01   : > { %3232 = vmatprep.subr.mxu0 %v2405_v5 }
 0xd02   : > { %3233 = vmatpush3.msra.mxu0 %v2405_v5 }
 0xd03   : > { %3234 = vmatprep.subr.mxu0 %v2404_v6 }
 0xd04   : > { %3235 = vmatpush3.msra.mxu0 %v2404_v6 }
 0xd05   : > { %3236 = vmatprep.subr.mxu0 %v2403_v7 }
 0xd06   : > { %3237 = vmatpush3.msra.mxu0 %v2403_v7 }
 0xd07   : > { %3238 = vmatprep.subr.mxu0 %v2402_v8 }
 0xd08   : > { %3239 = vmatpush3.msra.mxu0 %v2402_v8 }
 0xd09   : > { %3240 = vmatprep.subr.mxu0 %v2401_v42 }
 0xd0a   : > { %3241 = vmatpush3.msra.mxu0 %v2401_v42 }
 0xdad   : > { %v3176_v10 = vpop.f32.mrf.mxu0 }
 0xdae   : > { %v2237_v11 = vadd.f32 %v3176_v10, %v2802_v9  ;;  %v2805_v10 = vld [vmem:[#allocation15] ss:$0 sm:$0xff] }
 0xdaf   : > { %v2231_v13 = vpop.f32.mrf.mxu0 }
 0xdb0   : > { %v2232_v12 = vadd.f32 %v2802_v9, %v2231_v13  ;;  %v2241_v14 = vadd.f32 %v2237_v11, %v4303_v22  ;;  %v2400_v9 = vld [vmem:[%s4659_s19] sm:$0xff] }
 0xdb1   : > { %3242 = vmatprep.subr.mxu0 %v2400_v9 }
 0xdb2   : > { %v2246_v15 = vsel %vm1008_vm0, %v2241_v14, 0.0  ;;  %v2240_v16 = vadd.f32 %v2232_v12, %v4299_v19  ;;  %3243 = vmatpush3.msra.mxu0 %v2400_v9 }
 0xdb3   : > { %2247 = vadd.xlane.f32.xlu0 %v2246_v15 }
 0xdb4   : > { %2244 = vadd.xlane.f32.xlu1 %v2240_v16 }
 0xe3c   : > { %v2248_v20 = vpop.xlane.xlu0 %2247 }
 0xe3d   : > { %v2250_v22 = vmul.f32 0.0078125, %v2248_v20  ;;  %v2245_v21 = vpop.xlane.xlu1 %2244 }
 0xe3e   : > { %v2249_v23 = vmul.f32 0.0078125, %v2245_v21 }
 0xe3f   : > { %v4527_v24 = vsub.f32 %v2241_v14, %v2250_v22 }
 0xe40   : > { %v2251_v19 = vsub.f32 %v2240_v16, %v2249_v23 }
 0xe41   : > { %v2254_v26 = vmul.f32 %v4527_v24, %v4527_v24 }
 0xe42   : > { %v2253_v25 = vmul.f32 %v2251_v19, %v2251_v19 }
 0xe43   : > { %v2257_v27 = vsel %vm1008_vm0, %v2254_v26, 0.0 }
 0xe44   : > { %2255 = vadd.xlane.f32.xlu0 %v2253_v25 }
 0xe48   : > { %2258 = vadd.xlane.f32.xlu0 %v2257_v27 }
 0xecd   : > { %v2256_v43 = vpop.xlane.xlu0 %2255 }
 0xece   : > { %v2260_v44 = vmul.f32 0.0078125, %v2256_v43 }
 0xed0   : > { %v2262_v45 = vadd.f32 1e-05, %v2260_v44 }
 0xed1   : > { %v2259_v46 = vpop.xlane.xlu0 %2258 }
 0xed2   : > { %3432 = vrsqrt.f32 %v2262_v45  ;;  %v2261_v48 = vmul.f32 0.0078125, %v2259_v46 }
 0xed4   : > { %v2263_v49 = vadd.f32 1e-05, %v2261_v48 }
 0xed6   : > { %3434 = vrsqrt.f32 %v2263_v49 }
 0xedf   : > { %v3433_v51 = vpop.eup %3432 }
 0xee0   : > { %v2266_v53 = vmul.f32 %v3433_v51, %v2251_v19 }
 0xee2   : > { %v2274_v55 = vmul.f32 %v2803_v52, %v2266_v53 }
 0xee3   : > { %v3435_v56 = vpop.eup %3434 }
 0xee4   : > { %v2267_v57 = vmul.f32 %v3435_v56, %v4527_v24  ;;  %v4575_v58 = vadd.f32 %v2804_v54, %v2274_v55 }
 0xee6   : > { %v2275_v59 = vmul.f32 %v2803_v52, %v2267_v57  ;;  %3209 = vmatprep.mubr.f32.mxu1 %v4575_v58 }
 0xee8   : > { %v4578_v60 = vadd.f32 %v2804_v54, %v2275_v59 }
 0xeea   : > { %3210 = vmatmul.mubr.f32.vlgmr.msra.gmra.mxu1 %v4578_v60 }
 0xfaa   : > { %v3211_v11 = vpop.f32.mrf.mxu1 }
 0xfab   : > { %v2379_v13 = vadd.f32 %v3211_v11, %v2805_v10 }
 0xfac   : > { %v2373_v12 = vpop.f32.mrf.mxu1 }
 0xfad   : > { %v2385_v14 = vmul.f32 0.044715, %v2379_v13  ;;  %v2374_v15 = vadd.f32 %v2805_v10, %v2373_v12  ;;  %v2383_v31 = vmul.f32 0.5, %v2379_v13 }
 0xfaf   : > { %v2387_v16 = vmul.f32 %v2385_v14, %v2379_v13  ;;  %v2384_v17 = vmul.f32 0.044715, %v2374_v15  ;;  %v2382_v28 = vmul.f32 0.5, %v2374_v15 }
 0xfb1   : > { %v2389_v18 = vmul.f32 %v2387_v16, %v2379_v13  ;;  %v2386_v20 = vmul.f32 %v2384_v17, %v2374_v15 }
 0xfb3   : > { %v2391_v22 = vadd.f32 %v2389_v18, %v2379_v13  ;;  %v2388_v21 = vmul.f32 %v2386_v20, %v2374_v15 }
 0xfb5   : > { %v2390_v23 = vadd.f32 %v2388_v21, %v2374_v15  ;;  %v2393_v24 = vmul.f32 0.7978846, %v2391_v22 }
 0xfb7   : > { %v2392_v19 = vmul.f32 0.7978846, %v2390_v23  ;;  %3436 = vtanh.f32 %v2393_v24 }
 0xfb9   : > { %3438 = vtanh.f32 %v2392_v19 }
 0xfc4   : > { %v3437_v25 = vpop.eup %3436 }
 0xfc5   : > { %v2397_v27 = vadd.f32 1.0, %v3437_v25 }
 0xfc6   : > { %v3439_v26 = vpop.eup %3438 }
 0xfc7   : > { %v2396_v29 = vadd.f32 1.0, %v3439_v26  ;;  %v2399_v50 = vmul.f32 %v2397_v27, %v2383_v31 }
 0xfc9   : > { %v2398_v32 = vmul.f32 %v2396_v29, %v2382_v28 }
 0xfcb   : > { %3244 = vmatprep.mubr.f32.mxu0 %v2398_v32 }
 0xfcc   : > { %3245 = vmatmul.mubr.f32.vlgmr.msra.gmra.mxu0 %v2399_v50 }
0x108c   : > { %v3246_v34 = vpop.f32.mrf.mxu0 }
0x108d   : > { %v2495_v35 = vadd.f32 %v3246_v34, %v2806_v33 }
0x108e   : > { %v2489_v36 = vpop.f32.mrf.mxu0 }
0x108f   : > { %v2490_v37 = vadd.f32 %v2806_v33, %v2489_v36  ;;  %v2499_v38 = vadd.f32 %v2495_v35, %v4578_v60  ;;  %v2807_v60 = vld [vmem:[#allocation18] ss:$0 sm:$0xff] }
0x1091   : > { %v2504_v39 = vsel %vm1008_vm0, %v2499_v38, 0.0  ;;  %v2498_v40 = vadd.f32 %v2490_v37, %v4575_v58 }
0x1092   : > { %2505 = vadd.xlane.f32.xlu1 %v2504_v39 }
0x1093   : > { %2502 = vadd.xlane.f32.xlu0 %v2498_v40 }
0x111b   : > { %v2506_v41 = vpop.xlane.xlu1 %2505 }
0x111c   : > { %v2508_v43 = vmul.f32 0.0078125, %v2506_v41  ;;  %v2503_v44 = vpop.xlane.xlu0 %2502 }
0x111d   : > { %v2507_v45 = vmul.f32 0.0078125, %v2503_v44 }
0x111e   : > { %v2510_v46 = vsub.f32 %v2499_v38, %v2508_v43 }
0x111f   : > { %v2509_v48 = vsub.f32 %v2498_v40, %v2507_v45 }
0x1120   : > { %v2512_v49 = vmul.f32 %v2510_v46, %v2510_v46 }
0x1121   : > { %v2511_v51 = vmul.f32 %v2509_v48, %v2509_v48 }
0x1122   : > { %v2515_v52 = vsel %vm1008_vm0, %v2512_v49, 0.0 }
0x1123   : > { %2516 = vadd.xlane.f32.xlu0 %v2515_v52  ;;  %2513 = vadd.xlane.f32.xlu1 %v2511_v51 }
0x11ac   : > { %v2514_v53 = vpop.xlane.xlu1 %2513  ;;  %v2517_v54 = vpop.xlane.xlu0 %2516 }
0x11ad   : > { %v2518_v55 = vmul.f32 0.0078125, %v2514_v53  ;;  %v2519_v56 = vmul.f32 0.0078125, %v2517_v54 }
0x11af   : > { %v2520_v57 = vadd.f32 1e-05, %v2518_v55  ;;  %v2521_v58 = vadd.f32 1e-05, %v2519_v56 }
0x11b1   : > { %3440 = vrsqrt.f32 %v2520_v57 }
0x11b2   : > { %3442 = vrsqrt.f32 %v2521_v58 }
0x11be   : > { %v3441_v59 = vpop.eup %3440 }
0x11bf   : > { %v3443_v61 = vpop.eup %3442  ;;  %v2524_v62 = vmul.f32 %v3441_v59, %v2509_v48 }
0x11c0   : > { %v2525_v0 = vmul.f32 %v3443_v61, %v2510_v46 }
0x11c1   : > { %v2532_v1 = vmul.f32 %v2807_v60, %v2524_v62 }
0x11c2   : > { %v2533_v47 = vmul.f32 %v2807_v60, %v2525_v0 }
0x11c3   : > { %v2540_v30 = vadd.f32 %v2808_v63, %v2532_v1 }
0x11c4   : > { %v2541_v2 = vadd.f32 %v2808_v63, %v2533_v47 }
0x11c5   : > { %2542 = vst [vmem:[%s898_s2] sm:$0xff] %v2540_v30 }
0x11c6   : > { %2543 = vst [vmem:[%s898_s2 + $0x8] sm:$0xf] %v2541_v2 }
0x11c7 PF: > { %s40_s4 = sadd.s32 1, %s3790_s4  }
0x11c8   : > { %p37_p6 = scmp.ge.s32.totalorder %s40_s4, 4  }
0x11ca   :  { %39 = sbr.rel (!%p37_p6) target bundleno = 17 (0x11), region = 197 }
0x11cf   :  { %2565 = vsyncpa [#allocation3], 1 }
0x11d0   :  { %2567 = vsyncpa [#allocation3 + $0x1], 1 }
0x11d1   :  { %2568 = vsyncpa [#allocation5], 1 }
0x11d2   :  { %2569 = vsyncpa [#allocation8], 1 }
0x11d3   :  { %2570 = vsyncpa [#allocation11], 1 }
0x11d4   :  { %2571 = vsyncpa [#allocation14], 1 }
0x11d5   :  { %2572 = vsyncpa [#allocation17], 1 }
0x11d6   :  { %2573 = vsyncpa [#allocation20], 1 }

</bundles_post_ra>
